<compile_context>
chip_gen: v7x
topology: tpu7x:2x2x1
jax: 0.10.0
libtpu: 0.0.40
codegen_flags: <defaults>
</compile_context>

<pallas_src>
import functools

import jax
import jax.numpy as jnp
from jax.experimental import pallas as pl
from jax.experimental.pallas import tpu as pltpu

EPS = 1e-5
VMEM_LIMIT = 48 * 1024 * 1024  # leave headroom on v7x's 64 MiB VMEM


def _pick_tm(m, cap=1024):
    """Largest row tile: whole array when small, else largest divisor <= cap."""
    if m <= cap:
        return m
    for t in (1024, 512, 256, 128, 64, 32, 16, 8):
        if t <= cap and m % t == 0:
            return t
    return m


# ----------------------------------------------------------------------------
# Kernel 1: [affine + relu] + matmul (+ fused per-channel output statistics)
# ----------------------------------------------------------------------------
def _matmul_kernel(*refs, relu, has_affine, compute_stats):
    if has_affine:
        x_ref, s_ref, b_ref, w_ref = refs[:4]
        rest = refs[4:]
    else:
        x_ref, w_ref = refs[:2]
        rest = refs[2:]
    if compute_stats:
        o_ref, sum_ref, sq_ref = rest
    else:
        (o_ref,) = rest

    x = x_ref[...]
    if has_affine:
        x = x * s_ref[...] + b_ref[...]          # f32 on the VPU
    if relu:
        x = jnp.maximum(x, 0.0)
    y = jnp.dot(x.astype(jnp.bfloat16), w_ref[...],   # bf16 operands on the MXU
                preferred_element_type=jnp.float32)
    o_ref[...] = y

    if compute_stats:
        @pl.when(pl.program_id(0) == 0)
        def _():
            sum_ref[...] = jnp.zeros_like(sum_ref)
            sq_ref[...] = jnp.zeros_like(sq_ref)
        sum_ref[...] += jnp.sum(y, axis=0, keepdims=True)
        sq_ref[...] += jnp.sum(y * y, axis=0, keepdims=True)


def fused_affine_matmul(x, w, scale=None, bias=None, relu=False,
                        compute_stats=False):
    """y = [relu](x*scale + bias) @ w.

    x: (M, K) f32, w: (K, N) bf16.  If compute_stats, also returns per-channel
    (1, N) sum and sum-of-squares of y (for the following BatchNorm)."""
    x = x.astype(jnp.float32)
    M, K = x.shape
    N = w.shape[1]
    has_affine = scale is not None

    tm = _pick_tm(M)
    grid = (M // tm,)

    inputs = [x]
    in_specs = [pl.BlockSpec((tm, K), lambda i: (i, 0))]
    if has_affine:
        inputs += [scale.reshape(1, K).astype(jnp.float32),
                   bias.reshape(1, K).astype(jnp.float32)]
        in_specs += [pl.BlockSpec((1, K), lambda i: (0, 0)),
                     pl.BlockSpec((1, K), lambda i: (0, 0))]
    inputs.append(w)
    in_specs.append(pl.BlockSpec((K, N), lambda i: (0, 0)))

    if compute_stats:
        out_shape = (jax.ShapeDtypeStruct((M, N), jnp.float32),
                     jax.ShapeDtypeStruct((1, N), jnp.float32),
                     jax.ShapeDtypeStruct((1, N), jnp.float32))
        out_specs = (pl.BlockSpec((tm, N), lambda i: (i, 0)),
                     pl.BlockSpec((1, N), lambda i: (0, 0)),
                     pl.BlockSpec((1, N), lambda i: (0, 0)))
        sem = ("arbitrary",)      # stats outputs are accumulators over the row axis
    else:
        out_shape = jax.ShapeDtypeStruct((M, N), jnp.float32)
        out_specs = pl.BlockSpec((tm, N), lambda i: (i, 0))
        sem = ("parallel",)

    kernel = functools.partial(_matmul_kernel, relu=relu,
                               has_affine=has_affine,
                               compute_stats=compute_stats)
    return pl.pallas_call(
        kernel,
        out_shape=out_shape,
        grid=grid,
        in_specs=in_specs,
        out_specs=out_specs,
        compiler_params=pltpu.CompilerParams(
            dimension_semantics=sem, vmem_limit_bytes=VMEM_LIMIT),
    )(*inputs)


# ----------------------------------------------------------------------------
# Kernel 2: element-wise affine (+relu)   (used once, for norm0/relu0)
# ----------------------------------------------------------------------------
def _affine_act_kernel(x_ref, s_ref, b_ref, o_ref, *, relu):
    x = x_ref[...] * s_ref[...] + b_ref[...]
    if relu:
        x = jnp.maximum(x, 0.0)
    o_ref[...] = x


def affine_act(x, scale, bias, relu=True):
    x = x.astype(jnp.float32)
    M, C = x.shape
    tm = _pick_tm(M)
    kernel = functools.partial(_affine_act_kernel, relu=relu)
    return pl.pallas_call(
        kernel,
        out_shape=jax.ShapeDtypeStruct((M, C), jnp.float32),
        grid=(M // tm,),
        in_specs=[pl.BlockSpec((tm, C), lambda i: (i, 0)),
                  pl.BlockSpec((1, C), lambda i: (0, 0)),
                  pl.BlockSpec((1, C), lambda i: (0, 0))],
        out_specs=pl.BlockSpec((tm, C), lambda i: (i, 0)),
        compiler_params=pltpu.CompilerParams(
            dimension_semantics=("parallel",), vmem_limit_bytes=VMEM_LIMIT),
    )(x, scale.reshape(1, C).astype(jnp.float32),
      bias.reshape(1, C).astype(jnp.float32))


# ----------------------------------------------------------------------------
# Kernel 3: bn2 + relu2 + zero halo (VMEM scratch only) + conv2 (3x3, pad 1)
#           + fused per-channel output statistics, all in one launch.
#
# Halo layout per image (flat rows of width C): data rows occupy flat rows
# [(2+i)*Wp, (2+i)*Wp + W) with Wp = W + 2 and 2 zero rows above / 2 below.
# In that row-major flattening, the tap (di, dj) of a 3x3/pad-1 conv is a
# constant row offset (di+1)*Wp + dj - 1, so the conv is 9 statically offset
# slices + small MXU dots.  The halo never touches HBM.
# ----------------------------------------------------------------------------
def _bn_relu_conv3x3_kernel(x_ref, s_ref, b_ref, w_ref,
                            o_ref, sum_ref, sq_ref, pad_ref, *, H, W):
    Wp = W + 2
    Mout = H * Wp
    Cout = o_ref.shape[-1]

    # bn2 + relu2 on the whole image tile (f32 on the VPU)
    v = jnp.maximum(x_ref[...] * s_ref[...] + b_ref[...], 0.0)   # (H*W, C)

    # Scatter into the zero-haloed, row-flattened VMEM scratch.
    pad_ref[...] = jnp.zeros(pad_ref.shape, pad_ref.dtype)
    for i in range(H):                                           # static unroll
        pad_ref[(2 + i) * Wp:(2 + i) * Wp + W, :] = v[i * W:(i + 1) * W, :]

    # 9-tap accumulation (bf16 operands on the MXU, f32 accumulate).
    acc = jnp.zeros((Mout, Cout), jnp.float32)
    for t in range(9):                                           # static unroll
        di, dj = t // 3, t % 3
        off = (di + 1) * Wp + dj - 1                             # static, >= Wp-1
        xs = pad_ref[off:off + Mout, :].astype(jnp.bfloat16)
        acc = acc + jnp.dot(xs, w_ref[t], preferred_element_type=jnp.float32)

    # Drop the 2 junk columns per row while storing; fuse per-channel stats
    # (sum / sum of squares over the real pixels only) for the following BNs.
    s_acc = jnp.zeros((1, Cout), jnp.float32)
    q_acc = jnp.zeros((1, Cout), jnp.float32)
    for i in range(H):                                           # static unroll
        rowv = acc[i * Wp:i * Wp + W, :]
        o_ref[i * W:(i + 1) * W, :] = rowv
        s_acc = s_acc + jnp.sum(rowv, axis=0, keepdims=True)
        q_acc = q_acc + jnp.sum(rowv * rowv, axis=0, keepdims=True)

    @pl.when(pl.program_id(0) == 0)
    def _():
        sum_ref[...] = jnp.zeros_like(sum_ref)
        sq_ref[...] = jnp.zeros_like(sq_ref)
    sum_ref[...] += s_acc
    sq_ref[...] += q_acc


def bn_relu_conv3x3(x_nhwc, scale, bias, w_taps):
    """x_nhwc: (N,H,W,C) f32 bottleneck, w_taps: (9,C,Cout) bf16.
    Returns (new_features (N,H,W,Cout) f32, channel_sum (Cout,), channel_sumsq (Cout,))."""
    N, H, W, C = x_nhwc.shape
    Cout = w_taps.shape[-1]
    Wp = W + 2
    kernel = functools.partial(_bn_relu_conv3x3_kernel, H=H, W=W)
    out, s, q = pl.pallas_call(
        kernel,
        out_shape=(jax.ShapeDtypeStruct((N, H * W, Cout), jnp.float32),
                   jax.ShapeDtypeStruct((1, Cout), jnp.float32),
                   jax.ShapeDtypeStruct((1, Cout), jnp.float32)),
        grid=(N,),
        in_specs=[pl.BlockSpec((None, H * W, C), lambda n: (n, 0, 0)),
                  pl.BlockSpec((1, C), lambda n: (0, 0)),
                  pl.BlockSpec((1, C), lambda n: (0, 0)),
                  pl.BlockSpec((9, C, Cout), lambda n: (0, 0, 0))],
        out_specs=(pl.BlockSpec((None, H * W, Cout), lambda n: (n, 0, 0)),
                   pl.BlockSpec((1, Cout), lambda n: (0, 0)),
                   pl.BlockSpec((1, Cout), lambda n: (0, 0))),
        scratch_shapes=[pltpu.VMEM(((H + 4) * Wp, C), jnp.float32)],
        compiler_params=pltpu.CompilerParams(
            dimension_semantics=("arbitrary",), vmem_limit_bytes=VMEM_LIMIT),
    )(x_nhwc.reshape(N, H * W, C).astype(jnp.float32),
      scale.reshape(1, C).astype(jnp.float32),
      bias.reshape(1, C).astype(jnp.float32),
      w_taps)
    # TODO(synk): growth_rate-wide outputs (<128 lanes) still use masked stores;
    # fixing that needs the whole dense-layer chain fused into one kernel.
    return out.reshape(N, H, W, Cout), s.reshape(-1), q.reshape(-1)


# ----------------------------------------------------------------------------
# Kernel 4: bn5 + relu + global avg-pool + classifier + relu + classifier2
# ----------------------------------------------------------------------------
def _tail_kernel(x_ref, s_ref, b_ref, w1_ref, w2_ref, out_ref, outs_ref):
    v = jnp.maximum(x_ref[...] * s_ref[...] + b_ref[...], 0.0)   # (N, HW, C)
    pooled = jnp.mean(v, axis=1)                                  # (N, C)
    outs_ref[...] = pooled
    h = jnp.dot(pooled.astype(jnp.bfloat16), w1_ref[...],
                preferred_element_type=jnp.float32)
    h = jnp.maximum(h, 0.0)
    out_ref[...] = jnp.dot(h.astype(jnp.bfloat16), w2_ref[...],
                           preferred_element_type=jnp.float32)


def classifier_tail(feats_nhwc, gamma, beta, ch_sum, ch_sumsq, w1, w2):
    N, H, W, C = feats_nhwc.shape
    scale, bias = fold_bn(ch_sum, ch_sumsq, N * H * W, gamma, beta)
    x = feats_nhwc.reshape(N, H * W, C)
    ncls = w2.shape[1]
    out, outs = pl.pallas_call(
        _tail_kernel,
        out_shape=(jax.ShapeDtypeStruct((N, ncls), jnp.float32),
                   jax.ShapeDtypeStruct((N, C), jnp.float32)),
        compiler_params=pltpu.CompilerParams(vmem_limit_bytes=VMEM_LIMIT),
    )(x, scale.reshape(1, 1, C).astype(jnp.float32),
      bias.reshape(1, 1, C).astype(jnp.float32), w1, w2)
    return out, outs


# ----------------------------------------------------------------------------
# JAX glue: BN folding from running sums, im2col for the stem, pooling
# ----------------------------------------------------------------------------
def fold_bn(ch_sum, ch_sumsq, count, gamma, beta):
    """Training-mode BatchNorm2d (biased variance) folded into scale/bias."""
    mean = ch_sum / count
    var = jnp.maximum(ch_sumsq / count - mean * mean, 0.0)
    scale = gamma / jnp.sqrt(var + EPS)
    bias = beta - mean * scale
    return scale, bias


def channel_stats(x_nhwc):
    return (jnp.sum(x_nhwc, axis=(0, 1, 2)),
            jnp.sum(jnp.square(x_nhwc), axis=(0, 1, 2)))


def im2col(x, kh, kw, stride, pad):
    """Only used for the one-time 3-channel 7x7 stem conv."""
    N, H, W, C = x.shape
    xp = jnp.pad(x, ((0, 0), (pad, pad), (pad, pad), (0, 0)))
    Ho = (H + 2 * pad - kh) // stride + 1
    Wo = (W + 2 * pad - kw) // stride + 1
    cols = []
    for i in range(kh):
        for j in range(kw):
            cols.append(xp[:, i:i + stride * Ho:stride, j:j + stride * Wo:stride, :])
    return jnp.concatenate(cols, axis=-1), Ho, Wo


def maxpool2d(x, k=3, stride=2, pad=1):
    N, H, W, C = x.shape
    xp = jnp.pad(x, ((0, 0), (pad, pad), (pad, pad), (0, 0)),
                 constant_values=-jnp.inf)
    Ho = (H + 2 * pad - k) // stride + 1
    Wo = (W + 2 * pad - k) // stride + 1
    out = jnp.full((N, Ho, Wo, C), -jnp.inf, x.dtype)
    for i in range(k):
        for j in range(k):
            out = jnp.maximum(out, xp[:, i:i + stride * Ho:stride,
                                      j:j + stride * Wo:stride, :])
    return out


def avgpool2x2(x):
    N, H, W, C = x.shape
    return x.reshape(N, H // 2, 2, W // 2, 2, C).mean(axis=(2, 4))


# ----------------------------------------------------------------------------
# Parameter construction (deterministic, synthetic).  Conv/linear weights are
# stored pre-cast to bf16 (MXU-native); BN params stay f32.
# ----------------------------------------------------------------------------
def init_params(key, growth_rate, block_config, num_init_features, bn_size,
                num_classes):
    keys = iter(jax.random.split(key, 512))

    def conv_w(kh, kw, cin, cout):
        std = (2.0 / (cin * kh * kw)) ** 0.5
        w = jax.random.normal(next(keys), (kh * kw * cin, cout), jnp.float32) * std
        return w.astype(jnp.bfloat16)

    def conv_taps(kh, kw, cin, cout):
        std = (2.0 / (cin * kh * kw)) ** 0.5
        w = jax.random.normal(next(keys), (kh * kw, cin, cout), jnp.float32) * std
        return w.astype(jnp.bfloat16)

    def lin_w(cin, cout):
        std = (1.0 / cin) ** 0.5
        w = jax.random.normal(next(keys), (cin, cout), jnp.float32) * std
        return w.astype(jnp.bfloat16)

    def bn(c):
        return (jnp.ones(c, jnp.float32), jnp.zeros(c, jnp.float32))

    params = {"conv0": conv_w(7, 7, 3, num_init_features),
              "bn0": bn(num_init_features)}
    nf = num_init_features

    blocks = []
    for i, num_layers in enumerate(block_config):
        layers = []
        for l in range(num_layers):
            cin = nf + l * growth_rate
            cbot = bn_size * growth_rate
            layers.append({
                "bn1": bn(cin),
                "conv1": conv_w(1, 1, cin, cbot),
                "bn2": bn(cbot),
                "conv2": conv_taps(3, 3, cbot, growth_rate),
            })
        nf += num_layers * growth_rate
        block = {"layers": layers}
        if i != len(block_config) - 1:
            block["trans_bn"] = bn(nf)
            block["trans_conv"] = conv_w(1, 1, nf, nf // 2)
            nf //= 2
        blocks.append(block)

    params["blocks"] = blocks
    params["bn5"] = bn(nf)
    params["fc1"] = lin_w(nf, 100)           # classifier   (bias init 0 -> omitted)
    params["fc2"] = lin_w(100, num_classes)  # classifier2  (bias init 0 -> omitted)
    # self.project is never used in forward(), so it is not built.
    return params


# ----------------------------------------------------------------------------
# Forward pass (matches DenseNet.forward -> (out, outs))
# ----------------------------------------------------------------------------
def densenet_forward(params, x_nchw):
    x = jnp.transpose(x_nchw, (0, 2, 3, 1)).astype(jnp.float32)  # NCHW -> NHWC
    N = x.shape[0]

    # conv0 (7x7 s2 p3, no bias); BN0 batch statistics come fused from the kernel.
    # TODO(synk): the stride-2 stem could also use an in-kernel tap loop; left as
    # JAX im2col since the 3-channel, one-time stem is a negligible HBM fraction.
    patches, Ho, Wo = im2col(x, 7, 7, 2, 3)
    y0, s0, q0 = fused_affine_matmul(patches.reshape(-1, patches.shape[-1]),
                                     params["conv0"], compute_stats=True)
    C0 = y0.shape[-1]

    # norm0 + relu0
    g, b = params["bn0"]
    scale, bias = fold_bn(s0.reshape(-1), q0.reshape(-1), y0.shape[0], g, b)
    y = affine_act(y0, scale, bias, relu=True).reshape(N, Ho, Wo, C0)

    # pool0
    y = maxpool2d(y, 3, 2, 1)

    # Running per-channel sums of the current feature stack.  Channel-wise BN
    # statistics of a concatenation are the concatenation of per-tensor
    # statistics, so the growing `feats` tensor is never re-read for BN.
    feat_sum, feat_sumsq = channel_stats(y)
    feats = y

    for block in params["blocks"]:
        Nn, Hh, Ww, _ = feats.shape
        M = Nn * Hh * Ww
        for layer in block["layers"]:
            Cc = feats.shape[-1]
            # norm1 + relu1 + conv1(1x1), fused; also emits bottleneck stats for bn2.
            g, b = layer["bn1"]
            s1, b1 = fold_bn(feat_sum, feat_sumsq, M, g, b)
            bott, bs, bq = fused_affine_matmul(
                feats.reshape(M, Cc), layer["conv1"], s1, b1,
                relu=True, compute_stats=True)
            Cbot = bott.shape[-1]
            # norm2 + relu2 + conv2(3x3 p1) in ONE kernel (halo in VMEM only),
            # which also emits the new features' channel stats.
            g, b = layer["bn2"]
            s2, b2 = fold_bn(bs.reshape(-1), bq.reshape(-1), M, g, b)
            new, ns, nq = bn_relu_conv3x3(bott.reshape(Nn, Hh, Ww, Cbot),
                                          s2, b2, layer["conv2"])

            feat_sum = jnp.concatenate([feat_sum, ns])
            feat_sumsq = jnp.concatenate([feat_sumsq, nq])
            # TODO(synk): write `new` into a preallocated full-channel slab via
            # input_output_aliases instead of concatenating (O(L^2) HBM copies).
            feats = jnp.concatenate([feats, new], axis=-1)

        if "trans_conv" in block:
            Cc = feats.shape[-1]
            g, b = block["trans_bn"]
            st, bt = fold_bn(feat_sum, feat_sumsq, M, g, b)
            t = fused_affine_matmul(feats.reshape(M, Cc), block["trans_conv"],
                                    st, bt, relu=True)
            feats = avgpool2x2(t.reshape(Nn, Hh, Ww, -1))
            feat_sum, feat_sumsq = channel_stats(feats)

    # norm5 + F.relu + adaptive_avg_pool2d + classifier -> relu -> classifier2,
    # all fused into one Pallas kernel.
    g, b = params["bn5"]
    out, outs = classifier_tail(feats, g, b, feat_sum, feat_sumsq,
                                params["fc1"], params["fc2"])
    return out, outs


# ----------------------------------------------------------------------------
if __name__ == "__main__":
    # Small DenseNet configuration (module takes these as constructor args).
    growth_rate = 8
    block_config = (2, 2)
    num_init_features = 16
    bn_size = 2
    num_classes = 10

    key = jax.random.PRNGKey(0)
    pkey, xkey = jax.random.split(key)
    params = init_params(pkey, growth_rate, block_config, num_init_features,
                         bn_size, num_classes)

    x = jax.random.normal(xkey, (2, 3, 32, 32), jnp.float32)  # NCHW like PyTorch

    fwd = jax.jit(densenet_forward)
    out, outs = fwd(params, x)
    out = jax.block_until_ready(out)
    outs = jax.block_until_ready(outs)

    assert out.shape == (2, num_classes), out.shape
    assert outs.shape == (2, 32), outs.shape   # 16 + 2*8 = 32 -> /2 = 16 -> +2*8 = 32
    assert bool(jnp.all(jnp.isfinite(out))) and bool(jnp.all(jnp.isfinite(outs)))
    print("KERNEL_OK")
</pallas_src>

<mosaic_0001>
module attributes {stable_mosaic.version = 11 : i64} {
  func.func @_affine_act_kernel(%arg0: i32, %arg1: memref<512x16xf32, #tpu.memory_space<vmem>>, %arg2: memref<1x16xf32, #tpu.memory_space<vmem>>, %arg3: memref<1x16xf32, #tpu.memory_space<vmem>>, %arg4: memref<512x16xf32, #tpu.memory_space<vmem>>) attributes {dimension_semantics = [#tpu.dimension_semantics<parallel>], iteration_bounds = array<i64: 1>, scalar_prefetch = 0 : i64, scratch_operands = 0 : i64, tpu.core_type = #tpu.core_type<tc>, window_params = [{transform_indices = @transform_0, window_bounds = array<i64: 512, 16>}, {pipeline_mode = #tpu.pipeline_mode<synchronous>, transform_indices = @transform_1, window_bounds = array<i64: 1, 16>}, {pipeline_mode = #tpu.pipeline_mode<synchronous>, transform_indices = @transform_2, window_bounds = array<i64: 1, 16>}, {transform_indices = @transform_3, window_bounds = array<i64: 512, 16>}]} {
    %c0 = arith.constant 0 : index
    %c0_0 = arith.constant 0 : index
    %0 = vector.load %arg1[%c0, %c0_0] : memref<512x16xf32, #tpu.memory_space<vmem>>, vector<512x16xf32>
    %c0_1 = arith.constant 0 : index
    %c0_2 = arith.constant 0 : index
    %1 = vector.load %arg2[%c0_1, %c0_2] : memref<1x16xf32, #tpu.memory_space<vmem>>, vector<1x16xf32>
    %2 = vector.broadcast %1 : vector<1x16xf32> to vector<512x16xf32>
    %3 = arith.mulf %0, %2 : vector<512x16xf32>
    %c0_3 = arith.constant 0 : index
    %c0_4 = arith.constant 0 : index
    %4 = vector.load %arg3[%c0_3, %c0_4] : memref<1x16xf32, #tpu.memory_space<vmem>>, vector<1x16xf32>
    %5 = vector.broadcast %4 : vector<1x16xf32> to vector<512x16xf32>
    %6 = arith.addf %3, %5 : vector<512x16xf32>
    %cst = arith.constant 0.000000e+00 : f32
    %7 = vector.broadcast %cst : f32 to vector<512x16xf32>
    %8 = arith.maximumf %6, %7 : vector<512x16xf32>
    %c0_5 = arith.constant 0 : index
    %c0_6 = arith.constant 0 : index
    %9 = vector.load %arg4[%c0_5, %c0_6] : memref<512x16xf32, #tpu.memory_space<vmem>>, vector<512x16xf32>
    tpu.vector_store %arg4[%c0_5, %c0_6], %8 {strides = array<i32>} : memref<512x16xf32, #tpu.memory_space<vmem>>, vector<512x16xf32>,
    return
  }
  func.func @transform_0(%arg0: i32) -> (i32, i32) {
    %c0_i32 = arith.constant 0 : i32
    %c0_i32_0 = arith.constant 0 : i32
    return %arg0, %c0_i32 : i32, i32
  }
  func.func @transform_1(%arg0: i32) -> (i32, i32) {
    %c0_i32 = arith.constant 0 : i32
    %c0_i32_0 = arith.constant 0 : i32
    %c0_i32_1 = arith.constant 0 : i32
    return %c0_i32, %c0_i32_0 : i32, i32
  }
  func.func @transform_2(%arg0: i32) -> (i32, i32) {
    %c0_i32 = arith.constant 0 : i32
    %c0_i32_0 = arith.constant 0 : i32
    %c0_i32_1 = arith.constant 0 : i32
    return %c0_i32, %c0_i32_0 : i32, i32
  }
  func.func @transform_3(%arg0: i32) -> (i32, i32) {
    %c0_i32 = arith.constant 0 : i32
    %c0_i32_0 = arith.constant 0 : i32
    return %arg0, %c0_i32 : i32, i32
  }
}

module attributes {stable_mosaic.version = 11 : i64} {
  func.func @_matmul_kernel(%arg0: i32, %arg1: memref<512x147xf32, #tpu.memory_space<vmem>>, %arg2: memref<147x16xbf16, #tpu.memory_space<vmem>>, %arg3: memref<512x16xf32, #tpu.memory_space<vmem>>, %arg4: memref<1x16xf32, #tpu.memory_space<vmem>>, %arg5: memref<1x16xf32, #tpu.memory_space<vmem>>) attributes {dimension_semantics = [#tpu.dimension_semantics<arbitrary>], iteration_bounds = array<i64: 1>, scalar_prefetch = 0 : i64, scratch_operands = 0 : i64, tpu.core_type = #tpu.core_type<tc>, window_params = [{transform_indices = @transform_0, window_bounds = array<i64: 512, 147>}, {pipeline_mode = #tpu.pipeline_mode<synchronous>, transform_indices = @transform_1, window_bounds = array<i64: 147, 16>}, {transform_indices = @transform_2, window_bounds = array<i64: 512, 16>}, {pipeline_mode = #tpu.pipeline_mode<synchronous>, transform_indices = @transform_3, window_bounds = array<i64: 1, 16>}, {pipeline_mode = #tpu.pipeline_mode<synchronous>, transform_indices = @transform_4, window_bounds = array<i64: 1, 16>}]} {
    %c0 = arith.constant 0 : index
    %c0_0 = arith.constant 0 : index
    %0 = vector.load %arg1[%c0, %c0_0] : memref<512x147xf32, #tpu.memory_space<vmem>>, vector<512x147xf32>
    %1 = arith.truncf %0 : vector<512x147xf32> to vector<512x147xbf16>
    %c0_1 = arith.constant 0 : index
    %c0_2 = arith.constant 0 : index
    %2 = vector.load %arg2[%c0_1, %c0_2] : memref<147x16xbf16, #tpu.memory_space<vmem>>, vector<147x16xbf16>
    %cst = arith.constant dense<0.000000e+00> : vector<512x16xf32>
    %3 = tpu.matmul %1, %2, %cst {dimension_numbers = #tpu.dot_dimension_numbers<[1], [0], [0], [1], [0, 0, 1, 1], [], []>} : vector<512x147xbf16>, vector<147x16xbf16>, vector<512x16xf32> -> vector<512x16xf32>
    %c0_3 = arith.constant 0 : index
    %c0_4 = arith.constant 0 : index
    %4 = vector.load %arg3[%c0_3, %c0_4] : memref<512x16xf32, #tpu.memory_space<vmem>>, vector<512x16xf32>
    tpu.vector_store %arg3[%c0_3, %c0_4], %3 {strides = array<i32>} : memref<512x16xf32, #tpu.memory_space<vmem>>, vector<512x16xf32>,
    %c0_i32 = arith.constant 0 : i32
    %5 = arith.cmpi eq, %arg0, %c0_i32 : i32
    %6 = arith.extui %5 : i1 to i32
    %c0_i32_5 = arith.constant 0 : i32
    %7 = arith.cmpi ne, %6, %c0_i32_5 : i32
    scf.if %7 {
      %cst_16 = arith.constant 0.000000e+00 : f32
      %19 = vector.broadcast %cst_16 : f32 to vector<1x16xf32>
      %c0_17 = arith.constant 0 : index
      %c0_18 = arith.constant 0 : index
      %20 = vector.load %arg4[%c0_17, %c0_18] : memref<1x16xf32, #tpu.memory_space<vmem>>, vector<1x16xf32>
      tpu.vector_store %arg4[%c0_17, %c0_18], %19 {strides = array<i32>} : memref<1x16xf32, #tpu.memory_space<vmem>>, vector<1x16xf32>,
      %cst_19 = arith.constant 0.000000e+00 : f32
      %21 = vector.broadcast %cst_19 : f32 to vector<1x16xf32>
      %c0_20 = arith.constant 0 : index
      %c0_21 = arith.constant 0 : index
      %22 = vector.load %arg5[%c0_20, %c0_21] : memref<1x16xf32, #tpu.memory_space<vmem>>, vector<1x16xf32>
      tpu.vector_store %arg5[%c0_20, %c0_21], %21 {strides = array<i32>} : memref<1x16xf32, #tpu.memory_space<vmem>>, vector<1x16xf32>,
    } else {
    }
    %c0_6 = arith.constant 0 : index
    %c0_7 = arith.constant 0 : index
    %8 = vector.load %arg4[%c0_6, %c0_7] : memref<1x16xf32, #tpu.memory_space<vmem>>, vector<1x16xf32>
    %cst_8 = arith.constant dense<0.000000e+00> : vector<16xf32>
    %9 = vector.multi_reduction <add>, %3, %cst_8 [0] : vector<512x16xf32> to vector<16xf32>
    %10 = vector.shape_cast %9 : vector<16xf32> to vector<1x16xf32>
    %11 = arith.addf %8, %10 : vector<1x16xf32>
    %c0_9 = arith.constant 0 : index
    %c0_10 = arith.constant 0 : index
    %12 = vector.load %arg4[%c0_9, %c0_10] : memref<1x16xf32, #tpu.memory_space<vmem>>, vector<1x16xf32>
    tpu.vector_store %arg4[%c0_9, %c0_10], %11 {strides = array<i32>} : memref<1x16xf32, #tpu.memory_space<vmem>>, vector<1x16xf32>,
    %c0_11 = arith.constant 0 : index
    %c0_12 = arith.constant 0 : index
    %13 = vector.load %arg5[%c0_11, %c0_12] : memref<1x16xf32, #tpu.memory_space<vmem>>, vector<1x16xf32>
    %14 = arith.mulf %3, %3 : vector<512x16xf32>
    %cst_13 = arith.constant dense<0.000000e+00> : vector<16xf32>
    %15 = vector.multi_reduction <add>, %14, %cst_13 [0] : vector<512x16xf32> to vector<16xf32>
    %16 = vector.shape_cast %15 : vector<16xf32> to vector<1x16xf32>
    %17 = arith.addf %13, %16 : vector<1x16xf32>
    %c0_14 = arith.constant 0 : index
    %c0_15 = arith.constant 0 : index
    %18 = vector.load %arg5[%c0_14, %c0_15] : memref<1x16xf32, #tpu.memory_space<vmem>>, vector<1x16xf32>
    tpu.vector_store %arg5[%c0_14, %c0_15], %17 {strides = array<i32>} : memref<1x16xf32, #tpu.memory_space<vmem>>, vector<1x16xf32>,
    return
  }
  func.func @transform_0(%arg0: i32) -> (i32, i32) {
    %c0_i32 = arith.constant 0 : i32
    %c0_i32_0 = arith.constant 0 : i32
    return %arg0, %c0_i32 : i32, i32
  }
  func.func @transform_1(%arg0: i32) -> (i32, i32) {
    %c0_i32 = arith.constant 0 : i32
    %c0_i32_0 = arith.constant 0 : i32
    %c0_i32_1 = arith.constant 0 : i32
    return %c0_i32, %c0_i32_0 : i32, i32
  }
  func.func @transform_2(%arg0: i32) -> (i32, i32) {
    %c0_i32 = arith.constant 0 : i32
    %c0_i32_0 = arith.constant 0 : i32
    return %arg0, %c0_i32 : i32, i32
  }
  func.func @transform_3(%arg0: i32) -> (i32, i32) {
    %c0_i32 = arith.constant 0 : i32
    %c0_i32_0 = arith.constant 0 : i32
    %c0_i32_1 = arith.constant 0 : i32
    return %c0_i32, %c0_i32_0 : i32, i32
  }
  func.func @transform_4(%arg0: i32) -> (i32, i32) {
    %c0_i32 = arith.constant 0 : i32
    %c0_i32_0 = arith.constant 0 : i32
    %c0_i32_1 = arith.constant 0 : i32
    return %c0_i32, %c0_i32_0 : i32, i32
  }
}

module attributes {stable_mosaic.version = 11 : i64} {
  func.func @_matmul_kernel(%arg0: i32, %arg1: memref<128x16xf32, #tpu.memory_space<vmem>>, %arg2: memref<1x16xf32, #tpu.memory_space<vmem>>, %arg3: memref<1x16xf32, #tpu.memory_space<vmem>>, %arg4: memref<16x16xbf16, #tpu.memory_space<vmem>>, %arg5: memref<128x16xf32, #tpu.memory_space<vmem>>, %arg6: memref<1x16xf32, #tpu.memory_space<vmem>>, %arg7: memref<1x16xf32, #tpu.memory_space<vmem>>) attributes {dimension_semantics = [#tpu.dimension_semantics<arbitrary>], iteration_bounds = array<i64: 1>, scalar_prefetch = 0 : i64, scratch_operands = 0 : i64, tpu.core_type = #tpu.core_type<tc>, window_params = [{transform_indices = @transform_0, window_bounds = array<i64: 128, 16>}, {pipeline_mode = #tpu.pipeline_mode<synchronous>, transform_indices = @transform_1, window_bounds = array<i64: 1, 16>}, {pipeline_mode = #tpu.pipeline_mode<synchronous>, transform_indices = @transform_2, window_bounds = array<i64: 1, 16>}, {pipeline_mode = #tpu.pipeline_mode<synchronous>, transform_indices = @transform_3, window_bounds = array<i64: 16, 16>}, {transform_indices = @transform_4, window_bounds = array<i64: 128, 16>}, {pipeline_mode = #tpu.pipeline_mode<synchronous>, transform_indices = @transform_5, window_bounds = array<i64: 1, 16>}, {pipeline_mode = #tpu.pipeline_mode<synchronous>, transform_indices = @transform_6, window_bounds = array<i64: 1, 16>}]} {
    %c0 = arith.constant 0 : index
    %c0_0 = arith.constant 0 : index
    %0 = vector.load %arg1[%c0, %c0_0] : memref<128x16xf32, #tpu.memory_space<vmem>>, vector<128x16xf32>
    %c0_1 = arith.constant 0 : index
    %c0_2 = arith.constant 0 : index
    %1 = vector.load %arg2[%c0_1, %c0_2] : memref<1x16xf32, #tpu.memory_space<vmem>>, vector<1x16xf32>
    %2 = vector.broadcast %1 : vector<1x16xf32> to vector<128x16xf32>
    %3 = arith.mulf %0, %2 : vector<128x16xf32>
    %c0_3 = arith.constant 0 : index
    %c0_4 = arith.constant 0 : index
    %4 = vector.load %arg3[%c0_3, %c0_4] : memref<1x16xf32, #tpu.memory_space<vmem>>, vector<1x16xf32>
    %5 = vector.broadcast %4 : vector<1x16xf32> to vector<128x16xf32>
    %6 = arith.addf %3, %5 : vector<128x16xf32>
    %cst = arith.constant 0.000000e+00 : f32
    %7 = vector.broadcast %cst : f32 to vector<128x16xf32>
    %8 = arith.maximumf %6, %7 : vector<128x16xf32>
    %9 = arith.truncf %8 : vector<128x16xf32> to vector<128x16xbf16>
    %c0_5 = arith.constant 0 : index
    %c0_6 = arith.constant 0 : index
    %10 = vector.load %arg4[%c0_5, %c0_6] : memref<16x16xbf16, #tpu.memory_space<vmem>>, vector<16x16xbf16>
    %cst_7 = arith.constant dense<0.000000e+00> : vector<128x16xf32>
    %11 = tpu.matmul %9, %10, %cst_7 {dimension_numbers = #tpu.dot_dimension_numbers<[1], [0], [0], [1], [0, 0, 1, 1], [], []>} : vector<128x16xbf16>, vector<16x16xbf16>, vector<128x16xf32> -> vector<128x16xf32>
    %c0_8 = arith.constant 0 : index
    %c0_9 = arith.constant 0 : index
    %12 = vector.load %arg5[%c0_8, %c0_9] : memref<128x16xf32, #tpu.memory_space<vmem>>, vector<128x16xf32>
    tpu.vector_store %arg5[%c0_8, %c0_9], %11 {strides = array<i32>} : memref<128x16xf32, #tpu.memory_space<vmem>>, vector<128x16xf32>,
    %c0_i32 = arith.constant 0 : i32
    %13 = arith.cmpi eq, %arg0, %c0_i32 : i32
    %14 = arith.extui %13 : i1 to i32
    %c0_i32_10 = arith.constant 0 : i32
    %15 = arith.cmpi ne, %14, %c0_i32_10 : i32
    scf.if %15 {
      %cst_21 = arith.constant 0.000000e+00 : f32
      %27 = vector.broadcast %cst_21 : f32 to vector<1x16xf32>
      %c0_22 = arith.constant 0 : index
      %c0_23 = arith.constant 0 : index
      %28 = vector.load %arg6[%c0_22, %c0_23] : memref<1x16xf32, #tpu.memory_space<vmem>>, vector<1x16xf32>
      tpu.vector_store %arg6[%c0_22, %c0_23], %27 {strides = array<i32>} : memref<1x16xf32, #tpu.memory_space<vmem>>, vector<1x16xf32>,
      %cst_24 = arith.constant 0.000000e+00 : f32
      %29 = vector.broadcast %cst_24 : f32 to vector<1x16xf32>
      %c0_25 = arith.constant 0 : index
      %c0_26 = arith.constant 0 : index
      %30 = vector.load %arg7[%c0_25, %c0_26] : memref<1x16xf32, #tpu.memory_space<vmem>>, vector<1x16xf32>
      tpu.vector_store %arg7[%c0_25, %c0_26], %29 {strides = array<i32>} : memref<1x16xf32, #tpu.memory_space<vmem>>, vector<1x16xf32>,
    } else {
    }
    %c0_11 = arith.constant 0 : index
    %c0_12 = arith.constant 0 : index
    %16 = vector.load %arg6[%c0_11, %c0_12] : memref<1x16xf32, #tpu.memory_space<vmem>>, vector<1x16xf32>
    %cst_13 = arith.constant dense<0.000000e+00> : vector<16xf32>
    %17 = vector.multi_reduction <add>, %11, %cst_13 [0] : vector<128x16xf32> to vector<16xf32>
    %18 = vector.shape_cast %17 : vector<16xf32> to vector<1x16xf32>
    %19 = arith.addf %16, %18 : vector<1x16xf32>
    %c0_14 = arith.constant 0 : index
    %c0_15 = arith.constant 0 : index
    %20 = vector.load %arg6[%c0_14, %c0_15] : memref<1x16xf32, #tpu.memory_space<vmem>>, vector<1x16xf32>
    tpu.vector_store %arg6[%c0_14, %c0_15], %19 {strides = array<i32>} : memref<1x16xf32, #tpu.memory_space<vmem>>, vector<1x16xf32>,
    %c0_16 = arith.constant 0 : index
    %c0_17 = arith.constant 0 : index
    %21 = vector.load %arg7[%c0_16, %c0_17] : memref<1x16xf32, #tpu.memory_space<vmem>>, vector<1x16xf32>
    %22 = arith.mulf %11, %11 : vector<128x16xf32>
    %cst_18 = arith.constant dense<0.000000e+00> : vector<16xf32>
    %23 = vector.multi_reduction <add>, %22, %cst_18 [0] : vector<128x16xf32> to vector<16xf32>
    %24 = vector.shape_cast %23 : vector<16xf32> to vector<1x16xf32>
    %25 = arith.addf %21, %24 : vector<1x16xf32>
    %c0_19 = arith.constant 0 : index
    %c0_20 = arith.constant 0 : index
    %26 = vector.load %arg7[%c0_19, %c0_20] : memref<1x16xf32, #tpu.memory_space<vmem>>, vector<1x16xf32>
    tpu.vector_store %arg7[%c0_19, %c0_20], %25 {strides = array<i32>} : memref<1x16xf32, #tpu.memory_space<vmem>>, vector<1x16xf32>,
    return
  }
  func.func @transform_0(%arg0: i32) -> (i32, i32) {
    %c0_i32 = arith.constant 0 : i32
    %c0_i32_0 = arith.constant 0 : i32
    return %arg0, %c0_i32 : i32, i32
  }
  func.func @transform_1(%arg0: i32) -> (i32, i32) {
    %c0_i32 = arith.constant 0 : i32
    %c0_i32_0 = arith.constant 0 : i32
    %c0_i32_1 = arith.constant 0 : i32
    return %c0_i32, %c0_i32_0 : i32, i32
  }
  func.func @transform_2(%arg0: i32) -> (i32, i32) {
    %c0_i32 = arith.constant 0 : i32
    %c0_i32_0 = arith.constant 0 : i32
    %c0_i32_1 = arith.constant 0 : i32
    return %c0_i32, %c0_i32_0 : i32, i32
  }
  func.func @transform_3(%arg0: i32) -> (i32, i32) {
    %c0_i32 = arith.constant 0 : i32
    %c0_i32_0 = arith.constant 0 : i32
    %c0_i32_1 = arith.constant 0 : i32
    return %c0_i32, %c0_i32_0 : i32, i32
  }
  func.func @transform_4(%arg0: i32) -> (i32, i32) {
    %c0_i32 = arith.constant 0 : i32
    %c0_i32_0 = arith.constant 0 : i32
    return %arg0, %c0_i32 : i32, i32
  }
  func.func @transform_5(%arg0: i32) -> (i32, i32) {
    %c0_i32 = arith.constant 0 : i32
    %c0_i32_0 = arith.constant 0 : i32
    %c0_i32_1 = arith.constant 0 : i32
    return %c0_i32, %c0_i32_0 : i32, i32
  }
  func.func @transform_6(%arg0: i32) -> (i32, i32) {
    %c0_i32 = arith.constant 0 : i32
    %c0_i32_0 = arith.constant 0 : i32
    %c0_i32_1 = arith.constant 0 : i32
    return %c0_i32, %c0_i32_0 : i32, i32
  }
}

module attributes {stable_mosaic.version = 11 : i64} {
  func.func @_bn_relu_conv3x3_kernel(%arg0: i32, %arg1: memref<1x64x16xf32, #tpu.memory_space<vmem>>, %arg2: memref<1x16xf32, #tpu.memory_space<vmem>>, %arg3: memref<1x16xf32, #tpu.memory_space<vmem>>, %arg4: memref<9x16x8xbf16, #tpu.memory_space<vmem>>, %arg5: memref<1x64x8xf32, #tpu.memory_space<vmem>>, %arg6: memref<1x8xf32, #tpu.memory_space<vmem>>, %arg7: memref<1x8xf32, #tpu.memory_space<vmem>>, %arg8: memref<120x16xf32, #tpu.memory_space<vmem>>) attributes {dimension_semantics = [#tpu.dimension_semantics<arbitrary>], iteration_bounds = array<i64: 2>, scalar_prefetch = 0 : i64, scratch_operands = 1 : i64, tpu.core_type = #tpu.core_type<tc>, window_params = [{transform_indices = @transform_0, window_bounds = array<i64: 1, 64, 16>}, {pipeline_mode = #tpu.pipeline_mode<synchronous>, transform_indices = @transform_1, window_bounds = array<i64: 1, 16>}, {pipeline_mode = #tpu.pipeline_mode<synchronous>, transform_indices = @transform_2, window_bounds = array<i64: 1, 16>}, {pipeline_mode = #tpu.pipeline_mode<synchronous>, transform_indices = @transform_3, window_bounds = array<i64: 9, 16, 8>}, {transform_indices = @transform_4, window_bounds = array<i64: 1, 64, 8>}, {pipeline_mode = #tpu.pipeline_mode<synchronous>, transform_indices = @transform_5, window_bounds = array<i64: 1, 8>}, {pipeline_mode = #tpu.pipeline_mode<synchronous>, transform_indices = @transform_6, window_bounds = array<i64: 1, 8>}]} {
    %c0 = arith.constant 0 : index
    %c0_0 = arith.constant 0 : index
    %c0_1 = arith.constant 0 : index
    %0 = vector.load %arg1[%c0, %c0_0, %c0_1] : memref<1x64x16xf32, #tpu.memory_space<vmem>>, vector<1x64x16xf32>
    %1 = vector.shape_cast %0 : vector<1x64x16xf32> to vector<64x16xf32>
    %c0_2 = arith.constant 0 : index
    %c0_3 = arith.constant 0 : index
    %2 = vector.load %arg2[%c0_2, %c0_3] : memref<1x16xf32, #tpu.memory_space<vmem>>, vector<1x16xf32>
    %3 = vector.broadcast %2 : vector<1x16xf32> to vector<64x16xf32>
    %4 = arith.mulf %1, %3 : vector<64x16xf32>
    %c0_4 = arith.constant 0 : index
    %c0_5 = arith.constant 0 : index
    %5 = vector.load %arg3[%c0_4, %c0_5] : memref<1x16xf32, #tpu.memory_space<vmem>>, vector<1x16xf32>
    %6 = vector.broadcast %5 : vector<1x16xf32> to vector<64x16xf32>
    %7 = arith.addf %4, %6 : vector<64x16xf32>
    %cst = arith.constant 0.000000e+00 : f32
    %8 = vector.broadcast %cst : f32 to vector<64x16xf32>
    %9 = arith.maximumf %7, %8 : vector<64x16xf32>
    %cst_6 = arith.constant 0.000000e+00 : f32
    %10 = vector.broadcast %cst_6 : f32 to vector<120x16xf32>
    %c0_7 = arith.constant 0 : index
    %c0_8 = arith.constant 0 : index
    %11 = vector.load %arg8[%c0_7, %c0_8] : memref<120x16xf32, #tpu.memory_space<vmem>>, vector<120x16xf32>
    tpu.vector_store %arg8[%c0_7, %c0_8], %10 {strides = array<i32>} : memref<120x16xf32, #tpu.memory_space<vmem>>, vector<120x16xf32>,
    %12 = vector.extract_strided_slice %9 {offsets = [0, 0], sizes = [8, 16], strides = [1, 1]} : vector<64x16xf32> to vector<8x16xf32>
    %c20 = arith.constant 20 : index
    %c0_9 = arith.constant 0 : index
    %13 = vector.load %arg8[%c20, %c0_9] : memref<120x16xf32, #tpu.memory_space<vmem>>, vector<8x16xf32>
    tpu.vector_store %arg8[%c20, %c0_9], %12 {strides = array<i32>} : memref<120x16xf32, #tpu.memory_space<vmem>>, vector<8x16xf32>,
    %14 = vector.extract_strided_slice %9 {offsets = [8, 0], sizes = [8, 16], strides = [1, 1]} : vector<64x16xf32> to vector<8x16xf32>
    %c30 = arith.constant 30 : index
    %c0_10 = arith.constant 0 : index
    %15 = vector.load %arg8[%c30, %c0_10] : memref<120x16xf32, #tpu.memory_space<vmem>>, vector<8x16xf32>
    tpu.vector_store %arg8[%c30, %c0_10], %14 {strides = array<i32>} : memref<120x16xf32, #tpu.memory_space<vmem>>, vector<8x16xf32>,
    %16 = vector.extract_strided_slice %9 {offsets = [16, 0], sizes = [8, 16], strides = [1, 1]} : vector<64x16xf32> to vector<8x16xf32>
    %c40 = arith.constant 40 : index
    %c0_11 = arith.constant 0 : index
    %17 = vector.load %arg8[%c40, %c0_11] : memref<120x16xf32, #tpu.memory_space<vmem>>, vector<8x16xf32>
    tpu.vector_store %arg8[%c40, %c0_11], %16 {strides = array<i32>} : memref<120x16xf32, #tpu.memory_space<vmem>>, vector<8x16xf32>,
    %18 = vector.extract_strided_slice %9 {offsets = [24, 0], sizes = [8, 16], strides = [1, 1]} : vector<64x16xf32> to vector<8x16xf32>
    %c50 = arith.constant 50 : index
    %c0_12 = arith.constant 0 : index
    %19 = vector.load %arg8[%c50, %c0_12] : memref<120x16xf32, #tpu.memory_space<vmem>>, vector<8x16xf32>
    tpu.vector_store %arg8[%c50, %c0_12], %18 {strides = array<i32>} : memref<120x16xf32, #tpu.memory_space<vmem>>, vector<8x16xf32>,
    %20 = vector.extract_strided_slice %9 {offsets = [32, 0], sizes = [8, 16], strides = [1, 1]} : vector<64x16xf32> to vector<8x16xf32>
    %c60 = arith.constant 60 : index
    %c0_13 = arith.constant 0 : index
    %21 = vector.load %arg8[%c60, %c0_13] : memref<120x16xf32, #tpu.memory_space<vmem>>, vector<8x16xf32>
    tpu.vector_store %arg8[%c60, %c0_13], %20 {strides = array<i32>} : memref<120x16xf32, #tpu.memory_space<vmem>>, vector<8x16xf32>,
    %22 = vector.extract_strided_slice %9 {offsets = [40, 0], sizes = [8, 16], strides = [1, 1]} : vector<64x16xf32> to vector<8x16xf32>
    %c70 = arith.constant 70 : index
    %c0_14 = arith.constant 0 : index
    %23 = vector.load %arg8[%c70, %c0_14] : memref<120x16xf32, #tpu.memory_space<vmem>>, vector<8x16xf32>
    tpu.vector_store %arg8[%c70, %c0_14], %22 {strides = array<i32>} : memref<120x16xf32, #tpu.memory_space<vmem>>, vector<8x16xf32>,
    %24 = vector.extract_strided_slice %9 {offsets = [48, 0], sizes = [8, 16], strides = [1, 1]} : vector<64x16xf32> to vector<8x16xf32>
    %c80 = arith.constant 80 : index
    %c0_15 = arith.constant 0 : index
    %25 = vector.load %arg8[%c80, %c0_15] : memref<120x16xf32, #tpu.memory_space<vmem>>, vector<8x16xf32>
    tpu.vector_store %arg8[%c80, %c0_15], %24 {strides = array<i32>} : memref<120x16xf32, #tpu.memory_space<vmem>>, vector<8x16xf32>,
    %26 = vector.extract_strided_slice %9 {offsets = [56, 0], sizes = [8, 16], strides = [1, 1]} : vector<64x16xf32> to vector<8x16xf32>
    %c90 = arith.constant 90 : index
    %c0_16 = arith.constant 0 : index
    %27 = vector.load %arg8[%c90, %c0_16] : memref<120x16xf32, #tpu.memory_space<vmem>>, vector<8x16xf32>
    tpu.vector_store %arg8[%c90, %c0_16], %26 {strides = array<i32>} : memref<120x16xf32, #tpu.memory_space<vmem>>, vector<8x16xf32>,
    %cst_17 = arith.constant 0.000000e+00 : f32
    %28 = vector.broadcast %cst_17 : f32 to vector<80x8xf32>
    %c9 = arith.constant 9 : index
    %c0_18 = arith.constant 0 : index
    %29 = vector.load %arg8[%c9, %c0_18] : memref<120x16xf32, #tpu.memory_space<vmem>>, vector<80x16xf32>
    %30 = arith.truncf %29 : vector<80x16xf32> to vector<80x16xbf16>
    %c0_19 = arith.constant 0 : index
    %c0_20 = arith.constant 0 : index
    %c0_21 = arith.constant 0 : index
    %31 = vector.load %arg4[%c0_19, %c0_20, %c0_21] : memref<9x16x8xbf16, #tpu.memory_space<vmem>>, vector<1x16x8xbf16>
    %32 = vector.shape_cast %31 : vector<1x16x8xbf16> to vector<16x8xbf16>
    %cst_22 = arith.constant dense<0.000000e+00> : vector<80x8xf32>
    %33 = tpu.matmul %30, %32, %cst_22 {dimension_numbers = #tpu.dot_dimension_numbers<[1], [0], [0], [1], [0, 0, 1, 1], [], []>} : vector<80x16xbf16>, vector<16x8xbf16>, vector<80x8xf32> -> vector<80x8xf32>
    %34 = arith.addf %28, %33 : vector<80x8xf32>
    %c10 = arith.constant 10 : index
    %c0_23 = arith.constant 0 : index
    %35 = vector.load %arg8[%c10, %c0_23] : memref<120x16xf32, #tpu.memory_space<vmem>>, vector<80x16xf32>
    %36 = arith.truncf %35 : vector<80x16xf32> to vector<80x16xbf16>
    %c1 = arith.constant 1 : index
    %c0_24 = arith.constant 0 : index
    %c0_25 = arith.constant 0 : index
    %37 = vector.load %arg4[%c1, %c0_24, %c0_25] : memref<9x16x8xbf16, #tpu.memory_space<vmem>>, vector<1x16x8xbf16>
    %38 = vector.shape_cast %37 : vector<1x16x8xbf16> to vector<16x8xbf16>
    %cst_26 = arith.constant dense<0.000000e+00> : vector<80x8xf32>
    %39 = tpu.matmul %36, %38, %cst_26 {dimension_numbers = #tpu.dot_dimension_numbers<[1], [0], [0], [1], [0, 0, 1, 1], [], []>} : vector<80x16xbf16>, vector<16x8xbf16>, vector<80x8xf32> -> vector<80x8xf32>
    %40 = arith.addf %34, %39 : vector<80x8xf32>
    %c11 = arith.constant 11 : index
    %c0_27 = arith.constant 0 : index
    %41 = vector.load %arg8[%c11, %c0_27] : memref<120x16xf32, #tpu.memory_space<vmem>>, vector<80x16xf32>
    %42 = arith.truncf %41 : vector<80x16xf32> to vector<80x16xbf16>
    %c2 = arith.constant 2 : index
    %c0_28 = arith.constant 0 : index
    %c0_29 = arith.constant 0 : index
    %43 = vector.load %arg4[%c2, %c0_28, %c0_29] : memref<9x16x8xbf16, #tpu.memory_space<vmem>>, vector<1x16x8xbf16>
    %44 = vector.shape_cast %43 : vector<1x16x8xbf16> to vector<16x8xbf16>
    %cst_30 = arith.constant dense<0.000000e+00> : vector<80x8xf32>
    %45 = tpu.matmul %42, %44, %cst_30 {dimension_numbers = #tpu.dot_dimension_numbers<[1], [0], [0], [1], [0, 0, 1, 1], [], []>} : vector<80x16xbf16>, vector<16x8xbf16>, vector<80x8xf32> -> vector<80x8xf32>
    %46 = arith.addf %40, %45 : vector<80x8xf32>
    %c19 = arith.constant 19 : index
    %c0_31 = arith.constant 0 : index
    %47 = vector.load %arg8[%c19, %c0_31] : memref<120x16xf32, #tpu.memory_space<vmem>>, vector<80x16xf32>
    %48 = arith.truncf %47 : vector<80x16xf32> to vector<80x16xbf16>
    %c3 = arith.constant 3 : index
    %c0_32 = arith.constant 0 : index
    %c0_33 = arith.constant 0 : index
    %49 = vector.load %arg4[%c3, %c0_32, %c0_33] : memref<9x16x8xbf16, #tpu.memory_space<vmem>>, vector<1x16x8xbf16>
    %50 = vector.shape_cast %49 : vector<1x16x8xbf16> to vector<16x8xbf16>
    %cst_34 = arith.constant dense<0.000000e+00> : vector<80x8xf32>
    %51 = tpu.matmul %48, %50, %cst_34 {dimension_numbers = #tpu.dot_dimension_numbers<[1], [0], [0], [1], [0, 0, 1, 1], [], []>} : vector<80x16xbf16>, vector<16x8xbf16>, vector<80x8xf32> -> vector<80x8xf32>
    %52 = arith.addf %46, %51 : vector<80x8xf32>
    %c20_35 = arith.constant 20 : index
    %c0_36 = arith.constant 0 : index
    %53 = vector.load %arg8[%c20_35, %c0_36] : memref<120x16xf32, #tpu.memory_space<vmem>>, vector<80x16xf32>
    %54 = arith.truncf %53 : vector<80x16xf32> to vector<80x16xbf16>
    %c4 = arith.constant 4 : index
    %c0_37 = arith.constant 0 : index
    %c0_38 = arith.constant 0 : index
    %55 = vector.load %arg4[%c4, %c0_37, %c0_38] : memref<9x16x8xbf16, #tpu.memory_space<vmem>>, vector<1x16x8xbf16>
    %56 = vector.shape_cast %55 : vector<1x16x8xbf16> to vector<16x8xbf16>
    %cst_39 = arith.constant dense<0.000000e+00> : vector<80x8xf32>
    %57 = tpu.matmul %54, %56, %cst_39 {dimension_numbers = #tpu.dot_dimension_numbers<[1], [0], [0], [1], [0, 0, 1, 1], [], []>} : vector<80x16xbf16>, vector<16x8xbf16>, vector<80x8xf32> -> vector<80x8xf32>
    %58 = arith.addf %52, %57 : vector<80x8xf32>
    %c21 = arith.constant 21 : index
    %c0_40 = arith.constant 0 : index
    %59 = vector.load %arg8[%c21, %c0_40] : memref<120x16xf32, #tpu.memory_space<vmem>>, vector<80x16xf32>
    %60 = arith.truncf %59 : vector<80x16xf32> to vector<80x16xbf16>
    %c5 = arith.constant 5 : index
    %c0_41 = arith.constant 0 : index
    %c0_42 = arith.constant 0 : index
    %61 = vector.load %arg4[%c5, %c0_41, %c0_42] : memref<9x16x8xbf16, #tpu.memory_space<vmem>>, vector<1x16x8xbf16>
    %62 = vector.shape_cast %61 : vector<1x16x8xbf16> to vector<16x8xbf16>
    %cst_43 = arith.constant dense<0.000000e+00> : vector<80x8xf32>
    %63 = tpu.matmul %60, %62, %cst_43 {dimension_numbers = #tpu.dot_dimension_numbers<[1], [0], [0], [1], [0, 0, 1, 1], [], []>} : vector<80x16xbf16>, vector<16x8xbf16>, vector<80x8xf32> -> vector<80x8xf32>
    %64 = arith.addf %58, %63 : vector<80x8xf32>
    %c29 = arith.constant 29 : index
    %c0_44 = arith.constant 0 : index
    %65 = vector.load %arg8[%c29, %c0_44] : memref<120x16xf32, #tpu.memory_space<vmem>>, vector<80x16xf32>
    %66 = arith.truncf %65 : vector<80x16xf32> to vector<80x16xbf16>
    %c6 = arith.constant 6 : index
    %c0_45 = arith.constant 0 : index
    %c0_46 = arith.constant 0 : index
    %67 = vector.load %arg4[%c6, %c0_45, %c0_46] : memref<9x16x8xbf16, #tpu.memory_space<vmem>>, vector<1x16x8xbf16>
    %68 = vector.shape_cast %67 : vector<1x16x8xbf16> to vector<16x8xbf16>
    %cst_47 = arith.constant dense<0.000000e+00> : vector<80x8xf32>
    %69 = tpu.matmul %66, %68, %cst_47 {dimension_numbers = #tpu.dot_dimension_numbers<[1], [0], [0], [1], [0, 0, 1, 1], [], []>} : vector<80x16xbf16>, vector<16x8xbf16>, vector<80x8xf32> -> vector<80x8xf32>
    %70 = arith.addf %64, %69 : vector<80x8xf32>
    %c30_48 = arith.constant 30 : index
    %c0_49 = arith.constant 0 : index
    %71 = vector.load %arg8[%c30_48, %c0_49] : memref<120x16xf32, #tpu.memory_space<vmem>>, vector<80x16xf32>
    %72 = arith.truncf %71 : vector<80x16xf32> to vector<80x16xbf16>
    %c7 = arith.constant 7 : index
    %c0_50 = arith.constant 0 : index
    %c0_51 = arith.constant 0 : index
    %73 = vector.load %arg4[%c7, %c0_50, %c0_51] : memref<9x16x8xbf16, #tpu.memory_space<vmem>>, vector<1x16x8xbf16>
    %74 = vector.shape_cast %73 : vector<1x16x8xbf16> to vector<16x8xbf16>
    %cst_52 = arith.constant dense<0.000000e+00> : vector<80x8xf32>
    %75 = tpu.matmul %72, %74, %cst_52 {dimension_numbers = #tpu.dot_dimension_numbers<[1], [0], [0], [1], [0, 0, 1, 1], [], []>} : vector<80x16xbf16>, vector<16x8xbf16>, vector<80x8xf32> -> vector<80x8xf32>
    %76 = arith.addf %70, %75 : vector<80x8xf32>
    %c31 = arith.constant 31 : index
    %c0_53 = arith.constant 0 : index
    %77 = vector.load %arg8[%c31, %c0_53] : memref<120x16xf32, #tpu.memory_space<vmem>>, vector<80x16xf32>
    %78 = arith.truncf %77 : vector<80x16xf32> to vector<80x16xbf16>
    %c8 = arith.constant 8 : index
    %c0_54 = arith.constant 0 : index
    %c0_55 = arith.constant 0 : index
    %79 = vector.load %arg4[%c8, %c0_54, %c0_55] : memref<9x16x8xbf16, #tpu.memory_space<vmem>>, vector<1x16x8xbf16>
    %80 = vector.shape_cast %79 : vector<1x16x8xbf16> to vector<16x8xbf16>
    %cst_56 = arith.constant dense<0.000000e+00> : vector<80x8xf32>
    %81 = tpu.matmul %78, %80, %cst_56 {dimension_numbers = #tpu.dot_dimension_numbers<[1], [0], [0], [1], [0, 0, 1, 1], [], []>} : vector<80x16xbf16>, vector<16x8xbf16>, vector<80x8xf32> -> vector<80x8xf32>
    %82 = arith.addf %76, %81 : vector<80x8xf32>
    %cst_57 = arith.constant 0.000000e+00 : f32
    %83 = vector.broadcast %cst_57 : f32 to vector<1x8xf32>
    %cst_58 = arith.constant 0.000000e+00 : f32
    %84 = vector.broadcast %cst_58 : f32 to vector<1x8xf32>
    %85 = vector.extract_strided_slice %82 {offsets = [0, 0], sizes = [8, 8], strides = [1, 1]} : vector<80x8xf32> to vector<8x8xf32>
    %c0_59 = arith.constant 0 : index
    %c0_60 = arith.constant 0 : index
    %c0_61 = arith.constant 0 : index
    %86 = vector.load %arg5[%c0_59, %c0_60, %c0_61] : memref<1x64x8xf32, #tpu.memory_space<vmem>>, vector<1x8x8xf32>
    %87 = vector.shape_cast %86 : vector<1x8x8xf32> to vector<8x8xf32>
    %88 = vector.shape_cast %85 : vector<8x8xf32> to vector<1x8x8xf32>
    tpu.vector_store %arg5[%c0_59, %c0_60, %c0_61], %88 {strides = array<i32>} : memref<1x64x8xf32, #tpu.memory_space<vmem>>, vector<1x8x8xf32>,
    %cst_62 = arith.constant dense<0.000000e+00> : vector<8xf32>
    %89 = vector.multi_reduction <add>, %85, %cst_62 [0] : vector<8x8xf32> to vector<8xf32>
    %90 = vector.shape_cast %89 : vector<8xf32> to vector<1x8xf32>
    %91 = arith.addf %83, %90 : vector<1x8xf32>
    %92 = arith.mulf %85, %85 : vector<8x8xf32>
    %cst_63 = arith.constant dense<0.000000e+00> : vector<8xf32>
    %93 = vector.multi_reduction <add>, %92, %cst_63 [0] : vector<8x8xf32> to vector<8xf32>
    %94 = vector.shape_cast %93 : vector<8xf32> to vector<1x8xf32>
    %95 = arith.addf %84, %94 : vector<1x8xf32>
    %96 = vector.extract_strided_slice %82 {offsets = [10, 0], sizes = [8, 8], strides = [1, 1]} : vector<80x8xf32> to vector<8x8xf32>
    %c0_64 = arith.constant 0 : index
    %c8_65 = arith.constant 8 : index
    %c0_66 = arith.constant 0 : index
    %97 = vector.load %arg5[%c0_64, %c8_65, %c0_66] : memref<1x64x8xf32, #tpu.memory_space<vmem>>, vector<1x8x8xf32>
    %98 = vector.shape_cast %97 : vector<1x8x8xf32> to vector<8x8xf32>
    %99 = vector.shape_cast %96 : vector<8x8xf32> to vector<1x8x8xf32>
    tpu.vector_store %arg5[%c0_64, %c8_65, %c0_66], %99 {strides = array<i32>} : memref<1x64x8xf32, #tpu.memory_space<vmem>>, vector<1x8x8xf32>,
    %cst_67 = arith.constant dense<0.000000e+00> : vector<8xf32>
    %100 = vector.multi_reduction <add>, %96, %cst_67 [0] : vector<8x8xf32> to vector<8xf32>
    %101 = vector.shape_cast %100 : vector<8xf32> to vector<1x8xf32>
    %102 = arith.addf %91, %101 : vector<1x8xf32>
    %103 = arith.mulf %96, %96 : vector<8x8xf32>
    %cst_68 = arith.constant dense<0.000000e+00> : vector<8xf32>
    %104 = vector.multi_reduction <add>, %103, %cst_68 [0] : vector<8x8xf32> to vector<8xf32>
    %105 = vector.shape_cast %104 : vector<8xf32> to vector<1x8xf32>
    %106 = arith.addf %95, %105 : vector<1x8xf32>
    %107 = vector.extract_strided_slice %82 {offsets = [20, 0], sizes = [8, 8], strides = [1, 1]} : vector<80x8xf32> to vector<8x8xf32>
    %c0_69 = arith.constant 0 : index
    %c16 = arith.constant 16 : index
    %c0_70 = arith.constant 0 : index
    %108 = vector.load %arg5[%c0_69, %c16, %c0_70] : memref<1x64x8xf32, #tpu.memory_space<vmem>>, vector<1x8x8xf32>
    %109 = vector.shape_cast %108 : vector<1x8x8xf32> to vector<8x8xf32>
    %110 = vector.shape_cast %107 : vector<8x8xf32> to vector<1x8x8xf32>
    tpu.vector_store %arg5[%c0_69, %c16, %c0_70], %110 {strides = array<i32>} : memref<1x64x8xf32, #tpu.memory_space<vmem>>, vector<1x8x8xf32>,
    %cst_71 = arith.constant dense<0.000000e+00> : vector<8xf32>
    %111 = vector.multi_reduction <add>, %107, %cst_71 [0] : vector<8x8xf32> to vector<8xf32>
    %112 = vector.shape_cast %111 : vector<8xf32> to vector<1x8xf32>
    %113 = arith.addf %102, %112 : vector<1x8xf32>
    %114 = arith.mulf %107, %107 : vector<8x8xf32>
    %cst_72 = arith.constant dense<0.000000e+00> : vector<8xf32>
    %115 = vector.multi_reduction <add>, %114, %cst_72 [0] : vector<8x8xf32> to vector<8xf32>
    %116 = vector.shape_cast %115 : vector<8xf32> to vector<1x8xf32>
    %117 = arith.addf %106, %116 : vector<1x8xf32>
    %118 = vector.extract_strided_slice %82 {offsets = [30, 0], sizes = [8, 8], strides = [1, 1]} : vector<80x8xf32> to vector<8x8xf32>
    %c0_73 = arith.constant 0 : index
    %c24 = arith.constant 24 : index
    %c0_74 = arith.constant 0 : index
    %119 = vector.load %arg5[%c0_73, %c24, %c0_74] : memref<1x64x8xf32, #tpu.memory_space<vmem>>, vector<1x8x8xf32>
    %120 = vector.shape_cast %119 : vector<1x8x8xf32> to vector<8x8xf32>
    %121 = vector.shape_cast %118 : vector<8x8xf32> to vector<1x8x8xf32>
    tpu.vector_store %arg5[%c0_73, %c24, %c0_74], %121 {strides = array<i32>} : memref<1x64x8xf32, #tpu.memory_space<vmem>>, vector<1x8x8xf32>,
    %cst_75 = arith.constant dense<0.000000e+00> : vector<8xf32>
    %122 = vector.multi_reduction <add>, %118, %cst_75 [0] : vector<8x8xf32> to vector<8xf32>
    %123 = vector.shape_cast %122 : vector<8xf32> to vector<1x8xf32>
    %124 = arith.addf %113, %123 : vector<1x8xf32>
    %125 = arith.mulf %118, %118 : vector<8x8xf32>
    %cst_76 = arith.constant dense<0.000000e+00> : vector<8xf32>
    %126 = vector.multi_reduction <add>, %125, %cst_76 [0] : vector<8x8xf32> to vector<8xf32>
    %127 = vector.shape_cast %126 : vector<8xf32> to vector<1x8xf32>
    %128 = arith.addf %117, %127 : vector<1x8xf32>
    %129 = vector.extract_strided_slice %82 {offsets = [40, 0], sizes = [8, 8], strides = [1, 1]} : vector<80x8xf32> to vector<8x8xf32>
    %c0_77 = arith.constant 0 : index
    %c32 = arith.constant 32 : index
    %c0_78 = arith.constant 0 : index
    %130 = vector.load %arg5[%c0_77, %c32, %c0_78] : memref<1x64x8xf32, #tpu.memory_space<vmem>>, vector<1x8x8xf32>
    %131 = vector.shape_cast %130 : vector<1x8x8xf32> to vector<8x8xf32>
    %132 = vector.shape_cast %129 : vector<8x8xf32> to vector<1x8x8xf32>
    tpu.vector_store %arg5[%c0_77, %c32, %c0_78], %132 {strides = array<i32>} : memref<1x64x8xf32, #tpu.memory_space<vmem>>, vector<1x8x8xf32>,
    %cst_79 = arith.constant dense<0.000000e+00> : vector<8xf32>
    %133 = vector.multi_reduction <add>, %129, %cst_79 [0] : vector<8x8xf32> to vector<8xf32>
    %134 = vector.shape_cast %133 : vector<8xf32> to vector<1x8xf32>
    %135 = arith.addf %124, %134 : vector<1x8xf32>
    %136 = arith.mulf %129, %129 : vector<8x8xf32>
    %cst_80 = arith.constant dense<0.000000e+00> : vector<8xf32>
    %137 = vector.multi_reduction <add>, %136, %cst_80 [0] : vector<8x8xf32> to vector<8xf32>
    %138 = vector.shape_cast %137 : vector<8xf32> to vector<1x8xf32>
    %139 = arith.addf %128, %138 : vector<1x8xf32>
    %140 = vector.extract_strided_slice %82 {offsets = [50, 0], sizes = [8, 8], strides = [1, 1]} : vector<80x8xf32> to vector<8x8xf32>
    %c0_81 = arith.constant 0 : index
    %c40_82 = arith.constant 40 : index
    %c0_83 = arith.constant 0 : index
    %141 = vector.load %arg5[%c0_81, %c40_82, %c0_83] : memref<1x64x8xf32, #tpu.memory_space<vmem>>, vector<1x8x8xf32>
    %142 = vector.shape_cast %141 : vector<1x8x8xf32> to vector<8x8xf32>
    %143 = vector.shape_cast %140 : vector<8x8xf32> to vector<1x8x8xf32>
    tpu.vector_store %arg5[%c0_81, %c40_82, %c0_83], %143 {strides = array<i32>} : memref<1x64x8xf32, #tpu.memory_space<vmem>>, vector<1x8x8xf32>,
    %cst_84 = arith.constant dense<0.000000e+00> : vector<8xf32>
    %144 = vector.multi_reduction <add>, %140, %cst_84 [0] : vector<8x8xf32> to vector<8xf32>
    %145 = vector.shape_cast %144 : vector<8xf32> to vector<1x8xf32>
    %146 = arith.addf %135, %145 : vector<1x8xf32>
    %147 = arith.mulf %140, %140 : vector<8x8xf32>
    %cst_85 = arith.constant dense<0.000000e+00> : vector<8xf32>
    %148 = vector.multi_reduction <add>, %147, %cst_85 [0] : vector<8x8xf32> to vector<8xf32>
    %149 = vector.shape_cast %148 : vector<8xf32> to vector<1x8xf32>
    %150 = arith.addf %139, %149 : vector<1x8xf32>
    %151 = vector.extract_strided_slice %82 {offsets = [60, 0], sizes = [8, 8], strides = [1, 1]} : vector<80x8xf32> to vector<8x8xf32>
    %c0_86 = arith.constant 0 : index
    %c48 = arith.constant 48 : index
    %c0_87 = arith.constant 0 : index
    %152 = vector.load %arg5[%c0_86, %c48, %c0_87] : memref<1x64x8xf32, #tpu.memory_space<vmem>>, vector<1x8x8xf32>
    %153 = vector.shape_cast %152 : vector<1x8x8xf32> to vector<8x8xf32>
    %154 = vector.shape_cast %151 : vector<8x8xf32> to vector<1x8x8xf32>
    tpu.vector_store %arg5[%c0_86, %c48, %c0_87], %154 {strides = array<i32>} : memref<1x64x8xf32, #tpu.memory_space<vmem>>, vector<1x8x8xf32>,
    %cst_88 = arith.constant dense<0.000000e+00> : vector<8xf32>
    %155 = vector.multi_reduction <add>, %151, %cst_88 [0] : vector<8x8xf32> to vector<8xf32>
    %156 = vector.shape_cast %155 : vector<8xf32> to vector<1x8xf32>
    %157 = arith.addf %146, %156 : vector<1x8xf32>
    %158 = arith.mulf %151, %151 : vector<8x8xf32>
    %cst_89 = arith.constant dense<0.000000e+00> : vector<8xf32>
    %159 = vector.multi_reduction <add>, %158, %cst_89 [0] : vector<8x8xf32> to vector<8xf32>
    %160 = vector.shape_cast %159 : vector<8xf32> to vector<1x8xf32>
    %161 = arith.addf %150, %160 : vector<1x8xf32>
    %162 = vector.extract_strided_slice %82 {offsets = [70, 0], sizes = [8, 8], strides = [1, 1]} : vector<80x8xf32> to vector<8x8xf32>
    %c0_90 = arith.constant 0 : index
    %c56 = arith.constant 56 : index
    %c0_91 = arith.constant 0 : index
    %163 = vector.load %arg5[%c0_90, %c56, %c0_91] : memref<1x64x8xf32, #tpu.memory_space<vmem>>, vector<1x8x8xf32>
    %164 = vector.shape_cast %163 : vector<1x8x8xf32> to vector<8x8xf32>
    %165 = vector.shape_cast %162 : vector<8x8xf32> to vector<1x8x8xf32>
    tpu.vector_store %arg5[%c0_90, %c56, %c0_91], %165 {strides = array<i32>} : memref<1x64x8xf32, #tpu.memory_space<vmem>>, vector<1x8x8xf32>,
    %cst_92 = arith.constant dense<0.000000e+00> : vector<8xf32>
    %166 = vector.multi_reduction <add>, %162, %cst_92 [0] : vector<8x8xf32> to vector<8xf32>
    %167 = vector.shape_cast %166 : vector<8xf32> to vector<1x8xf32>
    %168 = arith.addf %157, %167 : vector<1x8xf32>
    %169 = arith.mulf %162, %162 : vector<8x8xf32>
    %cst_93 = arith.constant dense<0.000000e+00> : vector<8xf32>
    %170 = vector.multi_reduction <add>, %169, %cst_93 [0] : vector<8x8xf32> to vector<8xf32>
    %171 = vector.shape_cast %170 : vector<8xf32> to vector<1x8xf32>
    %172 = arith.addf %161, %171 : vector<1x8xf32>
    %c0_i32 = arith.constant 0 : i32
    %173 = arith.cmpi eq, %arg0, %c0_i32 : i32
    %174 = arith.extui %173 : i1 to i32
    %c0_i32_94 = arith.constant 0 : i32
    %175 = arith.cmpi ne, %174, %c0_i32_94 : i32
    scf.if %175 {
      %cst_103 = arith.constant 0.000000e+00 : f32
      %182 = vector.broadcast %cst_103 : f32 to vector<1x8xf32>
      %c0_104 = arith.constant 0 : index
      %c0_105 = arith.constant 0 : index
      %183 = vector.load %arg6[%c0_104, %c0_105] : memref<1x8xf32, #tpu.memory_space<vmem>>, vector<1x8xf32>
      tpu.vector_store %arg6[%c0_104, %c0_105], %182 {strides = array<i32>} : memref<1x8xf32, #tpu.memory_space<vmem>>, vector<1x8xf32>,
      %cst_106 = arith.constant 0.000000e+00 : f32
      %184 = vector.broadcast %cst_106 : f32 to vector<1x8xf32>
      %c0_107 = arith.constant 0 : index
      %c0_108 = arith.constant 0 : index
      %185 = vector.load %arg7[%c0_107, %c0_108] : memref<1x8xf32, #tpu.memory_space<vmem>>, vector<1x8xf32>
      tpu.vector_store %arg7[%c0_107, %c0_108], %184 {strides = array<i32>} : memref<1x8xf32, #tpu.memory_space<vmem>>, vector<1x8xf32>,
    } else {
    }
    %c0_95 = arith.constant 0 : index
    %c0_96 = arith.constant 0 : index
    %176 = vector.load %arg6[%c0_95, %c0_96] : memref<1x8xf32, #tpu.memory_space<vmem>>, vector<1x8xf32>
    %177 = arith.addf %176, %168 : vector<1x8xf32>
    %c0_97 = arith.constant 0 : index
    %c0_98 = arith.constant 0 : index
    %178 = vector.load %arg6[%c0_97, %c0_98] : memref<1x8xf32, #tpu.memory_space<vmem>>, vector<1x8xf32>
    tpu.vector_store %arg6[%c0_97, %c0_98], %177 {strides = array<i32>} : memref<1x8xf32, #tpu.memory_space<vmem>>, vector<1x8xf32>,
    %c0_99 = arith.constant 0 : index
    %c0_100 = arith.constant 0 : index
    %179 = vector.load %arg7[%c0_99, %c0_100] : memref<1x8xf32, #tpu.memory_space<vmem>>, vector<1x8xf32>
    %180 = arith.addf %179, %172 : vector<1x8xf32>
    %c0_101 = arith.constant 0 : index
    %c0_102 = arith.constant 0 : index
    %181 = vector.load %arg7[%c0_101, %c0_102] : memref<1x8xf32, #tpu.memory_space<vmem>>, vector<1x8xf32>
    tpu.vector_store %arg7[%c0_101, %c0_102], %180 {strides = array<i32>} : memref<1x8xf32, #tpu.memory_space<vmem>>, vector<1x8xf32>,
    return
  }
  func.func @transform_0(%arg0: i32) -> (i32, i32, i32) {
    %c0_i32 = arith.constant 0 : i32
    %c0_i32_0 = arith.constant 0 : i32
    %c0_i32_1 = arith.constant 0 : i32
    return %arg0, %c0_i32, %c0_i32_0 : i32, i32, i32
  }
  func.func @transform_1(%arg0: i32) -> (i32, i32) {
    %c0_i32 = arith.constant 0 : i32
    %c0_i32_0 = arith.constant 0 : i32
    %c0_i32_1 = arith.constant 0 : i32
    return %c0_i32, %c0_i32_0 : i32, i32
  }
  func.func @transform_2(%arg0: i32) -> (i32, i32) {
    %c0_i32 = arith.constant 0 : i32
    %c0_i32_0 = arith.constant 0 : i32
    %c0_i32_1 = arith.constant 0 : i32
    return %c0_i32, %c0_i32_0 : i32, i32
  }
  func.func @transform_3(%arg0: i32) -> (i32, i32, i32) {
    %c0_i32 = arith.constant 0 : i32
    %c0_i32_0 = arith.constant 0 : i32
    %c0_i32_1 = arith.constant 0 : i32
    %c0_i32_2 = arith.constant 0 : i32
    return %c0_i32, %c0_i32_0, %c0_i32_1 : i32, i32, i32
  }
  func.func @transform_4(%arg0: i32) -> (i32, i32, i32) {
    %c0_i32 = arith.constant 0 : i32
    %c0_i32_0 = arith.constant 0 : i32
    %c0_i32_1 = arith.constant 0 : i32
    return %arg0, %c0_i32, %c0_i32_0 : i32, i32, i32
  }
  func.func @transform_5(%arg0: i32) -> (i32, i32) {
    %c0_i32 = arith.constant 0 : i32
    %c0_i32_0 = arith.constant 0 : i32
    %c0_i32_1 = arith.constant 0 : i32
    return %c0_i32, %c0_i32_0 : i32, i32
  }
  func.func @transform_6(%arg0: i32) -> (i32, i32) {
    %c0_i32 = arith.constant 0 : i32
    %c0_i32_0 = arith.constant 0 : i32
    %c0_i32_1 = arith.constant 0 : i32
    return %c0_i32, %c0_i32_0 : i32, i32
  }
}

module attributes {stable_mosaic.version = 11 : i64} {
  func.func @_matmul_kernel(%arg0: i32, %arg1: memref<128x24xf32, #tpu.memory_space<vmem>>, %arg2: memref<1x24xf32, #tpu.memory_space<vmem>>, %arg3: memref<1x24xf32, #tpu.memory_space<vmem>>, %arg4: memref<24x16xbf16, #tpu.memory_space<vmem>>, %arg5: memref<128x16xf32, #tpu.memory_space<vmem>>, %arg6: memref<1x16xf32, #tpu.memory_space<vmem>>, %arg7: memref<1x16xf32, #tpu.memory_space<vmem>>) attributes {dimension_semantics = [#tpu.dimension_semantics<arbitrary>], iteration_bounds = array<i64: 1>, scalar_prefetch = 0 : i64, scratch_operands = 0 : i64, tpu.core_type = #tpu.core_type<tc>, window_params = [{transform_indices = @transform_0, window_bounds = array<i64: 128, 24>}, {pipeline_mode = #tpu.pipeline_mode<synchronous>, transform_indices = @transform_1, window_bounds = array<i64: 1, 24>}, {pipeline_mode = #tpu.pipeline_mode<synchronous>, transform_indices = @transform_2, window_bounds = array<i64: 1, 24>}, {pipeline_mode = #tpu.pipeline_mode<synchronous>, transform_indices = @transform_3, window_bounds = array<i64: 24, 16>}, {transform_indices = @transform_4, window_bounds = array<i64: 128, 16>}, {pipeline_mode = #tpu.pipeline_mode<synchronous>, transform_indices = @transform_5, window_bounds = array<i64: 1, 16>}, {pipeline_mode = #tpu.pipeline_mode<synchronous>, transform_indices = @transform_6, window_bounds = array<i64: 1, 16>}]} {
    %c0 = arith.constant 0 : index
    %c0_0 = arith.constant 0 : index
    %0 = vector.load %arg1[%c0, %c0_0] : memref<128x24xf32, #tpu.memory_space<vmem>>, vector<128x24xf32>
    %c0_1 = arith.constant 0 : index
    %c0_2 = arith.constant 0 : index
    %1 = vector.load %arg2[%c0_1, %c0_2] : memref<1x24xf32, #tpu.memory_space<vmem>>, vector<1x24xf32>
    %2 = vector.broadcast %1 : vector<1x24xf32> to vector<128x24xf32>
    %3 = arith.mulf %0, %2 : vector<128x24xf32>
    %c0_3 = arith.constant 0 : index
    %c0_4 = arith.constant 0 : index
    %4 = vector.load %arg3[%c0_3, %c0_4] : memref<1x24xf32, #tpu.memory_space<vmem>>, vector<1x24xf32>
    %5 = vector.broadcast %4 : vector<1x24xf32> to vector<128x24xf32>
    %6 = arith.addf %3, %5 : vector<128x24xf32>
    %cst = arith.constant 0.000000e+00 : f32
    %7 = vector.broadcast %cst : f32 to vector<128x24xf32>
    %8 = arith.maximumf %6, %7 : vector<128x24xf32>
    %9 = arith.truncf %8 : vector<128x24xf32> to vector<128x24xbf16>
    %c0_5 = arith.constant 0 : index
    %c0_6 = arith.constant 0 : index
    %10 = vector.load %arg4[%c0_5, %c0_6] : memref<24x16xbf16, #tpu.memory_space<vmem>>, vector<24x16xbf16>
    %cst_7 = arith.constant dense<0.000000e+00> : vector<128x16xf32>
    %11 = tpu.matmul %9, %10, %cst_7 {dimension_numbers = #tpu.dot_dimension_numbers<[1], [0], [0], [1], [0, 0, 1, 1], [], []>} : vector<128x24xbf16>, vector<24x16xbf16>, vector<128x16xf32> -> vector<128x16xf32>
    %c0_8 = arith.constant 0 : index
    %c0_9 = arith.constant 0 : index
    %12 = vector.load %arg5[%c0_8, %c0_9] : memref<128x16xf32, #tpu.memory_space<vmem>>, vector<128x16xf32>
    tpu.vector_store %arg5[%c0_8, %c0_9], %11 {strides = array<i32>} : memref<128x16xf32, #tpu.memory_space<vmem>>, vector<128x16xf32>,
    %c0_i32 = arith.constant 0 : i32
    %13 = arith.cmpi eq, %arg0, %c0_i32 : i32
    %14 = arith.extui %13 : i1 to i32
    %c0_i32_10 = arith.constant 0 : i32
    %15 = arith.cmpi ne, %14, %c0_i32_10 : i32
    scf.if %15 {
      %cst_21 = arith.constant 0.000000e+00 : f32
      %27 = vector.broadcast %cst_21 : f32 to vector<1x16xf32>
      %c0_22 = arith.constant 0 : index
      %c0_23 = arith.constant 0 : index
      %28 = vector.load %arg6[%c0_22, %c0_23] : memref<1x16xf32, #tpu.memory_space<vmem>>, vector<1x16xf32>
      tpu.vector_store %arg6[%c0_22, %c0_23], %27 {strides = array<i32>} : memref<1x16xf32, #tpu.memory_space<vmem>>, vector<1x16xf32>,
      %cst_24 = arith.constant 0.000000e+00 : f32
      %29 = vector.broadcast %cst_24 : f32 to vector<1x16xf32>
      %c0_25 = arith.constant 0 : index
      %c0_26 = arith.constant 0 : index
      %30 = vector.load %arg7[%c0_25, %c0_26] : memref<1x16xf32, #tpu.memory_space<vmem>>, vector<1x16xf32>
      tpu.vector_store %arg7[%c0_25, %c0_26], %29 {strides = array<i32>} : memref<1x16xf32, #tpu.memory_space<vmem>>, vector<1x16xf32>,
    } else {
    }
    %c0_11 = arith.constant 0 : index
    %c0_12 = arith.constant 0 : index
    %16 = vector.load %arg6[%c0_11, %c0_12] : memref<1x16xf32, #tpu.memory_space<vmem>>, vector<1x16xf32>
    %cst_13 = arith.constant dense<0.000000e+00> : vector<16xf32>
    %17 = vector.multi_reduction <add>, %11, %cst_13 [0] : vector<128x16xf32> to vector<16xf32>
    %18 = vector.shape_cast %17 : vector<16xf32> to vector<1x16xf32>
    %19 = arith.addf %16, %18 : vector<1x16xf32>
    %c0_14 = arith.constant 0 : index
    %c0_15 = arith.constant 0 : index
    %20 = vector.load %arg6[%c0_14, %c0_15] : memref<1x16xf32, #tpu.memory_space<vmem>>, vector<1x16xf32>
    tpu.vector_store %arg6[%c0_14, %c0_15], %19 {strides = array<i32>} : memref<1x16xf32, #tpu.memory_space<vmem>>, vector<1x16xf32>,
    %c0_16 = arith.constant 0 : index
    %c0_17 = arith.constant 0 : index
    %21 = vector.load %arg7[%c0_16, %c0_17] : memref<1x16xf32, #tpu.memory_space<vmem>>, vector<1x16xf32>
    %22 = arith.mulf %11, %11 : vector<128x16xf32>
    %cst_18 = arith.constant dense<0.000000e+00> : vector<16xf32>
    %23 = vector.multi_reduction <add>, %22, %cst_18 [0] : vector<128x16xf32> to vector<16xf32>
    %24 = vector.shape_cast %23 : vector<16xf32> to vector<1x16xf32>
    %25 = arith.addf %21, %24 : vector<1x16xf32>
    %c0_19 = arith.constant 0 : index
    %c0_20 = arith.constant 0 : index
    %26 = vector.load %arg7[%c0_19, %c0_20] : memref<1x16xf32, #tpu.memory_space<vmem>>, vector<1x16xf32>
    tpu.vector_store %arg7[%c0_19, %c0_20], %25 {strides = array<i32>} : memref<1x16xf32, #tpu.memory_space<vmem>>, vector<1x16xf32>,
    return
  }
  func.func @transform_0(%arg0: i32) -> (i32, i32) {
    %c0_i32 = arith.constant 0 : i32
    %c0_i32_0 = arith.constant 0 : i32
    return %arg0, %c0_i32 : i32, i32
  }
  func.func @transform_1(%arg0: i32) -> (i32, i32) {
    %c0_i32 = arith.constant 0 : i32
    %c0_i32_0 = arith.constant 0 : i32
    %c0_i32_1 = arith.constant 0 : i32
    return %c0_i32, %c0_i32_0 : i32, i32
  }
  func.func @transform_2(%arg0: i32) -> (i32, i32) {
    %c0_i32 = arith.constant 0 : i32
    %c0_i32_0 = arith.constant 0 : i32
    %c0_i32_1 = arith.constant 0 : i32
    return %c0_i32, %c0_i32_0 : i32, i32
  }
  func.func @transform_3(%arg0: i32) -> (i32, i32) {
    %c0_i32 = arith.constant 0 : i32
    %c0_i32_0 = arith.constant 0 : i32
    %c0_i32_1 = arith.constant 0 : i32
    return %c0_i32, %c0_i32_0 : i32, i32
  }
  func.func @transform_4(%arg0: i32) -> (i32, i32) {
    %c0_i32 = arith.constant 0 : i32
    %c0_i32_0 = arith.constant 0 : i32
    return %arg0, %c0_i32 : i32, i32
  }
  func.func @transform_5(%arg0: i32) -> (i32, i32) {
    %c0_i32 = arith.constant 0 : i32
    %c0_i32_0 = arith.constant 0 : i32
    %c0_i32_1 = arith.constant 0 : i32
    return %c0_i32, %c0_i32_0 : i32, i32
  }
  func.func @transform_6(%arg0: i32) -> (i32, i32) {
    %c0_i32 = arith.constant 0 : i32
    %c0_i32_0 = arith.constant 0 : i32
    %c0_i32_1 = arith.constant 0 : i32
    return %c0_i32, %c0_i32_0 : i32, i32
  }
}

module attributes {stable_mosaic.version = 11 : i64} {
  func.func @_matmul_kernel(%arg0: i32, %arg1: memref<128x32xf32, #tpu.memory_space<vmem>>, %arg2: memref<1x32xf32, #tpu.memory_space<vmem>>, %arg3: memref<1x32xf32, #tpu.memory_space<vmem>>, %arg4: memref<32x16xbf16, #tpu.memory_space<vmem>>, %arg5: memref<128x16xf32, #tpu.memory_space<vmem>>) attributes {dimension_semantics = [#tpu.dimension_semantics<parallel>], iteration_bounds = array<i64: 1>, scalar_prefetch = 0 : i64, scratch_operands = 0 : i64, tpu.core_type = #tpu.core_type<tc>, window_params = [{transform_indices = @transform_0, window_bounds = array<i64: 128, 32>}, {pipeline_mode = #tpu.pipeline_mode<synchronous>, transform_indices = @transform_1, window_bounds = array<i64: 1, 32>}, {pipeline_mode = #tpu.pipeline_mode<synchronous>, transform_indices = @transform_2, window_bounds = array<i64: 1, 32>}, {pipeline_mode = #tpu.pipeline_mode<synchronous>, transform_indices = @transform_3, window_bounds = array<i64: 32, 16>}, {transform_indices = @transform_4, window_bounds = array<i64: 128, 16>}]} {
    %c0 = arith.constant 0 : index
    %c0_0 = arith.constant 0 : index
    %0 = vector.load %arg1[%c0, %c0_0] : memref<128x32xf32, #tpu.memory_space<vmem>>, vector<128x32xf32>
    %c0_1 = arith.constant 0 : index
    %c0_2 = arith.constant 0 : index
    %1 = vector.load %arg2[%c0_1, %c0_2] : memref<1x32xf32, #tpu.memory_space<vmem>>, vector<1x32xf32>
    %2 = vector.broadcast %1 : vector<1x32xf32> to vector<128x32xf32>
    %3 = arith.mulf %0, %2 : vector<128x32xf32>
    %c0_3 = arith.constant 0 : index
    %c0_4 = arith.constant 0 : index
    %4 = vector.load %arg3[%c0_3, %c0_4] : memref<1x32xf32, #tpu.memory_space<vmem>>, vector<1x32xf32>
    %5 = vector.broadcast %4 : vector<1x32xf32> to vector<128x32xf32>
    %6 = arith.addf %3, %5 : vector<128x32xf32>
    %cst = arith.constant 0.000000e+00 : f32
    %7 = vector.broadcast %cst : f32 to vector<128x32xf32>
    %8 = arith.maximumf %6, %7 : vector<128x32xf32>
    %9 = arith.truncf %8 : vector<128x32xf32> to vector<128x32xbf16>
    %c0_5 = arith.constant 0 : index
    %c0_6 = arith.constant 0 : index
    %10 = vector.load %arg4[%c0_5, %c0_6] : memref<32x16xbf16, #tpu.memory_space<vmem>>, vector<32x16xbf16>
    %cst_7 = arith.constant dense<0.000000e+00> : vector<128x16xf32>
    %11 = tpu.matmul %9, %10, %cst_7 {dimension_numbers = #tpu.dot_dimension_numbers<[1], [0], [0], [1], [0, 0, 1, 1], [], []>} : vector<128x32xbf16>, vector<32x16xbf16>, vector<128x16xf32> -> vector<128x16xf32>
    %c0_8 = arith.constant 0 : index
    %c0_9 = arith.constant 0 : index
    %12 = vector.load %arg5[%c0_8, %c0_9] : memref<128x16xf32, #tpu.memory_space<vmem>>, vector<128x16xf32>
    tpu.vector_store %arg5[%c0_8, %c0_9], %11 {strides = array<i32>} : memref<128x16xf32, #tpu.memory_space<vmem>>, vector<128x16xf32>,
    return
  }
  func.func @transform_0(%arg0: i32) -> (i32, i32) {
    %c0_i32 = arith.constant 0 : i32
    %c0_i32_0 = arith.constant 0 : i32
    return %arg0, %c0_i32 : i32, i32
  }
  func.func @transform_1(%arg0: i32) -> (i32, i32) {
    %c0_i32 = arith.constant 0 : i32
    %c0_i32_0 = arith.constant 0 : i32
    %c0_i32_1 = arith.constant 0 : i32
    return %c0_i32, %c0_i32_0 : i32, i32
  }
  func.func @transform_2(%arg0: i32) -> (i32, i32) {
    %c0_i32 = arith.constant 0 : i32
    %c0_i32_0 = arith.constant 0 : i32
    %c0_i32_1 = arith.constant 0 : i32
    return %c0_i32, %c0_i32_0 : i32, i32
  }
  func.func @transform_3(%arg0: i32) -> (i32, i32) {
    %c0_i32 = arith.constant 0 : i32
    %c0_i32_0 = arith.constant 0 : i32
    %c0_i32_1 = arith.constant 0 : i32
    return %c0_i32, %c0_i32_0 : i32, i32
  }
  func.func @transform_4(%arg0: i32) -> (i32, i32) {
    %c0_i32 = arith.constant 0 : i32
    %c0_i32_0 = arith.constant 0 : i32
    return %arg0, %c0_i32 : i32, i32
  }
}

module attributes {stable_mosaic.version = 11 : i64} {
  func.func @_matmul_kernel(%arg0: i32, %arg1: memref<32x16xf32, #tpu.memory_space<vmem>>, %arg2: memref<1x16xf32, #tpu.memory_space<vmem>>, %arg3: memref<1x16xf32, #tpu.memory_space<vmem>>, %arg4: memref<16x16xbf16, #tpu.memory_space<vmem>>, %arg5: memref<32x16xf32, #tpu.memory_space<vmem>>, %arg6: memref<1x16xf32, #tpu.memory_space<vmem>>, %arg7: memref<1x16xf32, #tpu.memory_space<vmem>>) attributes {dimension_semantics = [#tpu.dimension_semantics<arbitrary>], iteration_bounds = array<i64: 1>, scalar_prefetch = 0 : i64, scratch_operands = 0 : i64, tpu.core_type = #tpu.core_type<tc>, window_params = [{transform_indices = @transform_0, window_bounds = array<i64: 32, 16>}, {pipeline_mode = #tpu.pipeline_mode<synchronous>, transform_indices = @transform_1, window_bounds = array<i64: 1, 16>}, {pipeline_mode = #tpu.pipeline_mode<synchronous>, transform_indices = @transform_2, window_bounds = array<i64: 1, 16>}, {pipeline_mode = #tpu.pipeline_mode<synchronous>, transform_indices = @transform_3, window_bounds = array<i64: 16, 16>}, {transform_indices = @transform_4, window_bounds = array<i64: 32, 16>}, {pipeline_mode = #tpu.pipeline_mode<synchronous>, transform_indices = @transform_5, window_bounds = array<i64: 1, 16>}, {pipeline_mode = #tpu.pipeline_mode<synchronous>, transform_indices = @transform_6, window_bounds = array<i64: 1, 16>}]} {
    %c0 = arith.constant 0 : index
    %c0_0 = arith.constant 0 : index
    %0 = vector.load %arg1[%c0, %c0_0] : memref<32x16xf32, #tpu.memory_space<vmem>>, vector<32x16xf32>
    %c0_1 = arith.constant 0 : index
    %c0_2 = arith.constant 0 : index
    %1 = vector.load %arg2[%c0_1, %c0_2] : memref<1x16xf32, #tpu.memory_space<vmem>>, vector<1x16xf32>
    %2 = vector.broadcast %1 : vector<1x16xf32> to vector<32x16xf32>
    %3 = arith.mulf %0, %2 : vector<32x16xf32>
    %c0_3 = arith.constant 0 : index
    %c0_4 = arith.constant 0 : index
    %4 = vector.load %arg3[%c0_3, %c0_4] : memref<1x16xf32, #tpu.memory_space<vmem>>, vector<1x16xf32>
    %5 = vector.broadcast %4 : vector<1x16xf32> to vector<32x16xf32>
    %6 = arith.addf %3, %5 : vector<32x16xf32>
    %cst = arith.constant 0.000000e+00 : f32
    %7 = vector.broadcast %cst : f32 to vector<32x16xf32>
    %8 = arith.maximumf %6, %7 : vector<32x16xf32>
    %9 = arith.truncf %8 : vector<32x16xf32> to vector<32x16xbf16>
    %c0_5 = arith.constant 0 : index
    %c0_6 = arith.constant 0 : index
    %10 = vector.load %arg4[%c0_5, %c0_6] : memref<16x16xbf16, #tpu.memory_space<vmem>>, vector<16x16xbf16>
    %cst_7 = arith.constant dense<0.000000e+00> : vector<32x16xf32>
    %11 = tpu.matmul %9, %10, %cst_7 {dimension_numbers = #tpu.dot_dimension_numbers<[1], [0], [0], [1], [0, 0, 1, 1], [], []>} : vector<32x16xbf16>, vector<16x16xbf16>, vector<32x16xf32> -> vector<32x16xf32>
    %c0_8 = arith.constant 0 : index
    %c0_9 = arith.constant 0 : index
    %12 = vector.load %arg5[%c0_8, %c0_9] : memref<32x16xf32, #tpu.memory_space<vmem>>, vector<32x16xf32>
    tpu.vector_store %arg5[%c0_8, %c0_9], %11 {strides = array<i32>} : memref<32x16xf32, #tpu.memory_space<vmem>>, vector<32x16xf32>,
    %c0_i32 = arith.constant 0 : i32
    %13 = arith.cmpi eq, %arg0, %c0_i32 : i32
    %14 = arith.extui %13 : i1 to i32
    %c0_i32_10 = arith.constant 0 : i32
    %15 = arith.cmpi ne, %14, %c0_i32_10 : i32
    scf.if %15 {
      %cst_21 = arith.constant 0.000000e+00 : f32
      %27 = vector.broadcast %cst_21 : f32 to vector<1x16xf32>
      %c0_22 = arith.constant 0 : index
      %c0_23 = arith.constant 0 : index
      %28 = vector.load %arg6[%c0_22, %c0_23] : memref<1x16xf32, #tpu.memory_space<vmem>>, vector<1x16xf32>
      tpu.vector_store %arg6[%c0_22, %c0_23], %27 {strides = array<i32>} : memref<1x16xf32, #tpu.memory_space<vmem>>, vector<1x16xf32>,
      %cst_24 = arith.constant 0.000000e+00 : f32
      %29 = vector.broadcast %cst_24 : f32 to vector<1x16xf32>
      %c0_25 = arith.constant 0 : index
      %c0_26 = arith.constant 0 : index
      %30 = vector.load %arg7[%c0_25, %c0_26] : memref<1x16xf32, #tpu.memory_space<vmem>>, vector<1x16xf32>
      tpu.vector_store %arg7[%c0_25, %c0_26], %29 {strides = array<i32>} : memref<1x16xf32, #tpu.memory_space<vmem>>, vector<1x16xf32>,
    } else {
    }
    %c0_11 = arith.constant 0 : index
    %c0_12 = arith.constant 0 : index
    %16 = vector.load %arg6[%c0_11, %c0_12] : memref<1x16xf32, #tpu.memory_space<vmem>>, vector<1x16xf32>
    %cst_13 = arith.constant dense<0.000000e+00> : vector<16xf32>
    %17 = vector.multi_reduction <add>, %11, %cst_13 [0] : vector<32x16xf32> to vector<16xf32>
    %18 = vector.shape_cast %17 : vector<16xf32> to vector<1x16xf32>
    %19 = arith.addf %16, %18 : vector<1x16xf32>
    %c0_14 = arith.constant 0 : index
    %c0_15 = arith.constant 0 : index
    %20 = vector.load %arg6[%c0_14, %c0_15] : memref<1x16xf32, #tpu.memory_space<vmem>>, vector<1x16xf32>
    tpu.vector_store %arg6[%c0_14, %c0_15], %19 {strides = array<i32>} : memref<1x16xf32, #tpu.memory_space<vmem>>, vector<1x16xf32>,
    %c0_16 = arith.constant 0 : index
    %c0_17 = arith.constant 0 : index
    %21 = vector.load %arg7[%c0_16, %c0_17] : memref<1x16xf32, #tpu.memory_space<vmem>>, vector<1x16xf32>
    %22 = arith.mulf %11, %11 : vector<32x16xf32>
    %cst_18 = arith.constant dense<0.000000e+00> : vector<16xf32>
    %23 = vector.multi_reduction <add>, %22, %cst_18 [0] : vector<32x16xf32> to vector<16xf32>
    %24 = vector.shape_cast %23 : vector<16xf32> to vector<1x16xf32>
    %25 = arith.addf %21, %24 : vector<1x16xf32>
    %c0_19 = arith.constant 0 : index
    %c0_20 = arith.constant 0 : index
    %26 = vector.load %arg7[%c0_19, %c0_20] : memref<1x16xf32, #tpu.memory_space<vmem>>, vector<1x16xf32>
    tpu.vector_store %arg7[%c0_19, %c0_20], %25 {strides = array<i32>} : memref<1x16xf32, #tpu.memory_space<vmem>>, vector<1x16xf32>,
    return
  }
  func.func @transform_0(%arg0: i32) -> (i32, i32) {
    %c0_i32 = arith.constant 0 : i32
    %c0_i32_0 = arith.constant 0 : i32
    return %arg0, %c0_i32 : i32, i32
  }
  func.func @transform_1(%arg0: i32) -> (i32, i32) {
    %c0_i32 = arith.constant 0 : i32
    %c0_i32_0 = arith.constant 0 : i32
    %c0_i32_1 = arith.constant 0 : i32
    return %c0_i32, %c0_i32_0 : i32, i32
  }
  func.func @transform_2(%arg0: i32) -> (i32, i32) {
    %c0_i32 = arith.constant 0 : i32
    %c0_i32_0 = arith.constant 0 : i32
    %c0_i32_1 = arith.constant 0 : i32
    return %c0_i32, %c0_i32_0 : i32, i32
  }
  func.func @transform_3(%arg0: i32) -> (i32, i32) {
    %c0_i32 = arith.constant 0 : i32
    %c0_i32_0 = arith.constant 0 : i32
    %c0_i32_1 = arith.constant 0 : i32
    return %c0_i32, %c0_i32_0 : i32, i32
  }
  func.func @transform_4(%arg0: i32) -> (i32, i32) {
    %c0_i32 = arith.constant 0 : i32
    %c0_i32_0 = arith.constant 0 : i32
    return %arg0, %c0_i32 : i32, i32
  }
  func.func @transform_5(%arg0: i32) -> (i32, i32) {
    %c0_i32 = arith.constant 0 : i32
    %c0_i32_0 = arith.constant 0 : i32
    %c0_i32_1 = arith.constant 0 : i32
    return %c0_i32, %c0_i32_0 : i32, i32
  }
  func.func @transform_6(%arg0: i32) -> (i32, i32) {
    %c0_i32 = arith.constant 0 : i32
    %c0_i32_0 = arith.constant 0 : i32
    %c0_i32_1 = arith.constant 0 : i32
    return %c0_i32, %c0_i32_0 : i32, i32
  }
}

module attributes {stable_mosaic.version = 11 : i64} {
  func.func @_bn_relu_conv3x3_kernel(%arg0: i32, %arg1: memref<1x16x16xf32, #tpu.memory_space<vmem>>, %arg2: memref<1x16xf32, #tpu.memory_space<vmem>>, %arg3: memref<1x16xf32, #tpu.memory_space<vmem>>, %arg4: memref<9x16x8xbf16, #tpu.memory_space<vmem>>, %arg5: memref<1x16x8xf32, #tpu.memory_space<vmem>>, %arg6: memref<1x8xf32, #tpu.memory_space<vmem>>, %arg7: memref<1x8xf32, #tpu.memory_space<vmem>>, %arg8: memref<48x16xf32, #tpu.memory_space<vmem>>) attributes {dimension_semantics = [#tpu.dimension_semantics<arbitrary>], iteration_bounds = array<i64: 2>, scalar_prefetch = 0 : i64, scratch_operands = 1 : i64, tpu.core_type = #tpu.core_type<tc>, window_params = [{transform_indices = @transform_0, window_bounds = array<i64: 1, 16, 16>}, {pipeline_mode = #tpu.pipeline_mode<synchronous>, transform_indices = @transform_1, window_bounds = array<i64: 1, 16>}, {pipeline_mode = #tpu.pipeline_mode<synchronous>, transform_indices = @transform_2, window_bounds = array<i64: 1, 16>}, {pipeline_mode = #tpu.pipeline_mode<synchronous>, transform_indices = @transform_3, window_bounds = array<i64: 9, 16, 8>}, {transform_indices = @transform_4, window_bounds = array<i64: 1, 16, 8>}, {pipeline_mode = #tpu.pipeline_mode<synchronous>, transform_indices = @transform_5, window_bounds = array<i64: 1, 8>}, {pipeline_mode = #tpu.pipeline_mode<synchronous>, transform_indices = @transform_6, window_bounds = array<i64: 1, 8>}]} {
    %c0 = arith.constant 0 : index
    %c0_0 = arith.constant 0 : index
    %c0_1 = arith.constant 0 : index
    %0 = vector.load %arg1[%c0, %c0_0, %c0_1] : memref<1x16x16xf32, #tpu.memory_space<vmem>>, vector<1x16x16xf32>
    %1 = vector.shape_cast %0 : vector<1x16x16xf32> to vector<16x16xf32>
    %c0_2 = arith.constant 0 : index
    %c0_3 = arith.constant 0 : index
    %2 = vector.load %arg2[%c0_2, %c0_3] : memref<1x16xf32, #tpu.memory_space<vmem>>, vector<1x16xf32>
    %3 = vector.broadcast %2 : vector<1x16xf32> to vector<16x16xf32>
    %4 = arith.mulf %1, %3 : vector<16x16xf32>
    %c0_4 = arith.constant 0 : index
    %c0_5 = arith.constant 0 : index
    %5 = vector.load %arg3[%c0_4, %c0_5] : memref<1x16xf32, #tpu.memory_space<vmem>>, vector<1x16xf32>
    %6 = vector.broadcast %5 : vector<1x16xf32> to vector<16x16xf32>
    %7 = arith.addf %4, %6 : vector<16x16xf32>
    %cst = arith.constant 0.000000e+00 : f32
    %8 = vector.broadcast %cst : f32 to vector<16x16xf32>
    %9 = arith.maximumf %7, %8 : vector<16x16xf32>
    %cst_6 = arith.constant 0.000000e+00 : f32
    %10 = vector.broadcast %cst_6 : f32 to vector<48x16xf32>
    %c0_7 = arith.constant 0 : index
    %c0_8 = arith.constant 0 : index
    %11 = vector.load %arg8[%c0_7, %c0_8] : memref<48x16xf32, #tpu.memory_space<vmem>>, vector<48x16xf32>
    tpu.vector_store %arg8[%c0_7, %c0_8], %10 {strides = array<i32>} : memref<48x16xf32, #tpu.memory_space<vmem>>, vector<48x16xf32>,
    %12 = vector.extract_strided_slice %9 {offsets = [0, 0], sizes = [4, 16], strides = [1, 1]} : vector<16x16xf32> to vector<4x16xf32>
    %c12 = arith.constant 12 : index
    %c0_9 = arith.constant 0 : index
    %13 = vector.load %arg8[%c12, %c0_9] : memref<48x16xf32, #tpu.memory_space<vmem>>, vector<4x16xf32>
    tpu.vector_store %arg8[%c12, %c0_9], %12 {strides = array<i32>} : memref<48x16xf32, #tpu.memory_space<vmem>>, vector<4x16xf32>,
    %14 = vector.extract_strided_slice %9 {offsets = [4, 0], sizes = [4, 16], strides = [1, 1]} : vector<16x16xf32> to vector<4x16xf32>
    %c18 = arith.constant 18 : index
    %c0_10 = arith.constant 0 : index
    %15 = vector.load %arg8[%c18, %c0_10] : memref<48x16xf32, #tpu.memory_space<vmem>>, vector<4x16xf32>
    tpu.vector_store %arg8[%c18, %c0_10], %14 {strides = array<i32>} : memref<48x16xf32, #tpu.memory_space<vmem>>, vector<4x16xf32>,
    %16 = vector.extract_strided_slice %9 {offsets = [8, 0], sizes = [4, 16], strides = [1, 1]} : vector<16x16xf32> to vector<4x16xf32>
    %c24 = arith.constant 24 : index
    %c0_11 = arith.constant 0 : index
    %17 = vector.load %arg8[%c24, %c0_11] : memref<48x16xf32, #tpu.memory_space<vmem>>, vector<4x16xf32>
    tpu.vector_store %arg8[%c24, %c0_11], %16 {strides = array<i32>} : memref<48x16xf32, #tpu.memory_space<vmem>>, vector<4x16xf32>,
    %18 = vector.extract_strided_slice %9 {offsets = [12, 0], sizes = [4, 16], strides = [1, 1]} : vector<16x16xf32> to vector<4x16xf32>
    %c30 = arith.constant 30 : index
    %c0_12 = arith.constant 0 : index
    %19 = vector.load %arg8[%c30, %c0_12] : memref<48x16xf32, #tpu.memory_space<vmem>>, vector<4x16xf32>
    tpu.vector_store %arg8[%c30, %c0_12], %18 {strides = array<i32>} : memref<48x16xf32, #tpu.memory_space<vmem>>, vector<4x16xf32>,
    %cst_13 = arith.constant 0.000000e+00 : f32
    %20 = vector.broadcast %cst_13 : f32 to vector<24x8xf32>
    %c5 = arith.constant 5 : index
    %c0_14 = arith.constant 0 : index
    %21 = vector.load %arg8[%c5, %c0_14] : memref<48x16xf32, #tpu.memory_space<vmem>>, vector<24x16xf32>
    %22 = arith.truncf %21 : vector<24x16xf32> to vector<24x16xbf16>
    %c0_15 = arith.constant 0 : index
    %c0_16 = arith.constant 0 : index
    %c0_17 = arith.constant 0 : index
    %23 = vector.load %arg4[%c0_15, %c0_16, %c0_17] : memref<9x16x8xbf16, #tpu.memory_space<vmem>>, vector<1x16x8xbf16>
    %24 = vector.shape_cast %23 : vector<1x16x8xbf16> to vector<16x8xbf16>
    %cst_18 = arith.constant dense<0.000000e+00> : vector<24x8xf32>
    %25 = tpu.matmul %22, %24, %cst_18 {dimension_numbers = #tpu.dot_dimension_numbers<[1], [0], [0], [1], [0, 0, 1, 1], [], []>} : vector<24x16xbf16>, vector<16x8xbf16>, vector<24x8xf32> -> vector<24x8xf32>
    %26 = arith.addf %20, %25 : vector<24x8xf32>
    %c6 = arith.constant 6 : index
    %c0_19 = arith.constant 0 : index
    %27 = vector.load %arg8[%c6, %c0_19] : memref<48x16xf32, #tpu.memory_space<vmem>>, vector<24x16xf32>
    %28 = arith.truncf %27 : vector<24x16xf32> to vector<24x16xbf16>
    %c1 = arith.constant 1 : index
    %c0_20 = arith.constant 0 : index
    %c0_21 = arith.constant 0 : index
    %29 = vector.load %arg4[%c1, %c0_20, %c0_21] : memref<9x16x8xbf16, #tpu.memory_space<vmem>>, vector<1x16x8xbf16>
    %30 = vector.shape_cast %29 : vector<1x16x8xbf16> to vector<16x8xbf16>
    %cst_22 = arith.constant dense<0.000000e+00> : vector<24x8xf32>
    %31 = tpu.matmul %28, %30, %cst_22 {dimension_numbers = #tpu.dot_dimension_numbers<[1], [0], [0], [1], [0, 0, 1, 1], [], []>} : vector<24x16xbf16>, vector<16x8xbf16>, vector<24x8xf32> -> vector<24x8xf32>
    %32 = arith.addf %26, %31 : vector<24x8xf32>
    %c7 = arith.constant 7 : index
    %c0_23 = arith.constant 0 : index
    %33 = vector.load %arg8[%c7, %c0_23] : memref<48x16xf32, #tpu.memory_space<vmem>>, vector<24x16xf32>
    %34 = arith.truncf %33 : vector<24x16xf32> to vector<24x16xbf16>
    %c2 = arith.constant 2 : index
    %c0_24 = arith.constant 0 : index
    %c0_25 = arith.constant 0 : index
    %35 = vector.load %arg4[%c2, %c0_24, %c0_25] : memref<9x16x8xbf16, #tpu.memory_space<vmem>>, vector<1x16x8xbf16>
    %36 = vector.shape_cast %35 : vector<1x16x8xbf16> to vector<16x8xbf16>
    %cst_26 = arith.constant dense<0.000000e+00> : vector<24x8xf32>
    %37 = tpu.matmul %34, %36, %cst_26 {dimension_numbers = #tpu.dot_dimension_numbers<[1], [0], [0], [1], [0, 0, 1, 1], [], []>} : vector<24x16xbf16>, vector<16x8xbf16>, vector<24x8xf32> -> vector<24x8xf32>
    %38 = arith.addf %32, %37 : vector<24x8xf32>
    %c11 = arith.constant 11 : index
    %c0_27 = arith.constant 0 : index
    %39 = vector.load %arg8[%c11, %c0_27] : memref<48x16xf32, #tpu.memory_space<vmem>>, vector<24x16xf32>
    %40 = arith.truncf %39 : vector<24x16xf32> to vector<24x16xbf16>
    %c3 = arith.constant 3 : index
    %c0_28 = arith.constant 0 : index
    %c0_29 = arith.constant 0 : index
    %41 = vector.load %arg4[%c3, %c0_28, %c0_29] : memref<9x16x8xbf16, #tpu.memory_space<vmem>>, vector<1x16x8xbf16>
    %42 = vector.shape_cast %41 : vector<1x16x8xbf16> to vector<16x8xbf16>
    %cst_30 = arith.constant dense<0.000000e+00> : vector<24x8xf32>
    %43 = tpu.matmul %40, %42, %cst_30 {dimension_numbers = #tpu.dot_dimension_numbers<[1], [0], [0], [1], [0, 0, 1, 1], [], []>} : vector<24x16xbf16>, vector<16x8xbf16>, vector<24x8xf32> -> vector<24x8xf32>
    %44 = arith.addf %38, %43 : vector<24x8xf32>
    %c12_31 = arith.constant 12 : index
    %c0_32 = arith.constant 0 : index
    %45 = vector.load %arg8[%c12_31, %c0_32] : memref<48x16xf32, #tpu.memory_space<vmem>>, vector<24x16xf32>
    %46 = arith.truncf %45 : vector<24x16xf32> to vector<24x16xbf16>
    %c4 = arith.constant 4 : index
    %c0_33 = arith.constant 0 : index
    %c0_34 = arith.constant 0 : index
    %47 = vector.load %arg4[%c4, %c0_33, %c0_34] : memref<9x16x8xbf16, #tpu.memory_space<vmem>>, vector<1x16x8xbf16>
    %48 = vector.shape_cast %47 : vector<1x16x8xbf16> to vector<16x8xbf16>
    %cst_35 = arith.constant dense<0.000000e+00> : vector<24x8xf32>
    %49 = tpu.matmul %46, %48, %cst_35 {dimension_numbers = #tpu.dot_dimension_numbers<[1], [0], [0], [1], [0, 0, 1, 1], [], []>} : vector<24x16xbf16>, vector<16x8xbf16>, vector<24x8xf32> -> vector<24x8xf32>
    %50 = arith.addf %44, %49 : vector<24x8xf32>
    %c13 = arith.constant 13 : index
    %c0_36 = arith.constant 0 : index
    %51 = vector.load %arg8[%c13, %c0_36] : memref<48x16xf32, #tpu.memory_space<vmem>>, vector<24x16xf32>
    %52 = arith.truncf %51 : vector<24x16xf32> to vector<24x16xbf16>
    %c5_37 = arith.constant 5 : index
    %c0_38 = arith.constant 0 : index
    %c0_39 = arith.constant 0 : index
    %53 = vector.load %arg4[%c5_37, %c0_38, %c0_39] : memref<9x16x8xbf16, #tpu.memory_space<vmem>>, vector<1x16x8xbf16>
    %54 = vector.shape_cast %53 : vector<1x16x8xbf16> to vector<16x8xbf16>
    %cst_40 = arith.constant dense<0.000000e+00> : vector<24x8xf32>
    %55 = tpu.matmul %52, %54, %cst_40 {dimension_numbers = #tpu.dot_dimension_numbers<[1], [0], [0], [1], [0, 0, 1, 1], [], []>} : vector<24x16xbf16>, vector<16x8xbf16>, vector<24x8xf32> -> vector<24x8xf32>
    %56 = arith.addf %50, %55 : vector<24x8xf32>
    %c17 = arith.constant 17 : index
    %c0_41 = arith.constant 0 : index
    %57 = vector.load %arg8[%c17, %c0_41] : memref<48x16xf32, #tpu.memory_space<vmem>>, vector<24x16xf32>
    %58 = arith.truncf %57 : vector<24x16xf32> to vector<24x16xbf16>
    %c6_42 = arith.constant 6 : index
    %c0_43 = arith.constant 0 : index
    %c0_44 = arith.constant 0 : index
    %59 = vector.load %arg4[%c6_42, %c0_43, %c0_44] : memref<9x16x8xbf16, #tpu.memory_space<vmem>>, vector<1x16x8xbf16>
    %60 = vector.shape_cast %59 : vector<1x16x8xbf16> to vector<16x8xbf16>
    %cst_45 = arith.constant dense<0.000000e+00> : vector<24x8xf32>
    %61 = tpu.matmul %58, %60, %cst_45 {dimension_numbers = #tpu.dot_dimension_numbers<[1], [0], [0], [1], [0, 0, 1, 1], [], []>} : vector<24x16xbf16>, vector<16x8xbf16>, vector<24x8xf32> -> vector<24x8xf32>
    %62 = arith.addf %56, %61 : vector<24x8xf32>
    %c18_46 = arith.constant 18 : index
    %c0_47 = arith.constant 0 : index
    %63 = vector.load %arg8[%c18_46, %c0_47] : memref<48x16xf32, #tpu.memory_space<vmem>>, vector<24x16xf32>
    %64 = arith.truncf %63 : vector<24x16xf32> to vector<24x16xbf16>
    %c7_48 = arith.constant 7 : index
    %c0_49 = arith.constant 0 : index
    %c0_50 = arith.constant 0 : index
    %65 = vector.load %arg4[%c7_48, %c0_49, %c0_50] : memref<9x16x8xbf16, #tpu.memory_space<vmem>>, vector<1x16x8xbf16>
    %66 = vector.shape_cast %65 : vector<1x16x8xbf16> to vector<16x8xbf16>
    %cst_51 = arith.constant dense<0.000000e+00> : vector<24x8xf32>
    %67 = tpu.matmul %64, %66, %cst_51 {dimension_numbers = #tpu.dot_dimension_numbers<[1], [0], [0], [1], [0, 0, 1, 1], [], []>} : vector<24x16xbf16>, vector<16x8xbf16>, vector<24x8xf32> -> vector<24x8xf32>
    %68 = arith.addf %62, %67 : vector<24x8xf32>
    %c19 = arith.constant 19 : index
    %c0_52 = arith.constant 0 : index
    %69 = vector.load %arg8[%c19, %c0_52] : memref<48x16xf32, #tpu.memory_space<vmem>>, vector<24x16xf32>
    %70 = arith.truncf %69 : vector<24x16xf32> to vector<24x16xbf16>
    %c8 = arith.constant 8 : index
    %c0_53 = arith.constant 0 : index
    %c0_54 = arith.constant 0 : index
    %71 = vector.load %arg4[%c8, %c0_53, %c0_54] : memref<9x16x8xbf16, #tpu.memory_space<vmem>>, vector<1x16x8xbf16>
    %72 = vector.shape_cast %71 : vector<1x16x8xbf16> to vector<16x8xbf16>
    %cst_55 = arith.constant dense<0.000000e+00> : vector<24x8xf32>
    %73 = tpu.matmul %70, %72, %cst_55 {dimension_numbers = #tpu.dot_dimension_numbers<[1], [0], [0], [1], [0, 0, 1, 1], [], []>} : vector<24x16xbf16>, vector<16x8xbf16>, vector<24x8xf32> -> vector<24x8xf32>
    %74 = arith.addf %68, %73 : vector<24x8xf32>
    %cst_56 = arith.constant 0.000000e+00 : f32
    %75 = vector.broadcast %cst_56 : f32 to vector<1x8xf32>
    %cst_57 = arith.constant 0.000000e+00 : f32
    %76 = vector.broadcast %cst_57 : f32 to vector<1x8xf32>
    %77 = vector.extract_strided_slice %74 {offsets = [0, 0], sizes = [4, 8], strides = [1, 1]} : vector<24x8xf32> to vector<4x8xf32>
    %c0_58 = arith.constant 0 : index
    %c0_59 = arith.constant 0 : index
    %c0_60 = arith.constant 0 : index
    %78 = vector.load %arg5[%c0_58, %c0_59, %c0_60] : memref<1x16x8xf32, #tpu.memory_space<vmem>>, vector<1x4x8xf32>
    %79 = vector.shape_cast %78 : vector<1x4x8xf32> to vector<4x8xf32>
    %80 = vector.shape_cast %77 : vector<4x8xf32> to vector<1x4x8xf32>
    tpu.vector_store %arg5[%c0_58, %c0_59, %c0_60], %80 {strides = array<i32>} : memref<1x16x8xf32, #tpu.memory_space<vmem>>, vector<1x4x8xf32>,
    %cst_61 = arith.constant dense<0.000000e+00> : vector<8xf32>
    %81 = vector.multi_reduction <add>, %77, %cst_61 [0] : vector<4x8xf32> to vector<8xf32>
    %82 = vector.shape_cast %81 : vector<8xf32> to vector<1x8xf32>
    %83 = arith.addf %75, %82 : vector<1x8xf32>
    %84 = arith.mulf %77, %77 : vector<4x8xf32>
    %cst_62 = arith.constant dense<0.000000e+00> : vector<8xf32>
    %85 = vector.multi_reduction <add>, %84, %cst_62 [0] : vector<4x8xf32> to vector<8xf32>
    %86 = vector.shape_cast %85 : vector<8xf32> to vector<1x8xf32>
    %87 = arith.addf %76, %86 : vector<1x8xf32>
    %88 = vector.extract_strided_slice %74 {offsets = [6, 0], sizes = [4, 8], strides = [1, 1]} : vector<24x8xf32> to vector<4x8xf32>
    %c0_63 = arith.constant 0 : index
    %c4_64 = arith.constant 4 : index
    %c0_65 = arith.constant 0 : index
    %89 = vector.load %arg5[%c0_63, %c4_64, %c0_65] : memref<1x16x8xf32, #tpu.memory_space<vmem>>, vector<1x4x8xf32>
    %90 = vector.shape_cast %89 : vector<1x4x8xf32> to vector<4x8xf32>
    %91 = vector.shape_cast %88 : vector<4x8xf32> to vector<1x4x8xf32>
    tpu.vector_store %arg5[%c0_63, %c4_64, %c0_65], %91 {strides = array<i32>} : memref<1x16x8xf32, #tpu.memory_space<vmem>>, vector<1x4x8xf32>,
    %cst_66 = arith.constant dense<0.000000e+00> : vector<8xf32>
    %92 = vector.multi_reduction <add>, %88, %cst_66 [0] : vector<4x8xf32> to vector<8xf32>
    %93 = vector.shape_cast %92 : vector<8xf32> to vector<1x8xf32>
    %94 = arith.addf %83, %93 : vector<1x8xf32>
    %95 = arith.mulf %88, %88 : vector<4x8xf32>
    %cst_67 = arith.constant dense<0.000000e+00> : vector<8xf32>
    %96 = vector.multi_reduction <add>, %95, %cst_67 [0] : vector<4x8xf32> to vector<8xf32>
    %97 = vector.shape_cast %96 : vector<8xf32> to vector<1x8xf32>
    %98 = arith.addf %87, %97 : vector<1x8xf32>
    %99 = vector.extract_strided_slice %74 {offsets = [12, 0], sizes = [4, 8], strides = [1, 1]} : vector<24x8xf32> to vector<4x8xf32>
    %c0_68 = arith.constant 0 : index
    %c8_69 = arith.constant 8 : index
    %c0_70 = arith.constant 0 : index
    %100 = vector.load %arg5[%c0_68, %c8_69, %c0_70] : memref<1x16x8xf32, #tpu.memory_space<vmem>>, vector<1x4x8xf32>
    %101 = vector.shape_cast %100 : vector<1x4x8xf32> to vector<4x8xf32>
    %102 = vector.shape_cast %99 : vector<4x8xf32> to vector<1x4x8xf32>
    tpu.vector_store %arg5[%c0_68, %c8_69, %c0_70], %102 {strides = array<i32>} : memref<1x16x8xf32, #tpu.memory_space<vmem>>, vector<1x4x8xf32>,
    %cst_71 = arith.constant dense<0.000000e+00> : vector<8xf32>
    %103 = vector.multi_reduction <add>, %99, %cst_71 [0] : vector<4x8xf32> to vector<8xf32>
    %104 = vector.shape_cast %103 : vector<8xf32> to vector<1x8xf32>
    %105 = arith.addf %94, %104 : vector<1x8xf32>
    %106 = arith.mulf %99, %99 : vector<4x8xf32>
    %cst_72 = arith.constant dense<0.000000e+00> : vector<8xf32>
    %107 = vector.multi_reduction <add>, %106, %cst_72 [0] : vector<4x8xf32> to vector<8xf32>
    %108 = vector.shape_cast %107 : vector<8xf32> to vector<1x8xf32>
    %109 = arith.addf %98, %108 : vector<1x8xf32>
    %110 = vector.extract_strided_slice %74 {offsets = [18, 0], sizes = [4, 8], strides = [1, 1]} : vector<24x8xf32> to vector<4x8xf32>
    %c0_73 = arith.constant 0 : index
    %c12_74 = arith.constant 12 : index
    %c0_75 = arith.constant 0 : index
    %111 = vector.load %arg5[%c0_73, %c12_74, %c0_75] : memref<1x16x8xf32, #tpu.memory_space<vmem>>, vector<1x4x8xf32>
    %112 = vector.shape_cast %111 : vector<1x4x8xf32> to vector<4x8xf32>
    %113 = vector.shape_cast %110 : vector<4x8xf32> to vector<1x4x8xf32>
    tpu.vector_store %arg5[%c0_73, %c12_74, %c0_75], %113 {strides = array<i32>} : memref<1x16x8xf32, #tpu.memory_space<vmem>>, vector<1x4x8xf32>,
    %cst_76 = arith.constant dense<0.000000e+00> : vector<8xf32>
    %114 = vector.multi_reduction <add>, %110, %cst_76 [0] : vector<4x8xf32> to vector<8xf32>
    %115 = vector.shape_cast %114 : vector<8xf32> to vector<1x8xf32>
    %116 = arith.addf %105, %115 : vector<1x8xf32>
    %117 = arith.mulf %110, %110 : vector<4x8xf32>
    %cst_77 = arith.constant dense<0.000000e+00> : vector<8xf32>
    %118 = vector.multi_reduction <add>, %117, %cst_77 [0] : vector<4x8xf32> to vector<8xf32>
    %119 = vector.shape_cast %118 : vector<8xf32> to vector<1x8xf32>
    %120 = arith.addf %109, %119 : vector<1x8xf32>
    %c0_i32 = arith.constant 0 : i32
    %121 = arith.cmpi eq, %arg0, %c0_i32 : i32
    %122 = arith.extui %121 : i1 to i32
    %c0_i32_78 = arith.constant 0 : i32
    %123 = arith.cmpi ne, %122, %c0_i32_78 : i32
    scf.if %123 {
      %cst_87 = arith.constant 0.000000e+00 : f32
      %130 = vector.broadcast %cst_87 : f32 to vector<1x8xf32>
      %c0_88 = arith.constant 0 : index
      %c0_89 = arith.constant 0 : index
      %131 = vector.load %arg6[%c0_88, %c0_89] : memref<1x8xf32, #tpu.memory_space<vmem>>, vector<1x8xf32>
      tpu.vector_store %arg6[%c0_88, %c0_89], %130 {strides = array<i32>} : memref<1x8xf32, #tpu.memory_space<vmem>>, vector<1x8xf32>,
      %cst_90 = arith.constant 0.000000e+00 : f32
      %132 = vector.broadcast %cst_90 : f32 to vector<1x8xf32>
      %c0_91 = arith.constant 0 : index
      %c0_92 = arith.constant 0 : index
      %133 = vector.load %arg7[%c0_91, %c0_92] : memref<1x8xf32, #tpu.memory_space<vmem>>, vector<1x8xf32>
      tpu.vector_store %arg7[%c0_91, %c0_92], %132 {strides = array<i32>} : memref<1x8xf32, #tpu.memory_space<vmem>>, vector<1x8xf32>,
    } else {
    }
    %c0_79 = arith.constant 0 : index
    %c0_80 = arith.constant 0 : index
    %124 = vector.load %arg6[%c0_79, %c0_80] : memref<1x8xf32, #tpu.memory_space<vmem>>, vector<1x8xf32>
    %125 = arith.addf %124, %116 : vector<1x8xf32>
    %c0_81 = arith.constant 0 : index
    %c0_82 = arith.constant 0 : index
    %126 = vector.load %arg6[%c0_81, %c0_82] : memref<1x8xf32, #tpu.memory_space<vmem>>, vector<1x8xf32>
    tpu.vector_store %arg6[%c0_81, %c0_82], %125 {strides = array<i32>} : memref<1x8xf32, #tpu.memory_space<vmem>>, vector<1x8xf32>,
    %c0_83 = arith.constant 0 : index
    %c0_84 = arith.constant 0 : index
    %127 = vector.load %arg7[%c0_83, %c0_84] : memref<1x8xf32, #tpu.memory_space<vmem>>, vector<1x8xf32>
    %128 = arith.addf %127, %120 : vector<1x8xf32>
    %c0_85 = arith.constant 0 : index
    %c0_86 = arith.constant 0 : index
    %129 = vector.load %arg7[%c0_85, %c0_86] : memref<1x8xf32, #tpu.memory_space<vmem>>, vector<1x8xf32>
    tpu.vector_store %arg7[%c0_85, %c0_86], %128 {strides = array<i32>} : memref<1x8xf32, #tpu.memory_space<vmem>>, vector<1x8xf32>,
    return
  }
  func.func @transform_0(%arg0: i32) -> (i32, i32, i32) {
    %c0_i32 = arith.constant 0 : i32
    %c0_i32_0 = arith.constant 0 : i32
    %c0_i32_1 = arith.constant 0 : i32
    return %arg0, %c0_i32, %c0_i32_0 : i32, i32, i32
  }
  func.func @transform_1(%arg0: i32) -> (i32, i32) {
    %c0_i32 = arith.constant 0 : i32
    %c0_i32_0 = arith.constant 0 : i32
    %c0_i32_1 = arith.constant 0 : i32
    return %c0_i32, %c0_i32_0 : i32, i32
  }
  func.func @transform_2(%arg0: i32) -> (i32, i32) {
    %c0_i32 = arith.constant 0 : i32
    %c0_i32_0 = arith.constant 0 : i32
    %c0_i32_1 = arith.constant 0 : i32
    return %c0_i32, %c0_i32_0 : i32, i32
  }
  func.func @transform_3(%arg0: i32) -> (i32, i32, i32) {
    %c0_i32 = arith.constant 0 : i32
    %c0_i32_0 = arith.constant 0 : i32
    %c0_i32_1 = arith.constant 0 : i32
    %c0_i32_2 = arith.constant 0 : i32
    return %c0_i32, %c0_i32_0, %c0_i32_1 : i32, i32, i32
  }
  func.func @transform_4(%arg0: i32) -> (i32, i32, i32) {
    %c0_i32 = arith.constant 0 : i32
    %c0_i32_0 = arith.constant 0 : i32
    %c0_i32_1 = arith.constant 0 : i32
    return %arg0, %c0_i32, %c0_i32_0 : i32, i32, i32
  }
  func.func @transform_5(%arg0: i32) -> (i32, i32) {
    %c0_i32 = arith.constant 0 : i32
    %c0_i32_0 = arith.constant 0 : i32
    %c0_i32_1 = arith.constant 0 : i32
    return %c0_i32, %c0_i32_0 : i32, i32
  }
  func.func @transform_6(%arg0: i32) -> (i32, i32) {
    %c0_i32 = arith.constant 0 : i32
    %c0_i32_0 = arith.constant 0 : i32
    %c0_i32_1 = arith.constant 0 : i32
    return %c0_i32, %c0_i32_0 : i32, i32
  }
}

module attributes {stable_mosaic.version = 11 : i64} {
  func.func @_tail_kernel(%arg0: memref<2x16x32xf32, #tpu.memory_space<vmem>>, %arg1: memref<1x1x32xf32, #tpu.memory_space<vmem>>, %arg2: memref<1x1x32xf32, #tpu.memory_space<vmem>>, %arg3: memref<32x100xbf16, #tpu.memory_space<vmem>>, %arg4: memref<100x10xbf16, #tpu.memory_space<vmem>>, %arg5: memref<2x10xf32, #tpu.memory_space<vmem>>, %arg6: memref<2x32xf32, #tpu.memory_space<vmem>>) attributes {dimension_semantics = [], scalar_prefetch = 0 : i64, scratch_operands = 0 : i64, tpu.core_type = #tpu.core_type<tc>} {
    %c0 = arith.constant 0 : index
    %c0_0 = arith.constant 0 : index
    %c0_1 = arith.constant 0 : index
    %0 = vector.load %arg0[%c0, %c0_0, %c0_1] : memref<2x16x32xf32, #tpu.memory_space<vmem>>, vector<2x16x32xf32>
    %c0_2 = arith.constant 0 : index
    %c0_3 = arith.constant 0 : index
    %c0_4 = arith.constant 0 : index
    %1 = vector.load %arg1[%c0_2, %c0_3, %c0_4] : memref<1x1x32xf32, #tpu.memory_space<vmem>>, vector<1x1x32xf32>
    %2 = vector.broadcast %1 : vector<1x1x32xf32> to vector<2x16x32xf32>
    %3 = arith.mulf %0, %2 : vector<2x16x32xf32>
    %c0_5 = arith.constant 0 : index
    %c0_6 = arith.constant 0 : index
    %c0_7 = arith.constant 0 : index
    %4 = vector.load %arg2[%c0_5, %c0_6, %c0_7] : memref<1x1x32xf32, #tpu.memory_space<vmem>>, vector<1x1x32xf32>
    %5 = vector.broadcast %4 : vector<1x1x32xf32> to vector<2x16x32xf32>
    %6 = arith.addf %3, %5 : vector<2x16x32xf32>
    %cst = arith.constant 0.000000e+00 : f32
    %7 = vector.broadcast %cst : f32 to vector<2x16x32xf32>
    %8 = arith.maximumf %6, %7 : vector<2x16x32xf32>
    %cst_8 = arith.constant dense<0.000000e+00> : vector<2x32xf32>
    %9 = vector.multi_reduction <add>, %8, %cst_8 [1] : vector<2x16x32xf32> to vector<2x32xf32>
    %cst_9 = arith.constant 1.600000e+01 : f32
    %10 = vector.broadcast %cst_9 : f32 to vector<2x32xf32>
    %11 = arith.divf %9, %10 : vector<2x32xf32>
    %c0_10 = arith.constant 0 : index
    %c0_11 = arith.constant 0 : index
    %12 = vector.load %arg6[%c0_10, %c0_11] : memref<2x32xf32, #tpu.memory_space<vmem>>, vector<2x32xf32>
    tpu.vector_store %arg6[%c0_10, %c0_11], %11 {strides = array<i32>} : memref<2x32xf32, #tpu.memory_space<vmem>>, vector<2x32xf32>,
    %13 = arith.truncf %11 : vector<2x32xf32> to vector<2x32xbf16>
    %c0_12 = arith.constant 0 : index
    %c0_13 = arith.constant 0 : index
    %14 = vector.load %arg3[%c0_12, %c0_13] : memref<32x100xbf16, #tpu.memory_space<vmem>>, vector<32x100xbf16>
    %cst_14 = arith.constant dense<0.000000e+00> : vector<2x100xf32>
    %15 = tpu.matmul %13, %14, %cst_14 {dimension_numbers = #tpu.dot_dimension_numbers<[1], [0], [0], [1], [0, 0, 1, 1], [], []>} : vector<2x32xbf16>, vector<32x100xbf16>, vector<2x100xf32> -> vector<2x100xf32>
    %cst_15 = arith.constant 0.000000e+00 : f32
    %16 = vector.broadcast %cst_15 : f32 to vector<2x100xf32>
    %17 = arith.maximumf %15, %16 : vector<2x100xf32>
    %18 = arith.truncf %17 : vector<2x100xf32> to vector<2x100xbf16>
    %c0_16 = arith.constant 0 : index
    %c0_17 = arith.constant 0 : index
    %19 = vector.load %arg4[%c0_16, %c0_17] : memref<100x10xbf16, #tpu.memory_space<vmem>>, vector<100x10xbf16>
    %cst_18 = arith.constant dense<0.000000e+00> : vector<2x10xf32>
    %20 = tpu.matmul %18, %19, %cst_18 {dimension_numbers = #tpu.dot_dimension_numbers<[1], [0], [0], [1], [0, 0, 1, 1], [], []>} : vector<2x100xbf16>, vector<100x10xbf16>, vector<2x10xf32> -> vector<2x10xf32>
    %c0_19 = arith.constant 0 : index
    %c0_20 = arith.constant 0 : index
    %21 = vector.load %arg5[%c0_19, %c0_20] : memref<2x10xf32, #tpu.memory_space<vmem>>, vector<2x10xf32>
    tpu.vector_store %arg5[%c0_19, %c0_20], %20 {strides = array<i32>} : memref<2x10xf32, #tpu.memory_space<vmem>>, vector<2x10xf32>,
    return
  }
}

module attributes {stable_mosaic.version = 11 : i64} {
  func.func @_matmul_kernel(%arg0: i32, %arg1: memref<32x24xf32, #tpu.memory_space<vmem>>, %arg2: memref<1x24xf32, #tpu.memory_space<vmem>>, %arg3: memref<1x24xf32, #tpu.memory_space<vmem>>, %arg4: memref<24x16xbf16, #tpu.memory_space<vmem>>, %arg5: memref<32x16xf32, #tpu.memory_space<vmem>>, %arg6: memref<1x16xf32, #tpu.memory_space<vmem>>, %arg7: memref<1x16xf32, #tpu.memory_space<vmem>>) attributes {dimension_semantics = [#tpu.dimension_semantics<arbitrary>], iteration_bounds = array<i64: 1>, scalar_prefetch = 0 : i64, scratch_operands = 0 : i64, tpu.core_type = #tpu.core_type<tc>, window_params = [{transform_indices = @transform_0, window_bounds = array<i64: 32, 24>}, {pipeline_mode = #tpu.pipeline_mode<synchronous>, transform_indices = @transform_1, window_bounds = array<i64: 1, 24>}, {pipeline_mode = #tpu.pipeline_mode<synchronous>, transform_indices = @transform_2, window_bounds = array<i64: 1, 24>}, {pipeline_mode = #tpu.pipeline_mode<synchronous>, transform_indices = @transform_3, window_bounds = array<i64: 24, 16>}, {transform_indices = @transform_4, window_bounds = array<i64: 32, 16>}, {pipeline_mode = #tpu.pipeline_mode<synchronous>, transform_indices = @transform_5, window_bounds = array<i64: 1, 16>}, {pipeline_mode = #tpu.pipeline_mode<synchronous>, transform_indices = @transform_6, window_bounds = array<i64: 1, 16>}]} {
    %c0 = arith.constant 0 : index
    %c0_0 = arith.constant 0 : index
    %0 = vector.load %arg1[%c0, %c0_0] : memref<32x24xf32, #tpu.memory_space<vmem>>, vector<32x24xf32>
    %c0_1 = arith.constant 0 : index
    %c0_2 = arith.constant 0 : index
    %1 = vector.load %arg2[%c0_1, %c0_2] : memref<1x24xf32, #tpu.memory_space<vmem>>, vector<1x24xf32>
    %2 = vector.broadcast %1 : vector<1x24xf32> to vector<32x24xf32>
    %3 = arith.mulf %0, %2 : vector<32x24xf32>
    %c0_3 = arith.constant 0 : index
    %c0_4 = arith.constant 0 : index
    %4 = vector.load %arg3[%c0_3, %c0_4] : memref<1x24xf32, #tpu.memory_space<vmem>>, vector<1x24xf32>
    %5 = vector.broadcast %4 : vector<1x24xf32> to vector<32x24xf32>
    %6 = arith.addf %3, %5 : vector<32x24xf32>
    %cst = arith.constant 0.000000e+00 : f32
    %7 = vector.broadcast %cst : f32 to vector<32x24xf32>
    %8 = arith.maximumf %6, %7 : vector<32x24xf32>
    %9 = arith.truncf %8 : vector<32x24xf32> to vector<32x24xbf16>
    %c0_5 = arith.constant 0 : index
    %c0_6 = arith.constant 0 : index
    %10 = vector.load %arg4[%c0_5, %c0_6] : memref<24x16xbf16, #tpu.memory_space<vmem>>, vector<24x16xbf16>
    %cst_7 = arith.constant dense<0.000000e+00> : vector<32x16xf32>
    %11 = tpu.matmul %9, %10, %cst_7 {dimension_numbers = #tpu.dot_dimension_numbers<[1], [0], [0], [1], [0, 0, 1, 1], [], []>} : vector<32x24xbf16>, vector<24x16xbf16>, vector<32x16xf32> -> vector<32x16xf32>
    %c0_8 = arith.constant 0 : index
    %c0_9 = arith.constant 0 : index
    %12 = vector.load %arg5[%c0_8, %c0_9] : memref<32x16xf32, #tpu.memory_space<vmem>>, vector<32x16xf32>
    tpu.vector_store %arg5[%c0_8, %c0_9], %11 {strides = array<i32>} : memref<32x16xf32, #tpu.memory_space<vmem>>, vector<32x16xf32>,
    %c0_i32 = arith.constant 0 : i32
    %13 = arith.cmpi eq, %arg0, %c0_i32 : i32
    %14 = arith.extui %13 : i1 to i32
    %c0_i32_10 = arith.constant 0 : i32
    %15 = arith.cmpi ne, %14, %c0_i32_10 : i32
    scf.if %15 {
      %cst_21 = arith.constant 0.000000e+00 : f32
      %27 = vector.broadcast %cst_21 : f32 to vector<1x16xf32>
      %c0_22 = arith.constant 0 : index
      %c0_23 = arith.constant 0 : index
      %28 = vector.load %arg6[%c0_22, %c0_23] : memref<1x16xf32, #tpu.memory_space<vmem>>, vector<1x16xf32>
      tpu.vector_store %arg6[%c0_22, %c0_23], %27 {strides = array<i32>} : memref<1x16xf32, #tpu.memory_space<vmem>>, vector<1x16xf32>,
      %cst_24 = arith.constant 0.000000e+00 : f32
      %29 = vector.broadcast %cst_24 : f32 to vector<1x16xf32>
      %c0_25 = arith.constant 0 : index
      %c0_26 = arith.constant 0 : index
      %30 = vector.load %arg7[%c0_25, %c0_26] : memref<1x16xf32, #tpu.memory_space<vmem>>, vector<1x16xf32>
      tpu.vector_store %arg7[%c0_25, %c0_26], %29 {strides = array<i32>} : memref<1x16xf32, #tpu.memory_space<vmem>>, vector<1x16xf32>,
    } else {
    }
    %c0_11 = arith.constant 0 : index
    %c0_12 = arith.constant 0 : index
    %16 = vector.load %arg6[%c0_11, %c0_12] : memref<1x16xf32, #tpu.memory_space<vmem>>, vector<1x16xf32>
    %cst_13 = arith.constant dense<0.000000e+00> : vector<16xf32>
    %17 = vector.multi_reduction <add>, %11, %cst_13 [0] : vector<32x16xf32> to vector<16xf32>
    %18 = vector.shape_cast %17 : vector<16xf32> to vector<1x16xf32>
    %19 = arith.addf %16, %18 : vector<1x16xf32>
    %c0_14 = arith.constant 0 : index
    %c0_15 = arith.constant 0 : index
    %20 = vector.load %arg6[%c0_14, %c0_15] : memref<1x16xf32, #tpu.memory_space<vmem>>, vector<1x16xf32>
    tpu.vector_store %arg6[%c0_14, %c0_15], %19 {strides = array<i32>} : memref<1x16xf32, #tpu.memory_space<vmem>>, vector<1x16xf32>,
    %c0_16 = arith.constant 0 : index
    %c0_17 = arith.constant 0 : index
    %21 = vector.load %arg7[%c0_16, %c0_17] : memref<1x16xf32, #tpu.memory_space<vmem>>, vector<1x16xf32>
    %22 = arith.mulf %11, %11 : vector<32x16xf32>
    %cst_18 = arith.constant dense<0.000000e+00> : vector<16xf32>
    %23 = vector.multi_reduction <add>, %22, %cst_18 [0] : vector<32x16xf32> to vector<16xf32>
    %24 = vector.shape_cast %23 : vector<16xf32> to vector<1x16xf32>
    %25 = arith.addf %21, %24 : vector<1x16xf32>
    %c0_19 = arith.constant 0 : index
    %c0_20 = arith.constant 0 : index
    %26 = vector.load %arg7[%c0_19, %c0_20] : memref<1x16xf32, #tpu.memory_space<vmem>>, vector<1x16xf32>
    tpu.vector_store %arg7[%c0_19, %c0_20], %25 {strides = array<i32>} : memref<1x16xf32, #tpu.memory_space<vmem>>, vector<1x16xf32>,
    return
  }
  func.func @transform_0(%arg0: i32) -> (i32, i32) {
    %c0_i32 = arith.constant 0 : i32
    %c0_i32_0 = arith.constant 0 : i32
    return %arg0, %c0_i32 : i32, i32
  }
  func.func @transform_1(%arg0: i32) -> (i32, i32) {
    %c0_i32 = arith.constant 0 : i32
    %c0_i32_0 = arith.constant 0 : i32
    %c0_i32_1 = arith.constant 0 : i32
    return %c0_i32, %c0_i32_0 : i32, i32
  }
  func.func @transform_2(%arg0: i32) -> (i32, i32) {
    %c0_i32 = arith.constant 0 : i32
    %c0_i32_0 = arith.constant 0 : i32
    %c0_i32_1 = arith.constant 0 : i32
    return %c0_i32, %c0_i32_0 : i32, i32
  }
  func.func @transform_3(%arg0: i32) -> (i32, i32) {
    %c0_i32 = arith.constant 0 : i32
    %c0_i32_0 = arith.constant 0 : i32
    %c0_i32_1 = arith.constant 0 : i32
    return %c0_i32, %c0_i32_0 : i32, i32
  }
  func.func @transform_4(%arg0: i32) -> (i32, i32) {
    %c0_i32 = arith.constant 0 : i32
    %c0_i32_0 = arith.constant 0 : i32
    return %arg0, %c0_i32 : i32, i32
  }
  func.func @transform_5(%arg0: i32) -> (i32, i32) {
    %c0_i32 = arith.constant 0 : i32
    %c0_i32_0 = arith.constant 0 : i32
    %c0_i32_1 = arith.constant 0 : i32
    return %c0_i32, %c0_i32_0 : i32, i32
  }
  func.func @transform_6(%arg0: i32) -> (i32, i32) {
    %c0_i32 = arith.constant 0 : i32
    %c0_i32_0 = arith.constant 0 : i32
    %c0_i32_1 = arith.constant 0 : i32
    return %c0_i32, %c0_i32_0 : i32, i32
  }
}

</mosaic_0001>

<bundles_post_ra>
// kernel: densenet_forward.13
= control target key start
LH: loop header
LB: loop body
LE: loop exit
PB: predicated region body
PF: predicated region fallthrough
CT: control target
= control target key end

     0   :  { %vm284_vm0 = vcmask 130048   ;;  %s961_s0 = inlined_call_operand.vmem [shape: f32[512,16], index: 0, kind: input, shape index: {}]   ;;  %s962_s1 = inlined_call_operand.vmem [shape: f32[1,16], index: 1, kind: input, shape index: {}]   ;;  %s963_s2 = inlined_call_operand.vmem [shape: f32[1,16], index: 2, kind: input, shape index: {}]   ;;  %s964_s3 = inlined_call_operand.vmem [shape: f32[512,16], index: 3, kind: output, shape index: {}]  }
   0x1   :  { %v14_v0 = vld [vmem:[%s961_s0] sm:$0xff]  ;;  %v15_v4 = vld [vmem:[%s961_s0 + $0x8] sm:$0xff]  ;;  %v16_v5 = vld [vmem:[%s961_s0 + $0x10] sm:$0xff] }
   0x2   :  { %v381_v1 = vld [vmem:[%s962_s1] ss:$0 sm:$0xff]  ;;  %v17_v6 = vld [vmem:[%s961_s0 + $0x18] sm:$0xff]  ;;  %v19_v11 = vld [vmem:[%s961_s0 + $0x28] sm:$0xff] }
   0x3   :  { %v386_v2 = vld [vmem:[%s963_s2] ss:$0 sm:$0xff]  ;;  %v85_v3 = vmul.f32 %v381_v1, %v14_v0  ;;  %v86_v7 = vmul.f32 %v381_v1, %v15_v4  ;;  %v87_v8 = vmul.f32 %v381_v1, %v16_v5  ;;  %v88_v9 = vmul.f32 %v381_v1, %v17_v6  ;;  %v20_v12 = vld [vmem:[%s961_s0 + $0x30] sm:$0xff]  ;;  %v21_v17 = vld [vmem:[%s961_s0 + $0x38] sm:$0xff] }
   0x4   :  { %v18_v10 = vld [vmem:[%s961_s0 + $0x20] sm:$0xff]  ;;  %v90_v15 = vmul.f32 %v381_v1, %v19_v11  ;;  %v91_v16 = vmul.f32 %v381_v1, %v20_v12  ;;  %v92_v21 = vmul.f32 %v381_v1, %v21_v17  ;;  %v23_v27 = vld [vmem:[%s961_s0 + $0x48] sm:$0xff]  ;;  %v24_v28 = vld [vmem:[%s961_s0 + $0x50] sm:$0xff] }
   0x5   :  { %v156_v13 = vadd.f32 %v386_v2, %v85_v3  ;;  %v89_v14 = vmul.f32 %v381_v1, %v18_v10  ;;  %v157_v18 = vadd.f32 %v386_v2, %v86_v7  ;;  %v158_v19 = vadd.f32 %v386_v2, %v87_v8  ;;  %v22_v22 = vld [vmem:[%s961_s0 + $0x40] sm:$0xff]  ;;  %v25_v29 = vld [vmem:[%s961_s0 + $0x58] sm:$0xff]  ;;  %v27_v35 = vld [vmem:[%s961_s0 + $0x68] sm:$0xff] }
   0x6   :  { %v159_v20 = vadd.f32 %v386_v2, %v88_v9  ;;  %v161_v25 = vadd.f32 %v386_v2, %v90_v15  ;;  %v162_v26 = vadd.f32 %v386_v2, %v91_v16  ;;  %v163_v33 = vadd.f32 %v386_v2, %v92_v21  ;;  %v26_v34 = vld [vmem:[%s961_s0 + $0x60] sm:$0xff]  ;;  %v28_v36 = vld [vmem:[%s961_s0 + $0x70] sm:$0xff]  ;;  %v29_v41 = vld [vmem:[%s961_s0 + $0x78] sm:$0xff] }
   0x7   :  { %v220_v23 = vmax.f32 %v156_v13, 0.0  ;;  %v160_v24 = vadd.f32 %v386_v2, %v89_v14  ;;  %v221_v30 = vmax.f32 %v157_v18, 0.0  ;;  %v222_v31 = vmax.f32 %v158_v19, 0.0  ;;  %v30_v54 = vld [vmem:[%s961_s0 + $0x80] sm:$0xff]  ;;  %v31_v59 = vld [vmem:[%s961_s0 + $0x88] sm:$0xff]  ;;  %v32_v60 = vld [vmem:[%s961_s0 + $0x90] sm:$0xff] }
   0x8   :  { %v223_v32 = vmax.f32 %v159_v20, 0.0  ;;  %v225_v38 = vmax.f32 %v161_v25, 0.0  ;;  %v226_v39 = vmax.f32 %v162_v26, 0.0  ;;  %v93_v40 = vmul.f32 %v381_v1, %v22_v22  ;;  %v33_v61 = vld [vmem:[%s961_s0 + $0x98] sm:$0xff]  ;;  %v34_v4 = vld [vmem:[%s961_s0 + $0xa0] sm:$0xff]  ;;  %v35_v5 = vld [vmem:[%s961_s0 + $0xa8] sm:$0xff] }
   0x9   :  { %285 = vst.msk [vmem:[%s964_s3] sm:$0xff] %vm284_vm0, %v220_v23  ;;  %v224_v37 = vmax.f32 %v160_v24, 0.0  ;;  %286 = vst.msk [vmem:[%s964_s3 + $0x8] sm:$0xff] %vm284_vm0, %v221_v30  ;;  %v227_v42 = vmax.f32 %v163_v33, 0.0  ;;  %v94_v43 = vmul.f32 %v381_v1, %v23_v27  ;;  %v95_v44 = vmul.f32 %v381_v1, %v24_v28  ;;  %v36_v6 = vld [vmem:[%s961_s0 + $0xb0] sm:$0xff]  ;;  %v37_v11 = vld [vmem:[%s961_s0 + $0xb8] sm:$0xff] }
   0xa   :  { %287 = vst.msk [vmem:[%s964_s3 + $0x10] sm:$0xff] %vm284_vm0, %v222_v31  ;;  %288 = vst.msk [vmem:[%s964_s3 + $0x18] sm:$0xff] %vm284_vm0, %v223_v32  ;;  %v96_v45 = vmul.f32 %v381_v1, %v25_v29  ;;  %v164_v46 = vadd.f32 %v386_v2, %v93_v40  ;;  %v97_v47 = vmul.f32 %v381_v1, %v26_v34  ;;  %v38_v24 = vld [vmem:[%s961_s0 + $0xc0] sm:$0xff]  ;;  %v39_v29 = vld [vmem:[%s961_s0 + $0xc8] sm:$0xff] }
   0xb   :  { %289 = vst.msk [vmem:[%s964_s3 + $0x20] sm:$0xff] %vm284_vm0, %v224_v37  ;;  %290 = vst.msk [vmem:[%s964_s3 + $0x28] sm:$0xff] %vm284_vm0, %v225_v38  ;;  %v98_v48 = vmul.f32 %v381_v1, %v27_v35  ;;  %v99_v49 = vmul.f32 %v381_v1, %v28_v36  ;;  %v165_v50 = vadd.f32 %v386_v2, %v94_v43  ;;  %v40_v30 = vld [vmem:[%s961_s0 + $0xd0] sm:$0xff]  ;;  %v41_v31 = vld [vmem:[%s961_s0 + $0xd8] sm:$0xff] }
   0xc   :  { %291 = vst.msk [vmem:[%s964_s3 + $0x30] sm:$0xff] %vm284_vm0, %v226_v39  ;;  %292 = vst.msk [vmem:[%s964_s3 + $0x38] sm:$0xff] %vm284_vm0, %v227_v42  ;;  %v166_v51 = vadd.f32 %v386_v2, %v95_v44  ;;  %v167_v52 = vadd.f32 %v386_v2, %v96_v45  ;;  %v100_v53 = vmul.f32 %v381_v1, %v29_v41  ;;  %v228_v55 = vmax.f32 %v164_v46, 0.0  ;;  %v42_v36 = vld [vmem:[%s961_s0 + $0xe0] sm:$0xff]  ;;  %v43_v37 = vld [vmem:[%s961_s0 + $0xe8] sm:$0xff] }
   0xd   :  { %v168_v56 = vadd.f32 %v386_v2, %v97_v47  ;;  %v169_v57 = vadd.f32 %v386_v2, %v98_v48  ;;  %v170_v58 = vadd.f32 %v386_v2, %v99_v49  ;;  %v229_v62 = vmax.f32 %v165_v50, 0.0  ;;  %v44_v38 = vld [vmem:[%s961_s0 + $0xf0] sm:$0xff]  ;;  %v45_v43 = vld [vmem:[%s961_s0 + $0xf8] sm:$0xff] }
   0xe   :  { %v230_v63 = vmax.f32 %v166_v51, 0.0  ;;  %v231_v0 = vmax.f32 %v167_v52, 0.0  ;;  %v171_v3 = vadd.f32 %v386_v2, %v100_v53  ;;  %293 = vst.msk [vmem:[%s964_s3 + $0x40] sm:$0xff] %vm284_vm0, %v228_v55  ;;  %v101_v10 = vmul.f32 %v381_v1, %v30_v54 }
   0xf   :  { %v232_v7 = vmax.f32 %v168_v56, 0.0  ;;  %v233_v8 = vmax.f32 %v169_v57, 0.0  ;;  %v234_v9 = vmax.f32 %v170_v58, 0.0  ;;  %294 = vst.msk [vmem:[%s964_s3 + $0x48] sm:$0xff] %vm284_vm0, %v229_v62  ;;  %v102_v13 = vmul.f32 %v381_v1, %v31_v59  ;;  %v46_v56 = vld [vmem:[%s961_s0 + $0x100] sm:$0xff]  ;;  %v48_v62 = vld [vmem:[%s961_s0 + $0x110] sm:$0xff] }
  0x10   :  { %295 = vst.msk [vmem:[%s964_s3 + $0x50] sm:$0xff] %vm284_vm0, %v230_v63  ;;  %296 = vst.msk [vmem:[%s964_s3 + $0x58] sm:$0xff] %vm284_vm0, %v231_v0  ;;  %v235_v12 = vmax.f32 %v171_v3, 0.0  ;;  %v103_v14 = vmul.f32 %v381_v1, %v32_v60  ;;  %v104_v15 = vmul.f32 %v381_v1, %v33_v61  ;;  %v172_v16 = vadd.f32 %v386_v2, %v101_v10  ;;  %v47_v61 = vld [vmem:[%s961_s0 + $0x108] sm:$0xff]  ;;  %v49_v63 = vld [vmem:[%s961_s0 + $0x118] sm:$0xff] }
  0x11   :  { %297 = vst.msk [vmem:[%s964_s3 + $0x60] sm:$0xff] %vm284_vm0, %v232_v7  ;;  %298 = vst.msk [vmem:[%s964_s3 + $0x68] sm:$0xff] %vm284_vm0, %v233_v8  ;;  %v105_v17 = vmul.f32 %v381_v1, %v34_v4  ;;  %v106_v18 = vmul.f32 %v381_v1, %v35_v5  ;;  %v107_v19 = vmul.f32 %v381_v1, %v36_v6  ;;  %v50_v6 = vld [vmem:[%s961_s0 + $0x120] sm:$0xff]  ;;  %v51_v7 = vld [vmem:[%s961_s0 + $0x128] sm:$0xff] }
  0x12   :  { %299 = vst.msk [vmem:[%s964_s3 + $0x70] sm:$0xff] %vm284_vm0, %v234_v9  ;;  %300 = vst.msk [vmem:[%s964_s3 + $0x78] sm:$0xff] %vm284_vm0, %v235_v12  ;;  %v173_v20 = vadd.f32 %v386_v2, %v102_v13  ;;  %v174_v21 = vadd.f32 %v386_v2, %v103_v14  ;;  %v175_v22 = vadd.f32 %v386_v2, %v104_v15  ;;  %v236_v25 = vmax.f32 %v172_v16, 0.0  ;;  %v52_v8 = vld [vmem:[%s961_s0 + $0x130] sm:$0xff]  ;;  %v53_v13 = vld [vmem:[%s961_s0 + $0x138] sm:$0xff] }
  0x13   :  { %v108_v23 = vmul.f32 %v381_v1, %v37_v11  ;;  %v176_v26 = vadd.f32 %v386_v2, %v105_v17  ;;  %v177_v27 = vadd.f32 %v386_v2, %v106_v18  ;;  %v178_v28 = vadd.f32 %v386_v2, %v107_v19 }
  0x14   :  { %v237_v32 = vmax.f32 %v173_v20, 0.0  ;;  %v238_v33 = vmax.f32 %v174_v21, 0.0  ;;  %v239_v34 = vmax.f32 %v175_v22, 0.0  ;;  %301 = vst.msk [vmem:[%s964_s3 + $0x80] sm:$0xff] %vm284_vm0, %v236_v25  ;;  %v109_v42 = vmul.f32 %v381_v1, %v38_v24 }
  0x15   :  { %v179_v35 = vadd.f32 %v386_v2, %v108_v23  ;;  %v240_v39 = vmax.f32 %v176_v26, 0.0  ;;  %v241_v40 = vmax.f32 %v177_v27, 0.0  ;;  %v242_v41 = vmax.f32 %v178_v28, 0.0  ;;  %v54_v26 = vld [vmem:[%s961_s0 + $0x140] sm:$0xff] }
  0x16   :  { %302 = vst.msk [vmem:[%s964_s3 + $0x88] sm:$0xff] %vm284_vm0, %v237_v32  ;;  %303 = vst.msk [vmem:[%s964_s3 + $0x90] sm:$0xff] %vm284_vm0, %v238_v33  ;;  %v110_v45 = vmul.f32 %v381_v1, %v39_v29  ;;  %v111_v46 = vmul.f32 %v381_v1, %v40_v30  ;;  %v112_v47 = vmul.f32 %v381_v1, %v41_v31  ;;  %v55_v31 = vld [vmem:[%s961_s0 + $0x148] sm:$0xff]  ;;  %v56_v32 = vld [vmem:[%s961_s0 + $0x150] sm:$0xff] }
  0x17   :  { %304 = vst.msk [vmem:[%s964_s3 + $0x98] sm:$0xff] %vm284_vm0, %v239_v34  ;;  %v243_v44 = vmax.f32 %v179_v35, 0.0  ;;  %305 = vst.msk [vmem:[%s964_s3 + $0xa0] sm:$0xff] %vm284_vm0, %v240_v39  ;;  %v180_v48 = vadd.f32 %v386_v2, %v109_v42  ;;  %v113_v49 = vmul.f32 %v381_v1, %v42_v36  ;;  %v114_v50 = vmul.f32 %v381_v1, %v43_v37  ;;  %v57_v33 = vld [vmem:[%s961_s0 + $0x158] sm:$0xff]  ;;  %v59_v39 = vld [vmem:[%s961_s0 + $0x168] sm:$0xff] }
  0x18   :  { %306 = vst.msk [vmem:[%s964_s3 + $0xa8] sm:$0xff] %vm284_vm0, %v241_v40  ;;  %307 = vst.msk [vmem:[%s964_s3 + $0xb0] sm:$0xff] %vm284_vm0, %v242_v41  ;;  %v115_v51 = vmul.f32 %v381_v1, %v44_v38  ;;  %v181_v52 = vadd.f32 %v386_v2, %v110_v45  ;;  %v182_v53 = vadd.f32 %v386_v2, %v111_v46  ;;  %v58_v38 = vld [vmem:[%s961_s0 + $0x160] sm:$0xff]  ;;  %v60_v40 = vld [vmem:[%s961_s0 + $0x170] sm:$0xff] }
  0x19   :  { %308 = vst.msk [vmem:[%s964_s3 + $0xb8] sm:$0xff] %vm284_vm0, %v243_v44  ;;  %v183_v54 = vadd.f32 %v386_v2, %v112_v47  ;;  %v116_v55 = vmul.f32 %v381_v1, %v45_v43  ;;  %v244_v57 = vmax.f32 %v180_v48, 0.0  ;;  %v184_v58 = vadd.f32 %v386_v2, %v113_v49  ;;  %v61_v45 = vld [vmem:[%s961_s0 + $0x178] sm:$0xff] }
  0x1a   :  { %v185_v59 = vadd.f32 %v386_v2, %v114_v50  ;;  %v186_v60 = vadd.f32 %v386_v2, %v115_v51  ;;  %v245_v0 = vmax.f32 %v181_v52, 0.0  ;;  %v246_v3 = vmax.f32 %v182_v53, 0.0 }
  0x1b   :  { %v247_v4 = vmax.f32 %v183_v54, 0.0  ;;  %v187_v5 = vadd.f32 %v386_v2, %v116_v55  ;;  %309 = vst.msk [vmem:[%s964_s3 + $0xc0] sm:$0xff] %vm284_vm0, %v244_v57  ;;  %v248_v9 = vmax.f32 %v184_v58, 0.0  ;;  %v117_v12 = vmul.f32 %v381_v1, %v46_v56  ;;  %v62_v58 = vld [vmem:[%s961_s0 + $0x180] sm:$0xff] }
  0x1c   :  { %v249_v10 = vmax.f32 %v185_v59, 0.0  ;;  %v250_v11 = vmax.f32 %v186_v60, 0.0  ;;  %310 = vst.msk [vmem:[%s964_s3 + $0xc8] sm:$0xff] %vm284_vm0, %v245_v0  ;;  %311 = vst.msk [vmem:[%s964_s3 + $0xd0] sm:$0xff] %vm284_vm0, %v246_v3  ;;  %v118_v15 = vmul.f32 %v381_v1, %v47_v61  ;;  %v119_v16 = vmul.f32 %v381_v1, %v48_v62  ;;  %v64_v0 = vld [vmem:[%s961_s0 + $0x190] sm:$0xff]  ;;  %v65_v3 = vld [vmem:[%s961_s0 + $0x198] sm:$0xff] }
  0x1d   :  { %312 = vst.msk [vmem:[%s964_s3 + $0xd8] sm:$0xff] %vm284_vm0, %v247_v4  ;;  %v251_v14 = vmax.f32 %v187_v5, 0.0  ;;  %v120_v17 = vmul.f32 %v381_v1, %v49_v63  ;;  %313 = vst.msk [vmem:[%s964_s3 + $0xe0] sm:$0xff] %vm284_vm0, %v248_v9  ;;  %v188_v18 = vadd.f32 %v386_v2, %v117_v12  ;;  %v121_v19 = vmul.f32 %v381_v1, %v50_v6  ;;  %v63_v63 = vld [vmem:[%s961_s0 + $0x188] sm:$0xff] }
  0x1e   :  { %314 = vst.msk [vmem:[%s964_s3 + $0xe8] sm:$0xff] %vm284_vm0, %v249_v10  ;;  %315 = vst.msk [vmem:[%s964_s3 + $0xf0] sm:$0xff] %vm284_vm0, %v250_v11  ;;  %v122_v20 = vmul.f32 %v381_v1, %v51_v7  ;;  %v123_v21 = vmul.f32 %v381_v1, %v52_v8  ;;  %v189_v22 = vadd.f32 %v386_v2, %v118_v15  ;;  %v66_v8 = vld [vmem:[%s961_s0 + $0x1a0] sm:$0xff]  ;;  %v67_v9 = vld [vmem:[%s961_s0 + $0x1a8] sm:$0xff] }
  0x1f   :  { %316 = vst.msk [vmem:[%s964_s3 + $0xf8] sm:$0xff] %vm284_vm0, %v251_v14  ;;  %v190_v23 = vadd.f32 %v386_v2, %v119_v16  ;;  %v191_v24 = vadd.f32 %v386_v2, %v120_v17  ;;  %v124_v25 = vmul.f32 %v381_v1, %v53_v13  ;;  %v252_v27 = vmax.f32 %v188_v18, 0.0  ;;  %v68_v10 = vld [vmem:[%s961_s0 + $0x1b0] sm:$0xff]  ;;  %v69_v15 = vld [vmem:[%s961_s0 + $0x1b8] sm:$0xff] }
  0x20   :  { %v192_v28 = vadd.f32 %v386_v2, %v121_v19  ;;  %v193_v29 = vadd.f32 %v386_v2, %v122_v20  ;;  %v194_v30 = vadd.f32 %v386_v2, %v123_v21  ;;  %v253_v34 = vmax.f32 %v189_v22, 0.0 }
  0x21   :  { %v254_v35 = vmax.f32 %v190_v23, 0.0  ;;  %v255_v36 = vmax.f32 %v191_v24, 0.0  ;;  %v195_v37 = vadd.f32 %v386_v2, %v124_v25  ;;  %317 = vst.msk [vmem:[%s964_s3 + $0x100] sm:$0xff] %vm284_vm0, %v252_v27  ;;  %v125_v44 = vmul.f32 %v381_v1, %v54_v26 }
  0x22   :  { %v256_v41 = vmax.f32 %v192_v28, 0.0  ;;  %v257_v42 = vmax.f32 %v193_v29, 0.0  ;;  %v258_v43 = vmax.f32 %v194_v30, 0.0  ;;  %318 = vst.msk [vmem:[%s964_s3 + $0x108] sm:$0xff] %vm284_vm0, %v253_v34  ;;  %v126_v47 = vmul.f32 %v381_v1, %v55_v31  ;;  %v70_v28 = vld [vmem:[%s961_s0 + $0x1c0] sm:$0xff]  ;;  %v72_v34 = vld [vmem:[%s961_s0 + $0x1d0] sm:$0xff] }
  0x23   :  { %319 = vst.msk [vmem:[%s964_s3 + $0x110] sm:$0xff] %vm284_vm0, %v254_v35  ;;  %320 = vst.msk [vmem:[%s964_s3 + $0x118] sm:$0xff] %vm284_vm0, %v255_v36  ;;  %v259_v46 = vmax.f32 %v195_v37, 0.0  ;;  %v127_v48 = vmul.f32 %v381_v1, %v56_v32  ;;  %v128_v49 = vmul.f32 %v381_v1, %v57_v33  ;;  %v196_v50 = vadd.f32 %v386_v2, %v125_v44  ;;  %v71_v33 = vld [vmem:[%s961_s0 + $0x1c8] sm:$0xff]  ;;  %v73_v35 = vld [vmem:[%s961_s0 + $0x1d8] sm:$0xff] }
  0x24   :  { %321 = vst.msk [vmem:[%s964_s3 + $0x120] sm:$0xff] %vm284_vm0, %v256_v41  ;;  %322 = vst.msk [vmem:[%s964_s3 + $0x128] sm:$0xff] %vm284_vm0, %v257_v42  ;;  %v129_v51 = vmul.f32 %v381_v1, %v58_v38  ;;  %v130_v52 = vmul.f32 %v381_v1, %v59_v39  ;;  %v131_v53 = vmul.f32 %v381_v1, %v60_v40  ;;  %v74_v40 = vld [vmem:[%s961_s0 + $0x1e0] sm:$0xff]  ;;  %v75_v41 = vld [vmem:[%s961_s0 + $0x1e8] sm:$0xff] }
  0x25   :  { %323 = vst.msk [vmem:[%s964_s3 + $0x130] sm:$0xff] %vm284_vm0, %v258_v43  ;;  %324 = vst.msk [vmem:[%s964_s3 + $0x138] sm:$0xff] %vm284_vm0, %v259_v46  ;;  %v197_v54 = vadd.f32 %v386_v2, %v126_v47  ;;  %v198_v55 = vadd.f32 %v386_v2, %v127_v48  ;;  %v199_v56 = vadd.f32 %v386_v2, %v128_v49  ;;  %v260_v59 = vmax.f32 %v196_v50, 0.0  ;;  %v76_v42 = vld [vmem:[%s961_s0 + $0x1f0] sm:$0xff]  ;;  %v77_v47 = vld [vmem:[%s961_s0 + $0x1f8] sm:$0xff] }
  0x26   :  { %v132_v57 = vmul.f32 %v381_v1, %v61_v45  ;;  %v200_v60 = vadd.f32 %v386_v2, %v129_v51  ;;  %v201_v61 = vadd.f32 %v386_v2, %v130_v52  ;;  %v202_v62 = vadd.f32 %v386_v2, %v131_v53 }
  0x27   :  { %v261_v4 = vmax.f32 %v197_v54, 0.0  ;;  %v262_v5 = vmax.f32 %v198_v55, 0.0  ;;  %v263_v6 = vmax.f32 %v199_v56, 0.0  ;;  %325 = vst.msk [vmem:[%s964_s3 + $0x140] sm:$0xff] %vm284_vm0, %v260_v59  ;;  %v133_v14 = vmul.f32 %v381_v1, %v62_v58 }
  0x28   :  { %v203_v7 = vadd.f32 %v386_v2, %v132_v57  ;;  %v264_v11 = vmax.f32 %v200_v60, 0.0  ;;  %v265_v12 = vmax.f32 %v201_v61, 0.0  ;;  %v266_v13 = vmax.f32 %v202_v62, 0.0 }
  0x29   :  { %326 = vst.msk [vmem:[%s964_s3 + $0x148] sm:$0xff] %vm284_vm0, %v261_v4  ;;  %327 = vst.msk [vmem:[%s964_s3 + $0x150] sm:$0xff] %vm284_vm0, %v262_v5  ;;  %v134_v17 = vmul.f32 %v381_v1, %v63_v63  ;;  %v135_v18 = vmul.f32 %v381_v1, %v64_v0  ;;  %v136_v19 = vmul.f32 %v381_v1, %v65_v3 }
  0x2a   :  { %328 = vst.msk [vmem:[%s964_s3 + $0x158] sm:$0xff] %vm284_vm0, %v263_v6  ;;  %v267_v16 = vmax.f32 %v203_v7, 0.0  ;;  %329 = vst.msk [vmem:[%s964_s3 + $0x160] sm:$0xff] %vm284_vm0, %v264_v11  ;;  %v204_v20 = vadd.f32 %v386_v2, %v133_v14  ;;  %v137_v21 = vmul.f32 %v381_v1, %v66_v8  ;;  %v138_v22 = vmul.f32 %v381_v1, %v67_v9 }
  0x2b   :  { %330 = vst.msk [vmem:[%s964_s3 + $0x168] sm:$0xff] %vm284_vm0, %v265_v12  ;;  %331 = vst.msk [vmem:[%s964_s3 + $0x170] sm:$0xff] %vm284_vm0, %v266_v13  ;;  %v139_v23 = vmul.f32 %v381_v1, %v68_v10  ;;  %v205_v24 = vadd.f32 %v386_v2, %v134_v17  ;;  %v206_v25 = vadd.f32 %v386_v2, %v135_v18 }
  0x2c   :  { %332 = vst.msk [vmem:[%s964_s3 + $0x178] sm:$0xff] %vm284_vm0, %v267_v16  ;;  %v207_v26 = vadd.f32 %v386_v2, %v136_v19  ;;  %v140_v27 = vmul.f32 %v381_v1, %v69_v15  ;;  %v268_v29 = vmax.f32 %v204_v20, 0.0  ;;  %v208_v30 = vadd.f32 %v386_v2, %v137_v21 }
  0x2d   :  { %v209_v31 = vadd.f32 %v386_v2, %v138_v22  ;;  %v210_v32 = vadd.f32 %v386_v2, %v139_v23  ;;  %v269_v36 = vmax.f32 %v205_v24, 0.0  ;;  %v270_v37 = vmax.f32 %v206_v25, 0.0 }
  0x2e   :  { %v271_v38 = vmax.f32 %v207_v26, 0.0  ;;  %v211_v39 = vadd.f32 %v386_v2, %v140_v27  ;;  %333 = vst.msk [vmem:[%s964_s3 + $0x180] sm:$0xff] %vm284_vm0, %v268_v29  ;;  %v272_v43 = vmax.f32 %v208_v30, 0.0  ;;  %v141_v46 = vmul.f32 %v381_v1, %v70_v28 }
  0x2f   :  { %v273_v44 = vmax.f32 %v209_v31, 0.0  ;;  %v274_v45 = vmax.f32 %v210_v32, 0.0  ;;  %334 = vst.msk [vmem:[%s964_s3 + $0x188] sm:$0xff] %vm284_vm0, %v269_v36  ;;  %335 = vst.msk [vmem:[%s964_s3 + $0x190] sm:$0xff] %vm284_vm0, %v270_v37  ;;  %v142_v49 = vmul.f32 %v381_v1, %v71_v33  ;;  %v143_v50 = vmul.f32 %v381_v1, %v72_v34 }
  0x30   :  { %336 = vst.msk [vmem:[%s964_s3 + $0x198] sm:$0xff] %vm284_vm0, %v271_v38  ;;  %v275_v48 = vmax.f32 %v211_v39, 0.0  ;;  %v144_v51 = vmul.f32 %v381_v1, %v73_v35  ;;  %337 = vst.msk [vmem:[%s964_s3 + $0x1a0] sm:$0xff] %vm284_vm0, %v272_v43  ;;  %v212_v52 = vadd.f32 %v386_v2, %v141_v46  ;;  %v145_v53 = vmul.f32 %v381_v1, %v74_v40 }
  0x31   :  { %338 = vst.msk [vmem:[%s964_s3 + $0x1a8] sm:$0xff] %vm284_vm0, %v273_v44  ;;  %339 = vst.msk [vmem:[%s964_s3 + $0x1b0] sm:$0xff] %vm284_vm0, %v274_v45  ;;  %v146_v54 = vmul.f32 %v381_v1, %v75_v41  ;;  %v147_v55 = vmul.f32 %v381_v1, %v76_v42  ;;  %v213_v56 = vadd.f32 %v386_v2, %v142_v49 }
  0x32   :  { %340 = vst.msk [vmem:[%s964_s3 + $0x1b8] sm:$0xff] %vm284_vm0, %v275_v48  ;;  %v214_v57 = vadd.f32 %v386_v2, %v143_v50  ;;  %v215_v58 = vadd.f32 %v386_v2, %v144_v51  ;;  %v148_v59 = vmul.f32 %v381_v1, %v77_v47  ;;  %v276_v60 = vmax.f32 %v212_v52, 0.0 }
  0x33   :  { %v216_v61 = vadd.f32 %v386_v2, %v145_v53  ;;  %v217_v62 = vadd.f32 %v386_v2, %v146_v54  ;;  %v218_v63 = vadd.f32 %v386_v2, %v147_v55  ;;  %v277_v0 = vmax.f32 %v213_v56, 0.0 }
  0x34   :  { %v278_v3 = vmax.f32 %v214_v57, 0.0  ;;  %v279_v4 = vmax.f32 %v215_v58, 0.0  ;;  %v219_v5 = vadd.f32 %v386_v2, %v148_v59  ;;  %341 = vst.msk [vmem:[%s964_s3 + $0x1c0] sm:$0xff] %vm284_vm0, %v276_v60 }
  0x35   :  { %v280_v6 = vmax.f32 %v216_v61, 0.0  ;;  %v281_v7 = vmax.f32 %v217_v62, 0.0  ;;  %v282_v1 = vmax.f32 %v218_v63, 0.0  ;;  %342 = vst.msk [vmem:[%s964_s3 + $0x1c8] sm:$0xff] %vm284_vm0, %v277_v0 }
  0x36   :  { %343 = vst.msk [vmem:[%s964_s3 + $0x1d0] sm:$0xff] %vm284_vm0, %v278_v3  ;;  %344 = vst.msk [vmem:[%s964_s3 + $0x1d8] sm:$0xff] %vm284_vm0, %v279_v4  ;;  %v283_v2 = vmax.f32 %v219_v5, 0.0 }
  0x37   :  { %345 = vst.msk [vmem:[%s964_s3 + $0x1e0] sm:$0xff] %vm284_vm0, %v280_v6  ;;  %346 = vst.msk [vmem:[%s964_s3 + $0x1e8] sm:$0xff] %vm284_vm0, %v281_v7 }
  0x38   :  { %347 = vst.msk [vmem:[%s964_s3 + $0x1f0] sm:$0xff] %vm284_vm0, %v282_v1  ;;  %348 = vst.msk [vmem:[%s964_s3 + $0x1f8] sm:$0xff] %vm284_vm0, %v283_v2 }

// kernel: densenet_forward.12
= control target key start
LH: loop header
LB: loop body
LE: loop exit
PB: predicated region body
PF: predicated region fallthrough
CT: control target
= control target key end

     0   :  { %v1172_v0 = vmov 0   ;;  %vm283_vm0 = vcmask 154624   ;;  %vm380_vm1 = vcmask 1040384   ;;  %vm381_vm2 = vcmask 1041408   ;;  %s2264_s1 = inlined_call_operand.vmem [shape: bf16[147,16], index: 1, kind: input, shape index: {}]   ;;  %s2265_s0 = inlined_call_operand.vmem [shape: f32[512,147], index: 0, kind: input, shape index: {}]   ;;  %s2266_s2 = inlined_call_operand.vmem [shape: f32[512,16], index: 2, kind: output, shape index: {0}]   ;;  %s2267_s3 = inlined_call_operand.vmem [shape: f32[1,16], index: 3, kind: output, shape index: {1}]   ;;  %s2268_s4 = inlined_call_operand.vmem [shape: f32[1,16], index: 4, kind: output, shape index: {2}]  }
   0x1   :  { %387 = vmatprep.subr.bf16.mxu0 %v1172_v0  ;;  %v1162_v1 = vld [vmem:[%s2264_s1] sm:$0xff]   ;;  %1139 = vmatprep.subr.bf16.mxu1 %v1172_v0  ;;  %v1163_v2 = vld [vmem:[%s2264_s1 + $0x8] sm:$0xff]   ;;  %v1164_v3 = vld [vmem:[%s2264_s1 + $0x10] sm:$0xff]   ;;  %v1173_v15 = vmov 65535   ;;  %vm676_vm3 = vcmask 130048   ;;  %vm745_vm4 = vcmask 122880  }
   0x2   :  { %388 = vmatpush1.bf16.msra.mxu0 %v1162_v1  ;;  %1149 = vmatpush1.bf16.msra.mxu1 %v1162_v1  ;;  %v16_v4 = vld [vmem:[%s2265_s0 + $0x8] sm:$0xff]  ;;  %v1165_v5 = vld [vmem:[%s2264_s1 + $0x18] sm:$0xff]   ;;  %v1166_v8 = vld [vmem:[%s2264_s1 + $0x20] sm:$0xff]   ;;  %v382_v16 = vsel %vm380_vm1, 4294967295, %v1173_v15 }
   0x3   :  { %389 = vmatprep.subr.bf16.mxu0 %v1172_v0  ;;  %1140 = vmatprep.subr.bf16.mxu1 %v1172_v0  ;;  %v18_v6 = vld [vmem:[%s2265_s0 + $0x18] sm:$0xff]  ;;  %v1167_v9 = vld [vmem:[%s2264_s1 + $0x28] sm:$0xff]   ;;  %v1168_v13 = vld [vmem:[%s2264_s1 + $0x30] sm:$0xff]   ;;  %v383_v19 = vsel %vm381_vm2, %v382_v16, 0 }
   0x4   :  { %v144_v7 = vpack.c.bf16 %v18_v6, %v16_v4  ;;  %v80_v10 = vld [vmem:[%s2265_s0 + $0x208] sm:$0xff]  ;;  %v82_v11 = vld [vmem:[%s2265_s0 + $0x218] sm:$0xff]  ;;  %v1170_v17 = vld [vmem:[%s2264_s1 + $0x40] sm:$0xff]  }
   0x5   :  { %v176_v12 = vpack.c.bf16 %v82_v11, %v80_v10  ;;  %v1169_v14 = vld [vmem:[%s2264_s1 + $0x38] sm:$0xff]   ;;  %v1171_v18 = vld [vmem:[%s2264_s1 + $0x48] ss:$0 sps:$4 sm:$0x33]   ;;  %v15_v20 = vld [vmem:[%s2265_s0] sm:$0xff] }
   0x6   :  { %390 = vmatpush1.bf16.msra.mxu0 %v1163_v2  ;;  %1150 = vmatpush1.bf16.msra.mxu1 %v1163_v2  ;;  %v17_v21 = vld [vmem:[%s2265_s0 + $0x10] sm:$0xff]  ;;  %v385_v22 = vand.u32 %v1171_v18, %v383_v19  ;;  %v20_v23 = vld [vmem:[%s2265_s0 + $0x28] sm:$0xff]  ;;  %v79_v24 = vld [vmem:[%s2265_s0 + $0x200] sm:$0xff] }
   0x7   :  { %391 = vmatprep.subr.bf16.mxu0 %v1172_v0  ;;  %1141 = vmatprep.subr.bf16.mxu1 %v1172_v0  ;;  %v81_v25 = vld [vmem:[%s2265_s0 + $0x210] sm:$0xff]  ;;  %v22_v26 = vld [vmem:[%s2265_s0 + $0x38] sm:$0xff]  ;;  %v84_v27 = vld [vmem:[%s2265_s0 + $0x228] sm:$0xff]  ;;  %v143_v29 = vpack.c.bf16 %v17_v21, %v15_v20 }
   0x8   :  { %1107 = vmatprep.mubr.msk.bf16.mxu0 %vm283_vm0, %v144_v7  ;;  %1123 = vmatprep.mubr.msk.bf16.mxu1 %vm283_vm0, %v176_v12  ;;  %v86_v28 = vld [vmem:[%s2265_s0 + $0x238] sm:$0xff]  ;;  %v175_v30 = vpack.c.bf16 %v81_v25, %v79_v24  ;;  %v146_v31 = vpack.c.bf16 %v22_v26, %v20_v23  ;;  %v19_v33 = vld [vmem:[%s2265_s0 + $0x20] sm:$0xff]  ;;  %v21_v34 = vld [vmem:[%s2265_s0 + $0x30] sm:$0xff] }
   0x9   :  { %v178_v32 = vpack.c.bf16 %v86_v28, %v84_v27  ;;  %v24_v35 = vld [vmem:[%s2265_s0 + $0x48] sm:$0xff]  ;;  %v83_v36 = vld [vmem:[%s2265_s0 + $0x220] sm:$0xff]  ;;  %v85_v37 = vld [vmem:[%s2265_s0 + $0x230] sm:$0xff]  ;;  %v145_v41 = vpack.c.bf16 %v21_v34, %v19_v33 }
   0xa   :  { %392 = vmatpush1.bf16.msra.mxu0 %v1164_v3  ;;  %1151 = vmatpush1.bf16.msra.mxu1 %v1164_v3  ;;  %v26_v38 = vld [vmem:[%s2265_s0 + $0x58] sm:$0xff]  ;;  %v88_v39 = vld [vmem:[%s2265_s0 + $0x248] sm:$0xff]  ;;  %v177_v42 = vpack.c.bf16 %v85_v37, %v83_v36  ;;  %v23_v45 = vld [vmem:[%s2265_s0 + $0x40] sm:$0xff] }
   0xb   :  { %393 = vmatprep.subr.bf16.mxu0 %v1172_v0  ;;  %1142 = vmatprep.subr.bf16.mxu1 %v1172_v0  ;;  %v90_v40 = vld [vmem:[%s2265_s0 + $0x258] sm:$0xff]  ;;  %v148_v43 = vpack.c.bf16 %v26_v38, %v24_v35  ;;  %v25_v46 = vld [vmem:[%s2265_s0 + $0x50] sm:$0xff]  ;;  %v28_v47 = vld [vmem:[%s2265_s0 + $0x68] sm:$0xff] }
   0xc   :  { %v180_v44 = vpack.c.bf16 %v90_v40, %v88_v39  ;;  %v87_v48 = vld [vmem:[%s2265_s0 + $0x240] sm:$0xff]  ;;  %v89_v49 = vld [vmem:[%s2265_s0 + $0x250] sm:$0xff]  ;;  %v30_v50 = vld [vmem:[%s2265_s0 + $0x78] sm:$0xff]  ;;  %v147_v53 = vpack.c.bf16 %v25_v46, %v23_v45 }
   0xd   :  { %v92_v51 = vld [vmem:[%s2265_s0 + $0x268] sm:$0xff]  ;;  %v94_v52 = vld [vmem:[%s2265_s0 + $0x278] sm:$0xff]  ;;  %v179_v54 = vpack.c.bf16 %v89_v49, %v87_v48  ;;  %v150_v55 = vpack.c.bf16 %v30_v50, %v28_v47  ;;  %v27_v57 = vld [vmem:[%s2265_s0 + $0x60] sm:$0xff] }
   0xe   :  { %394 = vmatpush1.bf16.msra.mxu0 %v1165_v5  ;;  %1152 = vmatpush1.bf16.msra.mxu1 %v1165_v5  ;;  %v182_v56 = vpack.c.bf16 %v94_v52, %v92_v51  ;;  %v29_v58 = vld [vmem:[%s2265_s0 + $0x70] sm:$0xff]  ;;  %v32_v59 = vld [vmem:[%s2265_s0 + $0x88] sm:$0xff]  ;;  %v91_v60 = vld [vmem:[%s2265_s0 + $0x260] sm:$0xff] }
   0xf   :  { %395 = vmatprep.subr.bf16.mxu0 %v1172_v0  ;;  %1143 = vmatprep.subr.bf16.mxu1 %v1172_v0  ;;  %v93_v61 = vld [vmem:[%s2265_s0 + $0x270] sm:$0xff]  ;;  %v34_v62 = vld [vmem:[%s2265_s0 + $0x98] sm:$0xff]  ;;  %v96_v63 = vld [vmem:[%s2265_s0 + $0x288] sm:$0xff]  ;;  %v149_v1 = vpack.c.bf16 %v29_v58, %v27_v57 }
  0x10   :  { %v181_v2 = vpack.c.bf16 %v93_v61, %v91_v60  ;;  %v152_v3 = vpack.c.bf16 %v34_v62, %v32_v59  ;;  %v31_v5 = vld [vmem:[%s2265_s0 + $0x80] sm:$0xff]  ;;  %v33_v6 = vld [vmem:[%s2265_s0 + $0x90] sm:$0xff]  ;;  %v36_v7 = vld [vmem:[%s2265_s0 + $0xa8] sm:$0xff] }
  0x11   :  { %v38_v10 = vld [vmem:[%s2265_s0 + $0xb8] sm:$0xff]  ;;  %v100_v11 = vld [vmem:[%s2265_s0 + $0x2a8] sm:$0xff]  ;;  %v37_v18 = vld [vmem:[%s2265_s0 + $0xb0] sm:$0xff] }
  0x12   :  { %396 = vmatpush1.bf16.msra.mxu0 %v1166_v8  ;;  %1153 = vmatpush1.bf16.msra.mxu1 %v1166_v8  ;;  %v95_v8 = vld [vmem:[%s2265_s0 + $0x280] sm:$0xff]  ;;  %v102_v12 = vld [vmem:[%s2265_s0 + $0x2b8] sm:$0xff]  ;;  %v154_v15 = vpack.c.bf16 %v38_v10, %v36_v7  ;;  %v40_v19 = vld [vmem:[%s2265_s0 + $0xc8] sm:$0xff] }
  0x13   :  { %397 = vmatprep.subr.bf16.mxu0 %v1172_v0  ;;  %1144 = vmatprep.subr.bf16.mxu1 %v1172_v0  ;;  %v186_v16 = vpack.c.bf16 %v102_v12, %v100_v11  ;;  %v99_v20 = vld [vmem:[%s2265_s0 + $0x2a0] sm:$0xff]  ;;  %v101_v21 = vld [vmem:[%s2265_s0 + $0x2b0] sm:$0xff]  ;;  %v104_v23 = vld [vmem:[%s2265_s0 + $0x2c8] sm:$0xff] }
  0x14   :  { %v106_v24 = vld [vmem:[%s2265_s0 + $0x2d8] sm:$0xff]  ;;  %v185_v26 = vpack.c.bf16 %v101_v21, %v99_v20  ;;  %v105_v33 = vld [vmem:[%s2265_s0 + $0x2d0] sm:$0xff]  ;;  %v108_v35 = vld [vmem:[%s2265_s0 + $0x2e8] sm:$0xff] }
  0x15   :  { %v188_v28 = vpack.c.bf16 %v106_v24, %v104_v23  ;;  %v46_v34 = vld [vmem:[%s2265_s0 + $0xf8] sm:$0xff]  ;;  %v109_v45 = vld [vmem:[%s2265_s0 + $0x2f0] sm:$0xff]  ;;  %v112_v47 = vld [vmem:[%s2265_s0 + $0x308] sm:$0xff] }
  0x16   :  { %398 = vmatpush1.bf16.msra.mxu0 %v1167_v9  ;;  %1154 = vmatpush1.bf16.msra.mxu1 %v1167_v9  ;;  %v97_v9 = vld [vmem:[%s2265_s0 + $0x290] sm:$0xff]  ;;  %v110_v36 = vld [vmem:[%s2265_s0 + $0x2f8] sm:$0xff]  ;;  %v116_v59 = vld [vmem:[%s2265_s0 + $0x328] sm:$0xff] }
  0x17   :  { %399 = vmatprep.subr.bf16.mxu0 %v1172_v0  ;;  %1145 = vmatprep.subr.bf16.mxu1 %v1172_v0  ;;  %v190_v40 = vpack.c.bf16 %v110_v36, %v108_v35  ;;  %v50_v46 = vld [vmem:[%s2265_s0 + $0x118] sm:$0xff]  ;;  %v113_v57 = vld [vmem:[%s2265_s0 + $0x310] sm:$0xff]  ;;  %v120_v7 = vld [vmem:[%s2265_s0 + $0x348] sm:$0xff] }
  0x18   :  { %v114_v48 = vld [vmem:[%s2265_s0 + $0x318] sm:$0xff] }
  0x19   :  { %v192_v52 = vpack.c.bf16 %v114_v48, %v112_v47  ;;  %v54_v58 = vld [vmem:[%s2265_s0 + $0x138] sm:$0xff] }
  0x1a   :  { %400 = vmatpush1.bf16.msra.mxu0 %v1168_v13  ;;  %1155 = vmatpush1.bf16.msra.mxu1 %v1168_v13  ;;  %v151_v13 = vpack.c.bf16 %v33_v6, %v31_v5  ;;  %v118_v60 = vld [vmem:[%s2265_s0 + $0x338] sm:$0xff]  ;;  %v117_v5 = vld [vmem:[%s2265_s0 + $0x330] sm:$0xff] }
  0x1b   :  { %401 = vmatprep.subr.bf16.mxu0 %v1172_v0  ;;  %1146 = vmatprep.subr.bf16.mxu1 %v1172_v0  ;;  %v58_v6 = vld [vmem:[%s2265_s0 + $0x158] sm:$0xff] }
  0x1c   :  { %v126_v20 = vld [vmem:[%s2265_s0 + $0x378] sm:$0xff] }
  0x1e   :  { %402 = vmatpush1.bf16.msra.mxu0 %v1169_v14  ;;  %1156 = vmatpush1.bf16.msra.mxu1 %v1169_v14  ;;  %v183_v14 = vpack.c.bf16 %v97_v9, %v95_v8  ;;  %v122_v8 = vld [vmem:[%s2265_s0 + $0x358] sm:$0xff] }
  0x1f   :  { %403 = vmatprep.subr.bf16.mxu0 %v1172_v0  ;;  %1147 = vmatprep.subr.bf16.mxu1 %v1172_v0  ;;  %v196_v12 = vpack.c.bf16 %v122_v8, %v120_v7 }
  0x22   :  { %404 = vmatpush1.bf16.msra.mxu0 %v1170_v17  ;;  %1157 = vmatpush1.bf16.msra.mxu1 %v1170_v17  ;;  %v35_v17 = vld [vmem:[%s2265_s0 + $0xa0] sm:$0xff] }
  0x23   :  { %405 = vmatprep.subr.bf16.mxu0 %v1172_v0  ;;  %1148 = vmatprep.subr.bf16.mxu1 %v1172_v0  ;;  %v98_v0 = vld [vmem:[%s2265_s0 + $0x298] sm:$0xff]  ;;  %v153_v25 = vpack.c.bf16 %v37_v18, %v35_v17  ;;  %v121_v17 = vld [vmem:[%s2265_s0 + $0x350] sm:$0xff] }
  0x24   :  { %v184_v4 = vpack.c.bf16 %v98_v0, %v96_v63  ;;  %v194_v0 = vpack.c.bf16 %v118_v60, %v116_v59  ;;  %v62_v18 = vld [vmem:[%s2265_s0 + $0x178] sm:$0xff] }
  0x26   :  { %406 = vmatpush1.bf16.msra.mxu0 %v385_v22  ;;  %1158 = vmatpush1.bf16.msra.mxu1 %v385_v22  ;;  %v42_v22 = vld [vmem:[%s2265_s0 + $0xd8] sm:$0xff] }
  0x27   :  { %v156_v27 = vpack.c.bf16 %v42_v22, %v40_v19  ;;  %v124_v19 = vld [vmem:[%s2265_s0 + $0x368] sm:$0xff] }
  0x28   :  { %v198_v24 = vpack.c.bf16 %v126_v20, %v124_v19 }
  0x29   :  { %420 = vmatmul.mubr.bf16.vlgmr.msra.gmra.mrb[0].mxu0 %v143_v29  ;;  %548 = vmatmul.mubr.bf16.vlgmr.msra.gmra.mrb[0].mxu1 %v175_v30  ;;  %v39_v29 = vld [vmem:[%s2265_s0 + $0xc0] sm:$0xff]  ;;  %v41_v30 = vld [vmem:[%s2265_s0 + $0xd0] sm:$0xff] }
  0x2a   :  { %1108 = vmatprep.mubr.msk.bf16.mxu0 %vm283_vm0, %v146_v31  ;;  %1124 = vmatprep.mubr.msk.bf16.mxu1 %vm283_vm0, %v178_v32  ;;  %v44_v31 = vld [vmem:[%s2265_s0 + $0xe8] sm:$0xff]  ;;  %v103_v32 = vld [vmem:[%s2265_s0 + $0x2c0] sm:$0xff]  ;;  %v155_v37 = vpack.c.bf16 %v41_v30, %v39_v29  ;;  %v125_v29 = vld [vmem:[%s2265_s0 + $0x370] sm:$0xff] }
  0x2b   :  { %v187_v38 = vpack.c.bf16 %v105_v33, %v103_v32  ;;  %v158_v39 = vpack.c.bf16 %v46_v34, %v44_v31  ;;  %v66_v30 = vld [vmem:[%s2265_s0 + $0x198] sm:$0xff]  ;;  %v128_v31 = vld [vmem:[%s2265_s0 + $0x388] sm:$0xff] }
  0x2c   :  { %v130_v32 = vld [vmem:[%s2265_s0 + $0x398] sm:$0xff] }
  0x2d   :  { %v200_v36 = vpack.c.bf16 %v130_v32, %v128_v31 }
  0x31   :  { %428 = vmatmul.mubr.bf16.gmra.mrb[4].mxu0 %v145_v41  ;;  %556 = vmatmul.mubr.bf16.gmra.mrb[4].mxu1 %v177_v42  ;;  %v43_v41 = vld [vmem:[%s2265_s0 + $0xe0] sm:$0xff]  ;;  %v45_v42 = vld [vmem:[%s2265_s0 + $0xf0] sm:$0xff] }
  0x32   :  { %1109 = vmatprep.mubr.msk.bf16.mxu0 %vm283_vm0, %v148_v43  ;;  %1125 = vmatprep.mubr.msk.bf16.mxu1 %vm283_vm0, %v180_v44  ;;  %v48_v43 = vld [vmem:[%s2265_s0 + $0x108] sm:$0xff]  ;;  %v107_v44 = vld [vmem:[%s2265_s0 + $0x2e0] sm:$0xff]  ;;  %v157_v49 = vpack.c.bf16 %v45_v42, %v43_v41  ;;  %v129_v41 = vld [vmem:[%s2265_s0 + $0x390] sm:$0xff] }
  0x33   :  { %v189_v50 = vpack.c.bf16 %v109_v45, %v107_v44  ;;  %v160_v51 = vpack.c.bf16 %v50_v46, %v48_v43  ;;  %v70_v42 = vld [vmem:[%s2265_s0 + $0x1b8] sm:$0xff]  ;;  %v132_v43 = vld [vmem:[%s2265_s0 + $0x3a8] sm:$0xff] }
  0x34   :  { %v134_v44 = vld [vmem:[%s2265_s0 + $0x3b8] sm:$0xff] }
  0x35   :  { %v202_v48 = vpack.c.bf16 %v134_v44, %v132_v43 }
  0x39   :  { %436 = vmatmul.mubr.bf16.gmra.mrb[8].mxu0 %v147_v53  ;;  %564 = vmatmul.mubr.bf16.gmra.mrb[8].mxu1 %v179_v54  ;;  %v47_v53 = vld [vmem:[%s2265_s0 + $0x100] sm:$0xff]  ;;  %v49_v54 = vld [vmem:[%s2265_s0 + $0x110] sm:$0xff] }
  0x3a   :  { %1110 = vmatprep.mubr.msk.bf16.mxu0 %vm283_vm0, %v150_v55  ;;  %1126 = vmatprep.mubr.msk.bf16.mxu1 %vm283_vm0, %v182_v56  ;;  %v52_v55 = vld [vmem:[%s2265_s0 + $0x128] sm:$0xff]  ;;  %v111_v56 = vld [vmem:[%s2265_s0 + $0x300] sm:$0xff]  ;;  %v159_v61 = vpack.c.bf16 %v49_v54, %v47_v53  ;;  %v133_v53 = vld [vmem:[%s2265_s0 + $0x3b0] sm:$0xff] }
  0x3b   :  { %v191_v62 = vpack.c.bf16 %v113_v57, %v111_v56  ;;  %v162_v63 = vpack.c.bf16 %v54_v58, %v52_v55  ;;  %v74_v54 = vld [vmem:[%s2265_s0 + $0x1d8] sm:$0xff]  ;;  %v136_v55 = vld [vmem:[%s2265_s0 + $0x3c8] sm:$0xff] }
  0x3c   :  { %v138_v56 = vld [vmem:[%s2265_s0 + $0x3d8] sm:$0xff] }
  0x3d   :  { %v204_v60 = vpack.c.bf16 %v138_v56, %v136_v55 }
  0x41   :  { %444 = vmatmul.mubr.bf16.gmra.mrb[12].mxu0 %v149_v1  ;;  %572 = vmatmul.mubr.bf16.gmra.mrb[12].mxu1 %v181_v2  ;;  %v51_v1 = vld [vmem:[%s2265_s0 + $0x120] sm:$0xff]  ;;  %v53_v2 = vld [vmem:[%s2265_s0 + $0x130] sm:$0xff] }
  0x42   :  { %1111 = vmatprep.mubr.msk.bf16.mxu0 %vm283_vm0, %v152_v3  ;;  %1127 = vmatprep.mubr.msk.bf16.mxu1 %vm283_vm0, %v184_v4  ;;  %v56_v3 = vld [vmem:[%s2265_s0 + $0x148] sm:$0xff]  ;;  %v115_v4 = vld [vmem:[%s2265_s0 + $0x320] sm:$0xff]  ;;  %v161_v9 = vpack.c.bf16 %v53_v2, %v51_v1  ;;  %v137_v1 = vld [vmem:[%s2265_s0 + $0x3d0] sm:$0xff] }
  0x43   :  { %v193_v10 = vpack.c.bf16 %v117_v5, %v115_v4  ;;  %v164_v11 = vpack.c.bf16 %v58_v6, %v56_v3  ;;  %v78_v2 = vld [vmem:[%s2265_s0 + $0x1f8] sm:$0xff]  ;;  %v140_v3 = vld [vmem:[%s2265_s0 + $0x3e8] sm:$0xff] }
  0x44   :  { %v142_v4 = vld [vmem:[%s2265_s0 + $0x3f8] sm:$0xff] }
  0x45   :  { %v206_v8 = vpack.c.bf16 %v142_v4, %v140_v3 }
  0x49   :  { %452 = vmatmul.mubr.bf16.gmra.mrb[16].mxu0 %v151_v13  ;;  %580 = vmatmul.mubr.bf16.gmra.mrb[16].mxu1 %v183_v14  ;;  %v55_v13 = vld [vmem:[%s2265_s0 + $0x140] sm:$0xff]  ;;  %v57_v14 = vld [vmem:[%s2265_s0 + $0x150] sm:$0xff] }
  0x4a   :  { %1112 = vmatprep.mubr.msk.bf16.mxu0 %vm283_vm0, %v154_v15  ;;  %1128 = vmatprep.mubr.msk.bf16.mxu1 %vm283_vm0, %v186_v16  ;;  %v60_v15 = vld [vmem:[%s2265_s0 + $0x168] sm:$0xff]  ;;  %v119_v16 = vld [vmem:[%s2265_s0 + $0x340] sm:$0xff]  ;;  %v163_v21 = vpack.c.bf16 %v57_v14, %v55_v13 }
  0x4b   :  { %v195_v22 = vpack.c.bf16 %v121_v17, %v119_v16  ;;  %v166_v23 = vpack.c.bf16 %v62_v18, %v60_v15 }
  0x51   :  { %460 = vmatmul.mubr.bf16.gmra.mrb[20].mxu0 %v153_v25  ;;  %588 = vmatmul.mubr.bf16.gmra.mrb[20].mxu1 %v185_v26  ;;  %v59_v25 = vld [vmem:[%s2265_s0 + $0x160] sm:$0xff]  ;;  %v61_v26 = vld [vmem:[%s2265_s0 + $0x170] sm:$0xff] }
  0x52   :  { %1113 = vmatprep.mubr.msk.bf16.mxu0 %vm283_vm0, %v156_v27  ;;  %1129 = vmatprep.mubr.msk.bf16.mxu1 %vm283_vm0, %v188_v28  ;;  %v64_v27 = vld [vmem:[%s2265_s0 + $0x188] sm:$0xff]  ;;  %v123_v28 = vld [vmem:[%s2265_s0 + $0x360] sm:$0xff]  ;;  %v165_v33 = vpack.c.bf16 %v61_v26, %v59_v25 }
  0x53   :  { %v197_v34 = vpack.c.bf16 %v125_v29, %v123_v28  ;;  %v168_v35 = vpack.c.bf16 %v66_v30, %v64_v27 }
  0x59   :  { %468 = vmatmul.mubr.bf16.gmra.mrb[24].mxu0 %v155_v37  ;;  %596 = vmatmul.mubr.bf16.gmra.mrb[24].mxu1 %v187_v38  ;;  %v63_v37 = vld [vmem:[%s2265_s0 + $0x180] sm:$0xff]  ;;  %v65_v38 = vld [vmem:[%s2265_s0 + $0x190] sm:$0xff] }
  0x5a   :  { %1114 = vmatprep.mubr.msk.bf16.mxu0 %vm283_vm0, %v158_v39  ;;  %1130 = vmatprep.mubr.msk.bf16.mxu1 %vm283_vm0, %v190_v40  ;;  %v68_v39 = vld [vmem:[%s2265_s0 + $0x1a8] sm:$0xff]  ;;  %v127_v40 = vld [vmem:[%s2265_s0 + $0x380] sm:$0xff]  ;;  %v167_v45 = vpack.c.bf16 %v65_v38, %v63_v37 }
  0x5b   :  { %v199_v46 = vpack.c.bf16 %v129_v41, %v127_v40  ;;  %v170_v47 = vpack.c.bf16 %v70_v42, %v68_v39 }
  0x61   :  { %476 = vmatmul.mubr.bf16.gmra.mrb[28].mxu0 %v157_v49  ;;  %604 = vmatmul.mubr.bf16.gmra.mrb[28].mxu1 %v189_v50  ;;  %v67_v49 = vld [vmem:[%s2265_s0 + $0x1a0] sm:$0xff]  ;;  %v69_v50 = vld [vmem:[%s2265_s0 + $0x1b0] sm:$0xff] }
  0x62   :  { %1115 = vmatprep.mubr.msk.bf16.mxu0 %vm283_vm0, %v160_v51  ;;  %1131 = vmatprep.mubr.msk.bf16.mxu1 %vm283_vm0, %v192_v52  ;;  %v72_v51 = vld [vmem:[%s2265_s0 + $0x1c8] sm:$0xff]  ;;  %v131_v52 = vld [vmem:[%s2265_s0 + $0x3a0] sm:$0xff]  ;;  %v169_v57 = vpack.c.bf16 %v69_v50, %v67_v49 }
  0x63   :  { %v201_v58 = vpack.c.bf16 %v133_v53, %v131_v52  ;;  %v172_v59 = vpack.c.bf16 %v74_v54, %v72_v51 }
  0x69   :  { %484 = vmatmul.mubr.bf16.gmra.mrb[32].mxu0 %v159_v61  ;;  %612 = vmatmul.mubr.bf16.gmra.mrb[32].mxu1 %v191_v62  ;;  %v71_v61 = vld [vmem:[%s2265_s0 + $0x1c0] sm:$0xff]  ;;  %v73_v62 = vld [vmem:[%s2265_s0 + $0x1d0] sm:$0xff] }
  0x6a   :  { %1116 = vmatprep.mubr.msk.bf16.mxu0 %vm283_vm0, %v162_v63  ;;  %1132 = vmatprep.mubr.msk.bf16.mxu1 %vm283_vm0, %v194_v0  ;;  %v76_v63 = vld [vmem:[%s2265_s0 + $0x1e8] sm:$0xff]  ;;  %v135_v0 = vld [vmem:[%s2265_s0 + $0x3c0] sm:$0xff]  ;;  %v171_v5 = vpack.c.bf16 %v73_v62, %v71_v61 }
  0x6b   :  { %v203_v6 = vpack.c.bf16 %v137_v1, %v135_v0  ;;  %v174_v7 = vpack.c.bf16 %v78_v2, %v76_v63 }
  0x71   :  { %492 = vmatmul.mubr.bf16.gmra.mrb[36].mxu0 %v161_v9  ;;  %620 = vmatmul.mubr.bf16.gmra.mrb[36].mxu1 %v193_v10  ;;  %v75_v9 = vld [vmem:[%s2265_s0 + $0x1e0] sm:$0xff]  ;;  %v77_v10 = vld [vmem:[%s2265_s0 + $0x1f0] sm:$0xff] }
  0x72   :  { %1117 = vmatprep.mubr.msk.bf16.mxu0 %vm283_vm0, %v164_v11  ;;  %1133 = vmatprep.mubr.msk.bf16.mxu1 %vm283_vm0, %v196_v12  ;;  %v139_v11 = vld [vmem:[%s2265_s0 + $0x3e0] sm:$0xff]  ;;  %v141_v12 = vld [vmem:[%s2265_s0 + $0x3f0] sm:$0xff]  ;;  %v173_v13 = vpack.c.bf16 %v77_v10, %v75_v9 }
  0x73   :  { %v205_v14 = vpack.c.bf16 %v141_v12, %v139_v11 }
  0x79   :  { %500 = vmatmul.mubr.bf16.gmra.mrb[40].mxu0 %v163_v21  ;;  %628 = vmatmul.mubr.bf16.gmra.mrb[40].mxu1 %v195_v22 }
  0x7a   :  { %1118 = vmatprep.mubr.msk.bf16.mxu0 %vm283_vm0, %v166_v23  ;;  %1134 = vmatprep.mubr.msk.bf16.mxu1 %vm283_vm0, %v198_v24 }
  0x81   :  { %508 = vmatmul.mubr.bf16.gmra.mrb[44].mxu0 %v165_v33  ;;  %636 = vmatmul.mubr.bf16.gmra.mrb[44].mxu1 %v197_v34 }
  0x82   :  { %1119 = vmatprep.mubr.msk.bf16.mxu0 %vm283_vm0, %v168_v35  ;;  %1135 = vmatprep.mubr.msk.bf16.mxu1 %vm283_vm0, %v200_v36 }
  0x89   :  { %516 = vmatmul.mubr.bf16.gmra.mrb[48].mxu0 %v167_v45  ;;  %644 = vmatmul.mubr.bf16.gmra.mrb[48].mxu1 %v199_v46 }
  0x8a   :  { %1120 = vmatprep.mubr.msk.bf16.mxu0 %vm283_vm0, %v170_v47  ;;  %1136 = vmatprep.mubr.msk.bf16.mxu1 %vm283_vm0, %v202_v48 }
  0x91   :  { %524 = vmatmul.mubr.bf16.gmra.mrb[52].mxu0 %v169_v57  ;;  %652 = vmatmul.mubr.bf16.gmra.mrb[52].mxu1 %v201_v58 }
  0x92   :  { %1121 = vmatprep.mubr.msk.bf16.mxu0 %vm283_vm0, %v172_v59  ;;  %1137 = vmatprep.mubr.msk.bf16.mxu1 %vm283_vm0, %v204_v60 }
  0x99   :  { %532 = vmatmul.mubr.bf16.gmra.mrb[56].mxu0 %v171_v5  ;;  %660 = vmatmul.mubr.bf16.gmra.mrb[56].mxu1 %v203_v6 }
  0x9a   :  { %1122 = vmatprep.mubr.msk.bf16.mxu0 %vm283_vm0, %v174_v7  ;;  %1138 = vmatprep.mubr.msk.bf16.mxu1 %vm283_vm0, %v206_v8 }
  0xa1   :  { %540 = vmatmul.mubr.bf16.gmra.mrb[60].mxu0 %v173_v13  ;;  %668 = vmatmul.mubr.bf16.gmra.mrb[60].mxu1 %v205_v14 }
  0xfc   :  { %v421_v15 = vpop.f32.mrb[0].mxu0  ;;  %v1666_v16 = vpop.f32.mrb[0].mxu1 }
  0xfd   :  { %677 = vst.msk [vmem:[%s2266_s2] sm:$0xff] %vm676_vm3, %v421_v15  ;;  %v886_v17 = vmul.f32 %v421_v15, %v421_v15  ;;  %v423_v18 = vpop.f32.mrb[1].mxu0  ;;  %709 = vst.msk [vmem:[%s2266_s2 + $0x100] sm:$0xff] %vm676_vm3, %v1666_v16  ;;  %v551_v19 = vpop.f32.mrb[1].mxu1  ;;  %v749_v22 = vsel %vm676_vm3, %v421_v15, 0.0 }
  0xfe   :  { %v424_v20 = vpop.f32.mrb[2].mxu0  ;;  %v1677_v21 = vpop.f32.mrb[2].mxu1 }
  0xff   :  { %678 = vst.msk [vmem:[%s2266_s2 + $0x8] sm:$0xff] %vm676_vm3, %v424_v20  ;;  %v750_v23 = vsel %vm676_vm3, %v424_v20, 0.0  ;;  %v887_v24 = vmul.f32 %v424_v20, %v424_v20  ;;  %v426_v25 = vpop.f32.mrb[3].mxu0  ;;  %710 = vst.msk [vmem:[%s2266_s2 + $0x108] sm:$0xff] %vm676_vm3, %v1677_v21  ;;  %v554_v26 = vpop.f32.mrb[3].mxu1  ;;  %v950_v28 = vsel %vm676_vm3, %v886_v17, 0.0 }
 0x100   :  { %v751_v27 = vadd.f32 %v750_v23, %v749_v22 }
 0x101   :  { %v951_v29 = vsel %vm676_vm3, %v887_v24, 0.0 }
 0x102   :  { %v952_v30 = vadd.f32 %v951_v29, %v950_v28 }
 0x104   :  { %v429_v31 = vpop.f32.mrb[4].mxu0  ;;  %v1692_v32 = vpop.f32.mrb[4].mxu1 }
 0x105   :  { %679 = vst.msk [vmem:[%s2266_s2 + $0x10] sm:$0xff] %vm676_vm3, %v429_v31  ;;  %v752_v33 = vsel %vm676_vm3, %v429_v31, 0.0  ;;  %v888_v34 = vmul.f32 %v429_v31, %v429_v31  ;;  %v431_v35 = vpop.f32.mrb[5].mxu0  ;;  %711 = vst.msk [vmem:[%s2266_s2 + $0x110] sm:$0xff] %vm676_vm3, %v1692_v32  ;;  %v559_v36 = vpop.f32.mrb[5].mxu1 }
 0x106   :  { %v753_v37 = vadd.f32 %v752_v33, %v751_v27  ;;  %v432_v38 = vpop.f32.mrb[6].mxu0  ;;  %v1704_v39 = vpop.f32.mrb[6].mxu1 }
 0x107   :  { %v953_v40 = vsel %vm676_vm3, %v888_v34, 0.0  ;;  %680 = vst.msk [vmem:[%s2266_s2 + $0x18] sm:$0xff] %vm676_vm3, %v432_v38  ;;  %v754_v41 = vsel %vm676_vm3, %v432_v38, 0.0  ;;  %v889_v42 = vmul.f32 %v432_v38, %v432_v38  ;;  %v434_v43 = vpop.f32.mrb[7].mxu0  ;;  %712 = vst.msk [vmem:[%s2266_s2 + $0x118] sm:$0xff] %vm676_vm3, %v1704_v39  ;;  %v562_v44 = vpop.f32.mrb[7].mxu1 }
 0x108   :  { %v954_v45 = vadd.f32 %v953_v40, %v952_v30  ;;  %v755_v46 = vadd.f32 %v754_v41, %v753_v37 }
 0x109   :  { %v955_v47 = vsel %vm676_vm3, %v889_v42, 0.0 }
 0x10a   :  { %v956_v48 = vadd.f32 %v955_v47, %v954_v45 }
 0x10c   :  { %v437_v49 = vpop.f32.mrb[8].mxu0  ;;  %v1718_v50 = vpop.f32.mrb[8].mxu1 }
 0x10d   :  { %681 = vst.msk [vmem:[%s2266_s2 + $0x20] sm:$0xff] %vm676_vm3, %v437_v49  ;;  %v756_v51 = vsel %vm676_vm3, %v437_v49, 0.0  ;;  %v890_v52 = vmul.f32 %v437_v49, %v437_v49  ;;  %v439_v53 = vpop.f32.mrb[9].mxu0  ;;  %713 = vst.msk [vmem:[%s2266_s2 + $0x120] sm:$0xff] %vm676_vm3, %v1718_v50  ;;  %v567_v54 = vpop.f32.mrb[9].mxu1 }
 0x10e   :  { %v757_v55 = vadd.f32 %v756_v51, %v755_v46  ;;  %v440_v56 = vpop.f32.mrb[10].mxu0  ;;  %v1730_v57 = vpop.f32.mrb[10].mxu1 }
 0x10f   :  { %v957_v58 = vsel %vm676_vm3, %v890_v52, 0.0  ;;  %682 = vst.msk [vmem:[%s2266_s2 + $0x28] sm:$0xff] %vm676_vm3, %v440_v56  ;;  %v758_v59 = vsel %vm676_vm3, %v440_v56, 0.0  ;;  %v891_v60 = vmul.f32 %v440_v56, %v440_v56  ;;  %v442_v61 = vpop.f32.mrb[11].mxu0  ;;  %714 = vst.msk [vmem:[%s2266_s2 + $0x128] sm:$0xff] %vm676_vm3, %v1730_v57  ;;  %v570_v62 = vpop.f32.mrb[11].mxu1 }
 0x110   :  { %v958_v63 = vadd.f32 %v957_v58, %v956_v48  ;;  %v759_v0 = vadd.f32 %v758_v59, %v757_v55 }
 0x111   :  { %v959_v1 = vsel %vm676_vm3, %v891_v60, 0.0 }
 0x112   :  { %v960_v2 = vadd.f32 %v959_v1, %v958_v63 }
 0x114   :  { %v445_v3 = vpop.f32.mrb[12].mxu0  ;;  %v1744_v4 = vpop.f32.mrb[12].mxu1 }
 0x115   :  { %683 = vst.msk [vmem:[%s2266_s2 + $0x30] sm:$0xff] %vm676_vm3, %v445_v3  ;;  %v760_v5 = vsel %vm676_vm3, %v445_v3, 0.0  ;;  %v892_v6 = vmul.f32 %v445_v3, %v445_v3  ;;  %v447_v7 = vpop.f32.mrb[13].mxu0  ;;  %715 = vst.msk [vmem:[%s2266_s2 + $0x130] sm:$0xff] %vm676_vm3, %v1744_v4  ;;  %v575_v8 = vpop.f32.mrb[13].mxu1 }
 0x116   :  { %v761_v9 = vadd.f32 %v760_v5, %v759_v0  ;;  %v448_v10 = vpop.f32.mrb[14].mxu0  ;;  %v1756_v11 = vpop.f32.mrb[14].mxu1 }
 0x117   :  { %v961_v12 = vsel %vm676_vm3, %v892_v6, 0.0  ;;  %684 = vst.msk [vmem:[%s2266_s2 + $0x38] sm:$0xff] %vm676_vm3, %v448_v10  ;;  %v762_v13 = vsel %vm676_vm3, %v448_v10, 0.0  ;;  %v893_v14 = vmul.f32 %v448_v10, %v448_v10  ;;  %v450_v15 = vpop.f32.mrb[15].mxu0  ;;  %716 = vst.msk [vmem:[%s2266_s2 + $0x138] sm:$0xff] %vm676_vm3, %v1756_v11  ;;  %v578_v17 = vpop.f32.mrb[15].mxu1 }
 0x118   :  { %v962_v18 = vadd.f32 %v961_v12, %v960_v2  ;;  %v763_v19 = vadd.f32 %v762_v13, %v761_v9 }
 0x119   :  { %v963_v20 = vsel %vm676_vm3, %v893_v14, 0.0 }
 0x11a   :  { %v964_v22 = vadd.f32 %v963_v20, %v962_v18 }
 0x11c   :  { %v453_v23 = vpop.f32.mrb[16].mxu0  ;;  %v1770_v24 = vpop.f32.mrb[16].mxu1 }
 0x11d   :  { %685 = vst.msk [vmem:[%s2266_s2 + $0x40] sm:$0xff] %vm676_vm3, %v453_v23  ;;  %v764_v25 = vsel %vm676_vm3, %v453_v23, 0.0  ;;  %v894_v26 = vmul.f32 %v453_v23, %v453_v23  ;;  %v455_v27 = vpop.f32.mrb[17].mxu0  ;;  %717 = vst.msk [vmem:[%s2266_s2 + $0x140] sm:$0xff] %vm676_vm3, %v1770_v24  ;;  %v583_v28 = vpop.f32.mrb[17].mxu1 }
 0x11e   :  { %v765_v29 = vadd.f32 %v764_v25, %v763_v19  ;;  %v456_v30 = vpop.f32.mrb[18].mxu0  ;;  %v1782_v31 = vpop.f32.mrb[18].mxu1 }
 0x11f   :  { %v965_v33 = vsel %vm676_vm3, %v894_v26, 0.0  ;;  %686 = vst.msk [vmem:[%s2266_s2 + $0x48] sm:$0xff] %vm676_vm3, %v456_v30  ;;  %v766_v34 = vsel %vm676_vm3, %v456_v30, 0.0  ;;  %v895_v35 = vmul.f32 %v456_v30, %v456_v30  ;;  %v458_v36 = vpop.f32.mrb[19].mxu0  ;;  %718 = vst.msk [vmem:[%s2266_s2 + $0x148] sm:$0xff] %vm676_vm3, %v1782_v31  ;;  %v586_v37 = vpop.f32.mrb[19].mxu1 }
 0x120   :  { %v966_v38 = vadd.f32 %v965_v33, %v964_v22  ;;  %v767_v40 = vadd.f32 %v766_v34, %v765_v29 }
 0x121   :  { %v967_v41 = vsel %vm676_vm3, %v895_v35, 0.0 }
 0x122   :  { %v968_v42 = vadd.f32 %v967_v41, %v966_v38 }
 0x124   :  { %v461_v43 = vpop.f32.mrb[20].mxu0  ;;  %v1796_v44 = vpop.f32.mrb[20].mxu1 }
 0x125   :  { %687 = vst.msk [vmem:[%s2266_s2 + $0x50] sm:$0xff] %vm676_vm3, %v461_v43  ;;  %v768_v45 = vsel %vm676_vm3, %v461_v43, 0.0  ;;  %v896_v46 = vmul.f32 %v461_v43, %v461_v43  ;;  %v463_v47 = vpop.f32.mrb[21].mxu0  ;;  %719 = vst.msk [vmem:[%s2266_s2 + $0x150] sm:$0xff] %vm676_vm3, %v1796_v44  ;;  %v591_v48 = vpop.f32.mrb[21].mxu1  ;;  %v1174_v43 = vmov 0.0  }
 0x126   :  { %v769_v49 = vadd.f32 %v768_v45, %v767_v40  ;;  %v464_v51 = vpop.f32.mrb[22].mxu0  ;;  %v1808_v52 = vpop.f32.mrb[22].mxu1  ;;  %746 = vst.msk [vmem:[%s2267_s3] sm:$0x1] %vm745_vm4, %v1174_v43  ;;  %747 = vst.msk [vmem:[%s2268_s4] sm:$0x1] %vm745_vm4, %v1174_v43 }
 0x127   :  { %v969_v53 = vsel %vm676_vm3, %v896_v46, 0.0  ;;  %688 = vst.msk [vmem:[%s2266_s2 + $0x58] sm:$0xff] %vm676_vm3, %v464_v51  ;;  %v770_v54 = vsel %vm676_vm3, %v464_v51, 0.0  ;;  %v897_v55 = vmul.f32 %v464_v51, %v464_v51  ;;  %v466_v56 = vpop.f32.mrb[23].mxu0  ;;  %720 = vst.msk [vmem:[%s2266_s2 + $0x158] sm:$0xff] %vm676_vm3, %v1808_v52  ;;  %v594_v58 = vpop.f32.mrb[23].mxu1 }
 0x128   :  { %v970_v59 = vadd.f32 %v969_v53, %v968_v42  ;;  %v771_v60 = vadd.f32 %v770_v54, %v769_v49 }
 0x129   :  { %v971_v61 = vsel %vm676_vm3, %v897_v55, 0.0 }
 0x12a   :  { %v972_v62 = vadd.f32 %v971_v61, %v970_v59 }
 0x12c   :  { %v469_v63 = vpop.f32.mrb[24].mxu0  ;;  %v1822_v0 = vpop.f32.mrb[24].mxu1 }
 0x12d   :  { %689 = vst.msk [vmem:[%s2266_s2 + $0x60] sm:$0xff] %vm676_vm3, %v469_v63  ;;  %v772_v1 = vsel %vm676_vm3, %v469_v63, 0.0  ;;  %v898_v2 = vmul.f32 %v469_v63, %v469_v63  ;;  %v471_v3 = vpop.f32.mrb[25].mxu0  ;;  %721 = vst.msk [vmem:[%s2266_s2 + $0x160] sm:$0xff] %vm676_vm3, %v1822_v0  ;;  %v599_v5 = vpop.f32.mrb[25].mxu1 }
 0x12e   :  { %v773_v6 = vadd.f32 %v772_v1, %v771_v60  ;;  %v472_v7 = vpop.f32.mrb[26].mxu0  ;;  %v1834_v8 = vpop.f32.mrb[26].mxu1 }
 0x12f   :  { %v973_v9 = vsel %vm676_vm3, %v898_v2, 0.0  ;;  %690 = vst.msk [vmem:[%s2266_s2 + $0x68] sm:$0xff] %vm676_vm3, %v472_v7  ;;  %v774_v10 = vsel %vm676_vm3, %v472_v7, 0.0  ;;  %v899_v12 = vmul.f32 %v472_v7, %v472_v7  ;;  %v474_v13 = vpop.f32.mrb[27].mxu0  ;;  %722 = vst.msk [vmem:[%s2266_s2 + $0x168] sm:$0xff] %vm676_vm3, %v1834_v8  ;;  %v602_v14 = vpop.f32.mrb[27].mxu1 }
 0x130   :  { %v974_v15 = vadd.f32 %v973_v9, %v972_v62  ;;  %v775_v17 = vadd.f32 %v774_v10, %v773_v6 }
 0x131   :  { %v975_v18 = vsel %vm676_vm3, %v899_v12, 0.0 }
 0x132   :  { %v976_v19 = vadd.f32 %v975_v18, %v974_v15 }
 0x134   :  { %v477_v20 = vpop.f32.mrb[28].mxu0  ;;  %v1848_v22 = vpop.f32.mrb[28].mxu1 }
 0x135   :  { %691 = vst.msk [vmem:[%s2266_s2 + $0x70] sm:$0xff] %vm676_vm3, %v477_v20  ;;  %v776_v23 = vsel %vm676_vm3, %v477_v20, 0.0  ;;  %v900_v25 = vmul.f32 %v477_v20, %v477_v20  ;;  %v479_v26 = vpop.f32.mrb[29].mxu0  ;;  %723 = vst.msk [vmem:[%s2266_s2 + $0x170] sm:$0xff] %vm676_vm3, %v1848_v22  ;;  %v607_v27 = vpop.f32.mrb[29].mxu1 }
 0x136   :  { %v777_v28 = vadd.f32 %v776_v23, %v775_v17  ;;  %v480_v29 = vpop.f32.mrb[30].mxu0  ;;  %v1860_v30 = vpop.f32.mrb[30].mxu1 }
 0x137   :  { %v977_v33 = vsel %vm676_vm3, %v900_v25, 0.0  ;;  %692 = vst.msk [vmem:[%s2266_s2 + $0x78] sm:$0xff] %vm676_vm3, %v480_v29  ;;  %v778_v34 = vsel %vm676_vm3, %v480_v29, 0.0  ;;  %v901_v35 = vmul.f32 %v480_v29, %v480_v29  ;;  %v482_v36 = vpop.f32.mrb[31].mxu0  ;;  %724 = vst.msk [vmem:[%s2266_s2 + $0x178] sm:$0xff] %vm676_vm3, %v1860_v30  ;;  %v610_v37 = vpop.f32.mrb[31].mxu1 }
 0x138   :  { %v978_v38 = vadd.f32 %v977_v33, %v976_v19  ;;  %v779_v40 = vadd.f32 %v778_v34, %v777_v28 }
 0x139   :  { %v979_v41 = vsel %vm676_vm3, %v901_v35, 0.0 }
 0x13a   :  { %v980_v42 = vadd.f32 %v979_v41, %v978_v38 }
 0x13c   :  { %v485_v45 = vpop.f32.mrb[32].mxu0  ;;  %v1882_v46 = vpop.f32.mrb[32].mxu1 }
 0x13d   :  { %693 = vst.msk [vmem:[%s2266_s2 + $0x80] sm:$0xff] %vm676_vm3, %v485_v45  ;;  %v780_v47 = vsel %vm676_vm3, %v485_v45, 0.0  ;;  %v902_v48 = vmul.f32 %v485_v45, %v485_v45  ;;  %v487_v49 = vpop.f32.mrb[33].mxu0  ;;  %725 = vst.msk [vmem:[%s2266_s2 + $0x180] sm:$0xff] %vm676_vm3, %v1882_v46  ;;  %v615_v51 = vpop.f32.mrb[33].mxu1 }
 0x13e   :  { %v781_v53 = vadd.f32 %v780_v47, %v779_v40  ;;  %v488_v54 = vpop.f32.mrb[34].mxu0  ;;  %v1894_v55 = vpop.f32.mrb[34].mxu1 }
 0x13f   :  { %v981_v56 = vsel %vm676_vm3, %v902_v48, 0.0  ;;  %694 = vst.msk [vmem:[%s2266_s2 + $0x88] sm:$0xff] %vm676_vm3, %v488_v54  ;;  %v782_v58 = vsel %vm676_vm3, %v488_v54, 0.0  ;;  %v903_v59 = vmul.f32 %v488_v54, %v488_v54  ;;  %v490_v60 = vpop.f32.mrb[35].mxu0  ;;  %726 = vst.msk [vmem:[%s2266_s2 + $0x188] sm:$0xff] %vm676_vm3, %v1894_v55  ;;  %v618_v61 = vpop.f32.mrb[35].mxu1 }
 0x140   :  { %v982_v62 = vadd.f32 %v981_v56, %v980_v42  ;;  %v783_v63 = vadd.f32 %v782_v58, %v781_v53 }
 0x141   :  { %v983_v1 = vsel %vm676_vm3, %v903_v59, 0.0 }
 0x142   :  { %v984_v2 = vadd.f32 %v983_v1, %v982_v62 }
 0x144   :  { %v493_v3 = vpop.f32.mrb[36].mxu0  ;;  %v1908_v5 = vpop.f32.mrb[36].mxu1 }
 0x145   :  { %695 = vst.msk [vmem:[%s2266_s2 + $0x90] sm:$0xff] %vm676_vm3, %v493_v3  ;;  %v784_v6 = vsel %vm676_vm3, %v493_v3, 0.0  ;;  %v904_v7 = vmul.f32 %v493_v3, %v493_v3  ;;  %v495_v9 = vpop.f32.mrb[37].mxu0  ;;  %727 = vst.msk [vmem:[%s2266_s2 + $0x190] sm:$0xff] %vm676_vm3, %v1908_v5  ;;  %v623_v10 = vpop.f32.mrb[37].mxu1 }
 0x146   :  { %v785_v12 = vadd.f32 %v784_v6, %v783_v63  ;;  %v496_v13 = vpop.f32.mrb[38].mxu0  ;;  %v1920_v14 = vpop.f32.mrb[38].mxu1 }
 0x147   :  { %v985_v15 = vsel %vm676_vm3, %v904_v7, 0.0  ;;  %696 = vst.msk [vmem:[%s2266_s2 + $0x98] sm:$0xff] %vm676_vm3, %v496_v13  ;;  %v786_v17 = vsel %vm676_vm3, %v496_v13, 0.0  ;;  %v905_v18 = vmul.f32 %v496_v13, %v496_v13  ;;  %v498_v19 = vpop.f32.mrb[39].mxu0  ;;  %728 = vst.msk [vmem:[%s2266_s2 + $0x198] sm:$0xff] %vm676_vm3, %v1920_v14  ;;  %v626_v20 = vpop.f32.mrb[39].mxu1 }
 0x148   :  { %v986_v23 = vadd.f32 %v985_v15, %v984_v2  ;;  %v787_v25 = vadd.f32 %v786_v17, %v785_v12 }
 0x149   :  { %v987_v26 = vsel %vm676_vm3, %v905_v18, 0.0 }
 0x14a   :  { %v988_v27 = vadd.f32 %v987_v26, %v986_v23 }
 0x14c   :  { %v501_v28 = vpop.f32.mrb[40].mxu0  ;;  %v1934_v29 = vpop.f32.mrb[40].mxu1 }
 0x14d   :  { %697 = vst.msk [vmem:[%s2266_s2 + $0xa0] sm:$0xff] %vm676_vm3, %v501_v28  ;;  %v788_v33 = vsel %vm676_vm3, %v501_v28, 0.0  ;;  %v906_v34 = vmul.f32 %v501_v28, %v501_v28  ;;  %v503_v35 = vpop.f32.mrb[41].mxu0  ;;  %729 = vst.msk [vmem:[%s2266_s2 + $0x1a0] sm:$0xff] %vm676_vm3, %v1934_v29  ;;  %v631_v36 = vpop.f32.mrb[41].mxu1 }
 0x14e   :  { %v789_v37 = vadd.f32 %v788_v33, %v787_v25  ;;  %v504_v38 = vpop.f32.mrb[42].mxu0  ;;  %v1946_v40 = vpop.f32.mrb[42].mxu1 }
 0x14f   :  { %v989_v41 = vsel %vm676_vm3, %v906_v34, 0.0  ;;  %698 = vst.msk [vmem:[%s2266_s2 + $0xa8] sm:$0xff] %vm676_vm3, %v504_v38  ;;  %v790_v42 = vsel %vm676_vm3, %v504_v38, 0.0  ;;  %v907_v43 = vmul.f32 %v504_v38, %v504_v38  ;;  %v506_v45 = vpop.f32.mrb[43].mxu0  ;;  %730 = vst.msk [vmem:[%s2266_s2 + $0x1a8] sm:$0xff] %vm676_vm3, %v1946_v40  ;;  %v634_v47 = vpop.f32.mrb[43].mxu1 }
 0x150   :  { %v990_v48 = vadd.f32 %v989_v41, %v988_v27  ;;  %v791_v49 = vadd.f32 %v790_v42, %v789_v37 }
 0x151   :  { %v991_v51 = vsel %vm676_vm3, %v907_v43, 0.0 }
 0x152   :  { %v992_v53 = vadd.f32 %v991_v51, %v990_v48 }
 0x154   :  { %v509_v54 = vpop.f32.mrb[44].mxu0  ;;  %v1960_v56 = vpop.f32.mrb[44].mxu1 }
 0x155   :  { %699 = vst.msk [vmem:[%s2266_s2 + $0xb0] sm:$0xff] %vm676_vm3, %v509_v54  ;;  %v792_v58 = vsel %vm676_vm3, %v509_v54, 0.0  ;;  %v908_v59 = vmul.f32 %v509_v54, %v509_v54  ;;  %v511_v60 = vpop.f32.mrb[45].mxu0  ;;  %731 = vst.msk [vmem:[%s2266_s2 + $0x1b0] sm:$0xff] %vm676_vm3, %v1960_v56  ;;  %v639_v61 = vpop.f32.mrb[45].mxu1 }
 0x156   :  { %v793_v62 = vadd.f32 %v792_v58, %v791_v49  ;;  %v512_v63 = vpop.f32.mrb[46].mxu0  ;;  %v1972_v1 = vpop.f32.mrb[46].mxu1 }
 0x157   :  { %v993_v2 = vsel %vm676_vm3, %v908_v59, 0.0  ;;  %700 = vst.msk [vmem:[%s2266_s2 + $0xb8] sm:$0xff] %vm676_vm3, %v512_v63  ;;  %v794_v3 = vsel %vm676_vm3, %v512_v63, 0.0  ;;  %v909_v6 = vmul.f32 %v512_v63, %v512_v63  ;;  %v514_v7 = vpop.f32.mrb[47].mxu0  ;;  %732 = vst.msk [vmem:[%s2266_s2 + $0x1b8] sm:$0xff] %vm676_vm3, %v1972_v1  ;;  %v642_v9 = vpop.f32.mrb[47].mxu1 }
 0x158   :  { %v994_v10 = vadd.f32 %v993_v2, %v992_v53  ;;  %v795_v12 = vadd.f32 %v794_v3, %v793_v62 }
 0x159   :  { %v995_v13 = vsel %vm676_vm3, %v909_v6, 0.0 }
 0x15a   :  { %v996_v15 = vadd.f32 %v995_v13, %v994_v10 }
 0x15c   :  { %v517_v17 = vpop.f32.mrb[48].mxu0  ;;  %v1986_v18 = vpop.f32.mrb[48].mxu1 }
 0x15d   :  { %701 = vst.msk [vmem:[%s2266_s2 + $0xc0] sm:$0xff] %vm676_vm3, %v517_v17  ;;  %v796_v19 = vsel %vm676_vm3, %v517_v17, 0.0  ;;  %v910_v20 = vmul.f32 %v517_v17, %v517_v17  ;;  %v519_v23 = vpop.f32.mrb[49].mxu0  ;;  %733 = vst.msk [vmem:[%s2266_s2 + $0x1c0] sm:$0xff] %vm676_vm3, %v1986_v18  ;;  %v647_v25 = vpop.f32.mrb[49].mxu1 }
 0x15e   :  { %v797_v26 = vadd.f32 %v796_v19, %v795_v12  ;;  %v520_v27 = vpop.f32.mrb[50].mxu0  ;;  %v1998_v28 = vpop.f32.mrb[50].mxu1 }
 0x15f   :  { %v997_v33 = vsel %vm676_vm3, %v910_v20, 0.0  ;;  %702 = vst.msk [vmem:[%s2266_s2 + $0xc8] sm:$0xff] %vm676_vm3, %v520_v27  ;;  %v798_v34 = vsel %vm676_vm3, %v520_v27, 0.0  ;;  %v911_v35 = vmul.f32 %v520_v27, %v520_v27  ;;  %v522_v36 = vpop.f32.mrb[51].mxu0  ;;  %734 = vst.msk [vmem:[%s2266_s2 + $0x1c8] sm:$0xff] %vm676_vm3, %v1998_v28  ;;  %v650_v37 = vpop.f32.mrb[51].mxu1 }
 0x160   :  { %v998_v38 = vadd.f32 %v997_v33, %v996_v15  ;;  %v799_v41 = vadd.f32 %v798_v34, %v797_v26 }
 0x161   :  { %v999_v42 = vsel %vm676_vm3, %v911_v35, 0.0 }
 0x162   :  { %v1000_v43 = vadd.f32 %v999_v42, %v998_v38 }
 0x164   :  { %v525_v45 = vpop.f32.mrb[52].mxu0  ;;  %v2012_v47 = vpop.f32.mrb[52].mxu1 }
 0x165   :  { %703 = vst.msk [vmem:[%s2266_s2 + $0xd0] sm:$0xff] %vm676_vm3, %v525_v45  ;;  %v800_v48 = vsel %vm676_vm3, %v525_v45, 0.0  ;;  %v912_v49 = vmul.f32 %v525_v45, %v525_v45  ;;  %v527_v51 = vpop.f32.mrb[53].mxu0  ;;  %735 = vst.msk [vmem:[%s2266_s2 + $0x1d0] sm:$0xff] %vm676_vm3, %v2012_v47  ;;  %v655_v53 = vpop.f32.mrb[53].mxu1 }
 0x166   :  { %v801_v54 = vadd.f32 %v800_v48, %v799_v41  ;;  %v528_v58 = vpop.f32.mrb[54].mxu0  ;;  %v2024_v59 = vpop.f32.mrb[54].mxu1 }
 0x167   :  { %v1001_v60 = vsel %vm676_vm3, %v912_v49, 0.0  ;;  %704 = vst.msk [vmem:[%s2266_s2 + $0xd8] sm:$0xff] %vm676_vm3, %v528_v58  ;;  %v802_v61 = vsel %vm676_vm3, %v528_v58, 0.0  ;;  %v913_v62 = vmul.f32 %v528_v58, %v528_v58  ;;  %v530_v63 = vpop.f32.mrb[55].mxu0  ;;  %736 = vst.msk [vmem:[%s2266_s2 + $0x1d8] sm:$0xff] %vm676_vm3, %v2024_v59  ;;  %v658_v2 = vpop.f32.mrb[55].mxu1 }
 0x168   :  { %v1002_v3 = vadd.f32 %v1001_v60, %v1000_v43  ;;  %v803_v6 = vadd.f32 %v802_v61, %v801_v54  ;;  %v918_v60 = vmul.f32 %v1666_v16, %v1666_v16 }
 0x169   :  { %v1003_v7 = vsel %vm676_vm3, %v913_v62, 0.0 }
 0x16a   :  { %v1004_v9 = vadd.f32 %v1003_v7, %v1002_v3 }
 0x16c   :  { %v533_v10 = vpop.f32.mrb[56].mxu0  ;;  %v2038_v12 = vpop.f32.mrb[56].mxu1 }
 0x16d   :  { %705 = vst.msk [vmem:[%s2266_s2 + $0xe0] sm:$0xff] %vm676_vm3, %v533_v10  ;;  %v804_v13 = vsel %vm676_vm3, %v533_v10, 0.0  ;;  %v914_v15 = vmul.f32 %v533_v10, %v533_v10  ;;  %v535_v17 = vpop.f32.mrb[57].mxu0  ;;  %737 = vst.msk [vmem:[%s2266_s2 + $0x1e0] sm:$0xff] %vm676_vm3, %v2038_v12  ;;  %v663_v19 = vpop.f32.mrb[57].mxu1  ;;  %v919_v10 = vmul.f32 %v1677_v21, %v1677_v21 }
 0x16e   :  { %v805_v20 = vadd.f32 %v804_v13, %v803_v6  ;;  %v536_v23 = vpop.f32.mrb[58].mxu0  ;;  %v2050_v25 = vpop.f32.mrb[58].mxu1  ;;  %v1013_v19 = vsel %vm676_vm3, %v918_v60, 0.0 }
 0x16f   :  { %v1005_v26 = vsel %vm676_vm3, %v914_v15, 0.0  ;;  %706 = vst.msk [vmem:[%s2266_s2 + $0xe8] sm:$0xff] %vm676_vm3, %v536_v23  ;;  %v806_v27 = vsel %vm676_vm3, %v536_v23, 0.0  ;;  %v915_v33 = vmul.f32 %v536_v23, %v536_v23  ;;  %v538_v34 = vpop.f32.mrb[59].mxu0  ;;  %738 = vst.msk [vmem:[%s2266_s2 + $0x1e8] sm:$0xff] %vm676_vm3, %v2050_v25  ;;  %v666_v35 = vpop.f32.mrb[59].mxu1  ;;  %v920_v23 = vmul.f32 %v1692_v32, %v1692_v32 }
 0x170   :  { %v1006_v36 = vadd.f32 %v1005_v26, %v1004_v9  ;;  %v807_v37 = vadd.f32 %v806_v27, %v805_v20  ;;  %v812_v9 = vsel %vm676_vm3, %v1666_v16, 0.0  ;;  %v814_v20 = vsel %vm676_vm3, %v1677_v21, 0.0 }
 0x171   :  { %v1007_v38 = vsel %vm676_vm3, %v915_v33, 0.0  ;;  %v1015_v33 = vsel %vm676_vm3, %v919_v10, 0.0  ;;  %v816_v16 = vsel %vm676_vm3, %v1692_v32, 0.0  ;;  %v921_v34 = vmul.f32 %v1704_v39, %v1704_v39 }
 0x172   :  { %v1008_v41 = vadd.f32 %v1007_v38, %v1006_v36  ;;  %v818_v21 = vsel %vm676_vm3, %v1704_v39, 0.0  ;;  %v922_v38 = vmul.f32 %v1718_v50, %v1718_v50  ;;  %v820_v32 = vsel %vm676_vm3, %v1718_v50, 0.0 }
 0x173   :  { %v822_v39 = vsel %vm676_vm3, %v1730_v57, 0.0  ;;  %v824_v50 = vsel %vm676_vm3, %v1744_v4, 0.0 }
 0x174   :  { %v541_v42 = vpop.f32.mrb[60].mxu0  ;;  %v2064_v43 = vpop.f32.mrb[60].mxu1 }
 0x175   :  { %707 = vst.msk [vmem:[%s2266_s2 + $0xf0] sm:$0xff] %vm676_vm3, %v541_v42  ;;  %v808_v45 = vsel %vm676_vm3, %v541_v42, 0.0  ;;  %v916_v48 = vmul.f32 %v541_v42, %v541_v42  ;;  %v543_v49 = vpop.f32.mrb[61].mxu0  ;;  %739 = vst.msk [vmem:[%s2266_s2 + $0x1f0] sm:$0xff] %vm676_vm3, %v2064_v43  ;;  %v671_v51 = vpop.f32.mrb[61].mxu1 }
 0x176   :  { %v809_v53 = vadd.f32 %v808_v45, %v807_v37  ;;  %v544_v54 = vpop.f32.mrb[62].mxu0  ;;  %v2076_v58 = vpop.f32.mrb[62].mxu1  ;;  %v1017_v37 = vsel %vm676_vm3, %v920_v23, 0.0  ;;  %v1019_v45 = vsel %vm676_vm3, %v921_v34, 0.0  ;;  %v928_v23 = vmul.f32 %v1796_v44, %v1796_v44 }
 0x177   :  { %v1009_v61 = vsel %vm676_vm3, %v916_v48, 0.0  ;;  %708 = vst.msk [vmem:[%s2266_s2 + $0xf8] sm:$0xff] %vm676_vm3, %v544_v54  ;;  %v810_v62 = vsel %vm676_vm3, %v544_v54, 0.0  ;;  %v917_v63 = vmul.f32 %v544_v54, %v544_v54  ;;  %v546_v2 = vpop.f32.mrb[63].mxu0  ;;  %740 = vst.msk [vmem:[%s2266_s2 + $0x1f8] sm:$0xff] %vm676_vm3, %v2076_v58  ;;  %v674_v3 = vpop.f32.mrb[63].mxu1  ;;  %v923_v48 = vmul.f32 %v1730_v57, %v1730_v57 }
 0x178   :  { %v1010_v6 = vadd.f32 %v1009_v61, %v1008_v41  ;;  %v811_v7 = vadd.f32 %v810_v62, %v809_v53  ;;  %v1021_v53 = vsel %vm676_vm3, %v922_v38, 0.0  ;;  %v924_v54 = vmul.f32 %v1744_v4, %v1744_v4 }
 0x179   :  { %v1011_v13 = vsel %vm676_vm3, %v917_v63, 0.0  ;;  %v1023_v62 = vsel %vm676_vm3, %v923_v48, 0.0  ;;  %v925_v63 = vmul.f32 %v1756_v11, %v1756_v11  ;;  %v826_v57 = vsel %vm676_vm3, %v1756_v11, 0.0 }
 0x17a   :  { %v813_v15 = vadd.f32 %v812_v9, %v811_v7  ;;  %v1012_v17 = vadd.f32 %v1011_v13, %v1010_v6  ;;  %v1025_v6 = vsel %vm676_vm3, %v924_v54, 0.0  ;;  %v926_v7 = vmul.f32 %v1770_v24, %v1770_v24 }
 0x17b   :  { %v1027_v13 = vsel %vm676_vm3, %v925_v63, 0.0  ;;  %v828_v4 = vsel %vm676_vm3, %v1770_v24, 0.0  ;;  %v830_v11 = vsel %vm676_vm3, %v1782_v31, 0.0  ;;  %v832_v24 = vsel %vm676_vm3, %v1796_v44, 0.0 }
 0x17c   :  { %v815_v26 = vadd.f32 %v814_v20, %v813_v15  ;;  %v1014_v27 = vadd.f32 %v1013_v19, %v1012_v17  ;;  %v927_v15 = vmul.f32 %v1782_v31, %v1782_v31  ;;  %v1029_v20 = vsel %vm676_vm3, %v926_v7, 0.0 }
 0x17d   :  { %v834_v31 = vsel %vm676_vm3, %v1808_v52, 0.0  ;;  %v836_v44 = vsel %vm676_vm3, %v1822_v0, 0.0  ;;  %v933_v54 = vmul.f32 %v1860_v30, %v1860_v30 }
 0x17e   :  { %v817_v35 = vadd.f32 %v816_v16, %v815_v26  ;;  %v1016_v36 = vadd.f32 %v1015_v33, %v1014_v27  ;;  %v1031_v33 = vsel %vm676_vm3, %v927_v15, 0.0  ;;  %v929_v16 = vmul.f32 %v1808_v52, %v1808_v52 }
 0x17f   :  { %v838_v52 = vsel %vm676_vm3, %v1834_v8, 0.0 }
 0x180   :  { %v819_v41 = vadd.f32 %v818_v21, %v817_v35  ;;  %v1018_v42 = vadd.f32 %v1017_v37, %v1016_v36  ;;  %v1033_v36 = vsel %vm676_vm3, %v928_v23, 0.0  ;;  %v930_v37 = vmul.f32 %v1822_v0, %v1822_v0 }
 0x181   :  { %v840_v0 = vsel %vm676_vm3, %v1848_v22, 0.0  ;;  %v938_v23 = vmul.f32 %v1934_v29, %v1934_v29 }
 0x182   :  { %v821_v49 = vadd.f32 %v820_v32, %v819_v41  ;;  %v1020_v51 = vadd.f32 %v1019_v45, %v1018_v42  ;;  %v1035_v41 = vsel %vm676_vm3, %v929_v16, 0.0  ;;  %v931_v42 = vmul.f32 %v1834_v8, %v1834_v8 }
 0x183   :  { %v1037_v48 = vsel %vm676_vm3, %v930_v37, 0.0  ;;  %v842_v8 = vsel %vm676_vm3, %v1860_v30, 0.0  ;;  %v846_v30 = vsel %vm676_vm3, %v1894_v55, 0.0 }
 0x184   :  { %v823_v60 = vadd.f32 %v822_v39, %v821_v49  ;;  %v1022_v61 = vadd.f32 %v1021_v53, %v1020_v51  ;;  %v932_v49 = vmul.f32 %v1848_v22, %v1848_v22  ;;  %v1039_v39 = vsel %vm676_vm3, %v931_v42, 0.0 }
 0x185   :  { %v844_v22 = vsel %vm676_vm3, %v1882_v46, 0.0 }
 0x186   :  { %v825_v2 = vadd.f32 %v824_v50, %v823_v60  ;;  %v1024_v3 = vadd.f32 %v1023_v62, %v1022_v61  ;;  %v1041_v62 = vsel %vm676_vm3, %v932_v49, 0.0  ;;  %v934_v50 = vmul.f32 %v1882_v46, %v1882_v46 }
 0x187   :  { %v848_v46 = vsel %vm676_vm3, %v1908_v5, 0.0  ;;  %v943_v49 = vmul.f32 %v1998_v28, %v1998_v28 }
 0x188   :  { %v827_v9 = vadd.f32 %v826_v57, %v825_v2  ;;  %v1026_v10 = vadd.f32 %v1025_v6, %v1024_v3  ;;  %v1043_v3 = vsel %vm676_vm3, %v933_v54, 0.0  ;;  %v935_v6 = vmul.f32 %v1894_v55, %v1894_v55 }
 0x189   :  { %v850_v55 = vsel %vm676_vm3, %v1920_v14, 0.0 }
 0x18a   :  { %v1028_v17 = vadd.f32 %v1027_v13, %v1026_v10  ;;  %v829_v19 = vadd.f32 %v828_v4, %v827_v9  ;;  %v1045_v9 = vsel %vm676_vm3, %v934_v50, 0.0  ;;  %v936_v10 = vmul.f32 %v1908_v5, %v1908_v5 }
 0x18b   :  { %v1047_v15 = vsel %vm676_vm3, %v935_v6, 0.0  ;;  %v852_v5 = vsel %vm676_vm3, %v1934_v29, 0.0  ;;  %v856_v29 = vsel %vm676_vm3, %v1960_v56, 0.0 }
 0x18c   :  { %v831_v26 = vadd.f32 %v830_v11, %v829_v19  ;;  %v1030_v27 = vadd.f32 %v1029_v20, %v1028_v17  ;;  %v937_v17 = vmul.f32 %v1920_v14, %v1920_v14  ;;  %v1049_v11 = vsel %vm676_vm3, %v936_v10, 0.0 }
 0x18d   :  { %v854_v14 = vsel %vm676_vm3, %v1946_v40, 0.0  ;;  %v870_v10 = vsel %vm676_vm3, %v2050_v25, 0.0 }
 0x18e   :  { %v833_v34 = vadd.f32 %v832_v24, %v831_v26  ;;  %v1032_v35 = vadd.f32 %v1031_v33, %v1030_v27  ;;  %v1051_v33 = vsel %vm676_vm3, %v937_v17, 0.0  ;;  %v939_v24 = vmul.f32 %v1946_v40, %v1946_v40 }
 0x18f   :  { %v858_v40 = vsel %vm676_vm3, %v1972_v1, 0.0  ;;  %v949_v17 = vmul.f32 %v2076_v58, %v2076_v58 }
 0x190   :  { %v835_v21 = vadd.f32 %v834_v31, %v833_v34  ;;  %v1034_v38 = vadd.f32 %v1033_v36, %v1032_v35  ;;  %v1053_v35 = vsel %vm676_vm3, %v938_v23, 0.0  ;;  %v940_v36 = vmul.f32 %v1960_v56, %v1960_v56 }
 0x191   :  { %v860_v56 = vsel %vm676_vm3, %v1986_v18, 0.0 }
 0x192   :  { %v837_v45 = vadd.f32 %v836_v44, %v835_v21  ;;  %v1036_v32 = vadd.f32 %v1035_v41, %v1034_v38  ;;  %v1055_v21 = vsel %vm676_vm3, %v939_v24, 0.0  ;;  %v941_v38 = vmul.f32 %v1972_v1, %v1972_v1 }
 0x193   :  { %v1057_v42 = vsel %vm676_vm3, %v940_v36, 0.0  ;;  %v862_v1 = vsel %vm676_vm3, %v1998_v28, 0.0  ;;  %v866_v28 = vsel %vm676_vm3, %v2024_v59, 0.0  ;;  %v748_v36 = vld [vmem:[%s2267_s3] sm:$0x1] }
 0x194   :  { %v839_v51 = vadd.f32 %v838_v52, %v837_v45  ;;  %v1038_v53 = vadd.f32 %v1037_v48, %v1036_v32  ;;  %v942_v45 = vmul.f32 %v1986_v18, %v1986_v18  ;;  %v1059_v52 = vsel %vm676_vm3, %v941_v38, 0.0 }
 0x195   :  { %v864_v18 = vsel %vm676_vm3, %v2012_v47, 0.0 }
 0x196   :  { %v841_v60 = vadd.f32 %v840_v0, %v839_v51  ;;  %v1040_v61 = vadd.f32 %v1039_v39, %v1038_v53  ;;  %v1061_v39 = vsel %vm676_vm3, %v942_v45, 0.0  ;;  %v944_v0 = vmul.f32 %v2012_v47, %v2012_v47 }
 0x197   :  { %v868_v47 = vsel %vm676_vm3, %v2038_v12, 0.0 }
 0x198   :  { %v843_v63 = vadd.f32 %v842_v8, %v841_v60  ;;  %v1042_v2 = vadd.f32 %v1041_v62, %v1040_v61  ;;  %v1063_v61 = vsel %vm676_vm3, %v943_v49, 0.0  ;;  %v945_v62 = vmul.f32 %v2024_v59, %v2024_v59 }
 0x19a   :  { %v845_v57 = vadd.f32 %v844_v22, %v843_v63  ;;  %v1044_v7 = vadd.f32 %v1043_v3, %v1042_v2  ;;  %v1065_v63 = vsel %vm676_vm3, %v944_v0, 0.0  ;;  %v946_v2 = vmul.f32 %v2038_v12, %v2038_v12 }
 0x19b   :  { %v1067_v6 = vsel %vm676_vm3, %v945_v62, 0.0 }
 0x19c   :  { %v1046_v13 = vadd.f32 %v1045_v9, %v1044_v7  ;;  %v847_v4 = vadd.f32 %v846_v30, %v845_v57  ;;  %v947_v57 = vmul.f32 %v2050_v25, %v2050_v25  ;;  %v948_v7 = vmul.f32 %v2064_v43, %v2064_v43 }
 0x19d   :  { %v1069_v59 = vsel %vm676_vm3, %v946_v2, 0.0  ;;  %v1075_v25 = vsel %vm676_vm3, %v949_v17, 0.0 }
 0x19e   :  { %v1048_v19 = vadd.f32 %v1047_v15, %v1046_v13  ;;  %v849_v20 = vadd.f32 %v848_v46, %v847_v4  ;;  %v872_v13 = vsel %vm676_vm3, %v2064_v43, 0.0  ;;  %v1071_v12 = vsel %vm676_vm3, %v947_v57, 0.0 }
 0x19f   :  { %v1073_v46 = vsel %vm676_vm3, %v948_v7, 0.0 }
 0x1a0   :  { %v1050_v26 = vadd.f32 %v1049_v11, %v1048_v19  ;;  %v851_v27 = vadd.f32 %v850_v55, %v849_v20  ;;  %v874_v11 = vsel %vm676_vm3, %v2076_v58, 0.0 }
 0x1a2   :  { %v1052_v16 = vadd.f32 %v1051_v33, %v1050_v26  ;;  %v853_v34 = vadd.f32 %v852_v5, %v851_v27 }
 0x1a4   :  { %v1054_v31 = vadd.f32 %v1053_v35, %v1052_v16  ;;  %v855_v37 = vadd.f32 %v854_v14, %v853_v34 }
 0x1a6   :  { %v1056_v41 = vadd.f32 %v1055_v21, %v1054_v31  ;;  %v857_v44 = vadd.f32 %v856_v29, %v855_v37  ;;  %v885_v37 = vld [vmem:[%s2268_s4] sm:$0x1] }
 0x1a8   :  { %v1058_v32 = vadd.f32 %v1057_v42, %v1056_v41  ;;  %v859_v48 = vadd.f32 %v858_v40, %v857_v44 }
 0x1aa   :  { %v1060_v51 = vadd.f32 %v1059_v52, %v1058_v32  ;;  %v861_v53 = vadd.f32 %v860_v56, %v859_v48 }
 0x1ac   :  { %v1062_v54 = vadd.f32 %v1061_v39, %v1060_v51  ;;  %v863_v60 = vadd.f32 %v862_v1, %v861_v53 }
 0x1ae   :  { %v1064_v8 = vadd.f32 %v1063_v61, %v1062_v54  ;;  %v865_v50 = vadd.f32 %v864_v18, %v863_v60 }
 0x1b0   :  { %v1066_v3 = vadd.f32 %v1065_v63, %v1064_v8  ;;  %v867_v22 = vadd.f32 %v866_v28, %v865_v50 }
 0x1b2   :  { %v1068_v9 = vadd.f32 %v1067_v6, %v1066_v3  ;;  %v869_v30 = vadd.f32 %v868_v47, %v867_v22 }
 0x1b4   :  { %v1070_v4 = vadd.f32 %v1069_v59, %v1068_v9  ;;  %v871_v15 = vadd.f32 %v870_v10, %v869_v30 }
 0x1b6   :  { %v1072_v19 = vadd.f32 %v1071_v12, %v1070_v4  ;;  %v873_v20 = vadd.f32 %v872_v13, %v871_v15 }
 0x1b8   :  { %v1074_v55 = vadd.f32 %v1073_v46, %v1072_v19  ;;  %v875_v23 = vadd.f32 %v874_v11, %v873_v20 }
 0x1ba   :  { %v876_v26 = vrot.slane %v875_v23, 4  ;;  %v1076_v43 = vadd.f32 %v1075_v25, %v1074_v55 }
 0x1bc   :  { %v877_v27 = vadd.f32 %v876_v26, %v875_v23  ;;  %v1077_v33 = vrot.slane %v1076_v43, 4 }
 0x1be   :  { %v878_v5 = vrot.slane %v877_v27, 2  ;;  %v1078_v24 = vadd.f32 %v1077_v33, %v1076_v43 }
 0x1c0   :  { %v879_v16 = vadd.f32 %v878_v5, %v877_v27  ;;  %v1079_v34 = vrot.slane %v1078_v24, 2 }
 0x1c2   :  { %v880_v35 = vrot.slane %v879_v16, 1  ;;  %v1080_v14 = vadd.f32 %v1079_v34, %v1078_v24 }
 0x1c4   :  { %v881_v31 = vadd.f32 %v880_v35, %v879_v16  ;;  %v1081_v58 = vrot.slane %v1080_v14, 1 }
 0x1c6   :  { %v882_v21 = vadd.f32 %v881_v31, %v748_v36  ;;  %v1082_v29 = vadd.f32 %v1081_v58, %v1080_v14 }
 0x1c8   :  { %884 = vst.msk [vmem:[%s2267_s3] sm:$0x1] %vm745_vm4, %v882_v21  ;;  %v1083_v38 = vadd.f32 %v1082_v29, %v885_v37 }
 0x1ca   :  { %1084 = vst.msk [vmem:[%s2268_s4] sm:$0x1] %vm745_vm4, %v1083_v38 }

// kernel: densenet_forward.14
= control target key start
LH: loop header
LB: loop body
LE: loop exit
PB: predicated region body
PF: predicated region fallthrough
CT: control target
= control target key end

     0   :  { %vm115_vm0 = vcmask 130048   ;;  %vm257_vm1 = vcmask 122880   ;;  %s666_s3 = inlined_call_operand.vmem [shape: bf16[16,16], index: 3, kind: input, shape index: {}]   ;;  %s667_s0 = inlined_call_operand.vmem [shape: f32[128,16], index: 0, kind: input, shape index: {}]   ;;  %s668_s1 = inlined_call_operand.vmem [shape: f32[1,16], index: 1, kind: input, shape index: {}]   ;;  %s669_s2 = inlined_call_operand.vmem [shape: f32[1,16], index: 2, kind: input, shape index: {}]   ;;  %s670_s5 = inlined_call_operand.vmem [shape: f32[1,16], index: 5, kind: output, shape index: {1}]   ;;  %s671_s6 = inlined_call_operand.vmem [shape: f32[1,16], index: 6, kind: output, shape index: {2}]   ;;  %s672_s4 = inlined_call_operand.vmem [shape: f32[128,16], index: 4, kind: output, shape index: {0}]  }
   0x1   :  { %v410_v0 = vld [vmem:[%s666_s3] sm:$0xff]   ;;  %v22_v2 = vld [vmem:[%s667_s0 + $0x8] sm:$0xff]  ;;  %v23_v7 = vld [vmem:[%s667_s0 + $0x10] sm:$0xff] }
   0x2   :  { %v21_v1 = vld [vmem:[%s667_s0] sm:$0xff]  ;;  %389 = vmatprep.subr.bf16.mxu0 %v410_v0  ;;  %v24_v8 = vld [vmem:[%s667_s0 + $0x18] sm:$0xff]  ;;  %407 = vmatprep.subr.bf16.mxu1 %v410_v0  ;;  %v26_v12 = vld [vmem:[%s667_s0 + $0x28] sm:$0xff] }
   0x3   :  { %v459_v3 = vld [vmem:[%s668_s1] ss:$0 sm:$0xff]  ;;  %390 = vmatpush3.bf16.msra.mxu0 %v410_v0  ;;  %v27_v13 = vld [vmem:[%s667_s0 + $0x30] sm:$0xff]  ;;  %408 = vmatpush3.bf16.msra.mxu1 %v410_v0  ;;  %v28_v18 = vld [vmem:[%s667_s0 + $0x38] sm:$0xff] }
   0x4   :  { %v44_v4 = vmul.f32 %v459_v3, %v21_v1  ;;  %v45_v5 = vmul.f32 %v459_v3, %v22_v2  ;;  %v466_v6 = vld [vmem:[%s669_s2] ss:$0 sm:$0xff]  ;;  %v46_v9 = vmul.f32 %v459_v3, %v23_v7  ;;  %v47_v10 = vmul.f32 %v459_v3, %v24_v8  ;;  %v30_v28 = vld [vmem:[%s667_s0 + $0x48] sm:$0xff]  ;;  %v31_v33 = vld [vmem:[%s667_s0 + $0x50] sm:$0xff] }
   0x5   :  { %v25_v11 = vld [vmem:[%s667_s0 + $0x20] sm:$0xff]  ;;  %v49_v17 = vmul.f32 %v459_v3, %v26_v12  ;;  %v50_v21 = vmul.f32 %v459_v3, %v27_v13  ;;  %v51_v22 = vmul.f32 %v459_v3, %v28_v18  ;;  %v32_v34 = vld [vmem:[%s667_s0 + $0x58] sm:$0xff]  ;;  %v34_v40 = vld [vmem:[%s667_s0 + $0x68] sm:$0xff]  ;;  %v53_v44 = vmul.f32 %v459_v3, %v30_v28 }
   0x6   :  { %v67_v14 = vadd.f32 %v466_v6, %v44_v4  ;;  %v68_v15 = vadd.f32 %v466_v6, %v45_v5  ;;  %v48_v16 = vmul.f32 %v459_v3, %v25_v11  ;;  %v69_v19 = vadd.f32 %v466_v6, %v46_v9  ;;  %v29_v23 = vld [vmem:[%s667_s0 + $0x40] sm:$0xff]  ;;  %v35_v45 = vld [vmem:[%s667_s0 + $0x70] sm:$0xff]  ;;  %v36_v50 = vld [vmem:[%s667_s0 + $0x78] sm:$0xff] }
   0x7   :  { %v70_v20 = vadd.f32 %v466_v6, %v47_v10  ;;  %v72_v27 = vadd.f32 %v466_v6, %v49_v17  ;;  %v73_v31 = vadd.f32 %v466_v6, %v50_v21  ;;  %v74_v32 = vadd.f32 %v466_v6, %v51_v22  ;;  %v33_v39 = vld [vmem:[%s667_s0 + $0x60] sm:$0xff] }
   0x8   :  { %v83_v24 = vmax.f32 %v67_v14, 0.0  ;;  %v84_v25 = vmax.f32 %v68_v15, 0.0  ;;  %v71_v26 = vadd.f32 %v466_v6, %v48_v16  ;;  %v85_v29 = vmax.f32 %v69_v19, 0.0 }
   0x9   :  { %v86_v30 = vmax.f32 %v70_v20, 0.0  ;;  %v88_v37 = vmax.f32 %v72_v27, 0.0  ;;  %v52_v38 = vmul.f32 %v459_v3, %v29_v23  ;;  %v89_v42 = vmax.f32 %v73_v31, 0.0 }
   0xa   :  { %v99_v35 = vpack.c.bf16 %v84_v25, %v83_v24  ;;  %v87_v36 = vmax.f32 %v71_v26, 0.0  ;;  %v90_v43 = vmax.f32 %v74_v32, 0.0  ;;  %v54_v48 = vmul.f32 %v459_v3, %v31_v33 }
   0xb   :  { %v100_v41 = vpack.c.bf16 %v86_v30, %v85_v29  ;;  %v75_v47 = vadd.f32 %v466_v6, %v52_v38  ;;  %v55_v49 = vmul.f32 %v459_v3, %v32_v34  ;;  %v76_v51 = vadd.f32 %v466_v6, %v53_v44 }
   0xc   :  { %391 = vmatprep.mubr.msk.bf16.mxu0 %vm115_vm0, %v99_v35  ;;  %v101_v46 = vpack.c.bf16 %v88_v37, %v87_v36  ;;  %v56_v52 = vmul.f32 %v459_v3, %v33_v39  ;;  %v57_v53 = vmul.f32 %v459_v3, %v34_v40  ;;  %v77_v55 = vadd.f32 %v466_v6, %v54_v48 }
   0xd   :  { %392 = vmatmul.mubr.msk.bf16.vlgmr.msra.gmra.mrb[0].mxu0 %vm115_vm0, %v100_v41  ;;  %v91_v54 = vmax.f32 %v75_v47, 0.0  ;;  %v78_v56 = vadd.f32 %v466_v6, %v55_v49  ;;  %v58_v57 = vmul.f32 %v459_v3, %v35_v45  ;;  %v92_v58 = vmax.f32 %v76_v51, 0.0 }
   0xe   :  { %395 = vmatprep.mubr.msk.bf16.mxu0 %vm115_vm0, %v101_v46  ;;  %v79_v59 = vadd.f32 %v466_v6, %v56_v52  ;;  %v80_v60 = vadd.f32 %v466_v6, %v57_v53  ;;  %v59_v61 = vmul.f32 %v459_v3, %v36_v50  ;;  %v102_v62 = vpack.c.bf16 %v90_v43, %v89_v42 }
   0xf   :  { %v93_v63 = vmax.f32 %v77_v55, 0.0  ;;  %v94_v0 = vmax.f32 %v78_v56, 0.0  ;;  %v81_v1 = vadd.f32 %v466_v6, %v58_v57  ;;  %v103_v2 = vpack.c.bf16 %v92_v58, %v91_v54 }
  0x10   :  { %v95_v4 = vmax.f32 %v79_v59, 0.0  ;;  %v96_v5 = vmax.f32 %v80_v60, 0.0  ;;  %v82_v7 = vadd.f32 %v466_v6, %v59_v61  ;;  %v411_v12 = vmov 0.0  }
  0x11   :  { %v104_v8 = vpack.c.bf16 %v94_v0, %v93_v63  ;;  %399 = vmatprep.mubr.msk.bf16.mxu1 %vm115_vm0, %v103_v2  ;;  %v97_v10 = vmax.f32 %v81_v1, 0.0  ;;  %258 = vst.msk [vmem:[%s670_s5] sm:$0x1] %vm257_vm1, %v411_v12  ;;  %259 = vst.msk [vmem:[%s671_s6] sm:$0x1] %vm257_vm1, %v411_v12 }
  0x12   :  { %v105_v9 = vpack.c.bf16 %v96_v5, %v95_v4  ;;  %v98_v11 = vmax.f32 %v82_v7, 0.0 }
  0x13   :  { %400 = vmatmul.mubr.msk.bf16.vlgmr.msra.gmra.mrb[0].mxu1 %vm115_vm0, %v104_v8 }
  0x14   :  { %403 = vmatprep.mubr.msk.bf16.mxu1 %vm115_vm0, %v105_v9  ;;  %v106_v3 = vpack.c.bf16 %v98_v11, %v97_v10 }
  0x15   :  { %396 = vmatmul.mubr.msk.bf16.gmra.mrb[4].mxu0 %vm115_vm0, %v102_v62 }
  0x1b   :  { %404 = vmatmul.mubr.msk.bf16.gmra.mrb[4].mxu1 %vm115_vm0, %v106_v3 }
  0xe0   :  { %v393_v6 = vpop.f32.mrb[0].mxu0 }
  0xe1   :  { %239 = vst.msk [vmem:[%s672_s4 + $0x10] sm:$0xff] %vm115_vm0, %v393_v6  ;;  %v174_v13 = vpop.f32.mrb[1].mxu0  ;;  %v304_v17 = vmul.f32 %v393_v6, %v393_v6  ;;  %v264_v22 = vsel %vm115_vm0, %v393_v6, 0.0 }
  0xe2   :  { %237 = vst.msk [vmem:[%s672_s4] sm:$0xff] %vm115_vm0, %v174_v13  ;;  %v302_v14 = vmul.f32 %v174_v13, %v174_v13  ;;  %v394_v15 = vpop.f32.mrb[2].mxu0  ;;  %v261_v18 = vsel %vm115_vm0, %v174_v13, 0.0 }
  0xe3   :  { %240 = vst.msk [vmem:[%s672_s4 + $0x18] sm:$0xff] %vm115_vm0, %v394_v15  ;;  %v177_v16 = vpop.f32.mrb[3].mxu0  ;;  %v305_v24 = vmul.f32 %v394_v15, %v394_v15  ;;  %v321_v29 = vsel %vm115_vm0, %v304_v17, 0.0  ;;  %v266_v30 = vsel %vm115_vm0, %v394_v15, 0.0 }
  0xe4   :  { %238 = vst.msk [vmem:[%s672_s4 + $0x8] sm:$0xff] %vm115_vm0, %v177_v16  ;;  %v262_v19 = vsel %vm115_vm0, %v177_v16, 0.0  ;;  %v303_v20 = vmul.f32 %v177_v16, %v177_v16  ;;  %v318_v23 = vsel %vm115_vm0, %v302_v14, 0.0 }
  0xe5   :  { %v263_v21 = vadd.f32 %v262_v19, %v261_v18  ;;  %v323_v37 = vsel %vm115_vm0, %v305_v24, 0.0 }
  0xe6   :  { %v319_v25 = vsel %vm115_vm0, %v303_v20, 0.0  ;;  %v401_v28 = vpop.f32.mrb[0].mxu1 }
  0xe7   :  { %v265_v26 = vadd.f32 %v264_v22, %v263_v21  ;;  %v320_v27 = vadd.f32 %v319_v25, %v318_v23  ;;  %247 = vst.msk [vmem:[%s672_s4 + $0x50] sm:$0xff] %vm115_vm0, %v401_v28  ;;  %v206_v32 = vpop.f32.mrb[1].mxu1  ;;  %v312_v9 = vmul.f32 %v401_v28, %v401_v28  ;;  %v280_v12 = vsel %vm115_vm0, %v401_v28, 0.0 }
  0xe8   :  { %v397_v31 = vpop.f32.mrb[4].mxu0  ;;  %245 = vst.msk [vmem:[%s672_s4 + $0x40] sm:$0xff] %vm115_vm0, %v206_v32  ;;  %v402_v36 = vpop.f32.mrb[2].mxu1  ;;  %v310_v54 = vmul.f32 %v206_v32, %v206_v32  ;;  %v276_v60 = vsel %vm115_vm0, %v206_v32, 0.0 }
  0xe9   :  { %v322_v33 = vadd.f32 %v321_v29, %v320_v27  ;;  %243 = vst.msk [vmem:[%s672_s4 + $0x30] sm:$0xff] %vm115_vm0, %v397_v31  ;;  %v190_v34 = vpop.f32.mrb[5].mxu0  ;;  %v267_v35 = vadd.f32 %v266_v30, %v265_v26  ;;  %248 = vst.msk [vmem:[%s672_s4 + $0x58] sm:$0xff] %vm115_vm0, %v402_v36  ;;  %v209_v41 = vpop.f32.mrb[3].mxu1  ;;  %v308_v45 = vmul.f32 %v397_v31, %v397_v31  ;;  %v272_v51 = vsel %vm115_vm0, %v397_v31, 0.0 }
  0xea   :  { %241 = vst.msk [vmem:[%s672_s4 + $0x20] sm:$0xff] %vm115_vm0, %v190_v34  ;;  %v268_v38 = vsel %vm115_vm0, %v190_v34, 0.0  ;;  %v306_v39 = vmul.f32 %v190_v34, %v190_v34  ;;  %v398_v40 = vpop.f32.mrb[6].mxu0  ;;  %246 = vst.msk [vmem:[%s672_s4 + $0x48] sm:$0xff] %vm115_vm0, %v209_v41  ;;  %v333_v2 = vsel %vm115_vm0, %v310_v54, 0.0  ;;  %v311_v4 = vmul.f32 %v209_v41, %v209_v41 }
  0xeb   :  { %v269_v42 = vadd.f32 %v268_v38, %v267_v35  ;;  %v324_v43 = vadd.f32 %v323_v37, %v322_v33  ;;  %244 = vst.msk [vmem:[%s672_s4 + $0x38] sm:$0xff] %vm115_vm0, %v398_v40  ;;  %v193_v44 = vpop.f32.mrb[7].mxu0  ;;  %v309_v52 = vmul.f32 %v398_v40, %v398_v40  ;;  %v329_v58 = vsel %vm115_vm0, %v308_v45, 0.0  ;;  %v301_v54 = vld [vmem:[%s671_s6] sm:$0x1] }
  0xec   :  { %v325_v46 = vsel %vm115_vm0, %v306_v39, 0.0  ;;  %242 = vst.msk [vmem:[%s672_s4 + $0x28] sm:$0xff] %vm115_vm0, %v193_v44  ;;  %v270_v47 = vsel %vm115_vm0, %v193_v44, 0.0  ;;  %v307_v48 = vmul.f32 %v193_v44, %v193_v44  ;;  %v274_v59 = vsel %vm115_vm0, %v398_v40, 0.0 }
  0xed   :  { %v326_v49 = vadd.f32 %v325_v46, %v324_v43  ;;  %v271_v50 = vadd.f32 %v270_v47, %v269_v42  ;;  %v331_v1 = vsel %vm115_vm0, %v309_v52, 0.0  ;;  %v278_v10 = vsel %vm115_vm0, %v209_v41, 0.0 }
  0xee   :  { %v327_v53 = vsel %vm115_vm0, %v307_v48, 0.0  ;;  %v405_v57 = vpop.f32.mrb[4].mxu1  ;;  %v313_v6 = vmul.f32 %v402_v36, %v402_v36  ;;  %v335_v13 = vsel %vm115_vm0, %v311_v4, 0.0  ;;  %v337_v17 = vsel %vm115_vm0, %v312_v9, 0.0 }
  0xef   :  { %v273_v55 = vadd.f32 %v272_v51, %v271_v50  ;;  %v328_v56 = vadd.f32 %v327_v53, %v326_v49  ;;  %251 = vst.msk [vmem:[%s672_s4 + $0x70] sm:$0xff] %vm115_vm0, %v405_v57  ;;  %v222_v61 = vpop.f32.mrb[5].mxu1  ;;  %v282_v18 = vsel %vm115_vm0, %v402_v36, 0.0  ;;  %v316_v27 = vmul.f32 %v405_v57, %v405_v57  ;;  %v260_v51 = vld [vmem:[%s670_s5] sm:$0x1] }
  0xf0   :  { %249 = vst.msk [vmem:[%s672_s4 + $0x60] sm:$0xff] %vm115_vm0, %v222_v61  ;;  %v406_v0 = vpop.f32.mrb[6].mxu1  ;;  %v314_v14 = vmul.f32 %v222_v61, %v222_v61  ;;  %v284_v19 = vsel %vm115_vm0, %v222_v61, 0.0  ;;  %v339_v22 = vsel %vm115_vm0, %v313_v6, 0.0  ;;  %v288_v31 = vsel %vm115_vm0, %v405_v57, 0.0 }
  0xf1   :  { %v330_v62 = vadd.f32 %v329_v58, %v328_v56  ;;  %v275_v63 = vadd.f32 %v274_v59, %v273_v55  ;;  %252 = vst.msk [vmem:[%s672_s4 + $0x78] sm:$0xff] %vm115_vm0, %v406_v0  ;;  %v225_v5 = vpop.f32.mrb[7].mxu1  ;;  %v317_v32 = vmul.f32 %v406_v0, %v406_v0  ;;  %v345_v36 = vsel %vm115_vm0, %v316_v27, 0.0 }
  0xf2   :  { %250 = vst.msk [vmem:[%s672_s4 + $0x68] sm:$0xff] %vm115_vm0, %v225_v5  ;;  %v341_v23 = vsel %vm115_vm0, %v314_v14, 0.0  ;;  %v315_v24 = vmul.f32 %v225_v5, %v225_v5  ;;  %v286_v28 = vsel %vm115_vm0, %v225_v5, 0.0  ;;  %v290_v37 = vsel %vm115_vm0, %v406_v0, 0.0 }
  0xf3   :  { %v277_v7 = vadd.f32 %v276_v60, %v275_v63  ;;  %v332_v8 = vadd.f32 %v331_v1, %v330_v62  ;;  %v347_v40 = vsel %vm115_vm0, %v317_v32, 0.0 }
  0xf4   :  { %v343_v33 = vsel %vm115_vm0, %v315_v24, 0.0 }
  0xf5   :  { %v334_v11 = vadd.f32 %v333_v2, %v332_v8  ;;  %v279_v3 = vadd.f32 %v278_v10, %v277_v7 }
  0xf7   :  { %v281_v15 = vadd.f32 %v280_v12, %v279_v3  ;;  %v336_v16 = vadd.f32 %v335_v13, %v334_v11 }
  0xf9   :  { %v338_v20 = vadd.f32 %v337_v17, %v336_v16  ;;  %v283_v21 = vadd.f32 %v282_v18, %v281_v15 }
  0xfb   :  { %v285_v25 = vadd.f32 %v284_v19, %v283_v21  ;;  %v340_v26 = vadd.f32 %v339_v22, %v338_v20 }
  0xfd   :  { %v342_v29 = vadd.f32 %v341_v23, %v340_v26  ;;  %v287_v30 = vadd.f32 %v286_v28, %v285_v25 }
  0xff   :  { %v289_v34 = vadd.f32 %v288_v31, %v287_v30  ;;  %v344_v35 = vadd.f32 %v343_v33, %v342_v29 }
 0x101   :  { %v291_v38 = vadd.f32 %v290_v37, %v289_v34  ;;  %v346_v39 = vadd.f32 %v345_v36, %v344_v35 }
 0x103   :  { %v292_v41 = vrot.slane %v291_v38, 4  ;;  %v348_v42 = vadd.f32 %v347_v40, %v346_v39 }
 0x105   :  { %v293_v43 = vadd.f32 %v292_v41, %v291_v38  ;;  %v349_v44 = vrot.slane %v348_v42, 4 }
 0x107   :  { %v294_v45 = vrot.slane %v293_v43, 2  ;;  %v350_v46 = vadd.f32 %v349_v44, %v348_v42 }
 0x109   :  { %v295_v47 = vadd.f32 %v294_v45, %v293_v43  ;;  %v351_v48 = vrot.slane %v350_v46, 2 }
 0x10b   :  { %v296_v49 = vrot.slane %v295_v47, 1  ;;  %v352_v50 = vadd.f32 %v351_v48, %v350_v46 }
 0x10d   :  { %v297_v52 = vadd.f32 %v296_v49, %v295_v47  ;;  %v353_v53 = vrot.slane %v352_v50, 1 }
 0x10f   :  { %v298_v55 = vadd.f32 %v297_v52, %v260_v51  ;;  %v354_v56 = vadd.f32 %v353_v53, %v352_v50 }
 0x111   :  { %300 = vst.msk [vmem:[%s670_s5] sm:$0x1] %vm257_vm1, %v298_v55  ;;  %v355_v57 = vadd.f32 %v354_v56, %v301_v54 }
 0x113   :  { %356 = vst.msk [vmem:[%s671_s6] sm:$0x1] %vm257_vm1, %v355_v57 }

// kernel: densenet_forward.16
= control target key start
LH: loop header
LB: loop body
LE: loop exit
PB: predicated region body
PF: predicated region fallthrough
CT: control target
= control target key end

     0   :  { %vm144_vm0 = vcmask 1043456   ;;  %vm119_vm1 = vcmask 195584   ;;  %vm266_vm2 = vcmask 122880   ;;  %vm245_vm3 = vcmask 130048   ;;  %s690_s3 = inlined_call_operand.vmem [shape: bf16[24,16], index: 3, kind: input, shape index: {}]   ;;  %s691_s0 = inlined_call_operand.vmem [shape: f32[128,24], index: 0, kind: input, shape index: {}]   ;;  %s692_s1 = inlined_call_operand.vmem [shape: f32[1,24], index: 1, kind: input, shape index: {}]   ;;  %s693_s2 = inlined_call_operand.vmem [shape: f32[1,24], index: 2, kind: input, shape index: {}]   ;;  %s694_s5 = inlined_call_operand.vmem [shape: f32[1,16], index: 5, kind: output, shape index: {1}]   ;;  %s695_s6 = inlined_call_operand.vmem [shape: f32[1,16], index: 6, kind: output, shape index: {2}]   ;;  %s696_s4 = inlined_call_operand.vmem [shape: f32[128,16], index: 4, kind: output, shape index: {0}]  }
   0x1   :  { %v427_v0 = vld [vmem:[%s690_s3] sm:$0xff]   ;;  %v428_v1 = vld [vmem:[%s690_s3 + $0x8] ss:$0 sps:$4 sm:$0xff]   ;;  %v23_v8 = vld [vmem:[%s691_s0 + $0x10] sm:$0xff] }
   0x2   :  { %v21_v2 = vld [vmem:[%s691_s0] sm:$0xff]  ;;  %400 = vmatprep.subr.bf16.mxu0 %v427_v0  ;;  %v22_v3 = vld [vmem:[%s691_s0 + $0x8] sm:$0xff]  ;;  %420 = vmatprep.subr.bf16.mxu1 %v427_v0  ;;  %v24_v9 = vld [vmem:[%s691_s0 + $0x18] sm:$0xff]  ;;  %v146_v11 = vsel %vm144_vm0, %v428_v1, 0 }
   0x3   :  { %v480_v4 = vld [vmem:[%s692_s1] ss:$0 sm:$0xff]  ;;  %401 = vmatpush3.bf16.msra.mxu0 %v427_v0  ;;  %422 = vmatpush3.bf16.msra.mxu1 %v427_v0  ;;  %v26_v14 = vld [vmem:[%s691_s0 + $0x28] sm:$0xff]  ;;  %v27_v16 = vld [vmem:[%s691_s0 + $0x30] sm:$0xff] }
   0x4   :  { %v485_v5 = vld [vmem:[%s693_s2] ss:$0 sm:$0xff]  ;;  %v44_v6 = vmul.f32 %v480_v4, %v21_v2  ;;  %v45_v7 = vmul.f32 %v480_v4, %v22_v3  ;;  %424 = vmatprep.subr.msk.bf16.mxu0 %vm144_vm0, %v428_v1  ;;  %v46_v12 = vmul.f32 %v480_v4, %v23_v8  ;;  %v47_v13 = vmul.f32 %v480_v4, %v24_v9  ;;  %v28_v17 = vld [vmem:[%s691_s0 + $0x38] sm:$0xff]  ;;  %v30_v31 = vld [vmem:[%s691_s0 + $0x48] sm:$0xff] }
   0x5   :  { %v25_v10 = vld [vmem:[%s691_s0 + $0x20] sm:$0xff]  ;;  %425 = vmatprep.subr.msk.bf16.mxu1 %vm144_vm0, %v428_v1  ;;  %v49_v20 = vmul.f32 %v480_v4, %v26_v14  ;;  %v50_v21 = vmul.f32 %v480_v4, %v27_v16  ;;  %v51_v25 = vmul.f32 %v480_v4, %v28_v17  ;;  %v31_v32 = vld [vmem:[%s691_s0 + $0x50] sm:$0xff]  ;;  %v32_v37 = vld [vmem:[%s691_s0 + $0x58] sm:$0xff]  ;;  %v53_v45 = vmul.f32 %v480_v4, %v30_v31 }
   0x6   :  { %v48_v15 = vmul.f32 %v480_v4, %v25_v10  ;;  %v67_v18 = vadd.f32 %v485_v5, %v44_v6  ;;  %v68_v19 = vadd.f32 %v485_v5, %v45_v7  ;;  %v69_v22 = vadd.f32 %v485_v5, %v46_v12  ;;  %v29_v26 = vld [vmem:[%s691_s0 + $0x40] sm:$0xff]  ;;  %v34_v42 = vld [vmem:[%s691_s0 + $0x68] sm:$0xff]  ;;  %v35_v47 = vld [vmem:[%s691_s0 + $0x70] sm:$0xff] }
   0x7   :  { %v70_v23 = vadd.f32 %v485_v5, %v47_v13  ;;  %403 = vmatpush3.bf16.msra.mxu0 %v146_v11  ;;  %v72_v29 = vadd.f32 %v485_v5, %v49_v20  ;;  %v73_v30 = vadd.f32 %v485_v5, %v50_v21  ;;  %423 = vmatpush3.bf16.msra.mxu1 %v146_v11  ;;  %v33_v38 = vld [vmem:[%s691_s0 + $0x60] sm:$0xff]  ;;  %v36_v52 = vld [vmem:[%s691_s0 + $0x78] sm:$0xff]  ;;  %v429_v14 = vmov 0.0  }
   0x8   :  { %v71_v24 = vadd.f32 %v485_v5, %v48_v15  ;;  %v83_v27 = vmax.f32 %v67_v18, 0.0  ;;  %v84_v28 = vmax.f32 %v68_v19, 0.0  ;;  %v85_v33 = vmax.f32 %v69_v22, 0.0  ;;  %267 = vst.msk [vmem:[%s694_s5] sm:$0x1] %vm266_vm2, %v429_v14 }
   0x9   :  { %v86_v34 = vmax.f32 %v70_v23, 0.0  ;;  %v74_v36 = vadd.f32 %v485_v5, %v51_v25  ;;  %v88_v40 = vmax.f32 %v72_v29, 0.0  ;;  %v52_v41 = vmul.f32 %v480_v4, %v29_v26  ;;  %268 = vst.msk [vmem:[%s695_s6] sm:$0x1] %vm266_vm2, %v429_v14 }
   0xa   :  { %v87_v35 = vmax.f32 %v71_v24, 0.0  ;;  %v99_v39 = vpack.c.bf16 %v84_v28, %v83_v27  ;;  %v89_v44 = vmax.f32 %v73_v30, 0.0  ;;  %v54_v46 = vmul.f32 %v480_v4, %v31_v32 }
   0xb   :  { %v100_v43 = vpack.c.bf16 %v86_v34, %v85_v33  ;;  %v75_v49 = vadd.f32 %v485_v5, %v52_v41  ;;  %v55_v50 = vmul.f32 %v480_v4, %v32_v37  ;;  %v56_v51 = vmul.f32 %v480_v4, %v33_v38 }
   0xc   :  { %404 = vmatprep.mubr.msk.bf16.mxu0 %vm119_vm1, %v99_v39  ;;  %v101_v48 = vpack.c.bf16 %v88_v40, %v87_v35  ;;  %v90_v53 = vmax.f32 %v74_v36, 0.0  ;;  %v76_v54 = vadd.f32 %v485_v5, %v53_v45  ;;  %v77_v55 = vadd.f32 %v485_v5, %v54_v46 }
   0xd   :  { %405 = vmatmul.mubr.msk.bf16.vlgmr.msra.gmra.mrb[0].mxu0 %vm119_vm1, %v100_v43  ;;  %v57_v56 = vmul.f32 %v480_v4, %v34_v42  ;;  %v91_v57 = vmax.f32 %v75_v49, 0.0  ;;  %v78_v58 = vadd.f32 %v485_v5, %v55_v50  ;;  %v79_v59 = vadd.f32 %v485_v5, %v56_v51 }
   0xe   :  { %408 = vmatprep.mubr.msk.bf16.mxu0 %vm119_vm1, %v101_v48  ;;  %v58_v60 = vmul.f32 %v480_v4, %v35_v47  ;;  %v92_v61 = vmax.f32 %v76_v54, 0.0  ;;  %v93_v62 = vmax.f32 %v77_v55, 0.0  ;;  %v59_v0 = vmul.f32 %v480_v4, %v36_v52 }
   0xf   :  { %v80_v63 = vadd.f32 %v485_v5, %v57_v56  ;;  %v94_v1 = vmax.f32 %v78_v58, 0.0  ;;  %v95_v2 = vmax.f32 %v79_v59, 0.0  ;;  %v102_v6 = vpack.c.bf16 %v90_v53, %v89_v44 }
  0x10   :  { %v81_v3 = vadd.f32 %v485_v5, %v58_v60  ;;  %v103_v7 = vpack.c.bf16 %v92_v61, %v91_v57  ;;  %v82_v9 = vadd.f32 %v485_v5, %v59_v0 }
  0x11   :  { %v96_v8 = vmax.f32 %v80_v63, 0.0  ;;  %v104_v10 = vpack.c.bf16 %v94_v1, %v93_v62 }
  0x12   :  { %412 = vmatprep.mubr.msk.bf16.mxu1 %vm119_vm1, %v103_v7  ;;  %v97_v12 = vmax.f32 %v81_v3, 0.0  ;;  %v98_v13 = vmax.f32 %v82_v9, 0.0 }
  0x13   :  { %v105_v11 = vpack.c.bf16 %v96_v8, %v95_v2  ;;  %413 = vmatmul.mubr.msk.bf16.vlgmr.msra.gmra.mrb[0].mxu1 %vm119_vm1, %v104_v10 }
  0x14   :  { %v106_v4 = vpack.c.bf16 %v98_v13, %v97_v12 }
  0x15   :  { %409 = vmatmul.mubr.msk.bf16.gmra.mrb[4].mxu0 %vm119_vm1, %v102_v6  ;;  %416 = vmatprep.mubr.msk.bf16.mxu1 %vm119_vm1, %v105_v11 }
  0x1b   :  { %417 = vmatmul.mubr.msk.bf16.gmra.mrb[4].mxu1 %vm119_vm1, %v106_v4 }
  0xe0   :  { %v406_v5 = vpop.f32.mrb[0].mxu0 }
  0xe1   :  { %248 = vst.msk [vmem:[%s696_s4 + $0x10] sm:$0xff] %vm245_vm3, %v406_v5  ;;  %v182_v15 = vpop.f32.mrb[1].mxu0  ;;  %v313_v19 = vmul.f32 %v406_v5, %v406_v5  ;;  %v273_v24 = vsel %vm245_vm3, %v406_v5, 0.0 }
  0xe2   :  { %246 = vst.msk [vmem:[%s696_s4] sm:$0xff] %vm245_vm3, %v182_v15  ;;  %v311_v16 = vmul.f32 %v182_v15, %v182_v15  ;;  %v407_v17 = vpop.f32.mrb[2].mxu0  ;;  %v270_v20 = vsel %vm245_vm3, %v182_v15, 0.0 }
  0xe3   :  { %249 = vst.msk [vmem:[%s696_s4 + $0x18] sm:$0xff] %vm245_vm3, %v407_v17  ;;  %v185_v18 = vpop.f32.mrb[3].mxu0  ;;  %v314_v26 = vmul.f32 %v407_v17, %v407_v17  ;;  %v330_v31 = vsel %vm245_vm3, %v313_v19, 0.0  ;;  %v275_v32 = vsel %vm245_vm3, %v407_v17, 0.0 }
  0xe4   :  { %247 = vst.msk [vmem:[%s696_s4 + $0x8] sm:$0xff] %vm245_vm3, %v185_v18  ;;  %v271_v21 = vsel %vm245_vm3, %v185_v18, 0.0  ;;  %v312_v22 = vmul.f32 %v185_v18, %v185_v18  ;;  %v327_v25 = vsel %vm245_vm3, %v311_v16, 0.0 }
  0xe5   :  { %v272_v23 = vadd.f32 %v271_v21, %v270_v20  ;;  %v332_v39 = vsel %vm245_vm3, %v314_v26, 0.0 }
  0xe6   :  { %v328_v27 = vsel %vm245_vm3, %v312_v22, 0.0  ;;  %v414_v30 = vpop.f32.mrb[0].mxu1 }
  0xe7   :  { %v274_v28 = vadd.f32 %v273_v24, %v272_v23  ;;  %v329_v29 = vadd.f32 %v328_v27, %v327_v25  ;;  %256 = vst.msk [vmem:[%s696_s4 + $0x50] sm:$0xff] %vm245_vm3, %v414_v30  ;;  %v214_v34 = vpop.f32.mrb[1].mxu1  ;;  %v321_v11 = vmul.f32 %v414_v30, %v414_v30  ;;  %v289_v14 = vsel %vm245_vm3, %v414_v30, 0.0 }
  0xe8   :  { %v410_v33 = vpop.f32.mrb[4].mxu0  ;;  %254 = vst.msk [vmem:[%s696_s4 + $0x40] sm:$0xff] %vm245_vm3, %v214_v34  ;;  %v415_v38 = vpop.f32.mrb[2].mxu1  ;;  %v319_v56 = vmul.f32 %v214_v34, %v214_v34  ;;  %v285_v62 = vsel %vm245_vm3, %v214_v34, 0.0 }
  0xe9   :  { %v331_v35 = vadd.f32 %v330_v31, %v329_v29  ;;  %252 = vst.msk [vmem:[%s696_s4 + $0x30] sm:$0xff] %vm245_vm3, %v410_v33  ;;  %v198_v36 = vpop.f32.mrb[5].mxu0  ;;  %v276_v37 = vadd.f32 %v275_v32, %v274_v28  ;;  %257 = vst.msk [vmem:[%s696_s4 + $0x58] sm:$0xff] %vm245_vm3, %v415_v38  ;;  %v217_v43 = vpop.f32.mrb[3].mxu1  ;;  %v317_v47 = vmul.f32 %v410_v33, %v410_v33  ;;  %v281_v53 = vsel %vm245_vm3, %v410_v33, 0.0 }
  0xea   :  { %250 = vst.msk [vmem:[%s696_s4 + $0x20] sm:$0xff] %vm245_vm3, %v198_v36  ;;  %v277_v40 = vsel %vm245_vm3, %v198_v36, 0.0  ;;  %v315_v41 = vmul.f32 %v198_v36, %v198_v36  ;;  %v411_v42 = vpop.f32.mrb[6].mxu0  ;;  %255 = vst.msk [vmem:[%s696_s4 + $0x48] sm:$0xff] %vm245_vm3, %v217_v43  ;;  %v342_v6 = vsel %vm245_vm3, %v319_v56, 0.0  ;;  %v320_v7 = vmul.f32 %v217_v43, %v217_v43 }
  0xeb   :  { %v278_v44 = vadd.f32 %v277_v40, %v276_v37  ;;  %v333_v45 = vadd.f32 %v332_v39, %v331_v35  ;;  %253 = vst.msk [vmem:[%s696_s4 + $0x38] sm:$0xff] %vm245_vm3, %v411_v42  ;;  %v201_v46 = vpop.f32.mrb[7].mxu0  ;;  %v318_v54 = vmul.f32 %v411_v42, %v411_v42  ;;  %v338_v60 = vsel %vm245_vm3, %v317_v47, 0.0  ;;  %v310_v56 = vld [vmem:[%s695_s6] sm:$0x1] }
  0xec   :  { %v334_v48 = vsel %vm245_vm3, %v315_v41, 0.0  ;;  %251 = vst.msk [vmem:[%s696_s4 + $0x28] sm:$0xff] %vm245_vm3, %v201_v46  ;;  %v279_v49 = vsel %vm245_vm3, %v201_v46, 0.0  ;;  %v316_v50 = vmul.f32 %v201_v46, %v201_v46  ;;  %v283_v61 = vsel %vm245_vm3, %v411_v42, 0.0 }
  0xed   :  { %v335_v51 = vadd.f32 %v334_v48, %v333_v45  ;;  %v280_v52 = vadd.f32 %v279_v49, %v278_v44  ;;  %v340_v3 = vsel %vm245_vm3, %v318_v54, 0.0  ;;  %v287_v12 = vsel %vm245_vm3, %v217_v43, 0.0 }
  0xee   :  { %v336_v55 = vsel %vm245_vm3, %v316_v50, 0.0  ;;  %v418_v59 = vpop.f32.mrb[4].mxu1  ;;  %v322_v5 = vmul.f32 %v415_v38, %v415_v38  ;;  %v344_v15 = vsel %vm245_vm3, %v320_v7, 0.0  ;;  %v346_v19 = vsel %vm245_vm3, %v321_v11, 0.0 }
  0xef   :  { %v282_v57 = vadd.f32 %v281_v53, %v280_v52  ;;  %v337_v58 = vadd.f32 %v336_v55, %v335_v51  ;;  %260 = vst.msk [vmem:[%s696_s4 + $0x70] sm:$0xff] %vm245_vm3, %v418_v59  ;;  %v230_v63 = vpop.f32.mrb[5].mxu1  ;;  %v291_v20 = vsel %vm245_vm3, %v415_v38, 0.0  ;;  %v325_v29 = vmul.f32 %v418_v59, %v418_v59  ;;  %v269_v53 = vld [vmem:[%s694_s5] sm:$0x1] }
  0xf0   :  { %258 = vst.msk [vmem:[%s696_s4 + $0x60] sm:$0xff] %vm245_vm3, %v230_v63  ;;  %v419_v2 = vpop.f32.mrb[6].mxu1  ;;  %v323_v16 = vmul.f32 %v230_v63, %v230_v63  ;;  %v293_v21 = vsel %vm245_vm3, %v230_v63, 0.0  ;;  %v348_v24 = vsel %vm245_vm3, %v322_v5, 0.0  ;;  %v297_v33 = vsel %vm245_vm3, %v418_v59, 0.0 }
  0xf1   :  { %v339_v0 = vadd.f32 %v338_v60, %v337_v58  ;;  %v284_v1 = vadd.f32 %v283_v61, %v282_v57  ;;  %261 = vst.msk [vmem:[%s696_s4 + $0x78] sm:$0xff] %vm245_vm3, %v419_v2  ;;  %v233_v8 = vpop.f32.mrb[7].mxu1  ;;  %v326_v34 = vmul.f32 %v419_v2, %v419_v2  ;;  %v354_v38 = vsel %vm245_vm3, %v325_v29, 0.0 }
  0xf2   :  { %259 = vst.msk [vmem:[%s696_s4 + $0x68] sm:$0xff] %vm245_vm3, %v233_v8  ;;  %v350_v25 = vsel %vm245_vm3, %v323_v16, 0.0  ;;  %v324_v26 = vmul.f32 %v233_v8, %v233_v8  ;;  %v295_v30 = vsel %vm245_vm3, %v233_v8, 0.0  ;;  %v299_v39 = vsel %vm245_vm3, %v419_v2, 0.0 }
  0xf3   :  { %v286_v9 = vadd.f32 %v285_v62, %v284_v1  ;;  %v341_v10 = vadd.f32 %v340_v3, %v339_v0  ;;  %v356_v42 = vsel %vm245_vm3, %v326_v34, 0.0 }
  0xf4   :  { %v352_v35 = vsel %vm245_vm3, %v324_v26, 0.0 }
  0xf5   :  { %v343_v13 = vadd.f32 %v342_v6, %v341_v10  ;;  %v288_v4 = vadd.f32 %v287_v12, %v286_v9 }
  0xf7   :  { %v290_v17 = vadd.f32 %v289_v14, %v288_v4  ;;  %v345_v18 = vadd.f32 %v344_v15, %v343_v13 }
  0xf9   :  { %v347_v22 = vadd.f32 %v346_v19, %v345_v18  ;;  %v292_v23 = vadd.f32 %v291_v20, %v290_v17 }
  0xfb   :  { %v294_v27 = vadd.f32 %v293_v21, %v292_v23  ;;  %v349_v28 = vadd.f32 %v348_v24, %v347_v22 }
  0xfd   :  { %v351_v31 = vadd.f32 %v350_v25, %v349_v28  ;;  %v296_v32 = vadd.f32 %v295_v30, %v294_v27 }
  0xff   :  { %v298_v36 = vadd.f32 %v297_v33, %v296_v32  ;;  %v353_v37 = vadd.f32 %v352_v35, %v351_v31 }
 0x101   :  { %v300_v40 = vadd.f32 %v299_v39, %v298_v36  ;;  %v355_v41 = vadd.f32 %v354_v38, %v353_v37 }
 0x103   :  { %v301_v43 = vrot.slane %v300_v40, 4  ;;  %v357_v44 = vadd.f32 %v356_v42, %v355_v41 }
 0x105   :  { %v302_v45 = vadd.f32 %v301_v43, %v300_v40  ;;  %v358_v46 = vrot.slane %v357_v44, 4 }
 0x107   :  { %v303_v47 = vrot.slane %v302_v45, 2  ;;  %v359_v48 = vadd.f32 %v358_v46, %v357_v44 }
 0x109   :  { %v304_v49 = vadd.f32 %v303_v47, %v302_v45  ;;  %v360_v50 = vrot.slane %v359_v48, 2 }
 0x10b   :  { %v305_v51 = vrot.slane %v304_v49, 1  ;;  %v361_v52 = vadd.f32 %v360_v50, %v359_v48 }
 0x10d   :  { %v306_v54 = vadd.f32 %v305_v51, %v304_v49  ;;  %v362_v55 = vrot.slane %v361_v52, 1 }
 0x10f   :  { %v307_v57 = vadd.f32 %v306_v54, %v269_v53  ;;  %v363_v58 = vadd.f32 %v362_v55, %v361_v52 }
 0x111   :  { %309 = vst.msk [vmem:[%s694_s5] sm:$0x1] %vm266_vm2, %v307_v57  ;;  %v364_v59 = vadd.f32 %v363_v58, %v310_v56 }
 0x113   :  { %365 = vst.msk [vmem:[%s695_s6] sm:$0x1] %vm266_vm2, %v364_v59 }

// kernel: densenet_forward.18
= control target key start
LH: loop header
LB: loop body
LE: loop exit
PB: predicated region body
PF: predicated region fallthrough
CT: control target
= control target key end

     0   :  { %vm120_vm0 = vcmask 261120   ;;  %vm242_vm1 = vcmask 130048   ;;  %s504_s3 = inlined_call_operand.vmem [shape: bf16[32,16], index: 3, kind: input, shape index: {}]   ;;  %s505_s0 = inlined_call_operand.vmem [shape: f32[128,32], index: 0, kind: input, shape index: {}]   ;;  %s506_s1 = inlined_call_operand.vmem [shape: f32[1,32], index: 1, kind: input, shape index: {}]   ;;  %s507_s2 = inlined_call_operand.vmem [shape: f32[1,32], index: 2, kind: input, shape index: {}]   ;;  %s508_s4 = inlined_call_operand.vmem [shape: f32[128,16], index: 4, kind: output, shape index: {}]  }
   0x1   :  { %v309_v0 = vld [vmem:[%s504_s3] sm:$0xff]   ;;  %v310_v1 = vld [vmem:[%s504_s3 + $0x8] sm:$0xff]   ;;  %v20_v12 = vld [vmem:[%s505_s0 + $0x10] sm:$0xff] }
   0x2   :  { %285 = vmatprep.subr.bf16.mxu0 %v309_v0  ;;  %305 = vmatprep.subr.bf16.mxu1 %v309_v0  ;;  %v18_v2 = vld [vmem:[%s505_s0] sm:$0xff]  ;;  %v19_v3 = vld [vmem:[%s505_s0 + $0x8] sm:$0xff]  ;;  %v21_v13 = vld [vmem:[%s505_s0 + $0x18] sm:$0xff] }
   0x3   :  { %v351_v4 = vld [vmem:[%s506_s1] ss:$0 sm:$0xff]  ;;  %286 = vmatpush3.bf16.msra.mxu0 %v309_v0  ;;  %307 = vmatpush3.bf16.msra.mxu1 %v309_v0  ;;  %v27_v9 = vld [vmem:[%s505_s0 + $0x48] sm:$0xff]  ;;  %v28_v14 = vld [vmem:[%s505_s0 + $0x50] sm:$0xff] }
   0x4   :  { %v41_v5 = vmul.f32 %v351_v4, %v18_v2  ;;  %v42_v6 = vmul.f32 %v351_v4, %v19_v3  ;;  %v358_v7 = vld [vmem:[%s507_s2] ss:$0 sm:$0xff]  ;;  %287 = vmatprep.subr.bf16.mxu0 %v310_v1  ;;  %306 = vmatprep.subr.bf16.mxu1 %v310_v1  ;;  %v50_v11 = vmul.f32 %v351_v4, %v27_v9  ;;  %v29_v19 = vld [vmem:[%s505_s0 + $0x58] sm:$0xff]  ;;  %v23_v29 = vld [vmem:[%s505_s0 + $0x28] sm:$0xff] }
   0x5   :  { %v26_v8 = vld [vmem:[%s505_s0 + $0x40] sm:$0xff]  ;;  %v43_v17 = vmul.f32 %v351_v4, %v20_v12  ;;  %v44_v18 = vmul.f32 %v351_v4, %v21_v13  ;;  %v51_v22 = vmul.f32 %v351_v4, %v28_v14  ;;  %v52_v23 = vmul.f32 %v351_v4, %v29_v19  ;;  %v31_v35 = vld [vmem:[%s505_s0 + $0x68] sm:$0xff]  ;;  %v24_v40 = vld [vmem:[%s505_s0 + $0x30] sm:$0xff] }
   0x6   :  { %v49_v10 = vmul.f32 %v351_v4, %v26_v8  ;;  %v64_v15 = vadd.f32 %v358_v7, %v41_v5  ;;  %v65_v16 = vadd.f32 %v358_v7, %v42_v6  ;;  %v73_v21 = vadd.f32 %v358_v7, %v50_v11  ;;  %v22_v24 = vld [vmem:[%s505_s0 + $0x20] sm:$0xff]  ;;  %v25_v41 = vld [vmem:[%s505_s0 + $0x38] sm:$0xff]  ;;  %v32_v46 = vld [vmem:[%s505_s0 + $0x70] sm:$0xff] }
   0x7   :  { %288 = vmatpush3.bf16.msra.mxu0 %v310_v1  ;;  %308 = vmatpush3.bf16.msra.mxu1 %v310_v1  ;;  %v66_v27 = vadd.f32 %v358_v7, %v43_v17  ;;  %v67_v28 = vadd.f32 %v358_v7, %v44_v18  ;;  %v74_v32 = vadd.f32 %v358_v7, %v51_v22  ;;  %v30_v34 = vld [vmem:[%s505_s0 + $0x60] sm:$0xff]  ;;  %v33_v51 = vld [vmem:[%s505_s0 + $0x78] sm:$0xff] }
   0x8   :  { %v72_v20 = vadd.f32 %v358_v7, %v49_v10  ;;  %v80_v25 = vmax.f32 %v64_v15, 0.0  ;;  %v81_v26 = vmax.f32 %v65_v16, 0.0  ;;  %v89_v31 = vmax.f32 %v73_v21, 0.0 }
   0x9   :  { %v75_v33 = vadd.f32 %v358_v7, %v52_v23  ;;  %v82_v37 = vmax.f32 %v66_v27, 0.0  ;;  %v83_v38 = vmax.f32 %v67_v28, 0.0  ;;  %v45_v39 = vmul.f32 %v351_v4, %v22_v24 }
   0xa   :  { %v88_v30 = vmax.f32 %v72_v20, 0.0  ;;  %v96_v36 = vpack.c.bf16 %v81_v26, %v80_v25  ;;  %v90_v43 = vmax.f32 %v74_v32, 0.0  ;;  %v46_v45 = vmul.f32 %v351_v4, %v23_v29 }
   0xb   :  { %v91_v44 = vmax.f32 %v75_v33, 0.0  ;;  %v97_v47 = vpack.c.bf16 %v83_v38, %v82_v37  ;;  %v68_v48 = vadd.f32 %v358_v7, %v45_v39  ;;  %v53_v49 = vmul.f32 %v351_v4, %v30_v34 }
   0xc   :  { %v100_v42 = vpack.c.bf16 %v89_v31, %v88_v30  ;;  %289 = vmatprep.mubr.msk.bf16.mxu0 %vm120_vm0, %v96_v36  ;;  %v54_v50 = vmul.f32 %v351_v4, %v31_v35  ;;  %v69_v53 = vadd.f32 %v358_v7, %v46_v45  ;;  %v47_v54 = vmul.f32 %v351_v4, %v24_v40 }
   0xd   :  { %v101_v52 = vpack.c.bf16 %v91_v44, %v90_v43  ;;  %v48_v55 = vmul.f32 %v351_v4, %v25_v41  ;;  %290 = vmatmul.mubr.msk.bf16.vlgmr.msra.gmra.mrb[0].mxu0 %vm120_vm0, %v97_v47  ;;  %v84_v56 = vmax.f32 %v68_v48, 0.0  ;;  %v76_v57 = vadd.f32 %v358_v7, %v53_v49 }
   0xe   :  { %297 = vmatprep.mubr.msk.bf16.mxu1 %vm120_vm0, %v100_v42  ;;  %v77_v58 = vadd.f32 %v358_v7, %v54_v50  ;;  %v55_v59 = vmul.f32 %v351_v4, %v32_v46  ;;  %v85_v60 = vmax.f32 %v69_v53, 0.0  ;;  %v70_v61 = vadd.f32 %v358_v7, %v47_v54 }
   0xf   :  { %298 = vmatmul.mubr.msk.bf16.vlgmr.msra.gmra.mrb[0].mxu1 %vm120_vm0, %v101_v52  ;;  %v71_v62 = vadd.f32 %v358_v7, %v48_v55  ;;  %v56_v63 = vmul.f32 %v351_v4, %v33_v51  ;;  %v92_v0 = vmax.f32 %v76_v57, 0.0 }
  0x10   :  { %v93_v1 = vmax.f32 %v77_v58, 0.0  ;;  %v78_v2 = vadd.f32 %v358_v7, %v55_v59  ;;  %v98_v3 = vpack.c.bf16 %v85_v60, %v84_v56  ;;  %v86_v5 = vmax.f32 %v70_v61, 0.0 }
  0x11   :  { %v87_v6 = vmax.f32 %v71_v62, 0.0  ;;  %v79_v8 = vadd.f32 %v358_v7, %v56_v63 }
  0x12   :  { %v102_v9 = vpack.c.bf16 %v93_v1, %v92_v0  ;;  %v94_v10 = vmax.f32 %v78_v2, 0.0  ;;  %293 = vmatprep.mubr.msk.bf16.mxu0 %vm120_vm0, %v98_v3 }
  0x13   :  { %v99_v11 = vpack.c.bf16 %v87_v6, %v86_v5  ;;  %v95_v12 = vmax.f32 %v79_v8, 0.0 }
  0x14   :  { %301 = vmatprep.mubr.msk.bf16.mxu1 %vm120_vm0, %v102_v9 }
  0x15   :  { %v103_v13 = vpack.c.bf16 %v95_v12, %v94_v10  ;;  %294 = vmatmul.mubr.msk.bf16.gmra.mrb[4].mxu0 %vm120_vm0, %v99_v11 }
  0x17   :  { %302 = vmatmul.mubr.msk.bf16.gmra.mrb[4].mxu1 %vm120_vm0, %v103_v13 }
  0xe0   :  { %v291_v4 = vpop.f32.mrb[0].mxu0 }
  0xe1   :  { %245 = vst.msk [vmem:[%s508_s4 + $0x10] sm:$0xff] %vm242_vm1, %v291_v4  ;;  %v179_v14 = vpop.f32.mrb[1].mxu0 }
  0xe2   :  { %v299_v7 = vpop.f32.mrb[0].mxu1  ;;  %243 = vst.msk [vmem:[%s508_s4] sm:$0xff] %vm242_vm1, %v179_v14  ;;  %v292_v16 = vpop.f32.mrb[2].mxu0 }
  0xe3   :  { %253 = vst.msk [vmem:[%s508_s4 + $0x50] sm:$0xff] %vm242_vm1, %v299_v7  ;;  %v211_v15 = vpop.f32.mrb[1].mxu1  ;;  %246 = vst.msk [vmem:[%s508_s4 + $0x18] sm:$0xff] %vm242_vm1, %v292_v16  ;;  %v182_v18 = vpop.f32.mrb[3].mxu0 }
  0xe4   :  { %251 = vst.msk [vmem:[%s508_s4 + $0x40] sm:$0xff] %vm242_vm1, %v211_v15  ;;  %v300_v17 = vpop.f32.mrb[2].mxu1  ;;  %244 = vst.msk [vmem:[%s508_s4 + $0x8] sm:$0xff] %vm242_vm1, %v182_v18 }
  0xe5   :  { %254 = vst.msk [vmem:[%s508_s4 + $0x58] sm:$0xff] %vm242_vm1, %v300_v17  ;;  %v214_v19 = vpop.f32.mrb[3].mxu1 }
  0xe6   :  { %252 = vst.msk [vmem:[%s508_s4 + $0x48] sm:$0xff] %vm242_vm1, %v214_v19 }
  0xe8   :  { %v295_v20 = vpop.f32.mrb[4].mxu0 }
  0xe9   :  { %249 = vst.msk [vmem:[%s508_s4 + $0x30] sm:$0xff] %vm242_vm1, %v295_v20  ;;  %v195_v22 = vpop.f32.mrb[5].mxu0 }
  0xea   :  { %v303_v21 = vpop.f32.mrb[4].mxu1  ;;  %247 = vst.msk [vmem:[%s508_s4 + $0x20] sm:$0xff] %vm242_vm1, %v195_v22  ;;  %v296_v24 = vpop.f32.mrb[6].mxu0 }
  0xeb   :  { %257 = vst.msk [vmem:[%s508_s4 + $0x70] sm:$0xff] %vm242_vm1, %v303_v21  ;;  %v227_v23 = vpop.f32.mrb[5].mxu1  ;;  %250 = vst.msk [vmem:[%s508_s4 + $0x38] sm:$0xff] %vm242_vm1, %v296_v24  ;;  %v198_v26 = vpop.f32.mrb[7].mxu0 }
  0xec   :  { %255 = vst.msk [vmem:[%s508_s4 + $0x60] sm:$0xff] %vm242_vm1, %v227_v23  ;;  %v304_v25 = vpop.f32.mrb[6].mxu1  ;;  %248 = vst.msk [vmem:[%s508_s4 + $0x28] sm:$0xff] %vm242_vm1, %v198_v26 }
  0xed   :  { %258 = vst.msk [vmem:[%s508_s4 + $0x78] sm:$0xff] %vm242_vm1, %v304_v25  ;;  %v230_v27 = vpop.f32.mrb[7].mxu1 }
  0xee   :  { %256 = vst.msk [vmem:[%s508_s4 + $0x68] sm:$0xff] %vm242_vm1, %v230_v27 }

// kernel: densenet_forward.15
= control target key start
LH: loop header
LB: loop body
LE: loop exit
PB: predicated region body
PF: predicated region fallthrough
CT: control target
= control target key end

     0   :  { %s2258_s21 = smov 0   ;;  %s2593_s0 = inlined_call_operand.vmem [shape: f32[2,64,16], index: 0, kind: input, shape index: {}]   ;;  %s2594_s1 = inlined_call_operand.vmem [shape: f32[1,16], index: 1, kind: input, shape index: {}]   ;;  %s2595_s2 = inlined_call_operand.vmem [shape: f32[1,16], index: 2, kind: input, shape index: {}]   ;;  %s2596_s3 = inlined_call_operand.vmem [shape: bf16[9,16,8], index: 3, kind: input, shape index: {}]   ;;  %s2597_s4 = inlined_call_operand.vmem [shape: f32[2,64,8], index: 4, kind: output, shape index: {0}]   ;;  %s2598_s5 = inlined_call_operand.vmem [shape: f32[1,8], index: 5, kind: output, shape index: {1}]   ;;  %s2599_s6 = inlined_call_operand.vmem [shape: f32[1,8], index: 6, kind: output, shape index: {2}]  }
   0x1 LB: > { %s2264_s22 = sadd.s32 4294967295, %s2218_s21   ;;  %p1706_p0 = scmp.ge.s32.totalorder %s2218_s21, 1  ;;  %s2218_s21 = sphi %s2258_s21, %s17_s21  }
   0x2   : > { %p207_p1 = scmp.lt.s32.totalorder %s2218_s21, 3 }
   0x4   : > { %p208_p2 = pnand %p1706_p0, %p207_p1 }
   0x5   : > { %v2271_v0 = vld [vmem:[%s2596_s3 + $0x20] sm:$0xff] (!%p208_p2)   ;;  %v2220_v1 = vmov (!%p208_p2), 0.0   ;;  %v2204_v2 = vld [vmem:[%s2596_s3 + $0x8] sm:$0xff] (!%p208_p2)   ;;  %vm2221_vm0 = vmmov (!%p208_p2), 0   ;;  %p237_p3 = scmp.lt.s32.totalorder (!%p208_p2), %s2264_s22, 1  ;;  %vm294_vm1 = vcmask (!%p208_p2), 130048  }
   0x6   : > { %211 = sbr.rel (%p208_p2) target bundleno = 456 (0x1c8), region = 36  ;;  %1930 = vmatprep.subr.bf16.mxu0 (!%p208_p2), %v2220_v1  ;;  %1842 = vmatprep.subr.bf16.mxu1 (!%p208_p2), %v2220_v1  ;;  %296 = vst.msk [vmem:[#allocation2 + $0x8] sm:$0xff] (!%p208_p2), %vm294_vm1, %v2220_v1  ;;  %297 = vst.msk [vmem:[#allocation2 + $0x10] sm:$0xff] (!%p208_p2), %vm294_vm1, %v2220_v1  ;;  %v1711_v3 = vld [vmem:[%s2594_s1] ss:$0 sm:$0xff] (!%p208_p2)  ;;  %v2205_v38 = vld [vmem:[%s2596_s3 + $0x28] sm:$0xff] (!%p208_p2)  }
   0x7   : > { %1931 = vmatpush3.bf16.msra.mxu0 (!%p208_p2), %v2271_v0  ;;  %1844 = vmatprep.mubr.msk.bf16.mxu1 (!%p208_p2), %vm2221_vm0, %v2220_v1  ;;  %298 = vst.msk [vmem:[#allocation2 + $0x18] sm:$0xff] (!%p208_p2), %vm294_vm1, %v2220_v1  ;;  %299 = vst.msk [vmem:[#allocation2 + $0x20] sm:$0xff] (!%p208_p2), %vm294_vm1, %v2220_v1  ;;  %v1712_v4 = vld [vmem:[%s2595_s2] ss:$0 sm:$0xff] (!%p208_p2)  ;;  %v2207_v63 = vld [vmem:[%s2596_s3 + $0x30] sm:$0xff] (!%p208_p2)   ;;  %vm1395_vm2 = vcmask (!%p208_p2), 64512  }
   0x8   : > { %1843 = vmatpush3.bf16.msra.mxu1 (!%p208_p2), %v2204_v2  ;;  %1932 = vmatprep.mubr.msk.bf16.mxu0 (!%p208_p2), %vm2221_vm0, %v2220_v1  ;;  %300 = vst.msk [vmem:[#allocation2 + $0x28] sm:$0xff] (!%p208_p2), %vm294_vm1, %v2220_v1  ;;  %301 = vst.msk [vmem:[#allocation2 + $0x30] sm:$0xff] (!%p208_p2), %vm294_vm1, %v2220_v1  ;;  %v2206_v44 = vld [vmem:[%s2596_s3] sm:$0xff] (!%p208_p2)   ;;  %vm1414_vm3 = vcmask (!%p208_p2), 64514   ;;  %vm1416_vm4 = vcmask (!%p208_p2), 58368   ;;  %vm1449_vm5 = vcmask (!%p208_p2), 64516  }
   0x9   : > { %302 = vst.msk [vmem:[#allocation2 + $0x38] sm:$0xff] (!%p208_p2), %vm294_vm1, %v2220_v1  ;;  %303 = vst.msk [vmem:[#allocation2 + $0x40] sm:$0xff] (!%p208_p2), %vm294_vm1, %v2220_v1  ;;  %1952 = vmatprep.subr.bf16.mxu0 (!%p208_p2), %v2220_v1  ;;  %1864 = vmatprep.subr.bf16.mxu1 (!%p208_p2), %v2220_v1  ;;  %vm1420_vm6 = vcmask (!%p208_p2), 1045504   ;;  %vm1451_vm7 = vcmask (!%p208_p2), 60416   ;;  %vm1481_vm8 = vcmask (!%p208_p2), 64518   ;;  %vm1454_vm9 = vcmask (!%p208_p2), 1043456  }
   0xa   : > { %304 = vst.msk [vmem:[#allocation2 + $0x48] sm:$0xff] (!%p208_p2), %vm294_vm1, %v2220_v1  ;;  %305 = vst.msk [vmem:[#allocation2 + $0x50] sm:$0xff] (!%p208_p2), %vm294_vm1, %v2220_v1  ;;  %vm1483_vm10 = vcmask (!%p208_p2), 62464   ;;  %vm1486_vm11 = vcmask (!%p208_p2), 1041408   ;;  %p1783_p4 = scmp.ne.s32.totalorder (!%p208_p2), %s2264_s22, 0 }
   0xb   : > { %306 = vst.msk [vmem:[#allocation2 + $0x58] sm:$0xff] (!%p208_p2), %vm294_vm1, %v2220_v1  ;;  %307 = vst.msk [vmem:[#allocation2 + $0x60] sm:$0xff] (!%p208_p2), %vm294_vm1, %v2220_v1 }
   0xc   : > { %308 = vst.msk [vmem:[#allocation2 + $0x68] sm:$0xff] (!%p208_p2), %vm294_vm1, %v2220_v1 }
   0xd   : > { %s2314_s27 = scalar_select %p237_p3, %s2264_s22, 1  ;;  %v335_v37 = vld [vmem:[#allocation2 + $0xa] sm:$0xff] }
   0xe   : > { %vm1625_vm12 = vcmask (!%p1783_p4), 57344  }
   0xf   : > { %s1786_s30 = sshll.u32 %s2314_s27, 6 }
  0x10   : > { %s241_s9 = scalar_lea.vmem %s2593_s0, %s1786_s30  ;;  %s2505_s8 = scalar_lea.vmem %s2597_s4, %s1786_s30 }
  0x11   : > { %v248_v5 = vld [vmem:[%s241_s9] sm:$0xff]  ;;  %v249_v6 = vld [vmem:[%s241_s9 + $0x8] sm:$0xff]  ;;  %v250_v7 = vld [vmem:[%s241_s9 + $0x10] sm:$0xff] }
  0x12   : > { %v263_v8 = vmul.f32 %v1711_v3, %v248_v5  ;;  %v264_v9 = vmul.f32 %v1711_v3, %v249_v6  ;;  %v265_v10 = vmul.f32 %v1711_v3, %v250_v7  ;;  %v251_v11 = vld [vmem:[%s241_s9 + $0x18] sm:$0xff]  ;;  %v252_v12 = vld [vmem:[%s241_s9 + $0x20] sm:$0xff]  ;;  %v253_v13 = vld [vmem:[%s241_s9 + $0x28] sm:$0xff] }
  0x13   : > { %v266_v14 = vmul.f32 %v1711_v3, %v251_v11  ;;  %v267_v15 = vmul.f32 %v1711_v3, %v252_v12  ;;  %v268_v16 = vmul.f32 %v1711_v3, %v253_v13  ;;  %v254_v17 = vld [vmem:[%s241_s9 + $0x30] sm:$0xff]  ;;  %v255_v22 = vld [vmem:[%s241_s9 + $0x38] sm:$0xff] }
  0x14   : > { %v278_v18 = vadd.f32 %v1712_v4, %v263_v8  ;;  %v279_v19 = vadd.f32 %v1712_v4, %v264_v9  ;;  %v280_v20 = vadd.f32 %v1712_v4, %v265_v10  ;;  %v269_v21 = vmul.f32 %v1711_v3, %v254_v17  ;;  %v318_v8 = vld [vmem:[#allocation2 + $0x9] sm:$0xff] }
  0x15   : > { %v281_v23 = vadd.f32 %v1712_v4, %v266_v14  ;;  %v282_v24 = vadd.f32 %v1712_v4, %v267_v15  ;;  %v283_v25 = vadd.f32 %v1712_v4, %v268_v16  ;;  %v270_v26 = vmul.f32 %v1711_v3, %v255_v22  ;;  %v2208_v14 = vld [vmem:[%s2596_s3 + $0x10] sm:$0xff]  }
  0x16   : > { %v286_v27 = vmax.f32 %v278_v18, 0.0  ;;  %v287_v28 = vmax.f32 %v279_v19, 0.0  ;;  %v288_v29 = vmax.f32 %v280_v20, 0.0  ;;  %v284_v30 = vadd.f32 %v1712_v4, %v269_v21 }
  0x17   : > { %v289_v31 = vmax.f32 %v281_v23, 0.0  ;;  %v290_v32 = vmax.f32 %v282_v24, 0.0  ;;  %v291_v33 = vmax.f32 %v283_v25, 0.0  ;;  %v285_v34 = vadd.f32 %v1712_v4, %v270_v26 }
  0x18   : > { %310 = vst.msk [vmem:[#allocation2 + $0x14] sm:$0xff] %vm294_vm1, %v286_v27  ;;  %311 = vst.msk [vmem:[#allocation2 + $0x1e] sm:$0xff] %vm294_vm1, %v287_v28  ;;  %v292_v35 = vmax.f32 %v284_v30, 0.0 }
  0x19   : > { %312 = vst.msk [vmem:[#allocation2 + $0x28] sm:$0xff] %vm294_vm1, %v288_v29  ;;  %313 = vst.msk [vmem:[#allocation2 + $0x32] sm:$0xff] %vm294_vm1, %v289_v31  ;;  %v293_v36 = vmax.f32 %v285_v34, 0.0  ;;  %v2209_v31 = vld [vmem:[%s2596_s3 + $0x38] sm:$0xff]  }
  0x1a   : > { %314 = vst.msk [vmem:[#allocation2 + $0x3c] sm:$0xff] %vm294_vm1, %v290_v32  ;;  %315 = vst.msk [vmem:[#allocation2 + $0x46] sm:$0xff] %vm294_vm1, %v291_v33 }
  0x1b   : > { %316 = vst.msk [vmem:[#allocation2 + $0x50] sm:$0xff] %vm294_vm1, %v292_v35  ;;  %317 = vst.msk [vmem:[#allocation2 + $0x5a] sm:$0xff] %vm294_vm1, %v293_v36  ;;  %v541_v36 = vld [vmem:[#allocation2 + $0xb] sm:$0xff] }
  0x1f   : > { %v336_v39 = vld [vmem:[#allocation2 + $0x12] sm:$0xff]  ;;  %v786_v41 = vld [vmem:[#allocation2 + $0x1c] sm:$0xff] }
  0x20   : > { %v785_v40 = vld [vmem:[#allocation2 + $0x14] sm:$0xff]  ;;  %v345_v42 = vpack.c.bf16 %v336_v39, %v335_v37  ;;  %v338_v46 = vld [vmem:[#allocation2 + $0x22] sm:$0xff]  ;;  %v788_v48 = vld [vmem:[#allocation2 + $0x2c] sm:$0xff] }
  0x21   : > { %v795_v43 = vpack.c.bf16 %v786_v41, %v785_v40  ;;  %v337_v45 = vld [vmem:[#allocation2 + $0x1a] sm:$0xff]  ;;  %v787_v47 = vld [vmem:[#allocation2 + $0x24] sm:$0xff]  ;;  %v340_v52 = vld [vmem:[#allocation2 + $0x32] sm:$0xff] }
  0x22   : > { %1845 = vmatmul.mubr.msk.bf16.vlgmr.msra.gmra.mrb[0].mxu1 %vm294_vm1, %v345_v42  ;;  %v346_v49 = vpack.c.bf16 %v338_v46, %v337_v45  ;;  %v796_v50 = vpack.c.bf16 %v788_v48, %v787_v47  ;;  %v339_v51 = vld [vmem:[#allocation2 + $0x2a] sm:$0xff]  ;;  %v789_v53 = vld [vmem:[#allocation2 + $0x34] sm:$0xff]  ;;  %v790_v54 = vld [vmem:[#allocation2 + $0x3c] sm:$0xff] }
  0x23   : > { %1933 = vmatmul.mubr.msk.bf16.vlgmr.msra.gmra.mrb[0].mxu0 %vm294_vm1, %v795_v43  ;;  %1848 = vmatprep.mubr.msk.bf16.mxu1 %vm2221_vm0, %v2220_v1  ;;  %v347_v55 = vpack.c.bf16 %v340_v52, %v339_v51  ;;  %v797_v56 = vpack.c.bf16 %v790_v54, %v789_v53  ;;  %v341_v57 = vld [vmem:[#allocation2 + $0x3a] sm:$0xff]  ;;  %v342_v58 = vld [vmem:[#allocation2 + $0x42] sm:$0xff]  ;;  %v343_v2 = vld [vmem:[#allocation2 + $0x4a] sm:$0xff] }
  0x24   : > { %1953 = vmatpush3.bf16.msra.mxu0 %v2205_v38  ;;  %1936 = vmatprep.mubr.msk.bf16.mxu0 %vm2221_vm0, %v2220_v1  ;;  %v907_v59 = vld [vmem:[#allocation2 + $0x15] sm:$0xff]  ;;  %v908_v60 = vld [vmem:[#allocation2 + $0x1d] sm:$0xff]  ;;  %v348_v61 = vpack.c.bf16 %v342_v58, %v341_v57  ;;  %v909_v4 = vld [vmem:[#allocation2 + $0x25] sm:$0xff] }
  0x25   : > { %1865 = vmatpush3.bf16.msra.mxu1 %v2206_v44  ;;  %1974 = vmatprep.subr.bf16.mxu0 %v2220_v1  ;;  %v917_v62 = vpack.c.bf16 %v908_v60, %v907_v59  ;;  %v344_v3 = vld [vmem:[#allocation2 + $0x52] sm:$0xff]  ;;  %v912_v11 = vld [vmem:[#allocation2 + $0x3d] sm:$0xff]  ;;  %v913_v17 = vld [vmem:[#allocation2 + $0x45] sm:$0xff]  ;;  %v1039_v30 = vpack.c.bf16 %v909_v4, %v908_v60 }
  0x26   : > { %1886 = vmatprep.subr.bf16.mxu1 %v2220_v1  ;;  %v910_v5 = vld [vmem:[#allocation2 + $0x2d] sm:$0xff]  ;;  %v349_v6 = vpack.c.bf16 %v344_v3, %v343_v2  ;;  %v911_v10 = vld [vmem:[#allocation2 + $0x35] sm:$0xff]  ;;  %v321_v16 = vld [vmem:[#allocation2 + $0x21] sm:$0xff]  ;;  %v1041_v39 = vpack.c.bf16 %v913_v17, %v912_v11 }
  0x27   : > { %v918_v7 = vpack.c.bf16 %v910_v5, %v909_v4  ;;  %v319_v9 = vld [vmem:[#allocation2 + $0x11] sm:$0xff]  ;;  %v919_v13 = vpack.c.bf16 %v912_v11, %v911_v10  ;;  %v320_v15 = vld [vmem:[#allocation2 + $0x19] sm:$0xff]  ;;  %v322_v21 = vld [vmem:[#allocation2 + $0x29] sm:$0xff]  ;;  %v1040_v35 = vpack.c.bf16 %v911_v10, %v910_v5 }
  0x28   : > { %v328_v12 = vpack.c.bf16 %v319_v9, %v318_v8  ;;  %v914_v18 = vld [vmem:[#allocation2 + $0x4d] sm:$0xff]  ;;  %v329_v19 = vpack.c.bf16 %v321_v16, %v320_v15  ;;  %v915_v23 = vld [vmem:[#allocation2 + $0x55] sm:$0xff]  ;;  %v916_v24 = vld [vmem:[#allocation2 + $0x5d] sm:$0xff] }
  0x29   : > { %v920_v20 = vpack.c.bf16 %v914_v18, %v913_v17  ;;  %v323_v22 = vld [vmem:[#allocation2 + $0x31] sm:$0xff]  ;;  %v921_v26 = vpack.c.bf16 %v916_v24, %v915_v23  ;;  %v324_v27 = vld [vmem:[#allocation2 + $0x39] sm:$0xff]  ;;  %v325_v28 = vld [vmem:[#allocation2 + $0x41] sm:$0xff]  ;;  %v1042_v44 = vpack.c.bf16 %v915_v23, %v914_v18 }
  0x2a   : > { %1849 = vmatmul.mubr.msk.bf16.gmra.mrb[4].mxu1 %vm294_vm1, %v346_v49  ;;  %v330_v25 = vpack.c.bf16 %v323_v22, %v322_v21  ;;  %v331_v29 = vpack.c.bf16 %v325_v28, %v324_v27  ;;  %v326_v32 = vld [vmem:[#allocation2 + $0x49] sm:$0xff]  ;;  %v327_v33 = vld [vmem:[#allocation2 + $0x51] sm:$0xff]  ;;  %v543_v41 = vld [vmem:[#allocation2 + $0x1b] sm:$0xff] }
  0x2b   : > { %1937 = vmatmul.mubr.msk.bf16.gmra.mrb[4].mxu0 %vm294_vm1, %v796_v50  ;;  %1852 = vmatprep.mubr.msk.bf16.mxu1 %vm2221_vm0, %v2220_v1  ;;  %v332_v34 = vpack.c.bf16 %v327_v33, %v326_v32  ;;  %v542_v37 = vld [vmem:[#allocation2 + $0x13] sm:$0xff]  ;;  %v544_v42 = vld [vmem:[#allocation2 + $0x23] sm:$0xff]  ;;  %v545_v45 = vld [vmem:[#allocation2 + $0x2b] sm:$0xff] }
  0x2c   : > { %1940 = vmatprep.mubr.msk.bf16.mxu0 %vm2221_vm0, %v2220_v1  ;;  %v551_v38 = vpack.c.bf16 %v542_v37, %v541_v36  ;;  %v2210_v40 = vld [vmem:[%s2596_s3 + $0x18] sm:$0xff]   ;;  %v552_v43 = vpack.c.bf16 %v544_v42, %v543_v41  ;;  %v1038_v47 = vld [vmem:[#allocation2 + $0x65] sm:$0xff]  ;;  %v1153_v59 = vld [vmem:[#allocation2 + $0x2e] sm:$0xff]  ;;  %v673_v3 = vpack.c.bf16 %v543_v41, %v542_v37 }
  0x2d   : > { %v546_v46 = vld [vmem:[#allocation2 + $0x33] sm:$0xff]  ;;  %v1043_v49 = vpack.c.bf16 %v1038_v47, %v916_v24  ;;  %v547_v50 = vld [vmem:[#allocation2 + $0x3b] sm:$0xff]  ;;  %v548_v51 = vld [vmem:[#allocation2 + $0x43] sm:$0xff] }
  0x2e   : > { %v553_v48 = vpack.c.bf16 %v546_v46, %v545_v45  ;;  %v1151_v52 = vld [vmem:[#allocation2 + $0x1e] sm:$0xff]  ;;  %v1152_v53 = vld [vmem:[#allocation2 + $0x26] sm:$0xff]  ;;  %v554_v54 = vpack.c.bf16 %v548_v51, %v547_v50  ;;  %v550_v58 = vld [vmem:[#allocation2 + $0x53] sm:$0xff]  ;;  %v675_v11 = vpack.c.bf16 %v547_v50, %v546_v46 }
  0x2f   : > { %v549_v57 = vld [vmem:[#allocation2 + $0x4b] sm:$0xff]  ;;  %v1154_v60 = vld [vmem:[#allocation2 + $0x36] sm:$0xff]  ;;  %v1159_v9 = vld [vmem:[#allocation2 + $0x5e] sm:$0xff] }
  0x30   : > { %v1156_v2 = vld [vmem:[#allocation2 + $0x46] sm:$0xff]  ;;  %v1157_v5 = vld [vmem:[#allocation2 + $0x4e] sm:$0xff]  ;;  %v672_v16 = vld [vmem:[#allocation2 + $0x5b] sm:$0xff] }
  0x31   : > { %v1160_v10 = vld [vmem:[#allocation2 + $0x66] sm:$0xff]  ;;  %v1275_v17 = vld [vmem:[#allocation2 + $0x2f] sm:$0xff]  ;;  %v1276_v18 = vld [vmem:[#allocation2 + $0x37] sm:$0xff] }
  0x32   : > { %1853 = vmatmul.mubr.msk.bf16.gmra.mrb[8].mxu1 %vm294_vm1, %v347_v55  ;;  %v1161_v55 = vpack.c.bf16 %v1152_v53, %v1151_v52  ;;  %v791_v21 = vld [vmem:[#allocation2 + $0x44] sm:$0xff]  ;;  %v792_v22 = vld [vmem:[#allocation2 + $0x4c] sm:$0xff]  ;;  %v793_v27 = vld [vmem:[#allocation2 + $0x54] sm:$0xff] }
  0x33   : > { %1941 = vmatmul.mubr.msk.bf16.gmra.mrb[8].mxu0 %vm294_vm1, %v797_v56  ;;  %1856 = vmatprep.mubr.msk.bf16.mxu1 %vm2221_vm0, %v2220_v1  ;;  %v2211_v56 = vld [vmem:[%s2596_s3 + $0x40] sm:$0xff]  }
  0x34   : > { %1954 = vmatprep.mubr.msk.bf16.mxu0 %vm2221_vm0, %v2220_v1  ;;  %v1277_v23 = vld [vmem:[#allocation2 + $0x3f] sm:$0xff]  ;;  %v1278_v24 = vld [vmem:[#allocation2 + $0x47] sm:$0xff] }
  0x35   : > { %v794_v28 = vld [vmem:[#allocation2 + $0x5c] sm:$0xff] }
  0x36   : > { %v1281_v33 = vld [vmem:[#allocation2 + $0x5f] sm:$0xff] }
  0x3a   : > { %1857 = vmatmul.mubr.msk.bf16.gmra.mrb[12].mxu1 %vm294_vm1, %v348_v61  ;;  %v555_v61 = vpack.c.bf16 %v550_v58, %v549_v57 }
  0x3b   : > { %1955 = vmatmul.mubr.msk.bf16.vlgmr.msra.gmra.mrb[0].mxu0 %vm294_vm1, %v917_v62  ;;  %1860 = vmatprep.mubr.msk.bf16.mxu1 %vm2221_vm0, %v2220_v1  ;;  %v1162_v62 = vpack.c.bf16 %v1154_v60, %v1153_v59 }
  0x3c   : > { %1975 = vmatpush3.bf16.msra.mxu0 %v2207_v63  ;;  %1958 = vmatprep.mubr.msk.bf16.mxu0 %vm2221_vm0, %v2220_v1  ;;  %v1155_v63 = vld [vmem:[#allocation2 + $0x3e] sm:$0xff] }
  0x3d   : > { %1996 = vmatprep.subr.bf16.mxu0 %v2220_v1  ;;  %v1163_v4 = vpack.c.bf16 %v1156_v2, %v1155_v63 }
  0x42   : > { %1861 = vmatmul.mubr.msk.bf16.gmra.mrb[16].mxu1 %vm294_vm1, %v349_v6  ;;  %v1158_v6 = vld [vmem:[#allocation2 + $0x56] sm:$0xff] }
  0x43   : > { %1959 = vmatmul.mubr.msk.bf16.gmra.mrb[4].mxu0 %vm294_vm1, %v918_v7  ;;  %1866 = vmatprep.mubr.msk.bf16.mxu1 %vm2221_vm0, %v2220_v1  ;;  %v674_v7 = vpack.c.bf16 %v545_v45, %v544_v42  ;;  %v1164_v8 = vpack.c.bf16 %v1158_v6, %v1157_v5 }
  0x44   : > { %1962 = vmatprep.mubr.msk.bf16.mxu0 %vm2221_vm0, %v2220_v1 }
  0x4a   : > { %1867 = vmatmul.mubr.msk.bf16.vlgmr.msra.gmra.mrb[0].mxu1 %vm294_vm1, %v328_v12  ;;  %v1165_v12 = vpack.c.bf16 %v1160_v10, %v1159_v9 }
  0x4b   : > { %1963 = vmatmul.mubr.msk.bf16.gmra.mrb[8].mxu0 %vm294_vm1, %v919_v13  ;;  %1870 = vmatprep.mubr.msk.bf16.mxu1 %vm2221_vm0, %v2220_v1  ;;  %v1274_v13 = vld [vmem:[#allocation2 + $0x27] sm:$0xff] }
  0x4c   : > { %1966 = vmatprep.mubr.msk.bf16.mxu0 %vm2221_vm0, %v2220_v1  ;;  %1887 = vmatpush3.bf16.msra.mxu1 %v2208_v14  ;;  %v676_v14 = vpack.c.bf16 %v549_v57, %v548_v51 }
  0x4d   : > { %1908 = vmatprep.subr.bf16.mxu1 %v2220_v1 }
  0x52   : > { %1871 = vmatmul.mubr.msk.bf16.gmra.mrb[4].mxu1 %vm294_vm1, %v329_v19  ;;  %v677_v19 = vpack.c.bf16 %v672_v16, %v550_v58 }
  0x53   : > { %1967 = vmatmul.mubr.msk.bf16.gmra.mrb[12].mxu0 %vm294_vm1, %v920_v20  ;;  %1874 = vmatprep.mubr.msk.bf16.mxu1 %vm2221_vm0, %v2220_v1  ;;  %v1284_v20 = vpack.c.bf16 %v1276_v18, %v1275_v17 }
  0x54   : > { %1970 = vmatprep.mubr.msk.bf16.mxu0 %vm2221_vm0, %v2220_v1 }
  0x5a   : > { %1875 = vmatmul.mubr.msk.bf16.gmra.mrb[8].mxu1 %vm294_vm1, %v330_v25  ;;  %v798_v25 = vpack.c.bf16 %v792_v22, %v791_v21 }
  0x5b   : > { %1971 = vmatmul.mubr.msk.bf16.gmra.mrb[16].mxu0 %vm294_vm1, %v921_v26  ;;  %1878 = vmatprep.mubr.msk.bf16.mxu1 %vm2221_vm0, %v2220_v1  ;;  %v1285_v26 = vpack.c.bf16 %v1278_v24, %v1277_v23 }
  0x5c   : > { %1976 = vmatprep.mubr.msk.bf16.mxu0 %vm2221_vm0, %v2220_v1 }
  0x62   : > { %1879 = vmatmul.mubr.msk.bf16.gmra.mrb[12].mxu1 %vm294_vm1, %v331_v29  ;;  %v1279_v29 = vld [vmem:[#allocation2 + $0x4f] sm:$0xff] }
  0x63   : > { %1977 = vmatmul.mubr.msk.bf16.vlgmr.msra.gmra.mrb[0].mxu0 %vm294_vm1, %v1039_v30  ;;  %1882 = vmatprep.mubr.msk.bf16.mxu1 %vm2221_vm0, %v2220_v1  ;;  %v1280_v30 = vld [vmem:[#allocation2 + $0x57] sm:$0xff] }
  0x64   : > { %1997 = vmatpush3.bf16.msra.mxu0 %v2209_v31  ;;  %1980 = vmatprep.mubr.msk.bf16.mxu0 %vm2221_vm0, %v2220_v1  ;;  %v799_v31 = vpack.c.bf16 %v794_v28, %v793_v27  ;;  %v1286_v32 = vpack.c.bf16 %v1280_v30, %v1279_v29 }
  0x65   : > { %2018 = vmatprep.subr.bf16.mxu0 %v2220_v1 }
  0x6a   : > { %1883 = vmatmul.mubr.msk.bf16.gmra.mrb[16].mxu1 %vm294_vm1, %v332_v34  ;;  %v1282_v34 = vld [vmem:[#allocation2 + $0x67] sm:$0xff] }
  0x6b   : > { %1981 = vmatmul.mubr.msk.bf16.gmra.mrb[4].mxu0 %vm294_vm1, %v1040_v35  ;;  %1888 = vmatprep.mubr.msk.bf16.mxu1 %vm2221_vm0, %v2220_v1  ;;  %v1287_v35 = vpack.c.bf16 %v1282_v34, %v1281_v33 }
  0x6c   : > { %1984 = vmatprep.mubr.msk.bf16.mxu0 %vm2221_vm0, %v2220_v1 }
  0x72   : > { %1889 = vmatmul.mubr.msk.bf16.vlgmr.msra.gmra.mrb[0].mxu1 %vm294_vm1, %v551_v38 }
  0x73   : > { %1985 = vmatmul.mubr.msk.bf16.gmra.mrb[8].mxu0 %vm294_vm1, %v1041_v39  ;;  %1892 = vmatprep.mubr.msk.bf16.mxu1 %vm2221_vm0, %v2220_v1 }
  0x74   : > { %1988 = vmatprep.mubr.msk.bf16.mxu0 %vm2221_vm0, %v2220_v1  ;;  %1909 = vmatpush3.bf16.msra.mxu1 %v2210_v40 }
  0x75   : > { %2040 = vmatprep.subr.bf16.mxu1 %v2220_v1 }
  0x7a   : > { %1893 = vmatmul.mubr.msk.bf16.gmra.mrb[4].mxu1 %vm294_vm1, %v552_v43 }
  0x7b   : > { %1989 = vmatmul.mubr.msk.bf16.gmra.mrb[12].mxu0 %vm294_vm1, %v1042_v44  ;;  %1896 = vmatprep.mubr.msk.bf16.mxu1 %vm2221_vm0, %v2220_v1 }
  0x7c   : > { %1992 = vmatprep.mubr.msk.bf16.mxu0 %vm2221_vm0, %v2220_v1 }
  0x82   : > { %1897 = vmatmul.mubr.msk.bf16.gmra.mrb[8].mxu1 %vm294_vm1, %v553_v48 }
  0x83   : > { %1993 = vmatmul.mubr.msk.bf16.gmra.mrb[16].mxu0 %vm294_vm1, %v1043_v49  ;;  %1900 = vmatprep.mubr.msk.bf16.mxu1 %vm2221_vm0, %v2220_v1 }
  0x84   : > { %1998 = vmatprep.mubr.msk.bf16.mxu0 %vm2221_vm0, %v2220_v1 }
  0x8a   : > { %1901 = vmatmul.mubr.msk.bf16.gmra.mrb[12].mxu1 %vm294_vm1, %v554_v54 }
  0x8b   : > { %1999 = vmatmul.mubr.msk.bf16.vlgmr.msra.gmra.mrb[0].mxu0 %vm294_vm1, %v1161_v55  ;;  %1904 = vmatprep.mubr.msk.bf16.mxu1 %vm2221_vm0, %v2220_v1 }
  0x8c   : > { %2019 = vmatpush3.bf16.msra.mxu0 %v2211_v56  ;;  %2002 = vmatprep.mubr.msk.bf16.mxu0 %vm2221_vm0, %v2220_v1 }
  0x92   : > { %1905 = vmatmul.mubr.msk.bf16.gmra.mrb[16].mxu1 %vm294_vm1, %v555_v61 }
  0x93   : > { %2003 = vmatmul.mubr.msk.bf16.gmra.mrb[4].mxu0 %vm294_vm1, %v1162_v62  ;;  %1910 = vmatprep.mubr.msk.bf16.mxu1 %vm2221_vm0, %v2220_v1 }
  0x94   : > { %2006 = vmatprep.mubr.msk.bf16.mxu0 %vm2221_vm0, %v2220_v1 }
  0x9a   : > { %1911 = vmatmul.mubr.msk.bf16.vlgmr.msra.gmra.mrb[0].mxu1 %vm294_vm1, %v673_v3 }
  0x9b   : > { %2007 = vmatmul.mubr.msk.bf16.gmra.mrb[8].mxu0 %vm294_vm1, %v1163_v4  ;;  %1914 = vmatprep.mubr.msk.bf16.mxu1 %vm2221_vm0, %v2220_v1 }
  0x9c   : > { %2010 = vmatprep.mubr.msk.bf16.mxu0 %vm2221_vm0, %v2220_v1  ;;  %2041 = vmatpush3.bf16.msra.mxu1 %v2271_v0  ;;  %v1273_v0 = vld [vmem:[#allocation2 + $0x1f] sm:$0xff] }
  0x9d   : > { %v1283_v15 = vpack.c.bf16 %v1274_v13, %v1273_v0 }
  0xa2   : > { %1915 = vmatmul.mubr.msk.bf16.gmra.mrb[4].mxu1 %vm294_vm1, %v674_v7 }
  0xa3   : > { %2011 = vmatmul.mubr.msk.bf16.gmra.mrb[12].mxu0 %vm294_vm1, %v1164_v8  ;;  %1918 = vmatprep.mubr.msk.bf16.mxu1 %vm2221_vm0, %v2220_v1 }
  0xa4   : > { %2014 = vmatprep.mubr.msk.bf16.mxu0 %vm2221_vm0, %v2220_v1 }
  0xaa   : > { %1919 = vmatmul.mubr.msk.bf16.gmra.mrb[8].mxu1 %vm294_vm1, %v675_v11 }
  0xab   : > { %2015 = vmatmul.mubr.msk.bf16.gmra.mrb[16].mxu0 %vm294_vm1, %v1165_v12  ;;  %1922 = vmatprep.mubr.msk.bf16.mxu1 %vm2221_vm0, %v2220_v1 }
  0xac   : > { %2020 = vmatprep.mubr.msk.bf16.mxu0 %vm2221_vm0, %v2220_v1 }
  0xb2   : > { %1923 = vmatmul.mubr.msk.bf16.gmra.mrb[12].mxu1 %vm294_vm1, %v676_v14 }
  0xb3   : > { %2021 = vmatmul.mubr.msk.bf16.vlgmr.msra.gmra.mrb[0].mxu0 %vm294_vm1, %v1283_v15  ;;  %1926 = vmatprep.mubr.msk.bf16.mxu1 %vm2221_vm0, %v2220_v1 }
  0xb4   : > { %2024 = vmatprep.mubr.msk.bf16.mxu0 %vm2221_vm0, %v2220_v1 }
  0xba   : > { %1927 = vmatmul.mubr.msk.bf16.gmra.mrb[16].mxu1 %vm294_vm1, %v677_v19 }
  0xbb   : > { %2025 = vmatmul.mubr.msk.bf16.gmra.mrb[4].mxu0 %vm294_vm1, %v1284_v20  ;;  %1944 = vmatprep.mubr.msk.bf16.mxu1 %vm2221_vm0, %v2220_v1 }
  0xbc   : > { %2028 = vmatprep.mubr.msk.bf16.mxu0 %vm2221_vm0, %v2220_v1 }
  0xc2   : > { %1945 = vmatmul.mubr.msk.bf16.vlgmr.msra.gmra.mrb[12].mxu1 %vm294_vm1, %v798_v25 }
  0xc3   : > { %2029 = vmatmul.mubr.msk.bf16.gmra.mrb[8].mxu0 %vm294_vm1, %v1285_v26  ;;  %1948 = vmatprep.mubr.msk.bf16.mxu1 %vm2221_vm0, %v2220_v1 }
  0xc4   : > { %2032 = vmatprep.mubr.msk.bf16.mxu0 %vm2221_vm0, %v2220_v1 }
  0xca   : > { %1949 = vmatmul.mubr.msk.bf16.gmra.mrb[16].mxu1 %vm294_vm1, %v799_v31 }
  0xcb   : > { %2033 = vmatmul.mubr.msk.bf16.gmra.mrb[12].mxu0 %vm294_vm1, %v1286_v32 }
  0xcc   : > { %2036 = vmatprep.mubr.msk.bf16.mxu0 %vm2221_vm0, %v2220_v1 }
  0xd3   : > { %2037 = vmatmul.mubr.msk.bf16.gmra.mrb[16].mxu0 %vm294_vm1, %v1287_v35 }
 0x16d   : > { %v736_v36 = vpop.f32.mrb[0].mxu1 }
 0x16e   : > { %v1912_v37 = vpop.f32.mrb[1].mxu1 }
 0x16f   : > { %v739_v38 = vpop.f32.mrb[2].mxu1 }
 0x170   : > { %v1913_v39 = vpop.f32.mrb[3].mxu1 }
 0x175   : > { %v744_v40 = vpop.f32.mrb[4].mxu1 }
 0x176   : > { %v1916_v41 = vpop.f32.mrb[5].mxu1 }
 0x177   : > { %v747_v42 = vpop.f32.mrb[6].mxu1 }
 0x178   : > { %v1917_v43 = vpop.f32.mrb[7].mxu1 }
 0x17d   : > { %v2496_v44 = vpop.f32.mrb[8].mxu1 }
 0x17e   : > { %v1920_v45 = vpop.f32.mrb[9].mxu1 }
 0x17f   : > { %v2498_v46 = vpop.f32.mrb[10].mxu1 }
 0x180   : > { %v1921_v1 = vpop.f32.mrb[11].mxu1 }
 0x186   : > { %v1346_v47 = vpop.f32.mrb[0].mxu0 }
 0x187   : > { %v2042_v48 = vadd.f32 %v1346_v47, %v736_v36  ;;  %v2022_v49 = vpop.f32.mrb[1].mxu0 }
 0x188   : > { %v1349_v50 = vpop.f32.mrb[2].mxu0 }
 0x189   : > { %1396 = vst.msk [vmem:[%s2505_s8] sm:$0xff] %vm1395_vm2, %v2042_v48  ;;  %v1397_v51 = vsel %vm1395_vm2, %v2042_v48, 0.0  ;;  %v1405_v52 = vmul.f32 %v2042_v48, %v2042_v48  ;;  %v2043_v53 = vadd.f32 %v1349_v50, %v739_v38  ;;  %v2023_v54 = vpop.f32.mrb[3].mxu0 }
 0x18a   : > { %v1398_v55 = vrot.slane %v1397_v51, 4 }
 0x18b   : > { %v1406_v56 = vsel %vm1395_vm2, %v1405_v52, 0.0  ;;  %1415 = vst.msk [vmem:[%s2505_s8 + $0x6] sm:$0xfc] %vm1414_vm3, %v2043_v53  ;;  %v1433_v61 = vmul.f32 %v2043_v53, %v2043_v53  ;;  %v1421_v6 = vrot.slane %v2043_v53, 2 }
 0x18c   : > { %v1399_v57 = vadd.f32 %v1398_v55, %v1397_v51  ;;  %v1407_v58 = vrot.slane %v1406_v56, 4 }
 0x18d   : > { %v1437_v12 = vrot.slane %v1433_v61, 2 }
 0x18e   : > { %v1400_v59 = vrot.slane %v1399_v57, 2  ;;  %v1408_v60 = vadd.f32 %v1407_v58, %v1406_v56  ;;  %v1354_v62 = vpop.f32.mrb[4].mxu0 }
 0x18f   : > { %v2044_v63 = vadd.f32 %v1354_v62, %v744_v40  ;;  %v2026_v2 = vpop.f32.mrb[5].mxu0 }
 0x190   : > { %v1401_v3 = vadd.f32 %v1400_v59, %v1399_v57  ;;  %v1409_v4 = vrot.slane %v1408_v60, 2  ;;  %v1357_v5 = vpop.f32.mrb[6].mxu0 }
 0x191   : > { %1417 = vst.msk [vmem:[%s2505_s8 + $0xe] sm:$0x3] %vm1416_vm4, %v2044_v63  ;;  %v1422_v7 = vrot.slane %v2044_v63, 2  ;;  %v1434_v8 = vmul.f32 %v2044_v63, %v2044_v63  ;;  %v2045_v9 = vadd.f32 %v1357_v5, %v747_v42  ;;  %v2027_v10 = vpop.f32.mrb[7].mxu0  ;;  %v1455_v14 = vrot.slane %v2044_v63, 4 }
 0x192   : > { %1450 = vst.msk [vmem:[%s2505_s8 + $0xc] sm:$0xf0] %vm1449_vm5, %v2044_v63  ;;  %v1410_v11 = vadd.f32 %v1409_v4, %v1408_v60  ;;  %v1402_v16 = vrot.slane %v1401_v3, 1 }
 0x193   : > { %v1423_v0 = vsel %vm1420_vm6, %v1421_v6, %v1422_v7  ;;  %v1438_v13 = vrot.slane %v1434_v8, 2  ;;  %1452 = vst.msk [vmem:[%s2505_s8 + $0x14] sm:$0xf] %vm1451_vm7, %v2045_v9  ;;  %v1456_v15 = vrot.slane %v2045_v9, 4  ;;  %v1467_v19 = vmul.f32 %v2045_v9, %v2045_v9 }
 0x194   : > { %1482 = vst.msk [vmem:[%s2505_s8 + $0x12] sm:$0xc0] %vm1481_vm8, %v2045_v9  ;;  %v1411_v17 = vrot.slane %v1410_v11, 1  ;;  %v1425_v18 = vsel %vm1395_vm2, %v1423_v0, 0.0  ;;  %v1469_v24 = vrot.slane %v1434_v8, 4  ;;  %v1403_v35 = vadd.f32 %v1402_v16, %v1401_v3 }
 0x195   : > { %v1426_v20 = vrot.slane %v1425_v18, 4  ;;  %v1439_v21 = vsel %vm1420_vm6, %v1437_v12, %v1438_v13  ;;  %v1457_v22 = vsel %vm1454_vm9, %v1455_v14, %v1456_v15  ;;  %v1470_v26 = vrot.slane %v1467_v19, 4  ;;  %v2527_v27 = vpop.f32.mrb[12].mxu1 }
 0x196   : > { %v1441_v23 = vsel %vm1395_vm2, %v1439_v21, 0.0  ;;  %v1459_v25 = vsel %vm1395_vm2, %v1457_v22, 0.0  ;;  %v1362_v28 = vpop.f32.mrb[8].mxu0  ;;  %v1946_v33 = vpop.f32.mrb[13].mxu1  ;;  %v1412_v36 = vadd.f32 %v1411_v17, %v1410_v11  ;;  %v1487_v38 = vrot.slane %v2045_v9, 6 }
 0x197   : > { %v1427_v29 = vadd.f32 %v1426_v20, %v1425_v18  ;;  %v1442_v30 = vrot.slane %v1441_v23, 4  ;;  %v1460_v31 = vrot.slane %v1459_v25, 4  ;;  %v2046_v32 = vadd.f32 %v1362_v28, %v2496_v44  ;;  %v2030_v34 = vpop.f32.mrb[9].mxu0  ;;  %v2531_v39 = vpop.f32.mrb[14].mxu1 }
 0x198   : > { %v1471_v37 = vsel %vm1454_vm9, %v1469_v24, %v1470_v26  ;;  %v1365_v40 = vpop.f32.mrb[10].mxu0  ;;  %v1947_v1 = vpop.f32.mrb[15].mxu1  ;;  %v1501_v54 = vrot.slane %v1467_v19, 6 }
 0x199   : > { %v1428_v41 = vrot.slane %v1427_v29, 2  ;;  %v1443_v42 = vadd.f32 %v1442_v30, %v1441_v23  ;;  %v1461_v43 = vadd.f32 %v1460_v31, %v1459_v25  ;;  %v1473_v45 = vsel %vm1395_vm2, %v1471_v37, 0.0  ;;  %1484 = vst.msk [vmem:[%s2505_s8 + $0x1a] sm:$0x3f] %vm1483_vm10, %v2046_v32  ;;  %v2031_v44 = vpop.f32.mrb[11].mxu0 }
 0x19a   : > { %v1474_v47 = vrot.slane %v1473_v45, 4  ;;  %v1488_v48 = vrot.slane %v2046_v32, 6  ;;  %v1499_v49 = vmul.f32 %v2046_v32, %v2046_v32  ;;  %v2047_v50 = vadd.f32 %v1365_v40, %v2498_v46 }
 0x19b   : > { %v1429_v51 = vadd.f32 %v1428_v41, %v1427_v29  ;;  %v1444_v52 = vrot.slane %v1443_v42, 2  ;;  %v1462_v53 = vrot.slane %v1461_v43, 2 }
 0x19c   : > { %v1475_v55 = vadd.f32 %v1474_v47, %v1473_v45  ;;  %v1489_v56 = vsel %vm1486_vm11, %v1487_v38, %v1488_v48  ;;  %v1502_v57 = vrot.slane %v1499_v49, 6  ;;  %1513 = vst.msk [vmem:[%s2505_s8 + $0x20] sm:$0xff] %vm1395_vm2, %v2047_v50  ;;  %v1514_v58 = vsel %vm1395_vm2, %v2047_v50, 0.0 }
 0x19d   : > { %v1445_v59 = vadd.f32 %v1444_v52, %v1443_v42  ;;  %v1491_v60 = vsel %vm1395_vm2, %v1489_v56, 0.0  ;;  %v1430_v61 = vrot.slane %v1429_v51, 1  ;;  %v1463_v62 = vadd.f32 %v1462_v53, %v1461_v43  ;;  %v890_v4 = vpop.f32.mrb[16].mxu1 }
 0x19e   : > { %v1476_v63 = vrot.slane %v1475_v55, 2  ;;  %v1492_v2 = vrot.slane %v1491_v60, 4  ;;  %v1503_v46 = vsel %vm1486_vm11, %v1501_v54, %v1502_v57  ;;  %v1515_v3 = vrot.slane %v1514_v58, 4  ;;  %v1370_v5 = vpop.f32.mrb[12].mxu0  ;;  %v1950_v10 = vpop.f32.mrb[17].mxu1 }
 0x19f   : > { %v1505_v6 = vsel %vm1395_vm2, %v1503_v46, 0.0  ;;  %v1431_v7 = vadd.f32 %v1430_v61, %v1429_v51  ;;  %v1446_v8 = vrot.slane %v1445_v59, 1  ;;  %v1464_v9 = vrot.slane %v1463_v62, 1  ;;  %v2034_v11 = vpop.f32.mrb[13].mxu0  ;;  %v893_v15 = vpop.f32.mrb[18].mxu1 }
 0x1a0   : > { %v1493_v12 = vadd.f32 %v1492_v2, %v1491_v60  ;;  %v1506_v0 = vrot.slane %v1505_v6, 4  ;;  %v1477_v13 = vadd.f32 %v1476_v63, %v1475_v55  ;;  %v1516_v14 = vadd.f32 %v1515_v3, %v1514_v58  ;;  %v1373_v16 = vpop.f32.mrb[14].mxu0  ;;  %v1951_v21 = vpop.f32.mrb[19].mxu1 }
 0x1a1   : > { %v1432_v17 = vadd.f32 %v1431_v7, %v1403_v35  ;;  %v1447_v18 = vadd.f32 %v1446_v8, %v1445_v59  ;;  %v1465_v19 = vadd.f32 %v1464_v9, %v1463_v62  ;;  %v1522_v20 = vmul.f32 %v2047_v50, %v2047_v50  ;;  %v2035_v22 = vpop.f32.mrb[15].mxu0 }
 0x1a2   : > { %v1494_v23 = vrot.slane %v1493_v12, 2  ;;  %v1507_v24 = vadd.f32 %v1506_v0, %v1505_v6  ;;  %v1478_v25 = vrot.slane %v1477_v13, 1  ;;  %v1517_v26 = vrot.slane %v1516_v14, 2 }
 0x1a3   : > { %v1448_v28 = vadd.f32 %v1447_v18, %v1412_v36  ;;  %v1466_v29 = vadd.f32 %v1465_v19, %v1432_v17  ;;  %v1523_v30 = vsel %vm1395_vm2, %v1522_v20, 0.0  ;;  %v2048_v31 = vadd.f32 %v1370_v5, %v2527_v27 }
 0x1a4   : > { %v1495_v32 = vadd.f32 %v1494_v23, %v1493_v12  ;;  %v1508_v33 = vrot.slane %v1507_v24, 2  ;;  %v1479_v34 = vadd.f32 %v1478_v25, %v1477_v13  ;;  %v1518_v35 = vadd.f32 %v1517_v26, %v1516_v14 }
 0x1a5   : > { %v1524_v37 = vrot.slane %v1523_v30, 4  ;;  %1531 = vst.msk [vmem:[%s2505_s8 + $0x26] sm:$0xfc] %vm1414_vm3, %v2048_v31  ;;  %v1535_v38 = vrot.slane %v2048_v31, 2  ;;  %v1547_v40 = vmul.f32 %v2048_v31, %v2048_v31  ;;  %v2049_v41 = vadd.f32 %v1373_v16, %v2531_v39 }
 0x1a6   : > { %v1496_v42 = vrot.slane %v1495_v32, 1  ;;  %v1509_v36 = vadd.f32 %v1508_v33, %v1507_v24  ;;  %v1480_v43 = vadd.f32 %v1479_v34, %v1448_v28  ;;  %v1519_v45 = vrot.slane %v1518_v35, 1  ;;  %v1378_v1 = vpop.f32.mrb[16].mxu0 }
 0x1a7   : > { %v1525_v44 = vadd.f32 %v1524_v37, %v1523_v30  ;;  %v1551_v27 = vrot.slane %v1547_v40, 2  ;;  %1532 = vst.msk [vmem:[%s2505_s8 + $0x2e] sm:$0x3] %vm1416_vm4, %v2049_v41  ;;  %v1536_v47 = vrot.slane %v2049_v41, 2  ;;  %v1548_v48 = vmul.f32 %v2049_v41, %v2049_v41  ;;  %v2038_v49 = vpop.f32.mrb[17].mxu0 }
 0x1a8   : > { %1563 = vst.msk [vmem:[%s2505_s8 + $0x2c] sm:$0xf0] %vm1449_vm5, %v2049_v41  ;;  %v1497_v50 = vadd.f32 %v1496_v42, %v1495_v32  ;;  %v1510_v51 = vrot.slane %v1509_v36, 1  ;;  %v1520_v52 = vadd.f32 %v1519_v45, %v1518_v35  ;;  %v1566_v53 = vrot.slane %v2049_v41, 4  ;;  %v1381_v54 = vpop.f32.mrb[18].mxu0 }
 0x1a9   : > { %v1526_v39 = vrot.slane %v1525_v44, 2  ;;  %v1537_v55 = vsel %vm1420_vm6, %v1535_v38, %v1536_v47  ;;  %v1552_v56 = vrot.slane %v1548_v48, 2  ;;  %v1580_v57 = vrot.slane %v1548_v48, 4  ;;  %v2039_v58 = vpop.f32.mrb[19].mxu0 }
 0x1aa   : > { %v1511_v59 = vadd.f32 %v1510_v51, %v1509_v36  ;;  %v1498_v60 = vadd.f32 %v1497_v50, %v1466_v29  ;;  %v1539_v61 = vsel %vm1395_vm2, %v1537_v55, 0.0  ;;  %v2050_v62 = vadd.f32 %v1378_v1, %v890_v4 }
 0x1ab   : > { %v1527_v63 = vadd.f32 %v1526_v39, %v1525_v44  ;;  %v1540_v2 = vrot.slane %v1539_v61, 4  ;;  %v1553_v46 = vsel %vm1420_vm6, %v1551_v27, %v1552_v56  ;;  %v2051_v3 = vadd.f32 %v1381_v54, %v893_v15 }
 0x1ac   : > { %v1512_v5 = vadd.f32 %v1511_v59, %v1480_v43  ;;  %v1521_v6 = vadd.f32 %v1520_v52, %v1498_v60  ;;  %v1555_v7 = vsel %vm1395_vm2, %v1553_v46, 0.0  ;;  %1564 = vst.msk [vmem:[%s2505_s8 + $0x34] sm:$0xf] %vm1451_vm7, %v2050_v62  ;;  %v1567_v8 = vrot.slane %v2050_v62, 4 }
 0x1ad   : > { %1592 = vst.msk [vmem:[%s2505_s8 + $0x32] sm:$0xc0] %vm1481_vm8, %v2050_v62  ;;  %v1528_v9 = vrot.slane %v1527_v63, 1  ;;  %v1541_v10 = vadd.f32 %v1540_v2, %v1539_v61  ;;  %v1556_v11 = vrot.slane %v1555_v7, 4  ;;  %v1578_v12 = vmul.f32 %v2050_v62, %v2050_v62 }
 0x1ae   : > { %1593 = vst.msk [vmem:[%s2505_s8 + $0x3a] sm:$0x3f] %vm1483_vm10, %v2051_v3  ;;  %v1568_v4 = vsel %vm1454_vm9, %v1566_v53, %v1567_v8  ;;  %v1595_v0 = vrot.slane %v2050_v62, 6  ;;  %v1596_v13 = vrot.slane %v2051_v3, 6  ;;  %v1607_v14 = vmul.f32 %v2051_v3, %v2051_v3 }
 0x1af   : > { %v1529_v15 = vadd.f32 %v1528_v9, %v1527_v63  ;;  %v1542_v16 = vrot.slane %v1541_v10, 2  ;;  %v1557_v17 = vadd.f32 %v1556_v11, %v1555_v7  ;;  %v1570_v18 = vsel %vm1395_vm2, %v1568_v4, 0.0 }
 0x1b0   : > { %v1571_v19 = vrot.slane %v1570_v18, 4  ;;  %v1581_v20 = vrot.slane %v1578_v12, 4  ;;  %v1597_v21 = vsel %vm1486_vm11, %v1595_v0, %v1596_v13  ;;  %v1609_v22 = vrot.slane %v1578_v12, 6 }
 0x1b1   : > { %v1530_v23 = vadd.f32 %v1529_v15, %v1512_v5  ;;  %v1543_v24 = vadd.f32 %v1542_v16, %v1541_v10  ;;  %v1558_v25 = vrot.slane %v1557_v17, 2  ;;  %v1599_v26 = vsel %vm1395_vm2, %v1597_v21, 0.0 }
 0x1b2   : > { %v1572_v28 = vadd.f32 %v1571_v19, %v1570_v18  ;;  %v1582_v29 = vsel %vm1454_vm9, %v1580_v57, %v1581_v20  ;;  %v1600_v30 = vrot.slane %v1599_v26, 4  ;;  %v1610_v31 = vrot.slane %v1607_v14, 6 }
 0x1b3   : > { %v1544_v32 = vrot.slane %v1543_v24, 1  ;;  %v1559_v33 = vadd.f32 %v1558_v25, %v1557_v17  ;;  %v1584_v34 = vsel %vm1395_vm2, %v1582_v29, 0.0  ;;  %v2222_v3 = vmov (!%p1783_p4), 0.0  }
 0x1b4   : > { %v1573_v35 = vrot.slane %v1572_v28, 2  ;;  %v1585_v37 = vrot.slane %v1584_v34, 4  ;;  %v1601_v38 = vadd.f32 %v1600_v30, %v1599_v26  ;;  %v1611_v40 = vsel %vm1486_vm11, %v1609_v22, %v1610_v31  ;;  %1626 = vst.msk [vmem:[%s2598_s5] sm:$0x1] (!%p1783_p4), %vm1625_vm12, %v2222_v3  ;;  %1627 = vst.msk [vmem:[%s2599_s6] sm:$0x1] (!%p1783_p4), %vm1625_vm12, %v2222_v3 }
 0x1b5   : > { %v1560_v41 = vrot.slane %v1559_v33, 1  ;;  %v1545_v42 = vadd.f32 %v1544_v32, %v1543_v24  ;;  %v1613_v36 = vsel %vm1395_vm2, %v1611_v40, 0.0 }
 0x1b6   : > { %v1574_v43 = vadd.f32 %v1573_v35, %v1572_v28  ;;  %v1586_v45 = vadd.f32 %v1585_v37, %v1584_v34  ;;  %v1602_v1 = vrot.slane %v1601_v38, 2  ;;  %v1614_v44 = vrot.slane %v1613_v36, 4 }
 0x1b7   : > { %v1546_v27 = vadd.f32 %v1545_v42, %v1521_v6  ;;  %v1561_v47 = vadd.f32 %v1560_v41, %v1559_v33 }
 0x1b8   : > { %v1587_v48 = vrot.slane %v1586_v45, 2  ;;  %v1575_v49 = vrot.slane %v1574_v43, 1  ;;  %v1603_v50 = vadd.f32 %v1602_v1, %v1601_v38  ;;  %v1615_v51 = vadd.f32 %v1614_v44, %v1613_v36 }
 0x1b9   : > { %v1562_v52 = vadd.f32 %v1561_v47, %v1530_v23 }
 0x1ba   : > { %v1588_v53 = vadd.f32 %v1587_v48, %v1586_v45  ;;  %v1576_v54 = vadd.f32 %v1575_v49, %v1574_v43  ;;  %v1604_v39 = vrot.slane %v1603_v50, 1  ;;  %v1616_v55 = vrot.slane %v1615_v51, 2 }
 0x1bc   : > { %v1577_v56 = vadd.f32 %v1576_v54, %v1546_v27  ;;  %v1589_v57 = vrot.slane %v1588_v53, 1  ;;  %v1605_v58 = vadd.f32 %v1604_v39, %v1603_v50  ;;  %v1617_v59 = vadd.f32 %v1616_v55, %v1615_v51  ;;  %1624 = sbr.rel (%p1783_p4) target bundleno = 451 (0x1c3), region = 40 }
 0x1be   : > { %v1590_v60 = vadd.f32 %v1589_v57, %v1588_v53  ;;  %v1606_v61 = vadd.f32 %v1605_v58, %v1577_v56  ;;  %v1618_v62 = vrot.slane %v1617_v59, 1 }
 0x1c0   : > { %v1591_v63 = vadd.f32 %v1590_v60, %v1562_v52  ;;  %v1619_v2 = vadd.f32 %v1618_v62, %v1617_v59 }
 0x1c2   : > { %v1620_v46 = vadd.f32 %v1619_v2, %v1591_v63 }
 0x1c3 PF: > { %v1628_v5 = vld [vmem:[%s2598_s5] sm:$0x1]  ;;  %vm1630_vm13 = vcmask 57344  }
 0x1c4   : > { %v1632_v6 = vld [vmem:[%s2599_s6] sm:$0x1]  ;;  %v1629_v7 = vadd.f32 %v1628_v5, %v1606_v61 }
 0x1c5   : > { %v1633_v8 = vadd.f32 %v1632_v6, %v1620_v46 }
 0x1c6   : > { %1631 = vst.msk [vmem:[%s2598_s5] sm:$0x1] %vm1630_vm13, %v1629_v7 }
 0x1c7   : > { %1634 = vst.msk [vmem:[%s2599_s6] sm:$0x1] %vm1630_vm13, %v1633_v8 }
 0x1c8 PF: > { %s17_s21 = sadd.s32 1, %s2218_s21  }
 0x1c9   : > { %p14_p5 = scmp.ge.s32.totalorder %s17_s21, 4  }
 0x1cb   :  { %16 = sbr.rel (!%p14_p5) target bundleno = 1 (0x1), region = 94 }

// kernel: densenet_forward.19
= control target key start
LH: loop header
LB: loop body
LE: loop exit
PB: predicated region body
PF: predicated region fallthrough
CT: control target
= control target key end

     0   :  { %vm61_vm0 = vcmask 130048   ;;  %vm125_vm1 = vcmask 122880   ;;  %v193_v21 = vmov 0.0   ;;  %s298_s3 = inlined_call_operand.vmem [shape: bf16[16,16], index: 3, kind: input, shape index: {}]   ;;  %s299_s0 = inlined_call_operand.vmem [shape: f32[32,16], index: 0, kind: input, shape index: {}]   ;;  %s300_s1 = inlined_call_operand.vmem [shape: f32[1,16], index: 1, kind: input, shape index: {}]   ;;  %s301_s2 = inlined_call_operand.vmem [shape: f32[1,16], index: 2, kind: input, shape index: {}]   ;;  %s302_s5 = inlined_call_operand.vmem [shape: f32[1,16], index: 5, kind: output, shape index: {1}]   ;;  %s303_s6 = inlined_call_operand.vmem [shape: f32[1,16], index: 6, kind: output, shape index: {2}]   ;;  %s304_s4 = inlined_call_operand.vmem [shape: f32[32,16], index: 4, kind: output, shape index: {0}]  }
   0x1   :  { %v192_v0 = vld [vmem:[%s298_s3] sm:$0xff]   ;;  %v22_v2 = vld [vmem:[%s299_s0 + $0x8] sm:$0xff]  ;;  %v23_v7 = vld [vmem:[%s299_s0 + $0x10] sm:$0xff]  ;;  %126 = vst.msk [vmem:[%s302_s5] sm:$0x1] %vm125_vm1, %v193_v21 }
   0x2   :  { %v21_v1 = vld [vmem:[%s299_s0] sm:$0xff]  ;;  %185 = vmatprep.subr.bf16.mxu0 %v192_v0  ;;  %v24_v8 = vld [vmem:[%s299_s0 + $0x18] sm:$0xff]  ;;  %127 = vst.msk [vmem:[%s303_s6] sm:$0x1] %vm125_vm1, %v193_v21 }
   0x3   :  { %v177_v3 = vld [vmem:[%s300_s1] ss:$0 sm:$0xff]  ;;  %186 = vmatpush3.bf16.msra.mxu0 %v192_v0 }
   0x4   :  { %v32_v4 = vmul.f32 %v177_v3, %v21_v1  ;;  %v33_v5 = vmul.f32 %v177_v3, %v22_v2  ;;  %v178_v6 = vld [vmem:[%s301_s2] ss:$0 sm:$0xff]  ;;  %v34_v9 = vmul.f32 %v177_v3, %v23_v7  ;;  %v35_v10 = vmul.f32 %v177_v3, %v24_v8 }
   0x6   :  { %v43_v11 = vadd.f32 %v178_v6, %v32_v4  ;;  %v44_v12 = vadd.f32 %v178_v6, %v33_v5  ;;  %v45_v13 = vadd.f32 %v178_v6, %v34_v9  ;;  %v46_v14 = vadd.f32 %v178_v6, %v35_v10 }
   0x8   :  { %v47_v15 = vmax.f32 %v43_v11, 0.0  ;;  %v48_v16 = vmax.f32 %v44_v12, 0.0  ;;  %v49_v17 = vmax.f32 %v45_v13, 0.0  ;;  %v50_v18 = vmax.f32 %v46_v14, 0.0  ;;  %v128_v53 = vld [vmem:[%s302_s5] sm:$0x1] }
   0x9   :  { %v145_v56 = vld [vmem:[%s303_s6] sm:$0x1] }
   0xa   :  { %v51_v19 = vpack.c.bf16 %v48_v16, %v47_v15  ;;  %v52_v20 = vpack.c.bf16 %v50_v18, %v49_v17 }
   0xc   :  { %187 = vmatprep.mubr.msk.bf16.mxu0 %vm61_vm0, %v51_v19 }
   0xd   :  { %188 = vmatmul.mubr.msk.bf16.vlgmr.msra.gmra.mrb[0].mxu0 %vm61_vm0, %v52_v20 }
  0xe0   :  { %v189_v22 = vpop.f32.mrb[0].mxu0 }
  0xe1   :  { %119 = vst.msk [vmem:[%s304_s4 + $0x10] sm:$0xff] %vm61_vm0, %v189_v22  ;;  %v102_v23 = vpop.f32.mrb[1].mxu0  ;;  %v148_v27 = vmul.f32 %v189_v22, %v189_v22  ;;  %v132_v32 = vsel %vm61_vm0, %v189_v22, 0.0 }
  0xe2   :  { %117 = vst.msk [vmem:[%s304_s4] sm:$0xff] %vm61_vm0, %v102_v23  ;;  %v146_v24 = vmul.f32 %v102_v23, %v102_v23  ;;  %v190_v25 = vpop.f32.mrb[2].mxu0  ;;  %v129_v28 = vsel %vm61_vm0, %v102_v23, 0.0 }
  0xe3   :  { %120 = vst.msk [vmem:[%s304_s4 + $0x18] sm:$0xff] %vm61_vm0, %v190_v25  ;;  %v105_v26 = vpop.f32.mrb[3].mxu0  ;;  %v149_v34 = vmul.f32 %v190_v25, %v190_v25  ;;  %v153_v38 = vsel %vm61_vm0, %v148_v27, 0.0  ;;  %v134_v39 = vsel %vm61_vm0, %v190_v25, 0.0 }
  0xe4   :  { %118 = vst.msk [vmem:[%s304_s4 + $0x8] sm:$0xff] %vm61_vm0, %v105_v26  ;;  %v130_v29 = vsel %vm61_vm0, %v105_v26, 0.0  ;;  %v147_v30 = vmul.f32 %v105_v26, %v105_v26  ;;  %v150_v33 = vsel %vm61_vm0, %v146_v24, 0.0 }
  0xe5   :  { %v131_v31 = vadd.f32 %v130_v29, %v129_v28  ;;  %v155_v42 = vsel %vm61_vm0, %v149_v34, 0.0 }
  0xe6   :  { %v151_v35 = vsel %vm61_vm0, %v147_v30, 0.0 }
  0xe7   :  { %v133_v36 = vadd.f32 %v132_v32, %v131_v31  ;;  %v152_v37 = vadd.f32 %v151_v35, %v150_v33 }
  0xe9   :  { %v135_v40 = vadd.f32 %v134_v39, %v133_v36  ;;  %v154_v41 = vadd.f32 %v153_v38, %v152_v37 }
  0xeb   :  { %v136_v43 = vrot.slane %v135_v40, 4  ;;  %v156_v44 = vadd.f32 %v155_v42, %v154_v41 }
  0xed   :  { %v137_v45 = vadd.f32 %v136_v43, %v135_v40  ;;  %v157_v46 = vrot.slane %v156_v44, 4 }
  0xef   :  { %v138_v47 = vrot.slane %v137_v45, 2  ;;  %v158_v48 = vadd.f32 %v157_v46, %v156_v44 }
  0xf1   :  { %v139_v49 = vadd.f32 %v138_v47, %v137_v45  ;;  %v159_v50 = vrot.slane %v158_v48, 2 }
  0xf3   :  { %v140_v51 = vrot.slane %v139_v49, 1  ;;  %v160_v52 = vadd.f32 %v159_v50, %v158_v48 }
  0xf5   :  { %v141_v54 = vadd.f32 %v140_v51, %v139_v49  ;;  %v161_v55 = vrot.slane %v160_v52, 1 }
  0xf7   :  { %v142_v57 = vadd.f32 %v141_v54, %v128_v53  ;;  %v162_v58 = vadd.f32 %v161_v55, %v160_v52 }
  0xf9   :  { %144 = vst.msk [vmem:[%s302_s5] sm:$0x1] %vm125_vm1, %v142_v57  ;;  %v163_v59 = vadd.f32 %v162_v58, %v145_v56 }
  0xfb   :  { %164 = vst.msk [vmem:[%s303_s6] sm:$0x1] %vm125_vm1, %v163_v59 }

// kernel: densenet_forward.20
= control target key start
LH: loop header
LB: loop body
LE: loop exit
PB: predicated region body
PF: predicated region fallthrough
CT: control target
= control target key end

     0   :  { %s1331_s21 = smov 0   ;;  %s1447_s0 = inlined_call_operand.vmem [shape: f32[2,16,16], index: 0, kind: input, shape index: {}]   ;;  %s1448_s1 = inlined_call_operand.vmem [shape: f32[1,16], index: 1, kind: input, shape index: {}]   ;;  %s1449_s2 = inlined_call_operand.vmem [shape: f32[1,16], index: 2, kind: input, shape index: {}]   ;;  %s1450_s3 = inlined_call_operand.vmem [shape: bf16[9,16,8], index: 3, kind: input, shape index: {}]   ;;  %s1451_s4 = inlined_call_operand.vmem [shape: f32[2,16,8], index: 4, kind: output, shape index: {0}]   ;;  %s1452_s5 = inlined_call_operand.vmem [shape: f32[1,8], index: 5, kind: output, shape index: {1}]   ;;  %s1453_s6 = inlined_call_operand.vmem [shape: f32[1,8], index: 6, kind: output, shape index: {2}]  }
   0x1 LB: > { %s1337_s22 = sadd.s32 4294967295, %s1292_s21   ;;  %p1100_p0 = scmp.ge.s32.totalorder %s1292_s21, 1  ;;  %s1292_s21 = sphi %s1331_s21, %s17_s21  }
   0x2   : > { %p207_p1 = scmp.lt.s32.totalorder %s1292_s21, 3 }
   0x4   : > { %p208_p2 = pnand %p1100_p0, %p207_p1 }
   0x5   : > { %v1277_v0 = vld [vmem:[%s1450_s3 + $0x20] sm:$0xff] (!%p208_p2)   ;;  %p237_p3 = scmp.lt.s32.totalorder (!%p208_p2), %s1337_s22, 1  ;;  %v1278_v1 = vld [vmem:[%s1450_s3 + $0x8] sm:$0xff] (!%p208_p2)   ;;  %vm270_vm0 = vcmask (!%p208_p2), 130048   ;;  %v1294_v3 = vmov (!%p208_p2), 0.0   ;;  %vm277_vm1 = vcmask (!%p208_p2), 125952  }
   0x6   : > { %211 = sbr.rel (%p208_p2) target bundleno = 331 (0x14b), region = 36  ;;  %1206 = vmatprep.subr.bf16.mxu0 (!%p208_p2), %v1277_v0  ;;  %1182 = vmatprep.subr.bf16.mxu1 (!%p208_p2), %v1278_v1  ;;  %v1105_v2 = vld [vmem:[%s1448_s1] ss:$0 sm:$0xff] (!%p208_p2)  ;;  %271 = vst.msk [vmem:[#allocation2] sm:$0xff] (!%p208_p2), %vm270_vm0, %v1294_v3  ;;  %272 = vst.msk [vmem:[#allocation2 + $0x8] sm:$0xff] (!%p208_p2), %vm270_vm0, %v1294_v3  ;;  %v1279_v4 = vld [vmem:[%s1450_s3 + $0x28] sm:$0xff] (!%p208_p2)  }
   0x7   : > { %1207 = vmatpush3.bf16.msra.mxu0 (!%p208_p2), %v1277_v0  ;;  %273 = vst.msk [vmem:[#allocation2 + $0x10] sm:$0xff] (!%p208_p2), %vm270_vm0, %v1294_v3  ;;  %274 = vst.msk [vmem:[#allocation2 + $0x18] sm:$0xff] (!%p208_p2), %vm270_vm0, %v1294_v3  ;;  %1183 = vmatpush3.bf16.msra.mxu1 (!%p208_p2), %v1278_v1  ;;  %v1280_v5 = vld [vmem:[%s1450_s3] sm:$0xff] (!%p208_p2)   ;;  %vm279_vm2 = vcmask (!%p208_p2), 130052   ;;  %v1281_v30 = vld [vmem:[%s1450_s3 + $0x30] sm:$0xff] (!%p208_p2)   ;;  %vm990_vm3 = vcmask (!%p208_p2), 62466  }
   0x8   : > { %275 = vst.msk [vmem:[#allocation2 + $0x20] sm:$0xff] (!%p208_p2), %vm270_vm0, %v1294_v3  ;;  %276 = vst.msk [vmem:[#allocation2 + $0x28] sm:$0xff] (!%p208_p2), %vm270_vm0, %v1294_v3  ;;  %v1106_v7 = vld [vmem:[%s1449_s2] ss:$0 sm:$0xff] (!%p208_p2)  ;;  %1212 = vmatprep.subr.bf16.mxu0 (!%p208_p2), %v1279_v4  ;;  %1188 = vmatprep.subr.bf16.mxu1 (!%p208_p2), %v1280_v5  ;;  %v1282_v31 = vld [vmem:[%s1450_s3 + $0x10] sm:$0xff] (!%p208_p2)   ;;  %vm915_vm4 = vcmask (!%p208_p2), 60416  }
   0x9   : > { %v1283_v41 = vld [vmem:[%s1450_s3 + $0x38] sm:$0xff] (!%p208_p2)   ;;  %v1285_v53 = vld [vmem:[%s1450_s3 + $0x40] sm:$0xff] (!%p208_p2)   ;;  %vm934_vm5 = vcmask (!%p208_p2), 64518   ;;  %vm936_vm6 = vcmask (!%p208_p2), 58368   ;;  %vm968_vm7 = vcmask (!%p208_p2), 64516   ;;  %vm940_vm8 = vcmask (!%p208_p2), 1041408  }
   0xa   : > { %v1284_v42 = vld [vmem:[%s1450_s3 + $0x18] sm:$0xff] (!%p208_p2)   ;;  %p1150_p4 = scmp.ne.s32.totalorder (!%p208_p2), %s1337_s22, 0 }
   0xd   : > { %s1349_s27 = scalar_select %p237_p3, %s1337_s22, 1 }
   0xe   : > { %vm1019_vm9 = vcmask (!%p1150_p4), 57344  }
   0xf   : > { %s1153_s30 = sshll.u32 %s1349_s27, 4  ;;  %v775_v55 = vld [vmem:[#allocation2 + $0x22] sm:$0xff] }
  0x10   : > { %s241_s11 = scalar_lea.vmem %s1447_s0, %s1153_s30  ;;  %v777_v57 = vpack.c.bf16 %v775_v55, %v775_v55  ;;  %v846_v59 = vld [vmem:[#allocation2 + $0x23] sm:$0xff]  ;;  %s246_s8 = scalar_lea.vmem %s1451_s4, %s1153_s30 }
  0x11   : > { %v248_v6 = vld [vmem:[%s241_s11] sm:$0xff]  ;;  %v249_v8 = vld [vmem:[%s241_s11 + $0x8] sm:$0xff]  ;;  %v848_v60 = vpack.c.bf16 %v846_v59, %v846_v59 }
  0x12   : > { %v257_v9 = vmul.f32 %v1105_v2, %v248_v6  ;;  %v258_v10 = vmul.f32 %v1105_v2, %v249_v8 }
  0x14   : > { %v266_v11 = vadd.f32 %v1106_v7, %v257_v9  ;;  %v267_v12 = vadd.f32 %v1106_v7, %v258_v10 }
  0x16   : > { %v268_v13 = vmax.f32 %v266_v11, 0.0  ;;  %v269_v14 = vmax.f32 %v267_v12, 0.0 }
  0x18   : > { %278 = vst.msk [vmem:[#allocation2 + $0xc] sm:$0xf] %vm277_vm1, %v268_v13  ;;  %281 = vst.msk [vmem:[#allocation2 + $0x18] sm:$0xf] %vm277_vm1, %v269_v14 }
  0x19   : > { %280 = vst.msk [vmem:[#allocation2 + $0xe] sm:$0xf0] %vm279_vm2, %v268_v13  ;;  %282 = vst.msk [vmem:[#allocation2 + $0x1a] sm:$0xf0] %vm279_vm2, %v269_v14 }
  0x1f   : > { %v290_v15 = vld [vmem:[#allocation2 + $0x6] sm:$0xff]  ;;  %v292_v20 = vld [vmem:[#allocation2 + $0x16] sm:$0xff] }
  0x20   : > { %v291_v16 = vld [vmem:[#allocation2 + $0xe] sm:$0xff]  ;;  %v562_v21 = vld [vmem:[#allocation2 + $0x1c] sm:$0xff]  ;;  %v294_v23 = vpack.c.bf16 %v292_v20, %v292_v20  ;;  %v283_v25 = vld [vmem:[#allocation2 + $0x5] sm:$0xff] }
  0x21   : > { %v560_v17 = vld [vmem:[#allocation2 + $0xc] sm:$0xff]  ;;  %v293_v18 = vpack.c.bf16 %v291_v16, %v290_v15  ;;  %v561_v19 = vld [vmem:[#allocation2 + $0x14] sm:$0xff]  ;;  %v564_v24 = vpack.c.bf16 %v562_v21, %v562_v21  ;;  %v633_v32 = vld [vmem:[#allocation2 + $0x1d] sm:$0xff] }
  0x22   : > { %v563_v22 = vpack.c.bf16 %v561_v19, %v560_v17  ;;  %v284_v26 = vld [vmem:[#allocation2 + $0xd] sm:$0xff]  ;;  %v632_v27 = vld [vmem:[#allocation2 + $0x15] sm:$0xff]  ;;  %v635_v38 = vpack.c.bf16 %v633_v32, %v633_v32  ;;  %v704_v44 = vld [vmem:[#allocation2 + $0x21] sm:$0xff] }
  0x23   : > { %1184 = vmatprep.mubr.msk.bf16.mxu1 %vm270_vm0, %v293_v18  ;;  %v286_v28 = vpack.c.bf16 %v284_v26, %v283_v25  ;;  %v634_v29 = vpack.c.bf16 %v632_v27, %v284_v26  ;;  %v418_v33 = vld [vmem:[#allocation2 + $0x7] sm:$0xff]  ;;  %v419_v34 = vld [vmem:[#allocation2 + $0xf] sm:$0xff]  ;;  %v287_v35 = vpack.c.bf16 %v632_v27, %v632_v27  ;;  %v703_v37 = vld [vmem:[#allocation2 + $0x19] sm:$0xff]  ;;  %v706_v50 = vpack.c.bf16 %v704_v44, %v704_v44 }
  0x24   : > { %1208 = vmatprep.mubr.msk.bf16.mxu0 %vm270_vm0, %v563_v22  ;;  %1185 = vmatmul.mubr.msk.bf16.vlgmr.msra.gmra.mrb[0].mxu1 %vm270_vm0, %v294_v23  ;;  %v702_v36 = vld [vmem:[#allocation2 + $0x11] sm:$0xff]  ;;  %v421_v39 = vpack.c.bf16 %v419_v34, %v418_v33  ;;  %v774_v49 = vld [vmem:[#allocation2 + $0x1a] sm:$0xff] }
  0x25   : > { %1209 = vmatmul.mubr.msk.bf16.vlgmr.msra.gmra.mrb[0].mxu0 %vm270_vm0, %v564_v24  ;;  %1189 = vmatpush3.bf16.msra.mxu1 %v1280_v5  ;;  %v705_v40 = vpack.c.bf16 %v703_v37, %v702_v36  ;;  %v420_v43 = vld [vmem:[#allocation2 + $0x17] sm:$0xff]  ;;  %v489_v45 = vld [vmem:[#allocation2 + $0xb] sm:$0xff] }
  0x26   : > { %1213 = vmatpush3.bf16.msra.mxu0 %v1279_v4  ;;  %1190 = vmatprep.mubr.msk.bf16.mxu1 %vm270_vm0, %v286_v28  ;;  %v490_v46 = vld [vmem:[#allocation2 + $0x13] sm:$0xff]  ;;  %v422_v47 = vpack.c.bf16 %v420_v43, %v420_v43  ;;  %v491_v54 = vld [vmem:[#allocation2 + $0x1b] sm:$0xff] }
  0x27   : > { %1214 = vmatprep.mubr.msk.bf16.mxu0 %vm270_vm0, %v634_v29  ;;  %1218 = vmatprep.subr.bf16.mxu0 %v1281_v30  ;;  %v773_v48 = vld [vmem:[#allocation2 + $0x12] sm:$0xff]  ;;  %v492_v51 = vpack.c.bf16 %v490_v46, %v489_v45  ;;  %v493_v56 = vpack.c.bf16 %v491_v54, %v491_v54  ;;  %v847_v58 = vpack.c.bf16 %v491_v54, %v490_v46 }
  0x28   : > { %1194 = vmatprep.subr.bf16.mxu1 %v1282_v31  ;;  %v776_v52 = vpack.c.bf16 %v774_v49, %v773_v48 }
  0x30   : > { %1191 = vmatmul.mubr.msk.bf16.vlgmr.msra.gmra.mrb[0].mxu1 %vm270_vm0, %v287_v35 }
  0x31   : > { %1215 = vmatmul.mubr.msk.bf16.vlgmr.msra.gmra.mrb[0].mxu0 %vm270_vm0, %v635_v38  ;;  %1195 = vmatpush3.bf16.msra.mxu1 %v1282_v31 }
  0x32   : > { %1219 = vmatpush3.bf16.msra.mxu0 %v1281_v30  ;;  %1196 = vmatprep.mubr.msk.bf16.mxu1 %vm270_vm0, %v421_v39 }
  0x33   : > { %1220 = vmatprep.mubr.msk.bf16.mxu0 %vm270_vm0, %v705_v40  ;;  %1224 = vmatprep.subr.bf16.mxu0 %v1283_v41 }
  0x34   : > { %1200 = vmatprep.subr.bf16.mxu1 %v1284_v42 }
  0x3c   : > { %1197 = vmatmul.mubr.msk.bf16.vlgmr.msra.gmra.mrb[0].mxu1 %vm270_vm0, %v422_v47 }
  0x3d   : > { %1221 = vmatmul.mubr.msk.bf16.vlgmr.msra.gmra.mrb[0].mxu0 %vm270_vm0, %v706_v50  ;;  %1201 = vmatpush3.bf16.msra.mxu1 %v1284_v42 }
  0x3e   : > { %1225 = vmatpush3.bf16.msra.mxu0 %v1283_v41  ;;  %1202 = vmatprep.mubr.msk.bf16.mxu1 %vm270_vm0, %v492_v51 }
  0x3f   : > { %1226 = vmatprep.mubr.msk.bf16.mxu0 %vm270_vm0, %v776_v52  ;;  %1230 = vmatprep.subr.bf16.mxu0 %v1285_v53 }
  0x48   : > { %1203 = vmatmul.mubr.msk.bf16.vlgmr.msra.gmra.mrb[0].mxu1 %vm270_vm0, %v493_v56 }
  0x49   : > { %1227 = vmatmul.mubr.msk.bf16.vlgmr.msra.gmra.mrb[0].mxu0 %vm270_vm0, %v777_v57 }
  0x4a   : > { %1231 = vmatpush3.bf16.msra.mxu0 %v1285_v53  ;;  %1232 = vmatprep.mubr.msk.bf16.mxu0 %vm270_vm0, %v847_v58 }
  0x55   : > { %1233 = vmatmul.mubr.msk.bf16.vlgmr.msra.gmra.mrb[0].mxu0 %vm270_vm0, %v848_v60 }
 0x11b   : > { %v1204_v61 = vpop.f32.mrb[0].mxu1 }
 0x11c   : > { %v543_v62 = vpop.f32.mrb[1].mxu1 }
 0x11d   : > { %v1205_v63 = vpop.f32.mrb[2].mxu1 }
 0x11e   : > { %v546_v0 = vpop.f32.mrb[3].mxu1 }
 0x128   : > { %v1234_v1 = vpop.f32.mrb[0].mxu0 }
 0x129   : > { %v1236_v2 = vadd.f32 %v1234_v1, %v1204_v61  ;;  %v898_v3 = vpop.f32.mrb[1].mxu0 }
 0x12a   : > { %v1237_v4 = vadd.f32 %v898_v3, %v543_v62  ;;  %v1235_v5 = vpop.f32.mrb[2].mxu0 }
 0x12b   : > { %991 = vst.msk [vmem:[%s246_s8 + $0xa] sm:$0x3c] %vm990_vm3, %v1236_v2  ;;  %v993_v6 = vrot.slane %v1236_v2, 2  ;;  %v1003_v7 = vmul.f32 %v1236_v2, %v1236_v2  ;;  %v901_v8 = vpop.f32.mrb[3].mxu0 }
 0x12c   : > { %916 = vst.msk [vmem:[%s246_s8] sm:$0xf] %vm915_vm4, %v1237_v4  ;;  %v917_v9 = vsel %vm915_vm4, %v1237_v4, 0.0  ;;  %v925_v10 = vmul.f32 %v1237_v4, %v1237_v4  ;;  %v1238_v11 = vadd.f32 %v901_v8, %v546_v0  ;;  %v941_v15 = vrot.slane %v1237_v4, 6 }
 0x12d   : > { %935 = vst.msk [vmem:[%s246_s8 - $0x2] sm:$0xc0] %vm934_vm5, %v1237_v4  ;;  %v995_v12 = vsel %vm915_vm4, %v993_v6, 0.0  ;;  %v1005_v13 = vrot.slane %v1003_v7, 2  ;;  %v918_v14 = vrot.slane %v917_v9, 4 }
 0x12e   : > { %v996_v16 = vrot.slane %v995_v12, 4  ;;  %v926_v17 = vsel %vm915_vm4, %v925_v10, 0.0  ;;  %v956_v18 = vrot.slane %v925_v10, 6  ;;  %937 = vst.msk [vmem:[%s246_s8 + $0x6] sm:$0x3] %vm936_vm6, %v1238_v11  ;;  %v942_v19 = vrot.slane %v1238_v11, 6 }
 0x12f   : > { %969 = vst.msk [vmem:[%s246_s8 + $0x4] sm:$0xf0] %vm968_vm7, %v1238_v11  ;;  %v1007_v20 = vsel %vm915_vm4, %v1005_v13, 0.0  ;;  %v919_v21 = vadd.f32 %v918_v14, %v917_v9  ;;  %v927_v22 = vrot.slane %v926_v17, 4  ;;  %v953_v23 = vmul.f32 %v1238_v11, %v1238_v11 }
 0x130   : > { %v997_v24 = vadd.f32 %v996_v16, %v995_v12  ;;  %v1008_v25 = vrot.slane %v1007_v20, 4  ;;  %v943_v26 = vsel %vm940_vm8, %v941_v15, %v942_v19  ;;  %v970_v27 = vrot.slane %v1238_v11, 4 }
 0x131   : > { %v920_v28 = vrot.slane %v919_v21, 2  ;;  %v928_v29 = vadd.f32 %v927_v22, %v926_v17  ;;  %v945_v30 = vsel %vm915_vm4, %v943_v26, 0.0  ;;  %v957_v31 = vrot.slane %v953_v23, 6 }
 0x132   : > { %v946_v32 = vrot.slane %v945_v30, 4  ;;  %v972_v33 = vsel %vm915_vm4, %v970_v27, 0.0  ;;  %v998_v37 = vrot.slane %v997_v24, 2  ;;  %v1009_v41 = vadd.f32 %v1008_v25, %v1007_v20 }
 0x133   : > { %v929_v34 = vrot.slane %v928_v29, 2  ;;  %v958_v35 = vsel %vm940_vm8, %v956_v18, %v957_v31  ;;  %v973_v36 = vrot.slane %v972_v33, 4  ;;  %v921_v38 = vadd.f32 %v920_v28, %v919_v21 }
 0x134   : > { %v947_v39 = vadd.f32 %v946_v32, %v945_v30  ;;  %v960_v40 = vsel %vm915_vm4, %v958_v35, 0.0  ;;  %v980_v45 = vrot.slane %v953_v23, 4  ;;  %v999_v49 = vadd.f32 %v998_v37, %v997_v24 }
 0x135   : > { %v961_v42 = vrot.slane %v960_v40, 4  ;;  %v974_v43 = vadd.f32 %v973_v36, %v972_v33  ;;  %v930_v46 = vadd.f32 %v929_v34, %v928_v29  ;;  %v922_v50 = vrot.slane %v921_v38, 1 }
 0x136   : > { %v948_v44 = vrot.slane %v947_v39, 2  ;;  %v982_v52 = vsel %vm915_vm4, %v980_v45, 0.0  ;;  %v1010_v53 = vrot.slane %v1009_v41, 2  ;;  %v1000_v62 = vrot.slane %v999_v49, 1 }
 0x137   : > { %v962_v47 = vadd.f32 %v961_v42, %v960_v40  ;;  %v975_v48 = vrot.slane %v974_v43, 2  ;;  %v983_v56 = vrot.slane %v982_v52, 4  ;;  %v931_v58 = vrot.slane %v930_v46, 1 }
 0x138   : > { %v949_v51 = vadd.f32 %v948_v44, %v947_v39  ;;  %v923_v63 = vadd.f32 %v922_v50, %v921_v38  ;;  %v1011_v1 = vadd.f32 %v1010_v53, %v1009_v41  ;;  %v1001_v9 = vadd.f32 %v1000_v62, %v999_v49 }
 0x139   : > { %v963_v54 = vrot.slane %v962_v47, 2  ;;  %v976_v55 = vadd.f32 %v975_v48, %v974_v43  ;;  %v984_v61 = vadd.f32 %v983_v56, %v982_v52  ;;  %v932_v6 = vadd.f32 %v931_v58, %v930_v46 }
 0x13a   : > { %v950_v57 = vrot.slane %v949_v51, 1  ;;  %v1012_v11 = vrot.slane %v1011_v1, 1  ;;  %v1295_v19 = vmov (!%p1150_p4), 0.0  }
 0x13b   : > { %v964_v59 = vadd.f32 %v963_v54, %v962_v47  ;;  %v977_v60 = vrot.slane %v976_v55, 1  ;;  %v985_v3 = vrot.slane %v984_v61, 2  ;;  %1020 = vst.msk [vmem:[%s1452_s5] sm:$0x1] (!%p1150_p4), %vm1019_vm9, %v1295_v19  ;;  %1021 = vst.msk [vmem:[%s1453_s6] sm:$0x1] (!%p1150_p4), %vm1019_vm9, %v1295_v19 }
 0x13c   : > { %v951_v0 = vadd.f32 %v950_v57, %v949_v51  ;;  %v1013_v16 = vadd.f32 %v1012_v11, %v1011_v1 }
 0x13d   : > { %v965_v2 = vrot.slane %v964_v59, 1  ;;  %v978_v5 = vadd.f32 %v977_v60, %v976_v55  ;;  %v986_v8 = vadd.f32 %v985_v3, %v984_v61 }
 0x13e   : > { %v952_v4 = vadd.f32 %v951_v0, %v923_v63 }
 0x13f   : > { %v966_v7 = vadd.f32 %v965_v2, %v964_v59  ;;  %v987_v13 = vrot.slane %v986_v8, 1  ;;  %1018 = sbr.rel (%p1150_p4) target bundleno = 326 (0x146), region = 40 }
 0x140   : > { %v979_v10 = vadd.f32 %v978_v5, %v952_v4 }
 0x141   : > { %v967_v12 = vadd.f32 %v966_v7, %v932_v6  ;;  %v988_v15 = vadd.f32 %v987_v13, %v986_v8 }
 0x142   : > { %v1002_v14 = vadd.f32 %v1001_v9, %v979_v10 }
 0x143   : > { %v989_v17 = vadd.f32 %v988_v15, %v967_v12 }
 0x145   : > { %v1014_v18 = vadd.f32 %v1013_v16, %v989_v17 }
 0x146 PF: > { %v1022_v20 = vld [vmem:[%s1452_s5] sm:$0x1]  ;;  %vm1024_vm10 = vcmask 57344  }
 0x147   : > { %v1026_v21 = vld [vmem:[%s1453_s6] sm:$0x1]  ;;  %v1023_v22 = vadd.f32 %v1022_v20, %v1002_v14 }
 0x148   : > { %v1027_v23 = vadd.f32 %v1026_v21, %v1014_v18 }
 0x149   : > { %1025 = vst.msk [vmem:[%s1452_s5] sm:$0x1] %vm1024_vm10, %v1023_v22 }
 0x14a   : > { %1028 = vst.msk [vmem:[%s1453_s6] sm:$0x1] %vm1024_vm10, %v1027_v23 }
 0x14b PF: > { %s17_s21 = sadd.s32 1, %s1292_s21  }
 0x14c   : > { %p14_p5 = scmp.ge.s32.totalorder %s17_s21, 4  }
 0x14e   :  { %16 = sbr.rel (!%p14_p5) target bundleno = 1 (0x1), region = 94 }

// kernel: densenet_forward.23
= control target key start
LH: loop header
LB: loop body
LE: loop exit
PB: predicated region body
PF: predicated region fallthrough
CT: control target
= control target key end

     0   :  { %12 = vsyncpa [#allocation3], 0  ;;  %v394_v1 = vmov 0.0   ;;  %vm395_vm0 = vmmov 0   ;;  %vm55_vm1 = vcmask 261120   ;;  %s520_s0 = inlined_call_operand.vmem [shape: f32[2,16,32], index: 0, kind: input, shape index: {}]   ;;  %s521_s1 = inlined_call_operand.vmem [shape: f32[1,1,32], index: 1, kind: input, shape index: {}]   ;;  %s522_s2 = inlined_call_operand.vmem [shape: f32[1,1,32], index: 2, kind: input, shape index: {}]   ;;  %s523_s3 = inlined_call_operand.vmem [shape: bf16[32,100], index: 3, kind: input, shape index: {}]   ;;  %s524_s4 = inlined_call_operand.vmem [shape: bf16[100,10], index: 4, kind: input, shape index: {}]   ;;  %s525_s5 = inlined_call_operand.hbm [shape: f32[2,10], index: 5, kind: output, shape index: {0}]   ;;  %s526_s6 = inlined_call_operand.hbm [shape: f32[2,32], index: 6, kind: output, shape index: {1}]  }
   0x1   :  { %v337_v0 = vld [vmem:[%s523_s3] sm:$0xff]   ;;  %307 = vmatprep.subr.bf16.mxu0 %v394_v1  ;;  %v338_v2 = vld [vmem:[%s523_s3 + $0x8] sm:$0xff]   ;;  %315 = vmatprep.subr.bf16.mxu1 %v394_v1  ;;  %v27_v5 = vld [vmem:[%s520_s0 + $0x10] sm:$0xff] }
   0x2   :  { %308 = vmatpush3.bf16.msra.mxu0 %v337_v0  ;;  %311 = vmatprep.mubr.msk.bf16.mxu0 %vm395_vm0, %v394_v1  ;;  %v25_v3 = vld [vmem:[%s520_s0] sm:$0xff]  ;;  %v26_v4 = vld [vmem:[%s520_s0 + $0x8] sm:$0xff]  ;;  %v28_v6 = vld [vmem:[%s520_s0 + $0x18] sm:$0xff] }
   0x3   :  { %309 = vmatprep.subr.bf16.mxu0 %v394_v1  ;;  %v283_v7 = vld [vmem:[%s521_s1] ss:$0 sm:$0xff]  ;;  %329 = vmatprep.mubr.msk.bf16.mxu1 %vm395_vm0, %v394_v1  ;;  %v340_v18 = vld [vmem:[%s524_s4 + $0x8] sm:$0xff]   ;;  %v341_v29 = vld [vmem:[%s524_s4 + $0x10] sm:$0xff]  }
   0x4   :  { %v284_v8 = vld [vmem:[%s522_s2] ss:$0 sm:$0xff]  ;;  %v36_v9 = vmul.f32 %v283_v7, %v25_v3  ;;  %v37_v10 = vmul.f32 %v283_v7, %v26_v4  ;;  %v38_v11 = vmul.f32 %v283_v7, %v27_v5  ;;  %v39_v12 = vmul.f32 %v283_v7, %v28_v6 }
   0x5   :  { %v339_v13 = vld [vmem:[%s524_s4] sm:$0xff]  }
   0x6   :  { %310 = vmatpush3.bf16.msra.mxu0 %v338_v2  ;;  %v47_v14 = vadd.f32 %v284_v8, %v36_v9  ;;  %v48_v15 = vadd.f32 %v284_v8, %v37_v10  ;;  %v49_v16 = vadd.f32 %v284_v8, %v38_v11  ;;  %v50_v17 = vadd.f32 %v284_v8, %v39_v12 }
   0x7   :  { %316 = vmatpush3.bf16.msra.mxu1 %v339_v13 }
   0x8   :  { %v51_v19 = vmax.f32 %v47_v14, 0.0  ;;  %v52_v20 = vmax.f32 %v48_v15, 0.0  ;;  %v53_v21 = vmax.f32 %v49_v16, 0.0  ;;  %v54_v22 = vmax.f32 %v50_v17, 0.0  ;;  %317 = vmatprep.subr.bf16.mxu1 %v394_v1 }
   0xa   :  { %v56_v23 = vsel %vm55_vm1, %v51_v19, 0.0  ;;  %v57_v24 = vsel %vm55_vm1, %v52_v20, 0.0  ;;  %v65_v25 = vsel %vm55_vm1, %v53_v21, 0.0  ;;  %v66_v26 = vsel %vm55_vm1, %v54_v22, 0.0 }
   0xb   :  { %v58_v27 = vadd.f32 %v57_v24, %v56_v23  ;;  %v67_v28 = vadd.f32 %v66_v26, %v65_v25  ;;  %318 = vmatpush3.bf16.msra.mxu1 %v340_v18 }
   0xc   :  { %13 = vsyncpa [#allocation5], 0  ;;  %319 = vmatprep.subr.bf16.mxu1 %v394_v1  ;;  %v342_v34 = vld [vmem:[%s524_s4 + $0x18] sm:$0xff]   ;;  %v343_v39 = vld [vmem:[%s524_s4 + $0x20] sm:$0xff]   ;;  %vm79_vm2 = vcmask 1041409   ;;  %vm209_vm3 = vcmask 1041408  }
   0xd   :  { %v59_v30 = vrot.slane %v58_v27, 4  ;;  %v68_v31 = vrot.slane %v67_v28, 4  ;;  %v344_v44 = vld [vmem:[%s524_s4 + $0x28] sm:$0xff]   ;;  %v345_v53 = vld [vmem:[%s524_s4 + $0x30] ss:$0 sps:$4 sm:$0x33]  }
   0xe   :  { %v211_v54 = vsel %vm209_vm3, %v345_v53, 0  ;;  %vm205_vm4 = vcmask 818176   ;;  %vm82_vm5 = vcmask 254976   ;;  %s396_s23 = smov [#allocation4]  }
   0xf   :  { %v60_v32 = vadd.f32 %v59_v30, %v58_v27  ;;  %v69_v33 = vadd.f32 %v68_v31, %v67_v28  ;;  %320 = vmatpush3.bf16.msra.mxu1 %v341_v29  ;;  %s271_s24 = sshll.u32 %s396_s23, 4  ;;  %s272_s24 = int_to_ptr.vmem [resolvable:$true] %s271_s24 }
  0x10   :  { %321 = vmatprep.subr.bf16.mxu1 %v394_v1  ;;  %s346_s25 = scalar_lea.vmem %s272_s24, 32  ;;  %p351_p1 = scmp.lt.s32.totalorder %s272_s24, %s272_s24 }
  0x11   :  { %v61_v35 = vrot.slane %v60_v32, 2  ;;  %v70_v36 = vrot.slane %v69_v33, 2  ;;  %p347_p0 = scmp.ne.s32.totalorder %s272_s24, %s346_s25  ;;  %p352_p2 = scmp.lt.s32.totalorder %s346_s25, %s346_s25 }
  0x13   :  { %v62_v37 = vadd.f32 %v61_v35, %v60_v32  ;;  %v71_v38 = vadd.f32 %v70_v36, %v69_v33  ;;  %322 = vmatpush3.bf16.msra.mxu1 %v342_v34  ;;  %p353_p3 = por %p352_p2, %p351_p1 }
  0x14   :  { %323 = vmatprep.subr.bf16.mxu1 %v394_v1 }
  0x15   :  { %v63_v40 = vrot.slane %v62_v37, 1  ;;  %v72_v41 = vrot.slane %v71_v38, 1  ;;  %p354_p4 = pnand %p353_p3, %p347_p0 }
  0x17   :  { %v64_v42 = vadd.f32 %v63_v40, %v62_v37  ;;  %v73_v43 = vadd.f32 %v72_v41, %v71_v38  ;;  %324 = vmatpush3.bf16.msra.mxu1 %v343_v39 }
  0x18   :  { %325 = vmatprep.subr.bf16.mxu1 %v394_v1 }
  0x19   :  { %v75_v45 = vmul.f32 0.0625, %v64_v42  ;;  %v76_v46 = vmul.f32 0.0625, %v73_v43 }
  0x1b   :  { %v84_v47 = vpack.c.bf16 %v75_v45, %v75_v45  ;;  %v85_v48 = vpack.c.bf16 %v76_v46, %v76_v46  ;;  %326 = vmatpush3.bf16.msra.mxu1 %v344_v44  ;;  %v80_v61 = vsel %vm79_vm2, %v76_v46, %v75_v45 }
  0x1c   :  { %327 = vmatprep.subr.bf16.mxu1 %v394_v1  ;;  %83 = vst.msk [vmem:[#allocation4] sm:$0x3] %vm82_vm5, %v80_v61 }
  0x1d   :  { %v92_v49 = vunpack.c.l.b16 %v84_v47  ;;  %v93_v50 = vunpack.c.l.b16 %v85_v48 }
  0x1f   :  { %v94_v51 = vsel %vm79_vm2, %v93_v50, %v92_v49  ;;  %328 = vmatpush3.bf16.msra.mxu1 %v211_v54 }
  0x20   :  { %v95_v52 = vpack.c.b16 %v94_v51, %v94_v51 }
  0x22   :  { %312 = vmatmul.mubr.msk.bf16.vlgmr.msra.gmra.mrb[0].mxu0 %vm55_vm1, %v95_v52 }
  0xf5   :  { %v145_v55 = vpop.f32.mrb[0].mxu0 }
  0xf6   :  { %v151_v56 = vmax.f32 %v145_v55, 0.0  ;;  %v313_v57 = vpop.f32.mrb[1].mxu0 }
  0xf7   :  { %v148_v58 = vpop.f32.mrb[2].mxu0 }
  0xf8   :  { %v152_v59 = vpack.c.bf16 %v151_v56, %v151_v56  ;;  %v314_v60 = vpop.f32.mrb[3].mxu0 }
  0xfa   :  { %330 = vmatmul.mubr.msk.bf16.vlgmr.msra.gmra.mrb[0].mxu1 %vm205_vm4, %v152_v59 }
  0xfb   :  { %357 = shalt.err (!%p354_p4)
}
  0xfc   :  { %s358_s27 = scalar_lea.hbm %s526_s6, 32 }
  0xfd   :  { %p359_p5 = scmp.ne.s32.totalorder %s526_s6, %s358_s27  ;;  %p362_p6 = scmp.lt.u32.totalorder %s358_s27, %s526_s6 }
  0xff   :  { %p364_p7 = pnand %p362_p6, %p359_p5 }
 0x101   :  { %367 = shalt.err (!%p364_p7)
}
 0x102   :  { %274 = dma.vmem_to_hbm [thread:$0]  %s272_s24, 32, %s526_s6, [#allocation5]   ;;  %vm253_vm6 = vcmask 74752  }
 0x103   :  { %s397_s9 = smov [#allocation2]  }
 0x104   :  { %s261_s10 = sshll.u32 %s397_s9, 4  ;;  %s262_s10 = int_to_ptr.vmem [resolvable:$true] %s261_s10 }
 0x105   :  { %s368_s11 = scalar_lea.vmem %s262_s10, 32  ;;  %p373_p9 = scmp.lt.s32.totalorder %s262_s10, %s262_s10 }
 0x106   :  { %p369_p8 = scmp.ne.s32.totalorder %s262_s10, %s368_s11  ;;  %p374_p10 = scmp.lt.s32.totalorder %s368_s11, %s368_s11 }
 0x108   :  { %p375_p11 = por %p374_p10, %p373_p9 }
 0x10a   :  { %p376_p12 = pnand %p375_p11, %p369_p8 }
 0x1cd   :  { %v247_v62 = vpop.f32.mrb[0].mxu1 }
 0x1ce   :  { %v331_v63 = vpop.f32.mrb[1].mxu1  ;;  %254 = vst.msk [vmem:[#allocation2] sm:$0x3] %vm253_vm6, %v247_v62 }
 0x1cf   :  { %v250_v0 = vpop.f32.mrb[2].mxu1 }
 0x1d0   :  { %379 = shalt.err (!%p376_p12)
}
 0x1d1   :  { %s380_s0 = scalar_lea.hbm %s525_s5, 32 }
 0x1d2   :  { %p381_p13 = scmp.ne.s32.totalorder %s525_s5, %s380_s0  ;;  %p384_p0 = scmp.lt.u32.totalorder %s380_s0, %s525_s5 }
 0x1d4   :  { %p386_p1 = pnand %p384_p0, %p381_p13 }
 0x1d6   :  { %389 = shalt.err (!%p386_p1)
}
 0x1d7   :  { %264 = dma.vmem_to_hbm [thread:$0]  %s262_s10, 32, %s525_s5, [#allocation3]   ;;  %v332_v1 = vpop.f32.mrb[3].mxu1 }
 0x1d8   :  { %390 = dma.done.wait [#allocation3], 32  }
 0x1d9   :  { %391 = vsyncadd [#allocation3], 4294967264 }
 0x1da   :  { %392 = dma.done.wait [#allocation5], 32  }
 0x1db   :  { %393 = vsyncadd [#allocation5], 4294967264 }
 0x1dc   :  { %281 = vsyncpa [#allocation3], 1 }
 0x1dd   :  { %282 = vsyncpa [#allocation5], 1 }

// kernel: densenet_forward.21
= control target key start
LH: loop header
LB: loop body
LE: loop exit
PB: predicated region body
PF: predicated region fallthrough
CT: control target
= control target key end

     0   :  { %vm72_vm0 = vcmask 1043456   ;;  %vm65_vm1 = vcmask 195584   ;;  %vm134_vm2 = vcmask 122880   ;;  %v208_v23 = vmov 0.0   ;;  %s314_s3 = inlined_call_operand.vmem [shape: bf16[24,16], index: 3, kind: input, shape index: {}]   ;;  %s315_s0 = inlined_call_operand.vmem [shape: f32[32,24], index: 0, kind: input, shape index: {}]   ;;  %s316_s1 = inlined_call_operand.vmem [shape: f32[1,24], index: 1, kind: input, shape index: {}]   ;;  %s317_s2 = inlined_call_operand.vmem [shape: f32[1,24], index: 2, kind: input, shape index: {}]   ;;  %s318_s5 = inlined_call_operand.vmem [shape: f32[1,16], index: 5, kind: output, shape index: {1}]   ;;  %s319_s6 = inlined_call_operand.vmem [shape: f32[1,16], index: 6, kind: output, shape index: {2}]   ;;  %s320_s4 = inlined_call_operand.vmem [shape: f32[32,16], index: 4, kind: output, shape index: {0}]  }
   0x1   :  { %v206_v0 = vld [vmem:[%s314_s3] sm:$0xff]   ;;  %v207_v1 = vld [vmem:[%s314_s3 + $0x8] ss:$0 sps:$4 sm:$0xff]   ;;  %v23_v8 = vld [vmem:[%s315_s0 + $0x10] sm:$0xff]  ;;  %135 = vst.msk [vmem:[%s318_s5] sm:$0x1] %vm134_vm2, %v208_v23 }
   0x2   :  { %v21_v2 = vld [vmem:[%s315_s0] sm:$0xff]  ;;  %v22_v3 = vld [vmem:[%s315_s0 + $0x8] sm:$0xff]  ;;  %196 = vmatprep.subr.bf16.mxu0 %v206_v0  ;;  %v24_v9 = vld [vmem:[%s315_s0 + $0x18] sm:$0xff]  ;;  %v74_v12 = vsel %vm72_vm0, %v207_v1, 0  ;;  %136 = vst.msk [vmem:[%s319_s6] sm:$0x1] %vm134_vm2, %v208_v23 }
   0x3   :  { %v186_v4 = vld [vmem:[%s316_s1] ss:$0 sm:$0xff]  ;;  %197 = vmatpush3.bf16.msra.mxu0 %v206_v0  ;;  %vm125_vm3 = vcmask 130048  }
   0x4   :  { %v187_v5 = vld [vmem:[%s317_s2] ss:$0 sm:$0xff]  ;;  %v32_v6 = vmul.f32 %v186_v4, %v21_v2  ;;  %v33_v7 = vmul.f32 %v186_v4, %v22_v3  ;;  %v34_v10 = vmul.f32 %v186_v4, %v23_v8  ;;  %v35_v11 = vmul.f32 %v186_v4, %v24_v9  ;;  %204 = vmatprep.subr.msk.bf16.mxu0 %vm72_vm0, %v207_v1 }
   0x6   :  { %v43_v13 = vadd.f32 %v187_v5, %v32_v6  ;;  %v44_v14 = vadd.f32 %v187_v5, %v33_v7  ;;  %v45_v15 = vadd.f32 %v187_v5, %v34_v10  ;;  %v46_v16 = vadd.f32 %v187_v5, %v35_v11 }
   0x7   :  { %199 = vmatpush3.bf16.msra.mxu0 %v74_v12 }
   0x8   :  { %v47_v17 = vmax.f32 %v43_v13, 0.0  ;;  %v48_v18 = vmax.f32 %v44_v14, 0.0  ;;  %v49_v19 = vmax.f32 %v45_v15, 0.0  ;;  %v50_v20 = vmax.f32 %v46_v16, 0.0  ;;  %v137_v55 = vld [vmem:[%s318_s5] sm:$0x1] }
   0x9   :  { %v154_v58 = vld [vmem:[%s319_s6] sm:$0x1] }
   0xa   :  { %v51_v21 = vpack.c.bf16 %v48_v18, %v47_v17  ;;  %v52_v22 = vpack.c.bf16 %v50_v20, %v49_v19 }
   0xc   :  { %200 = vmatprep.mubr.msk.bf16.mxu0 %vm65_vm1, %v51_v21 }
   0xd   :  { %201 = vmatmul.mubr.msk.bf16.vlgmr.msra.gmra.mrb[0].mxu0 %vm65_vm1, %v52_v22 }
  0xe0   :  { %v202_v24 = vpop.f32.mrb[0].mxu0 }
  0xe1   :  { %128 = vst.msk [vmem:[%s320_s4 + $0x10] sm:$0xff] %vm125_vm3, %v202_v24  ;;  %v110_v25 = vpop.f32.mrb[1].mxu0  ;;  %v157_v29 = vmul.f32 %v202_v24, %v202_v24  ;;  %v141_v34 = vsel %vm125_vm3, %v202_v24, 0.0 }
  0xe2   :  { %126 = vst.msk [vmem:[%s320_s4] sm:$0xff] %vm125_vm3, %v110_v25  ;;  %v155_v26 = vmul.f32 %v110_v25, %v110_v25  ;;  %v203_v27 = vpop.f32.mrb[2].mxu0  ;;  %v138_v30 = vsel %vm125_vm3, %v110_v25, 0.0 }
  0xe3   :  { %129 = vst.msk [vmem:[%s320_s4 + $0x18] sm:$0xff] %vm125_vm3, %v203_v27  ;;  %v113_v28 = vpop.f32.mrb[3].mxu0  ;;  %v158_v36 = vmul.f32 %v203_v27, %v203_v27  ;;  %v162_v40 = vsel %vm125_vm3, %v157_v29, 0.0  ;;  %v143_v41 = vsel %vm125_vm3, %v203_v27, 0.0 }
  0xe4   :  { %127 = vst.msk [vmem:[%s320_s4 + $0x8] sm:$0xff] %vm125_vm3, %v113_v28  ;;  %v139_v31 = vsel %vm125_vm3, %v113_v28, 0.0  ;;  %v156_v32 = vmul.f32 %v113_v28, %v113_v28  ;;  %v159_v35 = vsel %vm125_vm3, %v155_v26, 0.0 }
  0xe5   :  { %v140_v33 = vadd.f32 %v139_v31, %v138_v30  ;;  %v164_v44 = vsel %vm125_vm3, %v158_v36, 0.0 }
  0xe6   :  { %v160_v37 = vsel %vm125_vm3, %v156_v32, 0.0 }
  0xe7   :  { %v142_v38 = vadd.f32 %v141_v34, %v140_v33  ;;  %v161_v39 = vadd.f32 %v160_v37, %v159_v35 }
  0xe9   :  { %v144_v42 = vadd.f32 %v143_v41, %v142_v38  ;;  %v163_v43 = vadd.f32 %v162_v40, %v161_v39 }
  0xeb   :  { %v145_v45 = vrot.slane %v144_v42, 4  ;;  %v165_v46 = vadd.f32 %v164_v44, %v163_v43 }
  0xed   :  { %v146_v47 = vadd.f32 %v145_v45, %v144_v42  ;;  %v166_v48 = vrot.slane %v165_v46, 4 }
  0xef   :  { %v147_v49 = vrot.slane %v146_v47, 2  ;;  %v167_v50 = vadd.f32 %v166_v48, %v165_v46 }
  0xf1   :  { %v148_v51 = vadd.f32 %v147_v49, %v146_v47  ;;  %v168_v52 = vrot.slane %v167_v50, 2 }
  0xf3   :  { %v149_v53 = vrot.slane %v148_v51, 1  ;;  %v169_v54 = vadd.f32 %v168_v52, %v167_v50 }
  0xf5   :  { %v150_v56 = vadd.f32 %v149_v53, %v148_v51  ;;  %v170_v57 = vrot.slane %v169_v54, 1 }
  0xf7   :  { %v151_v59 = vadd.f32 %v150_v56, %v137_v55  ;;  %v171_v60 = vadd.f32 %v170_v57, %v169_v54 }
  0xf9   :  { %153 = vst.msk [vmem:[%s318_s5] sm:$0x1] %vm134_vm2, %v151_v59  ;;  %v172_v61 = vadd.f32 %v171_v60, %v154_v58 }
  0xfb   :  { %173 = vst.msk [vmem:[%s319_s6] sm:$0x1] %vm134_vm2, %v172_v61 }

</bundles_post_ra>
